<compile_context>
chip_gen: v6e
topology: v6e:2x2x1
jax: 0.10.0
libtpu: 0.0.40
codegen_flags: <defaults>
</compile_context>

<pallas_src>
import jax
import jax.numpy as jnp
from jax.experimental import pallas as pl
from jax.experimental.pallas import tpu as pltpu


# ----------------------------- conv3x3 + bias + relu -------------------------
def _make_conv_kernel(TH, W, Cin, Cout, groups):
    """groups == 1: single K=9*Cin matmul (tiny-Cin layer); groups == 3: one K=3*Cin matmul per ky."""

    def kernel(xm_ref, ha_ref, hb_ref, w_ref, b_ref, o_ref):
        # xm_ref: (1, TH, W+2, Cin) bf16   main padded rows (auto-pipelined)
        # ha_ref: (1, 1,  W+2, Cin) bf16   halo row h*TH+TH
        # hb_ref: (1, 1,  W+2, Cin) bf16   halo row h*TH+TH+1
        # w_ref : (groups, K, Cout) bf16   resident weights (K = 3*Cin or 9*Cin)
        # b_ref : (1, Cout) f32            bias
        # o_ref : (1, TH, W, Cout) bf16    output tile
        slab = jnp.concatenate([xm_ref[0], ha_ref[0], hb_ref[0]], axis=0)  # (TH+2, W+2, Cin)

        def ky_patch(ky):
            rows = slab[ky:ky + TH]                                        # (TH, W+2, Cin)
            # Lane-concat the 3 kx shifts -> grouped-K patch (TH, W, 3*Cin).
            return jnp.concatenate([rows[:, kx:kx + W, :] for kx in range(3)], axis=-1)

        if groups == 1:
            # First layer (Cin=3): fold all 9 taps into one K=27 matmul.
            patch = jnp.concatenate([ky_patch(ky) for ky in range(3)], axis=-1)
            acc = jnp.dot(patch.reshape(TH * W, 9 * Cin), w_ref[0],
                          preferred_element_type=jnp.float32)
        else:
            acc = None
            for ky in range(3):
                p = ky_patch(ky).reshape(TH * W, 3 * Cin)
                t = jnp.dot(p, w_ref[ky], preferred_element_type=jnp.float32)
                acc = t if acc is None else acc + t

        out = jnp.maximum(acc + b_ref[...], 0.0)            # f32 epilogue (v5e-friendly)
        o_ref[...] = out.astype(o_ref.dtype).reshape(1, TH, W, Cout)

    return kernel


def _pick_th(H, W):
    """Rows per tile: target ~2048 output pixels per tile, must divide H."""
    target = max(1, 2048 // max(W, 1))
    t = min(H, target)
    while H % t:
        t -= 1
    return t


def conv3x3_relu(x_nhwc, w, b):
    """x: (N,H,W,Cin) bf16, w: (3,3,Cin,Cout) bf16, b: (1,Cout) f32 -> (N,H,W,Cout) bf16."""
    N, H, W, Cin = x_nhwc.shape
    Cout = w.shape[-1]
    TH = _pick_th(H, W)
    Wp = W + 2

    groups = 1 if 9 * Cin <= 128 else 3
    wk = w.reshape(1, 9 * Cin, Cout) if groups == 1 else w.reshape(3, 3 * Cin, Cout)

    # TODO(synk): halo still materialized wrapper-side with jnp.pad (one extra HBM pass
    # per layer); could be removed with in-kernel edge masking on boundary tiles.
    x_pad = jnp.pad(x_nhwc, ((0, 0), (1, 1), (1, 1), (0, 0)))

    kernel = _make_conv_kernel(TH, W, Cin, Cout, groups)

    return pl.pallas_call(
        kernel,
        out_shape=jax.ShapeDtypeStruct((N, H, W, Cout), jnp.bfloat16),
        grid=(N, H // TH),
        in_specs=[
            # Main TH-row window of the padded input (block index h -> rows [h*TH, h*TH+TH)).
            pl.BlockSpec((1, TH, Wp, Cin), lambda n, h: (n, h, 0, 0)),
            # Two single-row halo windows (block size 1 -> block index == element row).
            pl.BlockSpec((1, 1, Wp, Cin), lambda n, h: (n, h * TH + TH, 0, 0)),
            pl.BlockSpec((1, 1, Wp, Cin), lambda n, h: (n, h * TH + TH + 1, 0, 0)),
            # Resident weights / bias (constant index_map -> fetched once).
            pl.BlockSpec(wk.shape, lambda n, h: (0, 0, 0)),
            pl.BlockSpec((1, Cout), lambda n, h: (0, 0)),
        ],
        out_specs=pl.BlockSpec((1, TH, W, Cout), lambda n, h: (n, h, 0, 0)),
        compiler_params=pltpu.CompilerParams(
            dimension_semantics=("parallel", "parallel"),
            vmem_limit_bytes=48 * 1024 * 1024,      # keep under v7x's 64 MiB VMEM
        ),
    )(x_pad, x_pad, x_pad, wk, b)


# ------------------------------ loss reductions ------------------------------
def _sq_err_sum_kernel(a_ref, b_ref, o_ref):
    @pl.when(pl.program_id(0) == 0)
    def _():
        o_ref[...] = jnp.zeros_like(o_ref)
    d = a_ref[...].astype(jnp.float32) - b_ref[...].astype(jnp.float32)
    o_ref[...] += jnp.sum(d * d, keepdims=True)


def _smooth_l1_sum_kernel(a_ref, b_ref, o_ref):
    @pl.when(pl.program_id(0) == 0)
    def _():
        o_ref[...] = jnp.zeros_like(o_ref)
    d = a_ref[...].astype(jnp.float32) - b_ref[...].astype(jnp.float32)
    ad = jnp.abs(d)
    # F.smooth_l1_loss with default beta=1.0
    val = jnp.where(ad < 1.0, 0.5 * d * d, ad - 0.5)
    o_ref[...] += jnp.sum(val, keepdims=True)


def _reduce_pair_mean(kernel, a, b):
    """Mean of kernel's per-element loss; lane-dense (TR, 1024) tiles, resident (1,1) acc."""
    n = a.size
    LANE = 1024                                   # multiple of 128 -> unmasked vectors
    rows = -(-n // LANE)
    TR = min(512, -(-rows // 8) * 8)              # rows per step (multiple of 8), ~2-4 MiB/step
    rows_p = -(-rows // TR) * TR
    total = rows_p * LANE

    a = a.reshape(-1)
    b = b.reshape(-1)
    if total != n:                                # pad only in the non-divisible case
        a = jnp.pad(a, (0, total - n))            # zeros contribute 0 to both losses
        b = jnp.pad(b, (0, total - n))
    a2 = a.reshape(rows_p, LANE)
    b2 = b.reshape(rows_p, LANE)

    s = pl.pallas_call(
        kernel,
        out_shape=jax.ShapeDtypeStruct((1, 1), jnp.float32),
        grid=(rows_p // TR,),
        in_specs=[
            pl.BlockSpec((TR, LANE), lambda i: (i, 0)),
            pl.BlockSpec((TR, LANE), lambda i: (i, 0)),
        ],
        out_specs=pl.BlockSpec((1, 1), lambda i: (0, 0)),   # resident accumulator block
        compiler_params=pltpu.CompilerParams(
            dimension_semantics=("arbitrary",),
            vmem_limit_bytes=32 * 1024 * 1024,
        ),
    )(a2, b2)
    return s[0, 0] / n


def smooth_l1_loss(a, b):
    return _reduce_pair_mean(_smooth_l1_sum_kernel, a, b)


def mse_loss(a, b):
    return _reduce_pair_mean(_sq_err_sum_kernel, a, b)


# ------------------------------ VGG16 prefix ---------------------------------
# TODO(synk): 2x2 max-pool kept in plain JAX glue (fusing it into the producing conv's
# epilogue as a second output block would save one HBM round-trip of relu1_2/relu2_2).
def maxpool2x2(x_nhwc):
    N, H, W, C = x_nhwc.shape
    return x_nhwc.reshape(N, H // 2, 2, W // 2, 2, C).max(axis=(2, 4))


# VGG16 features[0:16] conv shapes (each conv followed by ReLU):
#   conv1_1 (3->64), conv1_2 (64->64)           -> tap relu1_2
#   pool, conv2_1 (64->128), conv2_2 (128->128) -> tap relu2_2
#   pool, conv3_1 (128->256), conv3_2, conv3_3  -> tap relu3_3
_VGG_CFG = [(3, 64), (64, 64), (64, 128), (128, 128), (128, 256), (256, 256), (256, 256)]


def init_vgg_prefix_params(key):
    # TODO(synk): pretrained frozen VGG16 weights (and ImageNet mean/std normalization)
    # cannot be bundled in-script; deterministic random init stands in for them.
    params = []
    for cin, cout in _VGG_CFG:
        key, kw, kb = jax.random.split(key, 3)
        w = jax.random.normal(kw, (3, 3, cin, cout), jnp.float32) * (2.0 / (9 * cin)) ** 0.5
        b = jax.random.normal(kb, (1, cout), jnp.float32) * 0.01
        params.append((w.astype(jnp.bfloat16), b))
    return params


def vgg_features(x_nchw, params):
    """Returns [relu1_2, relu2_2, relu3_3] activations (NHWC, bf16)."""
    x = jnp.transpose(x_nchw, (0, 2, 3, 1)).astype(jnp.bfloat16)  # NCHW -> NHWC
    x = conv3x3_relu(x, *params[0])
    x = conv3x3_relu(x, *params[1])
    relu1_2 = x
    x = maxpool2x2(x)
    x = conv3x3_relu(x, *params[2])
    x = conv3x3_relu(x, *params[3])
    relu2_2 = x
    x = maxpool2x2(x)
    x = conv3x3_relu(x, *params[4])
    x = conv3x3_relu(x, *params[5])
    x = conv3x3_relu(x, *params[6])
    relu3_3 = x
    return [relu1_2, relu2_2, relu3_3]


# ------------------------------- TotalLoss -----------------------------------
def total_loss(pred_image, gt, lambda_loss, params):
    """pred_image, gt: (N, 3, H, W) float32 (NCHW, PyTorch convention)."""
    smooth = smooth_l1_loss(pred_image, gt)
    # Run pred and gt through the VGG prefix in a single pass (weights streamed once,
    # grid keeps >= 4 parallel steps for v7x) by stacking on the batch axis.
    n = pred_image.shape[0]
    feats = vgg_features(jnp.concatenate([pred_image, gt], axis=0), params)
    mses = [mse_loss(f[:n], f[n:]) for f in feats]
    perceptual = sum(mses) / len(mses)
    return smooth + lambda_loss * perceptual


if __name__ == "__main__":
    key = jax.random.PRNGKey(0)
    k_params, k_pred, k_gt = jax.random.split(key, 3)

    params = init_vgg_prefix_params(k_params)

    N, C, H, W = 2, 3, 16, 16
    pred_image = jax.random.uniform(k_pred, (N, C, H, W), jnp.float32)
    gt = jax.random.uniform(k_gt, (N, C, H, W), jnp.float32)
    lambda_loss = jnp.float32(0.04)

    loss_fn = jax.jit(lambda p, g, lam: total_loss(p, g, lam, params))
    out = loss_fn(pred_image, gt, lambda_loss)
    jax.block_until_ready(out)
    assert out.shape == () and bool(jnp.isfinite(out))
    print("KERNEL_OK")
</pallas_src>

<mosaic_0001>
module attributes {stable_mosaic.version = 11 : i64} {
  func.func @kernel(%arg0: i32, %arg1: i32, %arg2: memref<1x16x18x3xbf16, #tpu.memory_space<vmem>>, %arg3: memref<1x1x18x3xbf16, #tpu.memory_space<vmem>>, %arg4: memref<1x1x18x3xbf16, #tpu.memory_space<vmem>>, %arg5: memref<1x27x64xbf16, #tpu.memory_space<vmem>>, %arg6: memref<1x64xf32, #tpu.memory_space<vmem>>, %arg7: memref<1x16x16x64xbf16, #tpu.memory_space<vmem>>) attributes {dimension_semantics = [#tpu.dimension_semantics<parallel>, #tpu.dimension_semantics<parallel>], iteration_bounds = array<i64: 4, 1>, scalar_prefetch = 0 : i64, scratch_operands = 0 : i64, tpu.core_type = #tpu.core_type<tc>, window_params = [{transform_indices = @transform_0, window_bounds = array<i64: 1, 16, 18, 3>}, {transform_indices = @transform_1, window_bounds = array<i64: 1, 1, 18, 3>}, {transform_indices = @transform_2, window_bounds = array<i64: 1, 1, 18, 3>}, {pipeline_mode = #tpu.pipeline_mode<synchronous>, transform_indices = @transform_3, window_bounds = array<i64: 1, 27, 64>}, {pipeline_mode = #tpu.pipeline_mode<synchronous>, transform_indices = @transform_4, window_bounds = array<i64: 1, 64>}, {transform_indices = @transform_5, window_bounds = array<i64: 1, 16, 16, 64>}]} {
    %c0 = arith.constant 0 : index
    %c0_0 = arith.constant 0 : index
    %c0_1 = arith.constant 0 : index
    %c0_2 = arith.constant 0 : index
    %0 = vector.load %arg2[%c0, %c0_0, %c0_1, %c0_2] : memref<1x16x18x3xbf16, #tpu.memory_space<vmem>>, vector<1x16x18x3xbf16>
    %1 = vector.shape_cast %0 : vector<1x16x18x3xbf16> to vector<16x18x3xbf16>
    %c0_3 = arith.constant 0 : index
    %c0_4 = arith.constant 0 : index
    %c0_5 = arith.constant 0 : index
    %c0_6 = arith.constant 0 : index
    %2 = vector.load %arg3[%c0_3, %c0_4, %c0_5, %c0_6] : memref<1x1x18x3xbf16, #tpu.memory_space<vmem>>, vector<1x1x18x3xbf16>
    %3 = vector.shape_cast %2 : vector<1x1x18x3xbf16> to vector<1x18x3xbf16>
    %c0_7 = arith.constant 0 : index
    %c0_8 = arith.constant 0 : index
    %c0_9 = arith.constant 0 : index
    %c0_10 = arith.constant 0 : index
    %4 = vector.load %arg4[%c0_7, %c0_8, %c0_9, %c0_10] : memref<1x1x18x3xbf16, #tpu.memory_space<vmem>>, vector<1x1x18x3xbf16>
    %5 = vector.shape_cast %4 : vector<1x1x18x3xbf16> to vector<1x18x3xbf16>
    %6 = tpu.concatenate %1, %3, %5 in 0 : vector<16x18x3xbf16>, vector<1x18x3xbf16>, vector<1x18x3xbf16> -> vector<18x18x3xbf16>
    %7 = vector.extract_strided_slice %6 {offsets = [0, 0, 0], sizes = [16, 18, 3], strides = [1, 1, 1]} : vector<18x18x3xbf16> to vector<16x18x3xbf16>
    %8 = vector.extract_strided_slice %7 {offsets = [0, 0, 0], sizes = [16, 16, 3], strides = [1, 1, 1]} : vector<16x18x3xbf16> to vector<16x16x3xbf16>
    %9 = vector.extract_strided_slice %7 {offsets = [0, 1, 0], sizes = [16, 16, 3], strides = [1, 1, 1]} : vector<16x18x3xbf16> to vector<16x16x3xbf16>
    %10 = vector.extract_strided_slice %7 {offsets = [0, 2, 0], sizes = [16, 16, 3], strides = [1, 1, 1]} : vector<16x18x3xbf16> to vector<16x16x3xbf16>
    %11 = tpu.concatenate %8, %9, %10 in 2 : vector<16x16x3xbf16>, vector<16x16x3xbf16>, vector<16x16x3xbf16> -> vector<16x16x9xbf16>
    %12 = vector.extract_strided_slice %6 {offsets = [1, 0, 0], sizes = [16, 18, 3], strides = [1, 1, 1]} : vector<18x18x3xbf16> to vector<16x18x3xbf16>
    %13 = vector.extract_strided_slice %12 {offsets = [0, 0, 0], sizes = [16, 16, 3], strides = [1, 1, 1]} : vector<16x18x3xbf16> to vector<16x16x3xbf16>
    %14 = vector.extract_strided_slice %12 {offsets = [0, 1, 0], sizes = [16, 16, 3], strides = [1, 1, 1]} : vector<16x18x3xbf16> to vector<16x16x3xbf16>
    %15 = vector.extract_strided_slice %12 {offsets = [0, 2, 0], sizes = [16, 16, 3], strides = [1, 1, 1]} : vector<16x18x3xbf16> to vector<16x16x3xbf16>
    %16 = tpu.concatenate %13, %14, %15 in 2 : vector<16x16x3xbf16>, vector<16x16x3xbf16>, vector<16x16x3xbf16> -> vector<16x16x9xbf16>
    %17 = vector.extract_strided_slice %6 {offsets = [2, 0, 0], sizes = [16, 18, 3], strides = [1, 1, 1]} : vector<18x18x3xbf16> to vector<16x18x3xbf16>
    %18 = vector.extract_strided_slice %17 {offsets = [0, 0, 0], sizes = [16, 16, 3], strides = [1, 1, 1]} : vector<16x18x3xbf16> to vector<16x16x3xbf16>
    %19 = vector.extract_strided_slice %17 {offsets = [0, 1, 0], sizes = [16, 16, 3], strides = [1, 1, 1]} : vector<16x18x3xbf16> to vector<16x16x3xbf16>
    %20 = vector.extract_strided_slice %17 {offsets = [0, 2, 0], sizes = [16, 16, 3], strides = [1, 1, 1]} : vector<16x18x3xbf16> to vector<16x16x3xbf16>
    %21 = tpu.concatenate %18, %19, %20 in 2 : vector<16x16x3xbf16>, vector<16x16x3xbf16>, vector<16x16x3xbf16> -> vector<16x16x9xbf16>
    %22 = tpu.concatenate %11, %16, %21 in 2 : vector<16x16x9xbf16>, vector<16x16x9xbf16>, vector<16x16x9xbf16> -> vector<16x16x27xbf16>
    %23 = vector.shape_cast %22 : vector<16x16x27xbf16> to vector<256x27xbf16>
    %c0_11 = arith.constant 0 : index
    %c0_12 = arith.constant 0 : index
    %c0_13 = arith.constant 0 : index
    %24 = vector.load %arg5[%c0_11, %c0_12, %c0_13] : memref<1x27x64xbf16, #tpu.memory_space<vmem>>, vector<1x27x64xbf16>
    %25 = vector.shape_cast %24 : vector<1x27x64xbf16> to vector<27x64xbf16>
    %cst = arith.constant dense<0.000000e+00> : vector<256x64xf32>
    %26 = tpu.matmul %23, %25, %cst {dimension_numbers = #tpu.dot_dimension_numbers<[1], [0], [0], [1], [0, 0, 1, 1], [], []>} : vector<256x27xbf16>, vector<27x64xbf16>, vector<256x64xf32> -> vector<256x64xf32>
    %c0_14 = arith.constant 0 : index
    %c0_15 = arith.constant 0 : index
    %27 = vector.load %arg6[%c0_14, %c0_15] : memref<1x64xf32, #tpu.memory_space<vmem>>, vector<1x64xf32>
    %28 = vector.broadcast %27 : vector<1x64xf32> to vector<256x64xf32>
    %29 = arith.addf %26, %28 : vector<256x64xf32>
    %cst_16 = arith.constant 0.000000e+00 : f32
    %30 = vector.broadcast %cst_16 : f32 to vector<256x64xf32>
    %31 = arith.maximumf %29, %30 : vector<256x64xf32>
    %32 = arith.truncf %31 : vector<256x64xf32> to vector<256x64xbf16>
    %33 = vector.shape_cast %32 : vector<256x64xbf16> to vector<1x16x16x64xbf16>
    %c0_17 = arith.constant 0 : index
    %c0_18 = arith.constant 0 : index
    %c0_19 = arith.constant 0 : index
    %c0_20 = arith.constant 0 : index
    %34 = vector.load %arg7[%c0_17, %c0_18, %c0_19, %c0_20] : memref<1x16x16x64xbf16, #tpu.memory_space<vmem>>, vector<1x16x16x64xbf16>
    tpu.vector_store %arg7[%c0_17, %c0_18, %c0_19, %c0_20], %33 {strides = array<i32>} : memref<1x16x16x64xbf16, #tpu.memory_space<vmem>>, vector<1x16x16x64xbf16>,
    return
  }
  func.func @transform_0(%arg0: i32, %arg1: i32) -> (i32, i32, i32, i32) {
    %c0_i32 = arith.constant 0 : i32
    %c0_i32_0 = arith.constant 0 : i32
    %c0_i32_1 = arith.constant 0 : i32
    return %arg0, %arg1, %c0_i32, %c0_i32_0 : i32, i32, i32, i32
  }
  func.func @transform_1(%arg0: i32, %arg1: i32) -> (i32, i32, i32, i32) {
    %c16_i32 = arith.constant 16 : i32
    %0 = arith.muli %arg1, %c16_i32 : i32
    %c16_i32_0 = arith.constant 16 : i32
    %1 = arith.addi %0, %c16_i32_0 : i32
    %c0_i32 = arith.constant 0 : i32
    %c0_i32_1 = arith.constant 0 : i32
    %c0_i32_2 = arith.constant 0 : i32
    return %arg0, %1, %c0_i32, %c0_i32_1 : i32, i32, i32, i32
  }
  func.func @transform_2(%arg0: i32, %arg1: i32) -> (i32, i32, i32, i32) {
    %c16_i32 = arith.constant 16 : i32
    %0 = arith.muli %arg1, %c16_i32 : i32
    %c16_i32_0 = arith.constant 16 : i32
    %1 = arith.addi %0, %c16_i32_0 : i32
    %c1_i32 = arith.constant 1 : i32
    %2 = arith.addi %1, %c1_i32 : i32
    %c0_i32 = arith.constant 0 : i32
    %c0_i32_1 = arith.constant 0 : i32
    %c0_i32_2 = arith.constant 0 : i32
    return %arg0, %2, %c0_i32, %c0_i32_1 : i32, i32, i32, i32
  }
  func.func @transform_3(%arg0: i32, %arg1: i32) -> (i32, i32, i32) {
    %c0_i32 = arith.constant 0 : i32
    %c0_i32_0 = arith.constant 0 : i32
    %c0_i32_1 = arith.constant 0 : i32
    %c0_i32_2 = arith.constant 0 : i32
    return %c0_i32, %c0_i32_0, %c0_i32_1 : i32, i32, i32
  }
  func.func @transform_4(%arg0: i32, %arg1: i32) -> (i32, i32) {
    %c0_i32 = arith.constant 0 : i32
    %c0_i32_0 = arith.constant 0 : i32
    %c0_i32_1 = arith.constant 0 : i32
    return %c0_i32, %c0_i32_0 : i32, i32
  }
  func.func @transform_5(%arg0: i32, %arg1: i32) -> (i32, i32, i32, i32) {
    %c0_i32 = arith.constant 0 : i32
    %c0_i32_0 = arith.constant 0 : i32
    %c0_i32_1 = arith.constant 0 : i32
    return %arg0, %arg1, %c0_i32, %c0_i32_0 : i32, i32, i32, i32
  }
}

module attributes {stable_mosaic.version = 11 : i64} {
  func.func @kernel(%arg0: i32, %arg1: i32, %arg2: memref<1x16x18x64xbf16, #tpu.memory_space<vmem>>, %arg3: memref<1x1x18x64xbf16, #tpu.memory_space<vmem>>, %arg4: memref<1x1x18x64xbf16, #tpu.memory_space<vmem>>, %arg5: memref<3x192x64xbf16, #tpu.memory_space<vmem>>, %arg6: memref<1x64xf32, #tpu.memory_space<vmem>>, %arg7: memref<1x16x16x64xbf16, #tpu.memory_space<vmem>>) attributes {dimension_semantics = [#tpu.dimension_semantics<parallel>, #tpu.dimension_semantics<parallel>], iteration_bounds = array<i64: 4, 1>, scalar_prefetch = 0 : i64, scratch_operands = 0 : i64, tpu.core_type = #tpu.core_type<tc>, window_params = [{transform_indices = @transform_0, window_bounds = array<i64: 1, 16, 18, 64>}, {transform_indices = @transform_1, window_bounds = array<i64: 1, 1, 18, 64>}, {transform_indices = @transform_2, window_bounds = array<i64: 1, 1, 18, 64>}, {pipeline_mode = #tpu.pipeline_mode<synchronous>, transform_indices = @transform_3, window_bounds = array<i64: 3, 192, 64>}, {pipeline_mode = #tpu.pipeline_mode<synchronous>, transform_indices = @transform_4, window_bounds = array<i64: 1, 64>}, {transform_indices = @transform_5, window_bounds = array<i64: 1, 16, 16, 64>}]} {
    %c0 = arith.constant 0 : index
    %c0_0 = arith.constant 0 : index
    %c0_1 = arith.constant 0 : index
    %c0_2 = arith.constant 0 : index
    %0 = vector.load %arg2[%c0, %c0_0, %c0_1, %c0_2] : memref<1x16x18x64xbf16, #tpu.memory_space<vmem>>, vector<1x16x18x64xbf16>
    %1 = vector.shape_cast %0 : vector<1x16x18x64xbf16> to vector<16x18x64xbf16>
    %c0_3 = arith.constant 0 : index
    %c0_4 = arith.constant 0 : index
    %c0_5 = arith.constant 0 : index
    %c0_6 = arith.constant 0 : index
    %2 = vector.load %arg3[%c0_3, %c0_4, %c0_5, %c0_6] : memref<1x1x18x64xbf16, #tpu.memory_space<vmem>>, vector<1x1x18x64xbf16>
    %3 = vector.shape_cast %2 : vector<1x1x18x64xbf16> to vector<1x18x64xbf16>
    %c0_7 = arith.constant 0 : index
    %c0_8 = arith.constant 0 : index
    %c0_9 = arith.constant 0 : index
    %c0_10 = arith.constant 0 : index
    %4 = vector.load %arg4[%c0_7, %c0_8, %c0_9, %c0_10] : memref<1x1x18x64xbf16, #tpu.memory_space<vmem>>, vector<1x1x18x64xbf16>
    %5 = vector.shape_cast %4 : vector<1x1x18x64xbf16> to vector<1x18x64xbf16>
    %6 = tpu.concatenate %1, %3, %5 in 0 : vector<16x18x64xbf16>, vector<1x18x64xbf16>, vector<1x18x64xbf16> -> vector<18x18x64xbf16>
    %7 = vector.extract_strided_slice %6 {offsets = [0, 0, 0], sizes = [16, 18, 64], strides = [1, 1, 1]} : vector<18x18x64xbf16> to vector<16x18x64xbf16>
    %8 = vector.extract_strided_slice %7 {offsets = [0, 0, 0], sizes = [16, 16, 64], strides = [1, 1, 1]} : vector<16x18x64xbf16> to vector<16x16x64xbf16>
    %9 = vector.extract_strided_slice %7 {offsets = [0, 1, 0], sizes = [16, 16, 64], strides = [1, 1, 1]} : vector<16x18x64xbf16> to vector<16x16x64xbf16>
    %10 = vector.extract_strided_slice %7 {offsets = [0, 2, 0], sizes = [16, 16, 64], strides = [1, 1, 1]} : vector<16x18x64xbf16> to vector<16x16x64xbf16>
    %11 = tpu.concatenate %8, %9, %10 in 2 : vector<16x16x64xbf16>, vector<16x16x64xbf16>, vector<16x16x64xbf16> -> vector<16x16x192xbf16>
    %12 = vector.shape_cast %11 : vector<16x16x192xbf16> to vector<256x192xbf16>
    %c0_11 = arith.constant 0 : index
    %c0_12 = arith.constant 0 : index
    %c0_13 = arith.constant 0 : index
    %13 = vector.load %arg5[%c0_11, %c0_12, %c0_13] : memref<3x192x64xbf16, #tpu.memory_space<vmem>>, vector<1x192x64xbf16>
    %14 = vector.shape_cast %13 : vector<1x192x64xbf16> to vector<192x64xbf16>
    %cst = arith.constant dense<0.000000e+00> : vector<256x64xf32>
    %15 = tpu.matmul %12, %14, %cst {dimension_numbers = #tpu.dot_dimension_numbers<[1], [0], [0], [1], [0, 0, 1, 1], [], []>} : vector<256x192xbf16>, vector<192x64xbf16>, vector<256x64xf32> -> vector<256x64xf32>
    %16 = vector.extract_strided_slice %6 {offsets = [1, 0, 0], sizes = [16, 18, 64], strides = [1, 1, 1]} : vector<18x18x64xbf16> to vector<16x18x64xbf16>
    %17 = vector.extract_strided_slice %16 {offsets = [0, 0, 0], sizes = [16, 16, 64], strides = [1, 1, 1]} : vector<16x18x64xbf16> to vector<16x16x64xbf16>
    %18 = vector.extract_strided_slice %16 {offsets = [0, 1, 0], sizes = [16, 16, 64], strides = [1, 1, 1]} : vector<16x18x64xbf16> to vector<16x16x64xbf16>
    %19 = vector.extract_strided_slice %16 {offsets = [0, 2, 0], sizes = [16, 16, 64], strides = [1, 1, 1]} : vector<16x18x64xbf16> to vector<16x16x64xbf16>
    %20 = tpu.concatenate %17, %18, %19 in 2 : vector<16x16x64xbf16>, vector<16x16x64xbf16>, vector<16x16x64xbf16> -> vector<16x16x192xbf16>
    %21 = vector.shape_cast %20 : vector<16x16x192xbf16> to vector<256x192xbf16>
    %c1 = arith.constant 1 : index
    %c0_14 = arith.constant 0 : index
    %c0_15 = arith.constant 0 : index
    %22 = vector.load %arg5[%c1, %c0_14, %c0_15] : memref<3x192x64xbf16, #tpu.memory_space<vmem>>, vector<1x192x64xbf16>
    %23 = vector.shape_cast %22 : vector<1x192x64xbf16> to vector<192x64xbf16>
    %cst_16 = arith.constant dense<0.000000e+00> : vector<256x64xf32>
    %24 = tpu.matmul %21, %23, %cst_16 {dimension_numbers = #tpu.dot_dimension_numbers<[1], [0], [0], [1], [0, 0, 1, 1], [], []>} : vector<256x192xbf16>, vector<192x64xbf16>, vector<256x64xf32> -> vector<256x64xf32>
    %25 = arith.addf %15, %24 : vector<256x64xf32>
    %26 = vector.extract_strided_slice %6 {offsets = [2, 0, 0], sizes = [16, 18, 64], strides = [1, 1, 1]} : vector<18x18x64xbf16> to vector<16x18x64xbf16>
    %27 = vector.extract_strided_slice %26 {offsets = [0, 0, 0], sizes = [16, 16, 64], strides = [1, 1, 1]} : vector<16x18x64xbf16> to vector<16x16x64xbf16>
    %28 = vector.extract_strided_slice %26 {offsets = [0, 1, 0], sizes = [16, 16, 64], strides = [1, 1, 1]} : vector<16x18x64xbf16> to vector<16x16x64xbf16>
    %29 = vector.extract_strided_slice %26 {offsets = [0, 2, 0], sizes = [16, 16, 64], strides = [1, 1, 1]} : vector<16x18x64xbf16> to vector<16x16x64xbf16>
    %30 = tpu.concatenate %27, %28, %29 in 2 : vector<16x16x64xbf16>, vector<16x16x64xbf16>, vector<16x16x64xbf16> -> vector<16x16x192xbf16>
    %31 = vector.shape_cast %30 : vector<16x16x192xbf16> to vector<256x192xbf16>
    %c2 = arith.constant 2 : index
    %c0_17 = arith.constant 0 : index
    %c0_18 = arith.constant 0 : index
    %32 = vector.load %arg5[%c2, %c0_17, %c0_18] : memref<3x192x64xbf16, #tpu.memory_space<vmem>>, vector<1x192x64xbf16>
    %33 = vector.shape_cast %32 : vector<1x192x64xbf16> to vector<192x64xbf16>
    %cst_19 = arith.constant dense<0.000000e+00> : vector<256x64xf32>
    %34 = tpu.matmul %31, %33, %cst_19 {dimension_numbers = #tpu.dot_dimension_numbers<[1], [0], [0], [1], [0, 0, 1, 1], [], []>} : vector<256x192xbf16>, vector<192x64xbf16>, vector<256x64xf32> -> vector<256x64xf32>
    %35 = arith.addf %25, %34 : vector<256x64xf32>
    %c0_20 = arith.constant 0 : index
    %c0_21 = arith.constant 0 : index
    %36 = vector.load %arg6[%c0_20, %c0_21] : memref<1x64xf32, #tpu.memory_space<vmem>>, vector<1x64xf32>
    %37 = vector.broadcast %36 : vector<1x64xf32> to vector<256x64xf32>
    %38 = arith.addf %35, %37 : vector<256x64xf32>
    %cst_22 = arith.constant 0.000000e+00 : f32
    %39 = vector.broadcast %cst_22 : f32 to vector<256x64xf32>
    %40 = arith.maximumf %38, %39 : vector<256x64xf32>
    %41 = arith.truncf %40 : vector<256x64xf32> to vector<256x64xbf16>
    %42 = vector.shape_cast %41 : vector<256x64xbf16> to vector<1x16x16x64xbf16>
    %c0_23 = arith.constant 0 : index
    %c0_24 = arith.constant 0 : index
    %c0_25 = arith.constant 0 : index
    %c0_26 = arith.constant 0 : index
    %43 = vector.load %arg7[%c0_23, %c0_24, %c0_25, %c0_26] : memref<1x16x16x64xbf16, #tpu.memory_space<vmem>>, vector<1x16x16x64xbf16>
    tpu.vector_store %arg7[%c0_23, %c0_24, %c0_25, %c0_26], %42 {strides = array<i32>} : memref<1x16x16x64xbf16, #tpu.memory_space<vmem>>, vector<1x16x16x64xbf16>,
    return
  }
  func.func @transform_0(%arg0: i32, %arg1: i32) -> (i32, i32, i32, i32) {
    %c0_i32 = arith.constant 0 : i32
    %c0_i32_0 = arith.constant 0 : i32
    %c0_i32_1 = arith.constant 0 : i32
    return %arg0, %arg1, %c0_i32, %c0_i32_0 : i32, i32, i32, i32
  }
  func.func @transform_1(%arg0: i32, %arg1: i32) -> (i32, i32, i32, i32) {
    %c16_i32 = arith.constant 16 : i32
    %0 = arith.muli %arg1, %c16_i32 : i32
    %c16_i32_0 = arith.constant 16 : i32
    %1 = arith.addi %0, %c16_i32_0 : i32
    %c0_i32 = arith.constant 0 : i32
    %c0_i32_1 = arith.constant 0 : i32
    %c0_i32_2 = arith.constant 0 : i32
    return %arg0, %1, %c0_i32, %c0_i32_1 : i32, i32, i32, i32
  }
  func.func @transform_2(%arg0: i32, %arg1: i32) -> (i32, i32, i32, i32) {
    %c16_i32 = arith.constant 16 : i32
    %0 = arith.muli %arg1, %c16_i32 : i32
    %c16_i32_0 = arith.constant 16 : i32
    %1 = arith.addi %0, %c16_i32_0 : i32
    %c1_i32 = arith.constant 1 : i32
    %2 = arith.addi %1, %c1_i32 : i32
    %c0_i32 = arith.constant 0 : i32
    %c0_i32_1 = arith.constant 0 : i32
    %c0_i32_2 = arith.constant 0 : i32
    return %arg0, %2, %c0_i32, %c0_i32_1 : i32, i32, i32, i32
  }
  func.func @transform_3(%arg0: i32, %arg1: i32) -> (i32, i32, i32) {
    %c0_i32 = arith.constant 0 : i32
    %c0_i32_0 = arith.constant 0 : i32
    %c0_i32_1 = arith.constant 0 : i32
    %c0_i32_2 = arith.constant 0 : i32
    return %c0_i32, %c0_i32_0, %c0_i32_1 : i32, i32, i32
  }
  func.func @transform_4(%arg0: i32, %arg1: i32) -> (i32, i32) {
    %c0_i32 = arith.constant 0 : i32
    %c0_i32_0 = arith.constant 0 : i32
    %c0_i32_1 = arith.constant 0 : i32
    return %c0_i32, %c0_i32_0 : i32, i32
  }
  func.func @transform_5(%arg0: i32, %arg1: i32) -> (i32, i32, i32, i32) {
    %c0_i32 = arith.constant 0 : i32
    %c0_i32_0 = arith.constant 0 : i32
    %c0_i32_1 = arith.constant 0 : i32
    return %arg0, %arg1, %c0_i32, %c0_i32_0 : i32, i32, i32, i32
  }
}

module attributes {stable_mosaic.version = 11 : i64} {
  func.func @kernel(%arg0: i32, %arg1: i32, %arg2: memref<1x8x10x64xbf16, #tpu.memory_space<vmem>>, %arg3: memref<1x1x10x64xbf16, #tpu.memory_space<vmem>>, %arg4: memref<1x1x10x64xbf16, #tpu.memory_space<vmem>>, %arg5: memref<3x192x128xbf16, #tpu.memory_space<vmem>>, %arg6: memref<1x128xf32, #tpu.memory_space<vmem>>, %arg7: memref<1x8x8x128xbf16, #tpu.memory_space<vmem>>) attributes {dimension_semantics = [#tpu.dimension_semantics<parallel>, #tpu.dimension_semantics<parallel>], iteration_bounds = array<i64: 4, 1>, scalar_prefetch = 0 : i64, scratch_operands = 0 : i64, tpu.core_type = #tpu.core_type<tc>, window_params = [{transform_indices = @transform_0, window_bounds = array<i64: 1, 8, 10, 64>}, {transform_indices = @transform_1, window_bounds = array<i64: 1, 1, 10, 64>}, {transform_indices = @transform_2, window_bounds = array<i64: 1, 1, 10, 64>}, {pipeline_mode = #tpu.pipeline_mode<synchronous>, transform_indices = @transform_3, window_bounds = array<i64: 3, 192, 128>}, {pipeline_mode = #tpu.pipeline_mode<synchronous>, transform_indices = @transform_4, window_bounds = array<i64: 1, 128>}, {transform_indices = @transform_5, window_bounds = array<i64: 1, 8, 8, 128>}]} {
    %c0 = arith.constant 0 : index
    %c0_0 = arith.constant 0 : index
    %c0_1 = arith.constant 0 : index
    %c0_2 = arith.constant 0 : index
    %0 = vector.load %arg2[%c0, %c0_0, %c0_1, %c0_2] : memref<1x8x10x64xbf16, #tpu.memory_space<vmem>>, vector<1x8x10x64xbf16>
    %1 = vector.shape_cast %0 : vector<1x8x10x64xbf16> to vector<8x10x64xbf16>
    %c0_3 = arith.constant 0 : index
    %c0_4 = arith.constant 0 : index
    %c0_5 = arith.constant 0 : index
    %c0_6 = arith.constant 0 : index
    %2 = vector.load %arg3[%c0_3, %c0_4, %c0_5, %c0_6] : memref<1x1x10x64xbf16, #tpu.memory_space<vmem>>, vector<1x1x10x64xbf16>
    %3 = vector.shape_cast %2 : vector<1x1x10x64xbf16> to vector<1x10x64xbf16>
    %c0_7 = arith.constant 0 : index
    %c0_8 = arith.constant 0 : index
    %c0_9 = arith.constant 0 : index
    %c0_10 = arith.constant 0 : index
    %4 = vector.load %arg4[%c0_7, %c0_8, %c0_9, %c0_10] : memref<1x1x10x64xbf16, #tpu.memory_space<vmem>>, vector<1x1x10x64xbf16>
    %5 = vector.shape_cast %4 : vector<1x1x10x64xbf16> to vector<1x10x64xbf16>
    %6 = tpu.concatenate %1, %3, %5 in 0 : vector<8x10x64xbf16>, vector<1x10x64xbf16>, vector<1x10x64xbf16> -> vector<10x10x64xbf16>
    %7 = vector.extract_strided_slice %6 {offsets = [0, 0, 0], sizes = [8, 10, 64], strides = [1, 1, 1]} : vector<10x10x64xbf16> to vector<8x10x64xbf16>
    %8 = vector.extract_strided_slice %7 {offsets = [0, 0, 0], sizes = [8, 8, 64], strides = [1, 1, 1]} : vector<8x10x64xbf16> to vector<8x8x64xbf16>
    %9 = vector.extract_strided_slice %7 {offsets = [0, 1, 0], sizes = [8, 8, 64], strides = [1, 1, 1]} : vector<8x10x64xbf16> to vector<8x8x64xbf16>
    %10 = vector.extract_strided_slice %7 {offsets = [0, 2, 0], sizes = [8, 8, 64], strides = [1, 1, 1]} : vector<8x10x64xbf16> to vector<8x8x64xbf16>
    %11 = tpu.concatenate %8, %9, %10 in 2 : vector<8x8x64xbf16>, vector<8x8x64xbf16>, vector<8x8x64xbf16> -> vector<8x8x192xbf16>
    %12 = vector.shape_cast %11 : vector<8x8x192xbf16> to vector<64x192xbf16>
    %c0_11 = arith.constant 0 : index
    %c0_12 = arith.constant 0 : index
    %c0_13 = arith.constant 0 : index
    %13 = vector.load %arg5[%c0_11, %c0_12, %c0_13] : memref<3x192x128xbf16, #tpu.memory_space<vmem>>, vector<1x192x128xbf16>
    %14 = vector.shape_cast %13 : vector<1x192x128xbf16> to vector<192x128xbf16>
    %cst = arith.constant dense<0.000000e+00> : vector<64x128xf32>
    %15 = tpu.matmul %12, %14, %cst {dimension_numbers = #tpu.dot_dimension_numbers<[1], [0], [0], [1], [0, 0, 1, 1], [], []>} : vector<64x192xbf16>, vector<192x128xbf16>, vector<64x128xf32> -> vector<64x128xf32>
    %16 = vector.extract_strided_slice %6 {offsets = [1, 0, 0], sizes = [8, 10, 64], strides = [1, 1, 1]} : vector<10x10x64xbf16> to vector<8x10x64xbf16>
    %17 = vector.extract_strided_slice %16 {offsets = [0, 0, 0], sizes = [8, 8, 64], strides = [1, 1, 1]} : vector<8x10x64xbf16> to vector<8x8x64xbf16>
    %18 = vector.extract_strided_slice %16 {offsets = [0, 1, 0], sizes = [8, 8, 64], strides = [1, 1, 1]} : vector<8x10x64xbf16> to vector<8x8x64xbf16>
    %19 = vector.extract_strided_slice %16 {offsets = [0, 2, 0], sizes = [8, 8, 64], strides = [1, 1, 1]} : vector<8x10x64xbf16> to vector<8x8x64xbf16>
    %20 = tpu.concatenate %17, %18, %19 in 2 : vector<8x8x64xbf16>, vector<8x8x64xbf16>, vector<8x8x64xbf16> -> vector<8x8x192xbf16>
    %21 = vector.shape_cast %20 : vector<8x8x192xbf16> to vector<64x192xbf16>
    %c1 = arith.constant 1 : index
    %c0_14 = arith.constant 0 : index
    %c0_15 = arith.constant 0 : index
    %22 = vector.load %arg5[%c1, %c0_14, %c0_15] : memref<3x192x128xbf16, #tpu.memory_space<vmem>>, vector<1x192x128xbf16>
    %23 = vector.shape_cast %22 : vector<1x192x128xbf16> to vector<192x128xbf16>
    %cst_16 = arith.constant dense<0.000000e+00> : vector<64x128xf32>
    %24 = tpu.matmul %21, %23, %cst_16 {dimension_numbers = #tpu.dot_dimension_numbers<[1], [0], [0], [1], [0, 0, 1, 1], [], []>} : vector<64x192xbf16>, vector<192x128xbf16>, vector<64x128xf32> -> vector<64x128xf32>
    %25 = arith.addf %15, %24 : vector<64x128xf32>
    %26 = vector.extract_strided_slice %6 {offsets = [2, 0, 0], sizes = [8, 10, 64], strides = [1, 1, 1]} : vector<10x10x64xbf16> to vector<8x10x64xbf16>
    %27 = vector.extract_strided_slice %26 {offsets = [0, 0, 0], sizes = [8, 8, 64], strides = [1, 1, 1]} : vector<8x10x64xbf16> to vector<8x8x64xbf16>
    %28 = vector.extract_strided_slice %26 {offsets = [0, 1, 0], sizes = [8, 8, 64], strides = [1, 1, 1]} : vector<8x10x64xbf16> to vector<8x8x64xbf16>
    %29 = vector.extract_strided_slice %26 {offsets = [0, 2, 0], sizes = [8, 8, 64], strides = [1, 1, 1]} : vector<8x10x64xbf16> to vector<8x8x64xbf16>
    %30 = tpu.concatenate %27, %28, %29 in 2 : vector<8x8x64xbf16>, vector<8x8x64xbf16>, vector<8x8x64xbf16> -> vector<8x8x192xbf16>
    %31 = vector.shape_cast %30 : vector<8x8x192xbf16> to vector<64x192xbf16>
    %c2 = arith.constant 2 : index
    %c0_17 = arith.constant 0 : index
    %c0_18 = arith.constant 0 : index
    %32 = vector.load %arg5[%c2, %c0_17, %c0_18] : memref<3x192x128xbf16, #tpu.memory_space<vmem>>, vector<1x192x128xbf16>
    %33 = vector.shape_cast %32 : vector<1x192x128xbf16> to vector<192x128xbf16>
    %cst_19 = arith.constant dense<0.000000e+00> : vector<64x128xf32>
    %34 = tpu.matmul %31, %33, %cst_19 {dimension_numbers = #tpu.dot_dimension_numbers<[1], [0], [0], [1], [0, 0, 1, 1], [], []>} : vector<64x192xbf16>, vector<192x128xbf16>, vector<64x128xf32> -> vector<64x128xf32>
    %35 = arith.addf %25, %34 : vector<64x128xf32>
    %c0_20 = arith.constant 0 : index
    %c0_21 = arith.constant 0 : index
    %36 = vector.load %arg6[%c0_20, %c0_21] : memref<1x128xf32, #tpu.memory_space<vmem>>, vector<1x128xf32>
    %37 = vector.broadcast %36 : vector<1x128xf32> to vector<64x128xf32>
    %38 = arith.addf %35, %37 : vector<64x128xf32>
    %cst_22 = arith.constant 0.000000e+00 : f32
    %39 = vector.broadcast %cst_22 : f32 to vector<64x128xf32>
    %40 = arith.maximumf %38, %39 : vector<64x128xf32>
    %41 = arith.truncf %40 : vector<64x128xf32> to vector<64x128xbf16>
    %42 = vector.shape_cast %41 : vector<64x128xbf16> to vector<1x8x8x128xbf16>
    %c0_23 = arith.constant 0 : index
    %c0_24 = arith.constant 0 : index
    %c0_25 = arith.constant 0 : index
    %c0_26 = arith.constant 0 : index
    %43 = vector.load %arg7[%c0_23, %c0_24, %c0_25, %c0_26] : memref<1x8x8x128xbf16, #tpu.memory_space<vmem>>, vector<1x8x8x128xbf16>
    tpu.vector_store %arg7[%c0_23, %c0_24, %c0_25, %c0_26], %42 {strides = array<i32>} : memref<1x8x8x128xbf16, #tpu.memory_space<vmem>>, vector<1x8x8x128xbf16>,
    return
  }
  func.func @transform_0(%arg0: i32, %arg1: i32) -> (i32, i32, i32, i32) {
    %c0_i32 = arith.constant 0 : i32
    %c0_i32_0 = arith.constant 0 : i32
    %c0_i32_1 = arith.constant 0 : i32
    return %arg0, %arg1, %c0_i32, %c0_i32_0 : i32, i32, i32, i32
  }
  func.func @transform_1(%arg0: i32, %arg1: i32) -> (i32, i32, i32, i32) {
    %c8_i32 = arith.constant 8 : i32
    %0 = arith.muli %arg1, %c8_i32 : i32
    %c8_i32_0 = arith.constant 8 : i32
    %1 = arith.addi %0, %c8_i32_0 : i32
    %c0_i32 = arith.constant 0 : i32
    %c0_i32_1 = arith.constant 0 : i32
    %c0_i32_2 = arith.constant 0 : i32
    return %arg0, %1, %c0_i32, %c0_i32_1 : i32, i32, i32, i32
  }
  func.func @transform_2(%arg0: i32, %arg1: i32) -> (i32, i32, i32, i32) {
    %c8_i32 = arith.constant 8 : i32
    %0 = arith.muli %arg1, %c8_i32 : i32
    %c8_i32_0 = arith.constant 8 : i32
    %1 = arith.addi %0, %c8_i32_0 : i32
    %c1_i32 = arith.constant 1 : i32
    %2 = arith.addi %1, %c1_i32 : i32
    %c0_i32 = arith.constant 0 : i32
    %c0_i32_1 = arith.constant 0 : i32
    %c0_i32_2 = arith.constant 0 : i32
    return %arg0, %2, %c0_i32, %c0_i32_1 : i32, i32, i32, i32
  }
  func.func @transform_3(%arg0: i32, %arg1: i32) -> (i32, i32, i32) {
    %c0_i32 = arith.constant 0 : i32
    %c0_i32_0 = arith.constant 0 : i32
    %c0_i32_1 = arith.constant 0 : i32
    %c0_i32_2 = arith.constant 0 : i32
    return %c0_i32, %c0_i32_0, %c0_i32_1 : i32, i32, i32
  }
  func.func @transform_4(%arg0: i32, %arg1: i32) -> (i32, i32) {
    %c0_i32 = arith.constant 0 : i32
    %c0_i32_0 = arith.constant 0 : i32
    %c0_i32_1 = arith.constant 0 : i32
    return %c0_i32, %c0_i32_0 : i32, i32
  }
  func.func @transform_5(%arg0: i32, %arg1: i32) -> (i32, i32, i32, i32) {
    %c0_i32 = arith.constant 0 : i32
    %c0_i32_0 = arith.constant 0 : i32
    %c0_i32_1 = arith.constant 0 : i32
    return %arg0, %arg1, %c0_i32, %c0_i32_0 : i32, i32, i32, i32
  }
}

module attributes {stable_mosaic.version = 11 : i64} {
  func.func @kernel(%arg0: i32, %arg1: i32, %arg2: memref<1x8x10x128xbf16, #tpu.memory_space<vmem>>, %arg3: memref<1x1x10x128xbf16, #tpu.memory_space<vmem>>, %arg4: memref<1x1x10x128xbf16, #tpu.memory_space<vmem>>, %arg5: memref<3x384x128xbf16, #tpu.memory_space<vmem>>, %arg6: memref<1x128xf32, #tpu.memory_space<vmem>>, %arg7: memref<1x8x8x128xbf16, #tpu.memory_space<vmem>>) attributes {dimension_semantics = [#tpu.dimension_semantics<parallel>, #tpu.dimension_semantics<parallel>], iteration_bounds = array<i64: 4, 1>, scalar_prefetch = 0 : i64, scratch_operands = 0 : i64, tpu.core_type = #tpu.core_type<tc>, window_params = [{transform_indices = @transform_0, window_bounds = array<i64: 1, 8, 10, 128>}, {transform_indices = @transform_1, window_bounds = array<i64: 1, 1, 10, 128>}, {transform_indices = @transform_2, window_bounds = array<i64: 1, 1, 10, 128>}, {pipeline_mode = #tpu.pipeline_mode<synchronous>, transform_indices = @transform_3, window_bounds = array<i64: 3, 384, 128>}, {pipeline_mode = #tpu.pipeline_mode<synchronous>, transform_indices = @transform_4, window_bounds = array<i64: 1, 128>}, {transform_indices = @transform_5, window_bounds = array<i64: 1, 8, 8, 128>}]} {
    %c0 = arith.constant 0 : index
    %c0_0 = arith.constant 0 : index
    %c0_1 = arith.constant 0 : index
    %c0_2 = arith.constant 0 : index
    %0 = vector.load %arg2[%c0, %c0_0, %c0_1, %c0_2] : memref<1x8x10x128xbf16, #tpu.memory_space<vmem>>, vector<1x8x10x128xbf16>
    %1 = vector.shape_cast %0 : vector<1x8x10x128xbf16> to vector<8x10x128xbf16>
    %c0_3 = arith.constant 0 : index
    %c0_4 = arith.constant 0 : index
    %c0_5 = arith.constant 0 : index
    %c0_6 = arith.constant 0 : index
    %2 = vector.load %arg3[%c0_3, %c0_4, %c0_5, %c0_6] : memref<1x1x10x128xbf16, #tpu.memory_space<vmem>>, vector<1x1x10x128xbf16>
    %3 = vector.shape_cast %2 : vector<1x1x10x128xbf16> to vector<1x10x128xbf16>
    %c0_7 = arith.constant 0 : index
    %c0_8 = arith.constant 0 : index
    %c0_9 = arith.constant 0 : index
    %c0_10 = arith.constant 0 : index
    %4 = vector.load %arg4[%c0_7, %c0_8, %c0_9, %c0_10] : memref<1x1x10x128xbf16, #tpu.memory_space<vmem>>, vector<1x1x10x128xbf16>
    %5 = vector.shape_cast %4 : vector<1x1x10x128xbf16> to vector<1x10x128xbf16>
    %6 = tpu.concatenate %1, %3, %5 in 0 : vector<8x10x128xbf16>, vector<1x10x128xbf16>, vector<1x10x128xbf16> -> vector<10x10x128xbf16>
    %7 = vector.extract_strided_slice %6 {offsets = [0, 0, 0], sizes = [8, 10, 128], strides = [1, 1, 1]} : vector<10x10x128xbf16> to vector<8x10x128xbf16>
    %8 = vector.extract_strided_slice %7 {offsets = [0, 0, 0], sizes = [8, 8, 128], strides = [1, 1, 1]} : vector<8x10x128xbf16> to vector<8x8x128xbf16>
    %9 = vector.extract_strided_slice %7 {offsets = [0, 1, 0], sizes = [8, 8, 128], strides = [1, 1, 1]} : vector<8x10x128xbf16> to vector<8x8x128xbf16>
    %10 = vector.extract_strided_slice %7 {offsets = [0, 2, 0], sizes = [8, 8, 128], strides = [1, 1, 1]} : vector<8x10x128xbf16> to vector<8x8x128xbf16>
    %11 = tpu.concatenate %8, %9, %10 in 2 : vector<8x8x128xbf16>, vector<8x8x128xbf16>, vector<8x8x128xbf16> -> vector<8x8x384xbf16>
    %12 = vector.shape_cast %11 : vector<8x8x384xbf16> to vector<64x384xbf16>
    %c0_11 = arith.constant 0 : index
    %c0_12 = arith.constant 0 : index
    %c0_13 = arith.constant 0 : index
    %13 = vector.load %arg5[%c0_11, %c0_12, %c0_13] : memref<3x384x128xbf16, #tpu.memory_space<vmem>>, vector<1x384x128xbf16>
    %14 = vector.shape_cast %13 : vector<1x384x128xbf16> to vector<384x128xbf16>
    %cst = arith.constant dense<0.000000e+00> : vector<64x128xf32>
    %15 = tpu.matmul %12, %14, %cst {dimension_numbers = #tpu.dot_dimension_numbers<[1], [0], [0], [1], [0, 0, 1, 1], [], []>} : vector<64x384xbf16>, vector<384x128xbf16>, vector<64x128xf32> -> vector<64x128xf32>
    %16 = vector.extract_strided_slice %6 {offsets = [1, 0, 0], sizes = [8, 10, 128], strides = [1, 1, 1]} : vector<10x10x128xbf16> to vector<8x10x128xbf16>
    %17 = vector.extract_strided_slice %16 {offsets = [0, 0, 0], sizes = [8, 8, 128], strides = [1, 1, 1]} : vector<8x10x128xbf16> to vector<8x8x128xbf16>
    %18 = vector.extract_strided_slice %16 {offsets = [0, 1, 0], sizes = [8, 8, 128], strides = [1, 1, 1]} : vector<8x10x128xbf16> to vector<8x8x128xbf16>
    %19 = vector.extract_strided_slice %16 {offsets = [0, 2, 0], sizes = [8, 8, 128], strides = [1, 1, 1]} : vector<8x10x128xbf16> to vector<8x8x128xbf16>
    %20 = tpu.concatenate %17, %18, %19 in 2 : vector<8x8x128xbf16>, vector<8x8x128xbf16>, vector<8x8x128xbf16> -> vector<8x8x384xbf16>
    %21 = vector.shape_cast %20 : vector<8x8x384xbf16> to vector<64x384xbf16>
    %c1 = arith.constant 1 : index
    %c0_14 = arith.constant 0 : index
    %c0_15 = arith.constant 0 : index
    %22 = vector.load %arg5[%c1, %c0_14, %c0_15] : memref<3x384x128xbf16, #tpu.memory_space<vmem>>, vector<1x384x128xbf16>
    %23 = vector.shape_cast %22 : vector<1x384x128xbf16> to vector<384x128xbf16>
    %cst_16 = arith.constant dense<0.000000e+00> : vector<64x128xf32>
    %24 = tpu.matmul %21, %23, %cst_16 {dimension_numbers = #tpu.dot_dimension_numbers<[1], [0], [0], [1], [0, 0, 1, 1], [], []>} : vector<64x384xbf16>, vector<384x128xbf16>, vector<64x128xf32> -> vector<64x128xf32>
    %25 = arith.addf %15, %24 : vector<64x128xf32>
    %26 = vector.extract_strided_slice %6 {offsets = [2, 0, 0], sizes = [8, 10, 128], strides = [1, 1, 1]} : vector<10x10x128xbf16> to vector<8x10x128xbf16>
    %27 = vector.extract_strided_slice %26 {offsets = [0, 0, 0], sizes = [8, 8, 128], strides = [1, 1, 1]} : vector<8x10x128xbf16> to vector<8x8x128xbf16>
    %28 = vector.extract_strided_slice %26 {offsets = [0, 1, 0], sizes = [8, 8, 128], strides = [1, 1, 1]} : vector<8x10x128xbf16> to vector<8x8x128xbf16>
    %29 = vector.extract_strided_slice %26 {offsets = [0, 2, 0], sizes = [8, 8, 128], strides = [1, 1, 1]} : vector<8x10x128xbf16> to vector<8x8x128xbf16>
    %30 = tpu.concatenate %27, %28, %29 in 2 : vector<8x8x128xbf16>, vector<8x8x128xbf16>, vector<8x8x128xbf16> -> vector<8x8x384xbf16>
    %31 = vector.shape_cast %30 : vector<8x8x384xbf16> to vector<64x384xbf16>
    %c2 = arith.constant 2 : index
    %c0_17 = arith.constant 0 : index
    %c0_18 = arith.constant 0 : index
    %32 = vector.load %arg5[%c2, %c0_17, %c0_18] : memref<3x384x128xbf16, #tpu.memory_space<vmem>>, vector<1x384x128xbf16>
    %33 = vector.shape_cast %32 : vector<1x384x128xbf16> to vector<384x128xbf16>
    %cst_19 = arith.constant dense<0.000000e+00> : vector<64x128xf32>
    %34 = tpu.matmul %31, %33, %cst_19 {dimension_numbers = #tpu.dot_dimension_numbers<[1], [0], [0], [1], [0, 0, 1, 1], [], []>} : vector<64x384xbf16>, vector<384x128xbf16>, vector<64x128xf32> -> vector<64x128xf32>
    %35 = arith.addf %25, %34 : vector<64x128xf32>
    %c0_20 = arith.constant 0 : index
    %c0_21 = arith.constant 0 : index
    %36 = vector.load %arg6[%c0_20, %c0_21] : memref<1x128xf32, #tpu.memory_space<vmem>>, vector<1x128xf32>
    %37 = vector.broadcast %36 : vector<1x128xf32> to vector<64x128xf32>
    %38 = arith.addf %35, %37 : vector<64x128xf32>
    %cst_22 = arith.constant 0.000000e+00 : f32
    %39 = vector.broadcast %cst_22 : f32 to vector<64x128xf32>
    %40 = arith.maximumf %38, %39 : vector<64x128xf32>
    %41 = arith.truncf %40 : vector<64x128xf32> to vector<64x128xbf16>
    %42 = vector.shape_cast %41 : vector<64x128xbf16> to vector<1x8x8x128xbf16>
    %c0_23 = arith.constant 0 : index
    %c0_24 = arith.constant 0 : index
    %c0_25 = arith.constant 0 : index
    %c0_26 = arith.constant 0 : index
    %43 = vector.load %arg7[%c0_23, %c0_24, %c0_25, %c0_26] : memref<1x8x8x128xbf16, #tpu.memory_space<vmem>>, vector<1x8x8x128xbf16>
    tpu.vector_store %arg7[%c0_23, %c0_24, %c0_25, %c0_26], %42 {strides = array<i32>} : memref<1x8x8x128xbf16, #tpu.memory_space<vmem>>, vector<1x8x8x128xbf16>,
    return
  }
  func.func @transform_0(%arg0: i32, %arg1: i32) -> (i32, i32, i32, i32) {
    %c0_i32 = arith.constant 0 : i32
    %c0_i32_0 = arith.constant 0 : i32
    %c0_i32_1 = arith.constant 0 : i32
    return %arg0, %arg1, %c0_i32, %c0_i32_0 : i32, i32, i32, i32
  }
  func.func @transform_1(%arg0: i32, %arg1: i32) -> (i32, i32, i32, i32) {
    %c8_i32 = arith.constant 8 : i32
    %0 = arith.muli %arg1, %c8_i32 : i32
    %c8_i32_0 = arith.constant 8 : i32
    %1 = arith.addi %0, %c8_i32_0 : i32
    %c0_i32 = arith.constant 0 : i32
    %c0_i32_1 = arith.constant 0 : i32
    %c0_i32_2 = arith.constant 0 : i32
    return %arg0, %1, %c0_i32, %c0_i32_1 : i32, i32, i32, i32
  }
  func.func @transform_2(%arg0: i32, %arg1: i32) -> (i32, i32, i32, i32) {
    %c8_i32 = arith.constant 8 : i32
    %0 = arith.muli %arg1, %c8_i32 : i32
    %c8_i32_0 = arith.constant 8 : i32
    %1 = arith.addi %0, %c8_i32_0 : i32
    %c1_i32 = arith.constant 1 : i32
    %2 = arith.addi %1, %c1_i32 : i32
    %c0_i32 = arith.constant 0 : i32
    %c0_i32_1 = arith.constant 0 : i32
    %c0_i32_2 = arith.constant 0 : i32
    return %arg0, %2, %c0_i32, %c0_i32_1 : i32, i32, i32, i32
  }
  func.func @transform_3(%arg0: i32, %arg1: i32) -> (i32, i32, i32) {
    %c0_i32 = arith.constant 0 : i32
    %c0_i32_0 = arith.constant 0 : i32
    %c0_i32_1 = arith.constant 0 : i32
    %c0_i32_2 = arith.constant 0 : i32
    return %c0_i32, %c0_i32_0, %c0_i32_1 : i32, i32, i32
  }
  func.func @transform_4(%arg0: i32, %arg1: i32) -> (i32, i32) {
    %c0_i32 = arith.constant 0 : i32
    %c0_i32_0 = arith.constant 0 : i32
    %c0_i32_1 = arith.constant 0 : i32
    return %c0_i32, %c0_i32_0 : i32, i32
  }
  func.func @transform_5(%arg0: i32, %arg1: i32) -> (i32, i32, i32, i32) {
    %c0_i32 = arith.constant 0 : i32
    %c0_i32_0 = arith.constant 0 : i32
    %c0_i32_1 = arith.constant 0 : i32
    return %arg0, %arg1, %c0_i32, %c0_i32_0 : i32, i32, i32, i32
  }
}

module attributes {stable_mosaic.version = 11 : i64} {
  func.func @_sq_err_sum_kernel(%arg0: i32, %arg1: memref<16x1024xbf16, #tpu.memory_space<vmem>>, %arg2: memref<16x1024xbf16, #tpu.memory_space<vmem>>, %arg3: memref<1x1xf32, #tpu.memory_space<vmem>>) attributes {dimension_semantics = [#tpu.dimension_semantics<arbitrary>], iteration_bounds = array<i64: 1>, scalar_prefetch = 0 : i64, scratch_operands = 0 : i64, tpu.core_type = #tpu.core_type<tc>, window_params = [{transform_indices = @transform_0, window_bounds = array<i64: 16, 1024>}, {transform_indices = @transform_1, window_bounds = array<i64: 16, 1024>}, {pipeline_mode = #tpu.pipeline_mode<synchronous>, transform_indices = @transform_2, window_bounds = array<i64: 1, 1>}]} {
    %c0_i32 = arith.constant 0 : i32
    %0 = arith.cmpi eq, %arg0, %c0_i32 : i32
    %1 = arith.extui %0 : i1 to i32
    %c0_i32_0 = arith.constant 0 : i32
    %2 = arith.cmpi ne, %1, %c0_i32_0 : i32
    scf.if %2 {
      %cst_8 = arith.constant 0.000000e+00 : f32
      %17 = vector.broadcast %cst_8 : f32 to vector<1x1xf32>
      %c0_9 = arith.constant 0 : index
      %c0_10 = arith.constant 0 : index
      %18 = vector.load %arg3[%c0_9, %c0_10] : memref<1x1xf32, #tpu.memory_space<vmem>>, vector<1x1xf32>
      tpu.vector_store %arg3[%c0_9, %c0_10], %17 {strides = array<i32>} : memref<1x1xf32, #tpu.memory_space<vmem>>, vector<1x1xf32>,
    } else {
    }
    %c0 = arith.constant 0 : index
    %c0_1 = arith.constant 0 : index
    %3 = vector.load %arg1[%c0, %c0_1] : memref<16x1024xbf16, #tpu.memory_space<vmem>>, vector<16x1024xbf16>
    %4 = arith.extf %3 : vector<16x1024xbf16> to vector<16x1024xf32>
    %c0_2 = arith.constant 0 : index
    %c0_3 = arith.constant 0 : index
    %5 = vector.load %arg2[%c0_2, %c0_3] : memref<16x1024xbf16, #tpu.memory_space<vmem>>, vector<16x1024xbf16>
    %6 = arith.extf %5 : vector<16x1024xbf16> to vector<16x1024xf32>
    %7 = arith.subf %4, %6 : vector<16x1024xf32>
    %c0_4 = arith.constant 0 : index
    %c0_5 = arith.constant 0 : index
    %8 = vector.load %arg3[%c0_4, %c0_5] : memref<1x1xf32, #tpu.memory_space<vmem>>, vector<1x1xf32>
    %9 = arith.mulf %7, %7 : vector<16x1024xf32>
    %10 = vector.shape_cast %9 : vector<16x1024xf32> to vector<1x16x1024xf32>
    %cst = arith.constant dense<0.000000e+00> : vector<1xf32>
    %11 = vector.multi_reduction <add>, %10, %cst [1, 2] : vector<1x16x1024xf32> to vector<1xf32>
    %12 = vector.shape_cast %11 : vector<1xf32> to vector<1x1x1xf32>
    %13 = vector.extract %12[0, 0, 0] : f32 from vector<1x1x1xf32>
    %14 = vector.broadcast %13 : f32 to vector<1x1xf32>
    %15 = arith.addf %8, %14 : vector<1x1xf32>
    %c0_6 = arith.constant 0 : index
    %c0_7 = arith.constant 0 : index
    %16 = vector.load %arg3[%c0_6, %c0_7] : memref<1x1xf32, #tpu.memory_space<vmem>>, vector<1x1xf32>
    tpu.vector_store %arg3[%c0_6, %c0_7], %15 {strides = array<i32>} : memref<1x1xf32, #tpu.memory_space<vmem>>, vector<1x1xf32>,
    return
  }
  func.func @transform_0(%arg0: i32) -> (i32, i32) {
    %c0_i32 = arith.constant 0 : i32
    %c0_i32_0 = arith.constant 0 : i32
    return %arg0, %c0_i32 : i32, i32
  }
  func.func @transform_1(%arg0: i32) -> (i32, i32) {
    %c0_i32 = arith.constant 0 : i32
    %c0_i32_0 = arith.constant 0 : i32
    return %arg0, %c0_i32 : i32, i32
  }
  func.func @transform_2(%arg0: i32) -> (i32, i32) {
    %c0_i32 = arith.constant 0 : i32
    %c0_i32_0 = arith.constant 0 : i32
    %c0_i32_1 = arith.constant 0 : i32
    return %c0_i32, %c0_i32_0 : i32, i32
  }
}

module attributes {stable_mosaic.version = 11 : i64} {
  func.func @_sq_err_sum_kernel(%arg0: i32, %arg1: memref<32x1024xbf16, #tpu.memory_space<vmem>>, %arg2: memref<32x1024xbf16, #tpu.memory_space<vmem>>, %arg3: memref<1x1xf32, #tpu.memory_space<vmem>>) attributes {dimension_semantics = [#tpu.dimension_semantics<arbitrary>], iteration_bounds = array<i64: 1>, scalar_prefetch = 0 : i64, scratch_operands = 0 : i64, tpu.core_type = #tpu.core_type<tc>, window_params = [{transform_indices = @transform_0, window_bounds = array<i64: 32, 1024>}, {transform_indices = @transform_1, window_bounds = array<i64: 32, 1024>}, {pipeline_mode = #tpu.pipeline_mode<synchronous>, transform_indices = @transform_2, window_bounds = array<i64: 1, 1>}]} {
    %c0_i32 = arith.constant 0 : i32
    %0 = arith.cmpi eq, %arg0, %c0_i32 : i32
    %1 = arith.extui %0 : i1 to i32
    %c0_i32_0 = arith.constant 0 : i32
    %2 = arith.cmpi ne, %1, %c0_i32_0 : i32
    scf.if %2 {
      %cst_8 = arith.constant 0.000000e+00 : f32
      %17 = vector.broadcast %cst_8 : f32 to vector<1x1xf32>
      %c0_9 = arith.constant 0 : index
      %c0_10 = arith.constant 0 : index
      %18 = vector.load %arg3[%c0_9, %c0_10] : memref<1x1xf32, #tpu.memory_space<vmem>>, vector<1x1xf32>
      tpu.vector_store %arg3[%c0_9, %c0_10], %17 {strides = array<i32>} : memref<1x1xf32, #tpu.memory_space<vmem>>, vector<1x1xf32>,
    } else {
    }
    %c0 = arith.constant 0 : index
    %c0_1 = arith.constant 0 : index
    %3 = vector.load %arg1[%c0, %c0_1] : memref<32x1024xbf16, #tpu.memory_space<vmem>>, vector<32x1024xbf16>
    %4 = arith.extf %3 : vector<32x1024xbf16> to vector<32x1024xf32>
    %c0_2 = arith.constant 0 : index
    %c0_3 = arith.constant 0 : index
    %5 = vector.load %arg2[%c0_2, %c0_3] : memref<32x1024xbf16, #tpu.memory_space<vmem>>, vector<32x1024xbf16>
    %6 = arith.extf %5 : vector<32x1024xbf16> to vector<32x1024xf32>
    %7 = arith.subf %4, %6 : vector<32x1024xf32>
    %c0_4 = arith.constant 0 : index
    %c0_5 = arith.constant 0 : index
    %8 = vector.load %arg3[%c0_4, %c0_5] : memref<1x1xf32, #tpu.memory_space<vmem>>, vector<1x1xf32>
    %9 = arith.mulf %7, %7 : vector<32x1024xf32>
    %10 = vector.shape_cast %9 : vector<32x1024xf32> to vector<1x32x1024xf32>
    %cst = arith.constant dense<0.000000e+00> : vector<1xf32>
    %11 = vector.multi_reduction <add>, %10, %cst [1, 2] : vector<1x32x1024xf32> to vector<1xf32>
    %12 = vector.shape_cast %11 : vector<1xf32> to vector<1x1x1xf32>
    %13 = vector.extract %12[0, 0, 0] : f32 from vector<1x1x1xf32>
    %14 = vector.broadcast %13 : f32 to vector<1x1xf32>
    %15 = arith.addf %8, %14 : vector<1x1xf32>
    %c0_6 = arith.constant 0 : index
    %c0_7 = arith.constant 0 : index
    %16 = vector.load %arg3[%c0_6, %c0_7] : memref<1x1xf32, #tpu.memory_space<vmem>>, vector<1x1xf32>
    tpu.vector_store %arg3[%c0_6, %c0_7], %15 {strides = array<i32>} : memref<1x1xf32, #tpu.memory_space<vmem>>, vector<1x1xf32>,
    return
  }
  func.func @transform_0(%arg0: i32) -> (i32, i32) {
    %c0_i32 = arith.constant 0 : i32
    %c0_i32_0 = arith.constant 0 : i32
    return %arg0, %c0_i32 : i32, i32
  }
  func.func @transform_1(%arg0: i32) -> (i32, i32) {
    %c0_i32 = arith.constant 0 : i32
    %c0_i32_0 = arith.constant 0 : i32
    return %arg0, %c0_i32 : i32, i32
  }
  func.func @transform_2(%arg0: i32) -> (i32, i32) {
    %c0_i32 = arith.constant 0 : i32
    %c0_i32_0 = arith.constant 0 : i32
    %c0_i32_1 = arith.constant 0 : i32
    return %c0_i32, %c0_i32_0 : i32, i32
  }
}

module attributes {stable_mosaic.version = 11 : i64} {
  func.func @kernel(%arg0: i32, %arg1: i32, %arg2: memref<1x4x6x128xbf16, #tpu.memory_space<vmem>>, %arg3: memref<1x1x6x128xbf16, #tpu.memory_space<vmem>>, %arg4: memref<1x1x6x128xbf16, #tpu.memory_space<vmem>>, %arg5: memref<3x384x256xbf16, #tpu.memory_space<vmem>>, %arg6: memref<1x256xf32, #tpu.memory_space<vmem>>, %arg7: memref<1x4x4x256xbf16, #tpu.memory_space<vmem>>) attributes {dimension_semantics = [#tpu.dimension_semantics<parallel>, #tpu.dimension_semantics<parallel>], iteration_bounds = array<i64: 4, 1>, scalar_prefetch = 0 : i64, scratch_operands = 0 : i64, tpu.core_type = #tpu.core_type<tc>, window_params = [{transform_indices = @transform_0, window_bounds = array<i64: 1, 4, 6, 128>}, {transform_indices = @transform_1, window_bounds = array<i64: 1, 1, 6, 128>}, {transform_indices = @transform_2, window_bounds = array<i64: 1, 1, 6, 128>}, {pipeline_mode = #tpu.pipeline_mode<synchronous>, transform_indices = @transform_3, window_bounds = array<i64: 3, 384, 256>}, {pipeline_mode = #tpu.pipeline_mode<synchronous>, transform_indices = @transform_4, window_bounds = array<i64: 1, 256>}, {transform_indices = @transform_5, window_bounds = array<i64: 1, 4, 4, 256>}]} {
    %c0 = arith.constant 0 : index
    %c0_0 = arith.constant 0 : index
    %c0_1 = arith.constant 0 : index
    %c0_2 = arith.constant 0 : index
    %0 = vector.load %arg2[%c0, %c0_0, %c0_1, %c0_2] : memref<1x4x6x128xbf16, #tpu.memory_space<vmem>>, vector<1x4x6x128xbf16>
    %1 = vector.shape_cast %0 : vector<1x4x6x128xbf16> to vector<4x6x128xbf16>
    %c0_3 = arith.constant 0 : index
    %c0_4 = arith.constant 0 : index
    %c0_5 = arith.constant 0 : index
    %c0_6 = arith.constant 0 : index
    %2 = vector.load %arg3[%c0_3, %c0_4, %c0_5, %c0_6] : memref<1x1x6x128xbf16, #tpu.memory_space<vmem>>, vector<1x1x6x128xbf16>
    %3 = vector.shape_cast %2 : vector<1x1x6x128xbf16> to vector<1x6x128xbf16>
    %c0_7 = arith.constant 0 : index
    %c0_8 = arith.constant 0 : index
    %c0_9 = arith.constant 0 : index
    %c0_10 = arith.constant 0 : index
    %4 = vector.load %arg4[%c0_7, %c0_8, %c0_9, %c0_10] : memref<1x1x6x128xbf16, #tpu.memory_space<vmem>>, vector<1x1x6x128xbf16>
    %5 = vector.shape_cast %4 : vector<1x1x6x128xbf16> to vector<1x6x128xbf16>
    %6 = tpu.concatenate %1, %3, %5 in 0 : vector<4x6x128xbf16>, vector<1x6x128xbf16>, vector<1x6x128xbf16> -> vector<6x6x128xbf16>
    %7 = vector.extract_strided_slice %6 {offsets = [0, 0, 0], sizes = [4, 6, 128], strides = [1, 1, 1]} : vector<6x6x128xbf16> to vector<4x6x128xbf16>
    %8 = vector.extract_strided_slice %7 {offsets = [0, 0, 0], sizes = [4, 4, 128], strides = [1, 1, 1]} : vector<4x6x128xbf16> to vector<4x4x128xbf16>
    %9 = vector.extract_strided_slice %7 {offsets = [0, 1, 0], sizes = [4, 4, 128], strides = [1, 1, 1]} : vector<4x6x128xbf16> to vector<4x4x128xbf16>
    %10 = vector.extract_strided_slice %7 {offsets = [0, 2, 0], sizes = [4, 4, 128], strides = [1, 1, 1]} : vector<4x6x128xbf16> to vector<4x4x128xbf16>
    %11 = tpu.concatenate %8, %9, %10 in 2 : vector<4x4x128xbf16>, vector<4x4x128xbf16>, vector<4x4x128xbf16> -> vector<4x4x384xbf16>
    %12 = vector.shape_cast %11 : vector<4x4x384xbf16> to vector<16x384xbf16>
    %c0_11 = arith.constant 0 : index
    %c0_12 = arith.constant 0 : index
    %c0_13 = arith.constant 0 : index
    %13 = vector.load %arg5[%c0_11, %c0_12, %c0_13] : memref<3x384x256xbf16, #tpu.memory_space<vmem>>, vector<1x384x256xbf16>
    %14 = vector.shape_cast %13 : vector<1x384x256xbf16> to vector<384x256xbf16>
    %cst = arith.constant dense<0.000000e+00> : vector<16x256xf32>
    %15 = tpu.matmul %12, %14, %cst {dimension_numbers = #tpu.dot_dimension_numbers<[1], [0], [0], [1], [0, 0, 1, 1], [], []>} : vector<16x384xbf16>, vector<384x256xbf16>, vector<16x256xf32> -> vector<16x256xf32>
    %16 = vector.extract_strided_slice %6 {offsets = [1, 0, 0], sizes = [4, 6, 128], strides = [1, 1, 1]} : vector<6x6x128xbf16> to vector<4x6x128xbf16>
    %17 = vector.extract_strided_slice %16 {offsets = [0, 0, 0], sizes = [4, 4, 128], strides = [1, 1, 1]} : vector<4x6x128xbf16> to vector<4x4x128xbf16>
    %18 = vector.extract_strided_slice %16 {offsets = [0, 1, 0], sizes = [4, 4, 128], strides = [1, 1, 1]} : vector<4x6x128xbf16> to vector<4x4x128xbf16>
    %19 = vector.extract_strided_slice %16 {offsets = [0, 2, 0], sizes = [4, 4, 128], strides = [1, 1, 1]} : vector<4x6x128xbf16> to vector<4x4x128xbf16>
    %20 = tpu.concatenate %17, %18, %19 in 2 : vector<4x4x128xbf16>, vector<4x4x128xbf16>, vector<4x4x128xbf16> -> vector<4x4x384xbf16>
    %21 = vector.shape_cast %20 : vector<4x4x384xbf16> to vector<16x384xbf16>
    %c1 = arith.constant 1 : index
    %c0_14 = arith.constant 0 : index
    %c0_15 = arith.constant 0 : index
    %22 = vector.load %arg5[%c1, %c0_14, %c0_15] : memref<3x384x256xbf16, #tpu.memory_space<vmem>>, vector<1x384x256xbf16>
    %23 = vector.shape_cast %22 : vector<1x384x256xbf16> to vector<384x256xbf16>
    %cst_16 = arith.constant dense<0.000000e+00> : vector<16x256xf32>
    %24 = tpu.matmul %21, %23, %cst_16 {dimension_numbers = #tpu.dot_dimension_numbers<[1], [0], [0], [1], [0, 0, 1, 1], [], []>} : vector<16x384xbf16>, vector<384x256xbf16>, vector<16x256xf32> -> vector<16x256xf32>
    %25 = arith.addf %15, %24 : vector<16x256xf32>
    %26 = vector.extract_strided_slice %6 {offsets = [2, 0, 0], sizes = [4, 6, 128], strides = [1, 1, 1]} : vector<6x6x128xbf16> to vector<4x6x128xbf16>
    %27 = vector.extract_strided_slice %26 {offsets = [0, 0, 0], sizes = [4, 4, 128], strides = [1, 1, 1]} : vector<4x6x128xbf16> to vector<4x4x128xbf16>
    %28 = vector.extract_strided_slice %26 {offsets = [0, 1, 0], sizes = [4, 4, 128], strides = [1, 1, 1]} : vector<4x6x128xbf16> to vector<4x4x128xbf16>
    %29 = vector.extract_strided_slice %26 {offsets = [0, 2, 0], sizes = [4, 4, 128], strides = [1, 1, 1]} : vector<4x6x128xbf16> to vector<4x4x128xbf16>
    %30 = tpu.concatenate %27, %28, %29 in 2 : vector<4x4x128xbf16>, vector<4x4x128xbf16>, vector<4x4x128xbf16> -> vector<4x4x384xbf16>
    %31 = vector.shape_cast %30 : vector<4x4x384xbf16> to vector<16x384xbf16>
    %c2 = arith.constant 2 : index
    %c0_17 = arith.constant 0 : index
    %c0_18 = arith.constant 0 : index
    %32 = vector.load %arg5[%c2, %c0_17, %c0_18] : memref<3x384x256xbf16, #tpu.memory_space<vmem>>, vector<1x384x256xbf16>
    %33 = vector.shape_cast %32 : vector<1x384x256xbf16> to vector<384x256xbf16>
    %cst_19 = arith.constant dense<0.000000e+00> : vector<16x256xf32>
    %34 = tpu.matmul %31, %33, %cst_19 {dimension_numbers = #tpu.dot_dimension_numbers<[1], [0], [0], [1], [0, 0, 1, 1], [], []>} : vector<16x384xbf16>, vector<384x256xbf16>, vector<16x256xf32> -> vector<16x256xf32>
    %35 = arith.addf %25, %34 : vector<16x256xf32>
    %c0_20 = arith.constant 0 : index
    %c0_21 = arith.constant 0 : index
    %36 = vector.load %arg6[%c0_20, %c0_21] : memref<1x256xf32, #tpu.memory_space<vmem>>, vector<1x256xf32>
    %37 = vector.broadcast %36 : vector<1x256xf32> to vector<16x256xf32>
    %38 = arith.addf %35, %37 : vector<16x256xf32>
    %cst_22 = arith.constant 0.000000e+00 : f32
    %39 = vector.broadcast %cst_22 : f32 to vector<16x256xf32>
    %40 = arith.maximumf %38, %39 : vector<16x256xf32>
    %41 = arith.truncf %40 : vector<16x256xf32> to vector<16x256xbf16>
    %42 = vector.shape_cast %41 : vector<16x256xbf16> to vector<1x4x4x256xbf16>
    %c0_23 = arith.constant 0 : index
    %c0_24 = arith.constant 0 : index
    %c0_25 = arith.constant 0 : index
    %c0_26 = arith.constant 0 : index
    %43 = vector.load %arg7[%c0_23, %c0_24, %c0_25, %c0_26] : memref<1x4x4x256xbf16, #tpu.memory_space<vmem>>, vector<1x4x4x256xbf16>
    tpu.vector_store %arg7[%c0_23, %c0_24, %c0_25, %c0_26], %42 {strides = array<i32>} : memref<1x4x4x256xbf16, #tpu.memory_space<vmem>>, vector<1x4x4x256xbf16>,
    return
  }
  func.func @transform_0(%arg0: i32, %arg1: i32) -> (i32, i32, i32, i32) {
    %c0_i32 = arith.constant 0 : i32
    %c0_i32_0 = arith.constant 0 : i32
    %c0_i32_1 = arith.constant 0 : i32
    return %arg0, %arg1, %c0_i32, %c0_i32_0 : i32, i32, i32, i32
  }
  func.func @transform_1(%arg0: i32, %arg1: i32) -> (i32, i32, i32, i32) {
    %c4_i32 = arith.constant 4 : i32
    %0 = arith.muli %arg1, %c4_i32 : i32
    %c4_i32_0 = arith.constant 4 : i32
    %1 = arith.addi %0, %c4_i32_0 : i32
    %c0_i32 = arith.constant 0 : i32
    %c0_i32_1 = arith.constant 0 : i32
    %c0_i32_2 = arith.constant 0 : i32
    return %arg0, %1, %c0_i32, %c0_i32_1 : i32, i32, i32, i32
  }
  func.func @transform_2(%arg0: i32, %arg1: i32) -> (i32, i32, i32, i32) {
    %c4_i32 = arith.constant 4 : i32
    %0 = arith.muli %arg1, %c4_i32 : i32
    %c4_i32_0 = arith.constant 4 : i32
    %1 = arith.addi %0, %c4_i32_0 : i32
    %c1_i32 = arith.constant 1 : i32
    %2 = arith.addi %1, %c1_i32 : i32
    %c0_i32 = arith.constant 0 : i32
    %c0_i32_1 = arith.constant 0 : i32
    %c0_i32_2 = arith.constant 0 : i32
    return %arg0, %2, %c0_i32, %c0_i32_1 : i32, i32, i32, i32
  }
  func.func @transform_3(%arg0: i32, %arg1: i32) -> (i32, i32, i32) {
    %c0_i32 = arith.constant 0 : i32
    %c0_i32_0 = arith.constant 0 : i32
    %c0_i32_1 = arith.constant 0 : i32
    %c0_i32_2 = arith.constant 0 : i32
    return %c0_i32, %c0_i32_0, %c0_i32_1 : i32, i32, i32
  }
  func.func @transform_4(%arg0: i32, %arg1: i32) -> (i32, i32) {
    %c0_i32 = arith.constant 0 : i32
    %c0_i32_0 = arith.constant 0 : i32
    %c0_i32_1 = arith.constant 0 : i32
    return %c0_i32, %c0_i32_0 : i32, i32
  }
  func.func @transform_5(%arg0: i32, %arg1: i32) -> (i32, i32, i32, i32) {
    %c0_i32 = arith.constant 0 : i32
    %c0_i32_0 = arith.constant 0 : i32
    %c0_i32_1 = arith.constant 0 : i32
    return %arg0, %arg1, %c0_i32, %c0_i32_0 : i32, i32, i32, i32
  }
}

module attributes {stable_mosaic.version = 11 : i64} {
  func.func @kernel(%arg0: i32, %arg1: i32, %arg2: memref<1x4x6x256xbf16, #tpu.memory_space<vmem>>, %arg3: memref<1x1x6x256xbf16, #tpu.memory_space<vmem>>, %arg4: memref<1x1x6x256xbf16, #tpu.memory_space<vmem>>, %arg5: memref<3x768x256xbf16, #tpu.memory_space<vmem>>, %arg6: memref<1x256xf32, #tpu.memory_space<vmem>>, %arg7: memref<1x4x4x256xbf16, #tpu.memory_space<vmem>>) attributes {dimension_semantics = [#tpu.dimension_semantics<parallel>, #tpu.dimension_semantics<parallel>], iteration_bounds = array<i64: 4, 1>, scalar_prefetch = 0 : i64, scratch_operands = 0 : i64, tpu.core_type = #tpu.core_type<tc>, window_params = [{transform_indices = @transform_0, window_bounds = array<i64: 1, 4, 6, 256>}, {transform_indices = @transform_1, window_bounds = array<i64: 1, 1, 6, 256>}, {transform_indices = @transform_2, window_bounds = array<i64: 1, 1, 6, 256>}, {pipeline_mode = #tpu.pipeline_mode<synchronous>, transform_indices = @transform_3, window_bounds = array<i64: 3, 768, 256>}, {pipeline_mode = #tpu.pipeline_mode<synchronous>, transform_indices = @transform_4, window_bounds = array<i64: 1, 256>}, {transform_indices = @transform_5, window_bounds = array<i64: 1, 4, 4, 256>}]} {
    %c0 = arith.constant 0 : index
    %c0_0 = arith.constant 0 : index
    %c0_1 = arith.constant 0 : index
    %c0_2 = arith.constant 0 : index
    %0 = vector.load %arg2[%c0, %c0_0, %c0_1, %c0_2] : memref<1x4x6x256xbf16, #tpu.memory_space<vmem>>, vector<1x4x6x256xbf16>
    %1 = vector.shape_cast %0 : vector<1x4x6x256xbf16> to vector<4x6x256xbf16>
    %c0_3 = arith.constant 0 : index
    %c0_4 = arith.constant 0 : index
    %c0_5 = arith.constant 0 : index
    %c0_6 = arith.constant 0 : index
    %2 = vector.load %arg3[%c0_3, %c0_4, %c0_5, %c0_6] : memref<1x1x6x256xbf16, #tpu.memory_space<vmem>>, vector<1x1x6x256xbf16>
    %3 = vector.shape_cast %2 : vector<1x1x6x256xbf16> to vector<1x6x256xbf16>
    %c0_7 = arith.constant 0 : index
    %c0_8 = arith.constant 0 : index
    %c0_9 = arith.constant 0 : index
    %c0_10 = arith.constant 0 : index
    %4 = vector.load %arg4[%c0_7, %c0_8, %c0_9, %c0_10] : memref<1x1x6x256xbf16, #tpu.memory_space<vmem>>, vector<1x1x6x256xbf16>
    %5 = vector.shape_cast %4 : vector<1x1x6x256xbf16> to vector<1x6x256xbf16>
    %6 = tpu.concatenate %1, %3, %5 in 0 : vector<4x6x256xbf16>, vector<1x6x256xbf16>, vector<1x6x256xbf16> -> vector<6x6x256xbf16>
    %7 = vector.extract_strided_slice %6 {offsets = [0, 0, 0], sizes = [4, 6, 256], strides = [1, 1, 1]} : vector<6x6x256xbf16> to vector<4x6x256xbf16>
    %8 = vector.extract_strided_slice %7 {offsets = [0, 0, 0], sizes = [4, 4, 256], strides = [1, 1, 1]} : vector<4x6x256xbf16> to vector<4x4x256xbf16>
    %9 = vector.extract_strided_slice %7 {offsets = [0, 1, 0], sizes = [4, 4, 256], strides = [1, 1, 1]} : vector<4x6x256xbf16> to vector<4x4x256xbf16>
    %10 = vector.extract_strided_slice %7 {offsets = [0, 2, 0], sizes = [4, 4, 256], strides = [1, 1, 1]} : vector<4x6x256xbf16> to vector<4x4x256xbf16>
    %11 = tpu.concatenate %8, %9, %10 in 2 : vector<4x4x256xbf16>, vector<4x4x256xbf16>, vector<4x4x256xbf16> -> vector<4x4x768xbf16>
    %12 = vector.shape_cast %11 : vector<4x4x768xbf16> to vector<16x768xbf16>
    %c0_11 = arith.constant 0 : index
    %c0_12 = arith.constant 0 : index
    %c0_13 = arith.constant 0 : index
    %13 = vector.load %arg5[%c0_11, %c0_12, %c0_13] : memref<3x768x256xbf16, #tpu.memory_space<vmem>>, vector<1x768x256xbf16>
    %14 = vector.shape_cast %13 : vector<1x768x256xbf16> to vector<768x256xbf16>
    %cst = arith.constant dense<0.000000e+00> : vector<16x256xf32>
    %15 = tpu.matmul %12, %14, %cst {dimension_numbers = #tpu.dot_dimension_numbers<[1], [0], [0], [1], [0, 0, 1, 1], [], []>} : vector<16x768xbf16>, vector<768x256xbf16>, vector<16x256xf32> -> vector<16x256xf32>
    %16 = vector.extract_strided_slice %6 {offsets = [1, 0, 0], sizes = [4, 6, 256], strides = [1, 1, 1]} : vector<6x6x256xbf16> to vector<4x6x256xbf16>
    %17 = vector.extract_strided_slice %16 {offsets = [0, 0, 0], sizes = [4, 4, 256], strides = [1, 1, 1]} : vector<4x6x256xbf16> to vector<4x4x256xbf16>
    %18 = vector.extract_strided_slice %16 {offsets = [0, 1, 0], sizes = [4, 4, 256], strides = [1, 1, 1]} : vector<4x6x256xbf16> to vector<4x4x256xbf16>
    %19 = vector.extract_strided_slice %16 {offsets = [0, 2, 0], sizes = [4, 4, 256], strides = [1, 1, 1]} : vector<4x6x256xbf16> to vector<4x4x256xbf16>
    %20 = tpu.concatenate %17, %18, %19 in 2 : vector<4x4x256xbf16>, vector<4x4x256xbf16>, vector<4x4x256xbf16> -> vector<4x4x768xbf16>
    %21 = vector.shape_cast %20 : vector<4x4x768xbf16> to vector<16x768xbf16>
    %c1 = arith.constant 1 : index
    %c0_14 = arith.constant 0 : index
    %c0_15 = arith.constant 0 : index
    %22 = vector.load %arg5[%c1, %c0_14, %c0_15] : memref<3x768x256xbf16, #tpu.memory_space<vmem>>, vector<1x768x256xbf16>
    %23 = vector.shape_cast %22 : vector<1x768x256xbf16> to vector<768x256xbf16>
    %cst_16 = arith.constant dense<0.000000e+00> : vector<16x256xf32>
    %24 = tpu.matmul %21, %23, %cst_16 {dimension_numbers = #tpu.dot_dimension_numbers<[1], [0], [0], [1], [0, 0, 1, 1], [], []>} : vector<16x768xbf16>, vector<768x256xbf16>, vector<16x256xf32> -> vector<16x256xf32>
    %25 = arith.addf %15, %24 : vector<16x256xf32>
    %26 = vector.extract_strided_slice %6 {offsets = [2, 0, 0], sizes = [4, 6, 256], strides = [1, 1, 1]} : vector<6x6x256xbf16> to vector<4x6x256xbf16>
    %27 = vector.extract_strided_slice %26 {offsets = [0, 0, 0], sizes = [4, 4, 256], strides = [1, 1, 1]} : vector<4x6x256xbf16> to vector<4x4x256xbf16>
    %28 = vector.extract_strided_slice %26 {offsets = [0, 1, 0], sizes = [4, 4, 256], strides = [1, 1, 1]} : vector<4x6x256xbf16> to vector<4x4x256xbf16>
    %29 = vector.extract_strided_slice %26 {offsets = [0, 2, 0], sizes = [4, 4, 256], strides = [1, 1, 1]} : vector<4x6x256xbf16> to vector<4x4x256xbf16>
    %30 = tpu.concatenate %27, %28, %29 in 2 : vector<4x4x256xbf16>, vector<4x4x256xbf16>, vector<4x4x256xbf16> -> vector<4x4x768xbf16>
    %31 = vector.shape_cast %30 : vector<4x4x768xbf16> to vector<16x768xbf16>
    %c2 = arith.constant 2 : index
    %c0_17 = arith.constant 0 : index
    %c0_18 = arith.constant 0 : index
    %32 = vector.load %arg5[%c2, %c0_17, %c0_18] : memref<3x768x256xbf16, #tpu.memory_space<vmem>>, vector<1x768x256xbf16>
    %33 = vector.shape_cast %32 : vector<1x768x256xbf16> to vector<768x256xbf16>
    %cst_19 = arith.constant dense<0.000000e+00> : vector<16x256xf32>
    %34 = tpu.matmul %31, %33, %cst_19 {dimension_numbers = #tpu.dot_dimension_numbers<[1], [0], [0], [1], [0, 0, 1, 1], [], []>} : vector<16x768xbf16>, vector<768x256xbf16>, vector<16x256xf32> -> vector<16x256xf32>
    %35 = arith.addf %25, %34 : vector<16x256xf32>
    %c0_20 = arith.constant 0 : index
    %c0_21 = arith.constant 0 : index
    %36 = vector.load %arg6[%c0_20, %c0_21] : memref<1x256xf32, #tpu.memory_space<vmem>>, vector<1x256xf32>
    %37 = vector.broadcast %36 : vector<1x256xf32> to vector<16x256xf32>
    %38 = arith.addf %35, %37 : vector<16x256xf32>
    %cst_22 = arith.constant 0.000000e+00 : f32
    %39 = vector.broadcast %cst_22 : f32 to vector<16x256xf32>
    %40 = arith.maximumf %38, %39 : vector<16x256xf32>
    %41 = arith.truncf %40 : vector<16x256xf32> to vector<16x256xbf16>
    %42 = vector.shape_cast %41 : vector<16x256xbf16> to vector<1x4x4x256xbf16>
    %c0_23 = arith.constant 0 : index
    %c0_24 = arith.constant 0 : index
    %c0_25 = arith.constant 0 : index
    %c0_26 = arith.constant 0 : index
    %43 = vector.load %arg7[%c0_23, %c0_24, %c0_25, %c0_26] : memref<1x4x4x256xbf16, #tpu.memory_space<vmem>>, vector<1x4x4x256xbf16>
    tpu.vector_store %arg7[%c0_23, %c0_24, %c0_25, %c0_26], %42 {strides = array<i32>} : memref<1x4x4x256xbf16, #tpu.memory_space<vmem>>, vector<1x4x4x256xbf16>,
    return
  }
  func.func @transform_0(%arg0: i32, %arg1: i32) -> (i32, i32, i32, i32) {
    %c0_i32 = arith.constant 0 : i32
    %c0_i32_0 = arith.constant 0 : i32
    %c0_i32_1 = arith.constant 0 : i32
    return %arg0, %arg1, %c0_i32, %c0_i32_0 : i32, i32, i32, i32
  }
  func.func @transform_1(%arg0: i32, %arg1: i32) -> (i32, i32, i32, i32) {
    %c4_i32 = arith.constant 4 : i32
    %0 = arith.muli %arg1, %c4_i32 : i32
    %c4_i32_0 = arith.constant 4 : i32
    %1 = arith.addi %0, %c4_i32_0 : i32
    %c0_i32 = arith.constant 0 : i32
    %c0_i32_1 = arith.constant 0 : i32
    %c0_i32_2 = arith.constant 0 : i32
    return %arg0, %1, %c0_i32, %c0_i32_1 : i32, i32, i32, i32
  }
  func.func @transform_2(%arg0: i32, %arg1: i32) -> (i32, i32, i32, i32) {
    %c4_i32 = arith.constant 4 : i32
    %0 = arith.muli %arg1, %c4_i32 : i32
    %c4_i32_0 = arith.constant 4 : i32
    %1 = arith.addi %0, %c4_i32_0 : i32
    %c1_i32 = arith.constant 1 : i32
    %2 = arith.addi %1, %c1_i32 : i32
    %c0_i32 = arith.constant 0 : i32
    %c0_i32_1 = arith.constant 0 : i32
    %c0_i32_2 = arith.constant 0 : i32
    return %arg0, %2, %c0_i32, %c0_i32_1 : i32, i32, i32, i32
  }
  func.func @transform_3(%arg0: i32, %arg1: i32) -> (i32, i32, i32) {
    %c0_i32 = arith.constant 0 : i32
    %c0_i32_0 = arith.constant 0 : i32
    %c0_i32_1 = arith.constant 0 : i32
    %c0_i32_2 = arith.constant 0 : i32
    return %c0_i32, %c0_i32_0, %c0_i32_1 : i32, i32, i32
  }
  func.func @transform_4(%arg0: i32, %arg1: i32) -> (i32, i32) {
    %c0_i32 = arith.constant 0 : i32
    %c0_i32_0 = arith.constant 0 : i32
    %c0_i32_1 = arith.constant 0 : i32
    return %c0_i32, %c0_i32_0 : i32, i32
  }
  func.func @transform_5(%arg0: i32, %arg1: i32) -> (i32, i32, i32, i32) {
    %c0_i32 = arith.constant 0 : i32
    %c0_i32_0 = arith.constant 0 : i32
    %c0_i32_1 = arith.constant 0 : i32
    return %arg0, %arg1, %c0_i32, %c0_i32_0 : i32, i32, i32, i32
  }
}

module attributes {stable_mosaic.version = 11 : i64} {
  func.func @_sq_err_sum_kernel(%arg0: i32, %arg1: memref<8x1024xbf16, #tpu.memory_space<vmem>>, %arg2: memref<8x1024xbf16, #tpu.memory_space<vmem>>, %arg3: memref<1x1xf32, #tpu.memory_space<vmem>>) attributes {dimension_semantics = [#tpu.dimension_semantics<arbitrary>], iteration_bounds = array<i64: 1>, scalar_prefetch = 0 : i64, scratch_operands = 0 : i64, tpu.core_type = #tpu.core_type<tc>, window_params = [{transform_indices = @transform_0, window_bounds = array<i64: 8, 1024>}, {transform_indices = @transform_1, window_bounds = array<i64: 8, 1024>}, {pipeline_mode = #tpu.pipeline_mode<synchronous>, transform_indices = @transform_2, window_bounds = array<i64: 1, 1>}]} {
    %c0_i32 = arith.constant 0 : i32
    %0 = arith.cmpi eq, %arg0, %c0_i32 : i32
    %1 = arith.extui %0 : i1 to i32
    %c0_i32_0 = arith.constant 0 : i32
    %2 = arith.cmpi ne, %1, %c0_i32_0 : i32
    scf.if %2 {
      %cst_8 = arith.constant 0.000000e+00 : f32
      %17 = vector.broadcast %cst_8 : f32 to vector<1x1xf32>
      %c0_9 = arith.constant 0 : index
      %c0_10 = arith.constant 0 : index
      %18 = vector.load %arg3[%c0_9, %c0_10] : memref<1x1xf32, #tpu.memory_space<vmem>>, vector<1x1xf32>
      tpu.vector_store %arg3[%c0_9, %c0_10], %17 {strides = array<i32>} : memref<1x1xf32, #tpu.memory_space<vmem>>, vector<1x1xf32>,
    } else {
    }
    %c0 = arith.constant 0 : index
    %c0_1 = arith.constant 0 : index
    %3 = vector.load %arg1[%c0, %c0_1] : memref<8x1024xbf16, #tpu.memory_space<vmem>>, vector<8x1024xbf16>
    %4 = arith.extf %3 : vector<8x1024xbf16> to vector<8x1024xf32>
    %c0_2 = arith.constant 0 : index
    %c0_3 = arith.constant 0 : index
    %5 = vector.load %arg2[%c0_2, %c0_3] : memref<8x1024xbf16, #tpu.memory_space<vmem>>, vector<8x1024xbf16>
    %6 = arith.extf %5 : vector<8x1024xbf16> to vector<8x1024xf32>
    %7 = arith.subf %4, %6 : vector<8x1024xf32>
    %c0_4 = arith.constant 0 : index
    %c0_5 = arith.constant 0 : index
    %8 = vector.load %arg3[%c0_4, %c0_5] : memref<1x1xf32, #tpu.memory_space<vmem>>, vector<1x1xf32>
    %9 = arith.mulf %7, %7 : vector<8x1024xf32>
    %10 = vector.shape_cast %9 : vector<8x1024xf32> to vector<1x8x1024xf32>
    %cst = arith.constant dense<0.000000e+00> : vector<1xf32>
    %11 = vector.multi_reduction <add>, %10, %cst [1, 2] : vector<1x8x1024xf32> to vector<1xf32>
    %12 = vector.shape_cast %11 : vector<1xf32> to vector<1x1x1xf32>
    %13 = vector.extract %12[0, 0, 0] : f32 from vector<1x1x1xf32>
    %14 = vector.broadcast %13 : f32 to vector<1x1xf32>
    %15 = arith.addf %8, %14 : vector<1x1xf32>
    %c0_6 = arith.constant 0 : index
    %c0_7 = arith.constant 0 : index
    %16 = vector.load %arg3[%c0_6, %c0_7] : memref<1x1xf32, #tpu.memory_space<vmem>>, vector<1x1xf32>
    tpu.vector_store %arg3[%c0_6, %c0_7], %15 {strides = array<i32>} : memref<1x1xf32, #tpu.memory_space<vmem>>, vector<1x1xf32>,
    return
  }
  func.func @transform_0(%arg0: i32) -> (i32, i32) {
    %c0_i32 = arith.constant 0 : i32
    %c0_i32_0 = arith.constant 0 : i32
    return %arg0, %c0_i32 : i32, i32
  }
  func.func @transform_1(%arg0: i32) -> (i32, i32) {
    %c0_i32 = arith.constant 0 : i32
    %c0_i32_0 = arith.constant 0 : i32
    return %arg0, %c0_i32 : i32, i32
  }
  func.func @transform_2(%arg0: i32) -> (i32, i32) {
    %c0_i32 = arith.constant 0 : i32
    %c0_i32_0 = arith.constant 0 : i32
    %c0_i32_1 = arith.constant 0 : i32
    return %c0_i32, %c0_i32_0 : i32, i32
  }
}

module attributes {stable_mosaic.version = 11 : i64} {
  func.func @_smooth_l1_sum_kernel(%arg0: i32, %arg1: memref<8x1024xf32, #tpu.memory_space<vmem>>, %arg2: memref<8x1024xf32, #tpu.memory_space<vmem>>, %arg3: memref<1x1xf32, #tpu.memory_space<vmem>>) attributes {dimension_semantics = [#tpu.dimension_semantics<arbitrary>], iteration_bounds = array<i64: 1>, scalar_prefetch = 0 : i64, scratch_operands = 0 : i64, tpu.core_type = #tpu.core_type<tc>, window_params = [{transform_indices = @transform_0, window_bounds = array<i64: 8, 1024>}, {transform_indices = @transform_1, window_bounds = array<i64: 8, 1024>}, {pipeline_mode = #tpu.pipeline_mode<synchronous>, transform_indices = @transform_2, window_bounds = array<i64: 1, 1>}]} {
    %c0_i32 = arith.constant 0 : i32
    %0 = arith.cmpi eq, %arg0, %c0_i32 : i32
    %1 = arith.extui %0 : i1 to i32
    %c0_i32_0 = arith.constant 0 : i32
    %2 = arith.cmpi ne, %1, %c0_i32_0 : i32
    scf.if %2 {
      %cst_11 = arith.constant 0.000000e+00 : f32
      %23 = vector.broadcast %cst_11 : f32 to vector<1x1xf32>
      %c0_12 = arith.constant 0 : index
      %c0_13 = arith.constant 0 : index
      %24 = vector.load %arg3[%c0_12, %c0_13] : memref<1x1xf32, #tpu.memory_space<vmem>>, vector<1x1xf32>
      tpu.vector_store %arg3[%c0_12, %c0_13], %23 {strides = array<i32>} : memref<1x1xf32, #tpu.memory_space<vmem>>, vector<1x1xf32>,
    } else {
    }
    %c0 = arith.constant 0 : index
    %c0_1 = arith.constant 0 : index
    %3 = vector.load %arg1[%c0, %c0_1] : memref<8x1024xf32, #tpu.memory_space<vmem>>, vector<8x1024xf32>
    %c0_2 = arith.constant 0 : index
    %c0_3 = arith.constant 0 : index
    %4 = vector.load %arg2[%c0_2, %c0_3] : memref<8x1024xf32, #tpu.memory_space<vmem>>, vector<8x1024xf32>
    %5 = arith.subf %3, %4 : vector<8x1024xf32>
    %6 = math.absf %5 : vector<8x1024xf32>
    %cst = arith.constant 1.000000e+00 : f32
    %7 = vector.broadcast %cst : f32 to vector<8x1024xf32>
    %8 = arith.cmpf olt, %6, %7 : vector<8x1024xf32>
    %cst_4 = arith.constant 5.000000e-01 : f32
    %9 = vector.broadcast %cst_4 : f32 to vector<8x1024xf32>
    %10 = arith.mulf %9, %5 : vector<8x1024xf32>
    %11 = arith.mulf %10, %5 : vector<8x1024xf32>
    %cst_5 = arith.constant 5.000000e-01 : f32
    %12 = vector.broadcast %cst_5 : f32 to vector<8x1024xf32>
    %13 = arith.subf %6, %12 : vector<8x1024xf32>
    %14 = arith.select %8, %11, %13 : vector<8x1024xi1>, vector<8x1024xf32>
    %c0_6 = arith.constant 0 : index
    %c0_7 = arith.constant 0 : index
    %15 = vector.load %arg3[%c0_6, %c0_7] : memref<1x1xf32, #tpu.memory_space<vmem>>, vector<1x1xf32>
    %16 = vector.shape_cast %14 : vector<8x1024xf32> to vector<1x8x1024xf32>
    %cst_8 = arith.constant dense<0.000000e+00> : vector<1xf32>
    %17 = vector.multi_reduction <add>, %16, %cst_8 [1, 2] : vector<1x8x1024xf32> to vector<1xf32>
    %18 = vector.shape_cast %17 : vector<1xf32> to vector<1x1x1xf32>
    %19 = vector.extract %18[0, 0, 0] : f32 from vector<1x1x1xf32>
    %20 = vector.broadcast %19 : f32 to vector<1x1xf32>
    %21 = arith.addf %15, %20 : vector<1x1xf32>
    %c0_9 = arith.constant 0 : index
    %c0_10 = arith.constant 0 : index
    %22 = vector.load %arg3[%c0_9, %c0_10] : memref<1x1xf32, #tpu.memory_space<vmem>>, vector<1x1xf32>
    tpu.vector_store %arg3[%c0_9, %c0_10], %21 {strides = array<i32>} : memref<1x1xf32, #tpu.memory_space<vmem>>, vector<1x1xf32>,
    return
  }
  func.func @transform_0(%arg0: i32) -> (i32, i32) {
    %c0_i32 = arith.constant 0 : i32
    %c0_i32_0 = arith.constant 0 : i32
    return %arg0, %c0_i32 : i32, i32
  }
  func.func @transform_1(%arg0: i32) -> (i32, i32) {
    %c0_i32 = arith.constant 0 : i32
    %c0_i32_0 = arith.constant 0 : i32
    return %arg0, %c0_i32 : i32, i32
  }
  func.func @transform_2(%arg0: i32) -> (i32, i32) {
    %c0_i32 = arith.constant 0 : i32
    %c0_i32_0 = arith.constant 0 : i32
    %c0_i32_1 = arith.constant 0 : i32
    return %c0_i32, %c0_i32_0 : i32, i32
  }
}

</mosaic_0001>

<bundles_post_ra>
// kernel: _lambda_.12
= control target key start
LH: loop header
LB: loop body
LE: loop exit
PB: predicated region body
PF: predicated region fallthrough
CT: control target
= control target key end

     0   :  { %s2031_s18 = smov 0   ;;  %s2033_s19 = smov 0   ;;  %s2625_s0 = inlined_call_operand.vmem [shape: bf16[4,18,18,3], index: 0, kind: input, shape index: {}, may-alias: {0,1,2}]   ;;  %s2626_s1 = inlined_call_operand.vmem [shape: bf16[4,18,18,3], index: 1, kind: input, shape index: {}, may-alias: {0,1,2}]   ;;  %s2627_s2 = inlined_call_operand.vmem [shape: bf16[4,18,18,3], index: 2, kind: input, shape index: {}, may-alias: {0,1,2}]   ;;  %s2628_s3 = inlined_call_operand.vmem [shape: bf16[1,27,64], index: 3, kind: input, shape index: {}]   ;;  %s2629_s4 = inlined_call_operand.vmem [shape: f32[1,64], index: 4, kind: input, shape index: {}]   ;;  %s2630_s5 = inlined_call_operand.vmem [shape: bf16[4,16,16,64], index: 5, kind: output, shape index: {}]  }
   0x1   :  { %s2035_s20 = smov 0  }
   0x2 LB: > { %s27_s21 = sadd.s32 1, %s1990_s19  ;;  %p1712_p0 = scmp.ge.s32.totalorder %s1994_s20, 1  ;;  %s1994_s20 = sphi %s2035_s20, %s15_s20   ;;  %s1990_s19 = sphi %s2033_s19, %s2632_s19   ;;  %s1986_s18 = sphi %s2031_s18, %s2631_s18  }
   0x3   : > { %p29_p1 = scmp.ge.s32.totalorder %s27_s21, 4  ;;  %p267_p2 = scmp.lt.s32.totalorder %s1994_s20, 5 }
   0x5   : > { %s2634_s21 = smov (%p29_p1, %s27_s21), 0  ;;  %p268_p3 = pnand %p1712_p0, %p267_p2 }
   0x6   : > { %p338_p4 = scmp.lt.s32.totalorder (!%p268_p3), %s1986_s18, 3  ;;  %s1996_s26 = smov (!%p268_p3), 6  }
   0x7   : > { %271 = sbr.rel (%p268_p3) target bundleno = 532 (0x214), region = 40  ;;  %s1997_s27 = smov (!%p268_p3), 3  }
   0x8   : > { %s1999_s15 = smov (!%p268_p3), 9   ;;  %s2000_s16 = smov (!%p268_p3), 18  }
   0xc   : > { %s2636_s18 = smov (!%p338_p4, %s1986_s18), 3  ;;  %vm798_vm0 = vcmask 1046528   ;;  %vm573_vm1 = vsmask.f32 7424  ;;  %vm1209_vm2 = vcmask 1044480   ;;  %vm1210_vm3 = vcmask 1045504  }
   0xd   : > { %s2052_s22 = smul.u32 216, %s2636_s18  ;;  %vm879_vm4 = vcmask 23552   ;;  %vm912_vm5 = vcmask 48128   ;;  %vm1088_vm6 = vcmask 72704   ;;  %vm1121_vm7 = vcmask 146432   ;;  %s1811_s23 = sshll.u32 %s2636_s18, 7 }
   0xe   : > { %vm1176_vm8 = vcmask 220160   ;;  %vm1537_vm9 = vcmask 519168  }
   0xf   : > { %s2058_s25 = scalar_lea.vmem %s2625_s0, %s2052_s22  ;;  %s1808_s28 = sadd.s32 192, %s2052_s22 }
  0x10   : > { %v2061_v0 = vld [vmem:[%s2058_s25 + $0x6c] sm:$0xff]   ;;  %v1935_v1 = vld [vmem:[%s2058_s25 + $0x74] ss:$0 sps:$4 sm:$0x11]   ;;  %v2070_v6 = vld [vmem:[%s2058_s25 + $0x78] sm:$0xff]   ;;  %s2214_s6 = scalar_lea.vmem %s2626_s1, %s1808_s28  ;;  %s1810_s7 = sadd.s32 204, %s2052_s22 }
  0x11   : > { %v2065_v2 = vld [vmem:[%s2058_s25 + $0xc] sm:$0xff]   ;;  %v826_v3 = vrot.slane %v2061_v0, 1  ;;  %v827_v4 = vrot.slane %v1935_v1, 1  ;;  %v1937_v5 = vld [vmem:[%s2058_s25 + $0x14] ss:$0 sps:$4 sm:$0x11]   ;;  %s2232_s10 = scalar_lea.vmem %s2627_s2, %s1810_s7 }
  0x12   : > { %v802_v7 = vrot.slane %v2065_v2, 1  ;;  %v2074_v8 = vld [vmem:[%s2058_s25 + $0x18] sm:$0xff]   ;;  %v803_v10 = vrot.slane %v1937_v5, 1  ;;  %v1939_v11 = vld [vmem:[%s2058_s25 + $0x80] ss:$0 sps:$4 sm:$0x11]  }
  0x13   : > { %v828_v9 = vsel %vm798_vm0, %v826_v3, %v827_v4  ;;  %v829_v12 = vrot.slane %v2070_v6, 1  ;;  %v805_v13 = vrot.slane %v2074_v8, 1  ;;  %v830_v15 = vrot.slane %v1939_v11, 1  ;;  %v1941_v16 = vld [vmem:[%s2058_s25 + $0x20] ss:$0 sps:$4 sm:$0x11]  }
  0x14   : > { %865 = vrot.lane.b32.xlu1 %v828_v9, %s1996_s26  ;;  %v804_v14 = vsel %vm798_vm0, %v802_v7, %v803_v10  ;;  %v599_v17 = vshrl.u32 %v2074_v8, 16  ;;  %v601_v18 = vshll.u32 %v2074_v8, 16  ;;  %v587_v19 = vshrl.u32 %v2065_v2, 16  ;;  %v2090_v25 = vld [vmem:[%s2058_s25 + $0x84] sm:$0xff]   ;;  %v2109_v49 = vld [vmem:[%s2058_s25 + $0x90] sm:$0xff]   ;;  %v2121_v63 = vld [vmem:[%s2058_s25 + $0x9c] sm:$0xff]  }
  0x15   : > { %849 = vrot.lane.b32.xlu0 %v804_v14, %s1996_s26  ;;  %v589_v20 = vshll.u32 %v2065_v2, 16  ;;  %v831_v21 = vsel %vm798_vm0, %v829_v12, %v830_v15  ;;  %v806_v22 = vrot.slane %v1941_v16, 1  ;;  %v606_v23 = vshll.u32 %v1941_v16, 16  ;;  %v1943_v34 = vld [vmem:[%s2058_s25 + $0x8c] ss:$0 sps:$4 sm:$0x11]  }
  0x16   : > { %v594_v24 = vshll.u32 %v1937_v5, 16  ;;  %v603_v26 = vrot.slane %v601_v18, 1  ;;  %v695_v28 = vshrl.u32 %v2070_v6, 16  ;;  %v697_v29 = vshll.u32 %v2070_v6, 16  ;;  %v2105_v47 = vld [vmem:[%s2058_s25 + $0x24] sm:$0xff]   ;;  %v2118_v58 = vld [vmem:[%s2058_s25 + $0x30] sm:$0xff]  }
  0x17   : > { %v591_v27 = vrot.slane %v589_v20, 1  ;;  %v807_v30 = vsel %vm798_vm0, %v805_v13, %v806_v22  ;;  %v608_v31 = vrot.slane %v606_v23, 1  ;;  %v702_v33 = vshll.u32 %v1939_v11, 16  ;;  %v1945_v48 = vld [vmem:[%s2058_s25 + $0x2c] ss:$0 sps:$4 sm:$0x11]  }
  0x18   : > { %867 = vrot.lane.b32.xlu1 %v831_v21, %s1996_s26  ;;  %v596_v32 = vrot.slane %v594_v24, 1  ;;  %v604_v35 = vor.u32 %v603_v26, %v599_v17  ;;  %v699_v37 = vrot.slane %v697_v29, 1  ;;  %v683_v38 = vshrl.u32 %v2061_v0, 16  ;;  %v2125_v7 = vld [vmem:[%s2058_s25 + $0x98] ss:$0 sps:$4 sm:$0x11]  }
  0x19   : > { %851 = vrot.lane.b32.xlu0 %v807_v30, %s1996_s26  ;;  %v592_v36 = vor.u32 %v591_v27, %v587_v19  ;;  %v704_v39 = vrot.slane %v702_v33, 1  ;;  %v685_v40 = vshll.u32 %v2061_v0, 16  ;;  %v690_v41 = vshll.u32 %v1935_v1, 16  ;;  %v2134_v15 = vld [vmem:[%s2058_s25 + $0x38] ss:$0 sps:$4 sm:$0x11]  }
  0x1a   : > { %v707_v42 = vshrl.u32 %v2090_v25, 16  ;;  %v609_v43 = vsel %vm573_vm1, %v604_v35, %v608_v31  ;;  %v700_v45 = vor.u32 %v699_v37, %v695_v28  ;;  %v709_v46 = vshll.u32 %v2090_v25, 16  ;;  %v2143_v24 = vld [vmem:[%s2058_s25 + $0xa4] ss:$0 sps:$4 sm:$0x11]   ;;  %v2151_v31 = vld [vmem:[%s2058_s25 + $0x3c] sm:$0xff]  }
  0x1b   : > { %v597_v44 = vsel %vm573_vm1, %v592_v36, %v596_v32  ;;  %v687_v50 = vrot.slane %v685_v40, 1  ;;  %v692_v51 = vrot.slane %v690_v41, 1  ;;  %v714_v52 = vshll.u32 %v1943_v34, 16  ;;  %v1953_v36 = vld [vmem:[%s2058_s25 + $0x44] ss:$0 sps:$4 sm:$0x11]  }
  0x1c   : > { %770 = vrot.lane.b32.xlu1 %v609_v43, %s1997_s27  ;;  %v832_v53 = vrot.slane %v2090_v25, 1  ;;  %v705_v54 = vsel %vm573_vm1, %v700_v45, %v704_v39  ;;  %v711_v55 = vrot.slane %v709_v46, 1  ;;  %v611_v56 = vshrl.u32 %v2105_v47, 16  ;;  %v2165_v46 = vld [vmem:[%s2058_s25 + $0xb0] ss:$0 sps:$4 sm:$0x11]  }
  0x1d   : > { %768 = vrot.lane.b32.xlu0 %v597_v44, %s1997_s27  ;;  %v613_v57 = vshll.u32 %v2105_v47, 16  ;;  %v688_v59 = vor.u32 %v687_v50, %v683_v38  ;;  %v716_v60 = vrot.slane %v714_v52, 1  ;;  %v618_v61 = vshll.u32 %v1945_v48, 16  ;;  %v2161_v44 = vld [vmem:[%s2058_s25 + $0xa8] sm:$0xff]  }
  0x1e   : > { %v833_v62 = vrot.slane %v1943_v34, 1  ;;  %v712_v1 = vor.u32 %v711_v55, %v707_v42  ;;  %v808_v4 = vrot.slane %v2105_v47, 1  ;;  %v809_v5 = vrot.slane %v1945_v48, 1  ;;  %v2168_v48 = vld [vmem:[%s2058_s25 + $0x48] sm:$0xff]  }
  0x1f   : > { %v615_v3 = vrot.slane %v613_v57, 1  ;;  %v693_v9 = vsel %vm573_vm1, %v688_v59, %v692_v51  ;;  %v620_v10 = vrot.slane %v618_v61, 1  ;;  %v719_v11 = vshrl.u32 %v2109_v49, 16  ;;  %v2182_v61 = vld [vmem:[%s2058_s25 + $0x50] ss:$0 sps:$4 sm:$0x11]  }
  0x20   : > { %786 = vrot.lane.b32.xlu1 %v705_v54, %s1997_s27  ;;  %v717_v12 = vsel %vm573_vm1, %v712_v1, %v716_v60  ;;  %v721_v14 = vshll.u32 %v2109_v49, 16  ;;  %v726_v16 = vshll.u32 %v2125_v7, 16  ;;  %v623_v17 = vshrl.u32 %v2118_v58, 16 }
  0x21   : > { %784 = vrot.lane.b32.xlu0 %v693_v9, %s1997_s27  ;;  %v616_v13 = vor.u32 %v615_v3, %v611_v56  ;;  %v625_v18 = vshll.u32 %v2118_v58, 16  ;;  %v630_v21 = vshll.u32 %v2134_v15, 16  ;;  %v733_v26 = vshll.u32 %v2121_v63, 16 }
  0x22   : > { %v723_v20 = vrot.slane %v721_v14, 1  ;;  %v728_v22 = vrot.slane %v726_v16, 1  ;;  %v834_v27 = vsel %vm798_vm0, %v832_v53, %v833_v62  ;;  %v810_v28 = vsel %vm798_vm0, %v808_v4, %v809_v5  ;;  %v2185_v62 = vld [vmem:[%s2058_s25 + $0xb4] sm:$0xff]  }
  0x23   : > { %v621_v19 = vsel %vm573_vm1, %v616_v13, %v620_v10  ;;  %v627_v23 = vrot.slane %v625_v18, 1  ;;  %v731_v30 = vshrl.u32 %v2121_v63, 16  ;;  %v632_v33 = vrot.slane %v630_v21, 1  ;;  %v2190_v4 = vld [vmem:[%s2058_s25 + $0x54] sm:$0xff]  }
  0x24   : > { %788 = vrot.lane.b32.xlu1 %v717_v12, %s1997_s27  ;;  %v724_v29 = vor.u32 %v723_v20, %v719_v11  ;;  %v735_v34 = vrot.slane %v733_v26, 1  ;;  %v738_v35 = vshll.u32 %v2143_v24, 16  ;;  %v635_v37 = vshrl.u32 %v2151_v31, 16  ;;  %v2198_v12 = vld [vmem:[%s2058_s25 + $0xbc] ss:$0 sps:$4 sm:$0x11]  }
  0x25   : > { %772 = vrot.lane.b32.xlu0 %v621_v19, %s1997_s27  ;;  %v628_v32 = vor.u32 %v627_v23, %v623_v17  ;;  %v637_v38 = vshll.u32 %v2151_v31, 16  ;;  %v642_v43 = vshll.u32 %v1953_v36, 16  ;;  %v835_v52 = vrot.slane %v2109_v49, 1  ;;  %v2206_v19 = vld [vmem:[%s2058_s25 + $0x5c] ss:$0 sps:$4 sm:$0x11]  }
  0x26   : > { %v729_v39 = vsel %vm573_vm1, %v724_v29, %v728_v22  ;;  %v736_v40 = vor.u32 %v735_v34, %v731_v30  ;;  %v740_v41 = vrot.slane %v738_v35, 1  ;;  %v836_v53 = vrot.slane %v2125_v7, 1  ;;  %v2227_v35 = vld [vmem:[%s2214_s6] sm:$0xff]  }
  0x27   : > { %v639_v42 = vrot.slane %v637_v38, 1  ;;  %v633_v45 = vsel %vm573_vm1, %v628_v32, %v632_v33  ;;  %v644_v51 = vrot.slane %v642_v43, 1  ;;  %v811_v54 = vrot.slane %v2118_v58, 1 }
  0x28   : > { %869 = vrot.lane.b32.xlu1 %v834_v27, %s1996_s26  ;;  %v812_v55 = vrot.slane %v2134_v15, 1  ;;  %v838_v56 = vrot.slane %v2121_v63, 1  ;;  %v741_v57 = vsel %vm573_vm1, %v736_v40, %v740_v41  ;;  %v839_v59 = vrot.slane %v2143_v24, 1 }
  0x29   : > { %853 = vrot.lane.b32.xlu0 %v810_v28, %s1996_s26  ;;  %v640_v50 = vor.u32 %v639_v42, %v635_v37  ;;  %v745_v60 = vshll.u32 %v2161_v44, 16  ;;  %v649_v3 = vshll.u32 %v2168_v48, 16  ;;  %v814_v5 = vrot.slane %v2151_v31, 1  ;;  %v2238_v42 = vld [vmem:[%s2058_s25 + $0x60] sm:$0xff]  }
  0x2a   : > { %v815_v7 = vrot.slane %v1953_v36, 1  ;;  %v743_v9 = vshrl.u32 %v2161_v44, 16  ;;  %v750_v10 = vshll.u32 %v2165_v46, 16  ;;  %v647_v11 = vshrl.u32 %v2168_v48, 16 }
  0x2b   : > { %v645_v1 = vsel %vm573_vm1, %v640_v50, %v644_v51  ;;  %v837_v13 = vsel %vm798_vm0, %v835_v52, %v836_v53  ;;  %v747_v14 = vrot.slane %v745_v60, 1  ;;  %v757_v15 = vshll.u32 %v2185_v62, 16  ;;  %v1963_v52 = vld [vmem:[%s2214_s6 + $0x8] ss:$0 sps:$4 sm:$0x11]  }
  0x2c   : > { %790 = vrot.lane.b32.xlu1 %v729_v39, %s1997_s27  ;;  %v813_v16 = vsel %vm798_vm0, %v811_v54, %v812_v55  ;;  %v651_v17 = vrot.slane %v649_v3, 1  ;;  %v654_v18 = vshll.u32 %v2182_v61, 16  ;;  %v661_v20 = vshll.u32 %v2190_v4, 16  ;;  %v2248_v54 = vld [vmem:[%s2058_s25] sm:$0xff]  }
  0x2d   : > { %774 = vrot.lane.b32.xlu0 %v633_v45, %s1997_s27  ;;  %v840_v21 = vsel %vm798_vm0, %v838_v56, %v839_v59  ;;  %v816_v22 = vsel %vm798_vm0, %v814_v5, %v815_v7  ;;  %v752_v23 = vrot.slane %v750_v10, 1  ;;  %v755_v24 = vshrl.u32 %v2185_v62, 16  ;;  %v1969_v60 = vld [vmem:[%s2058_s25 + $0x8] ss:$0 sps:$4 sm:$0x11]  }
  0x2e   : > { %v748_v26 = vor.u32 %v747_v14, %v743_v9  ;;  %v759_v27 = vrot.slane %v757_v15, 1  ;;  %v762_v28 = vshll.u32 %v2198_v12, 16  ;;  %v659_v29 = vshrl.u32 %v2190_v4, 16 }
  0x2f   : > { %v652_v30 = vor.u32 %v651_v17, %v647_v11  ;;  %v656_v32 = vrot.slane %v654_v18, 1  ;;  %v663_v33 = vrot.slane %v661_v20, 1  ;;  %v666_v34 = vshll.u32 %v2206_v19, 16  ;;  %v2268_v18 = vld [vmem:[%s2232_s10] sm:$0xff]  }
  0x30   : > { %792 = vrot.lane.b32.xlu1 %v741_v57, %s1997_s27  ;;  %v753_v36 = vsel %vm573_vm1, %v748_v26, %v752_v23  ;;  %v760_v37 = vor.u32 %v759_v27, %v755_v24  ;;  %v764_v38 = vrot.slane %v762_v28, 1  ;;  %v841_v43 = vrot.slane %v2161_v44, 1  ;;  %v1965_v57 = vld [vmem:[%s2058_s25 + $0x68] ss:$0 sps:$4 sm:$0x11]  }
  0x31   : > { %776 = vrot.lane.b32.xlu0 %v645_v1, %s1997_s27  ;;  %v657_v39 = vsel %vm573_vm1, %v652_v30, %v656_v32  ;;  %v664_v40 = vor.u32 %v663_v33, %v659_v29  ;;  %v668_v41 = vrot.slane %v666_v34, 1  ;;  %v842_v45 = vrot.slane %v2165_v46, 1  ;;  %v1967_v26 = vld [vmem:[%s2232_s10 + $0x8] ss:$0 sps:$4 sm:$0x11]  }
  0x32   : > { %v817_v50 = vrot.slane %v2168_v48, 1  ;;  %v818_v51 = vrot.slane %v2182_v61, 1  ;;  %v956_v53 = vshll.u32 %v2227_v35, 16  ;;  %v765_v55 = vsel %vm573_vm1, %v760_v37, %v764_v38 }
  0x33   : > { %v669_v56 = vsel %vm573_vm1, %v664_v40, %v668_v41  ;;  %v673_v46 = vshll.u32 %v2238_v42, 16  ;;  %v843_v59 = vsel %vm798_vm0, %v841_v43, %v842_v45  ;;  %v799_v61 = vrot.slane %v2248_v54, 1 }
  0x34   : > { %871 = vrot.lane.b32.xlu1 %v837_v13, %s1996_s26  ;;  %v819_v1 = vsel %vm798_vm0, %v817_v50, %v818_v51  ;;  %v844_v3 = vrot.slane %v2185_v62, 1  ;;  %v845_v5 = vrot.slane %v2198_v12, 1  ;;  %v820_v7 = vrot.slane %v2190_v4, 1 }
  0x35   : > { %855 = vrot.lane.b32.xlu0 %v813_v16, %s1996_s26  ;;  %v954_v9 = vshrl.u32 %v2227_v35, 16  ;;  %v958_v10 = vrot.slane %v956_v53, 1  ;;  %v961_v11 = vshll.u32 %v1963_v52, 16  ;;  %v800_v13 = vrot.slane %v1969_v60, 1 }
  0x36   : > { %v821_v14 = vrot.slane %v2206_v19, 1  ;;  %v671_v15 = vshrl.u32 %v2238_v42, 16  ;;  %v675_v16 = vrot.slane %v673_v46, 1  ;;  %v678_v17 = vshll.u32 %v1965_v57, 16 }
  0x37   : > { %v801_v12 = vsel %vm798_vm0, %v799_v61, %v800_v13  ;;  %v846_v20 = vsel %vm798_vm0, %v844_v3, %v845_v5  ;;  %v987_v27 = vshll.u32 %v2268_v18, 16  ;;  %v967_v28 = vrot.slane %v2227_v35, 1 }
  0x38   : > { %873 = vrot.lane.b32.xlu1 %v840_v21, %s1996_s26  ;;  %v959_v21 = vor.u32 %v958_v10, %v954_v9  ;;  %v822_v23 = vsel %vm798_vm0, %v820_v7, %v821_v14  ;;  %v676_v24 = vor.u32 %v675_v16, %v671_v15  ;;  %v680_v19 = vrot.slane %v678_v17, 1  ;;  %v1971_v14 = vld [vmem:[%s2628_s3] sm:$0xff]  }
  0x39   : > { %857 = vrot.lane.b32.xlu0 %v816_v22, %s1996_s26  ;;  %v963_v22 = vrot.slane %v961_v11, 1  ;;  %v968_v29 = vrot.slane %v1963_v52, 1  ;;  %v823_v32 = vrot.slane %v2238_v42, 1  ;;  %v824_v33 = vrot.slane %v1965_v57, 1 }
  0x3a   : > { %v985_v34 = vshrl.u32 %v2268_v18, 16  ;;  %v989_v37 = vrot.slane %v987_v27, 1  ;;  %v992_v38 = vshll.u32 %v1967_v26, 16  ;;  %v998_v43 = vrot.slane %v2268_v18, 1 }
  0x3b   : > { %v964_v30 = vsel %vm573_vm1, %v959_v21, %v963_v22  ;;  %v969_v40 = vsel %vm798_vm0, %v967_v28, %v968_v29  ;;  %v825_v41 = vsel %vm798_vm0, %v823_v32, %v824_v33  ;;  %v999_v45 = vrot.slane %v1967_v26, 1 }
  0x3c   : > { %794 = vrot.lane.b32.xlu1 %v753_v36, %s1997_s27  ;;  %v681_v36 = vsel %vm573_vm1, %v676_v24, %v680_v19  ;;  %v575_v50 = vshrl.u32 %v2248_v54, 16  ;;  %v990_v51 = vor.u32 %v989_v37, %v985_v34  ;;  %v994_v52 = vrot.slane %v992_v38, 1 }
  0x3d   : > { %778 = vrot.lane.b32.xlu0 %v657_v39, %s1997_s27  ;;  %v577_v39 = vshll.u32 %v2248_v54, 16  ;;  %v1998_v3 = vmov 65535  }
  0x3e   : > { %v995_v57 = vsel %vm573_vm1, %v990_v51, %v994_v52  ;;  %v1211_v5 = vsel %vm1209_vm2, 4294967295, %v1998_v3 }
  0x3f   : > { %v579_v53 = vrot.slane %v577_v39, 1  ;;  %v1212_v9 = vsel %vm1210_vm3, %v1211_v5, 0 }
  0x40   : > { %796 = vrot.lane.b32.xlu1 %v765_v55, %s1997_s27  ;;  %v582_v55 = vshll.u32 %v1969_v60, 16 }
  0x41   : > { %780 = vrot.lane.b32.xlu0 %v669_v56, %s1997_s27  ;;  %v1000_v56 = vsel %vm798_vm0, %v998_v43, %v999_v45  ;;  %v580_v46 = vor.u32 %v579_v53, %v575_v50 }
  0x44   : > { %875 = vrot.lane.b32.xlu1 %v843_v59, %s1996_s26  ;;  %v584_v59 = vrot.slane %v582_v55, 1 }
  0x45   : > { %859 = vrot.lane.b32.xlu0 %v819_v1, %s1996_s26  ;;  %v1970_v1 = vld [vmem:[%s2628_s3 + $0x8] sm:$0x3f]  }
  0x46   : > { %v585_v61 = vsel %vm573_vm1, %v580_v46, %v584_v59  ;;  %v1214_v10 = vand.u32 %v1970_v1, %v1212_v9 }
  0x48   : > { %877 = vrot.lane.b32.xlu1 %v846_v20, %s1996_s26  ;;  %1862 = vmatprep.subr.bf16.mxu0 %v1214_v10 }
  0x49   : > { %861 = vrot.lane.b32.xlu0 %v822_v23, %s1996_s26  ;;  %1898 = vmatprep.subr.bf16.mxu1 %v1214_v10 }
  0x4a   : > { %1863 = vmatpush3.bf16.msra.mxu0 %v1214_v10  ;;  %1900 = vmatpush3.bf16.msra.mxu1 %v1214_v10 }
  0x4b   : > { %1864 = vmatprep.subr.bf16.mxu0 %v1971_v14  ;;  %1899 = vmatprep.subr.bf16.mxu1 %v1971_v14 }
  0x4c   : > { %965 = vrot.lane.b32.xlu1 %v964_v30, %s1997_s27 }
  0x4d   : > { %782 = vrot.lane.b32.xlu0 %v681_v36, %s1997_s27 }
  0x4e   : > { %1865 = vmatpush3.bf16.msra.mxu0 %v1971_v14  ;;  %1901 = vmatpush3.bf16.msra.mxu1 %v1971_v14 }
  0x50   : > { %970 = vrot.lane.b32.xlu1 %v969_v40, %s1996_s26 }
  0x51   : > { %863 = vrot.lane.b32.xlu0 %v825_v41, %s1996_s26 }
  0x54   : > { %1001 = vrot.lane.b32.xlu1 %v1000_v56, %s1996_s26 }
  0x55   : > { %996 = vrot.lane.b32.xlu0 %v995_v57, %s1997_s27 }
  0x58   : > { %847 = vrot.lane.b32.xlu1 %v801_v12, %s1996_s26  ;;  %s2520_s26 = scalar_lea.vmem %s2630_s5, %s1811_s23 }
  0x59   : > { %766 = vrot.lane.b32.xlu0 %v585_v61, %s1997_s27 }
  0x86   : > { %v866_v60 = vpop.permute.xlu1 %865 }
  0x87   : > { %v850_v7 = vpop.permute.xlu0 %849 }
  0x8a   : > { %v868_v11 = vpop.permute.xlu1 %867 }
  0x8b   : > { %v852_v13 = vpop.permute.xlu0 %851 }
  0x8e   : > { %v771_v15 = vpop.permute.xlu1 %770 }
  0x8f   : > { %v769_v16 = vpop.permute.xlu0 %768  ;;  %v885_v20 = vsel %vm879_vm4, %v2074_v8, %v771_v15 }
  0x90   : > { %v883_v17 = vsel %vm879_vm4, %v2065_v2, %v769_v16  ;;  %v2321_v2 = vsel %vm912_vm5, %v885_v20, %v852_v13 }
  0x91   : > { %v2309_v12 = vsel %vm912_vm5, %v883_v17, %v850_v7 }
  0x92   : > { %1023 = vrot.lane.b32.xlu0 %v2309_v12, %s1999_s15  ;;  %v787_v21 = vpop.permute.xlu1 %786 }
  0x93   : > { %v785_v22 = vpop.permute.xlu0 %784  ;;  %v901_v19 = vsel %vm879_vm4, %v2070_v6, %v787_v21 }
  0x94   : > { %v899_v23 = vsel %vm879_vm4, %v2061_v0, %v785_v22  ;;  %v2330_v27 = vsel %vm912_vm5, %v901_v19, %v868_v11 }
  0x95   : > { %v2318_v24 = vsel %vm912_vm5, %v899_v23, %v866_v60 }
  0x96   : > { %1039 = vrot.lane.b32.xlu1 %v2318_v24, %s1999_s15  ;;  %1025 = vrot.lane.b32.xlu0 %v2321_v2, %s1999_s15  ;;  %v789_v8 = vpop.permute.xlu1 %788 }
  0x97   : > { %v773_v26 = vpop.permute.xlu0 %772  ;;  %v903_v33 = vsel %vm879_vm4, %v2090_v25, %v789_v8 }
  0x98   : > { %v887_v6 = vsel %vm879_vm4, %v2105_v47, %v773_v26 }
  0x9a   : > { %1041 = vrot.lane.b32.xlu1 %v2330_v27, %s1999_s15  ;;  %1056 = vrot.lane.b32.xlu0 %v2321_v2, %s2000_s16  ;;  %v870_v0 = vpop.permute.xlu1 %869 }
  0x9b   : > { %v854_v28 = vpop.permute.xlu0 %853  ;;  %v2348_v34 = vsel %vm912_vm5, %v903_v33, %v870_v0 }
  0x9c   : > { %v2339_v29 = vsel %vm912_vm5, %v887_v6, %v854_v28 }
  0x9e   : > { %1072 = vrot.lane.b32.xlu1 %v2330_v27, %s2000_s16  ;;  %1058 = vrot.lane.b32.xlu0 %v2339_v29, %s2000_s16  ;;  %v791_v30 = vpop.permute.xlu1 %790 }
  0x9f   : > { %v775_v32 = vpop.permute.xlu0 %774  ;;  %v905_v37 = vsel %vm879_vm4, %v2109_v49, %v791_v30 }
  0xa0   : > { %v889_v25 = vsel %vm879_vm4, %v2118_v58, %v775_v32 }
  0xa2   : > { %1074 = vrot.lane.b32.xlu1 %v2348_v34, %s2000_s16  ;;  %1027 = vrot.lane.b32.xlu0 %v2339_v29, %s1999_s15  ;;  %v793_v47 = vpop.permute.xlu1 %792 }
  0xa3   : > { %v777_v36 = vpop.permute.xlu0 %776  ;;  %v907_v51 = vsel %vm879_vm4, %v2121_v63, %v793_v47 }
  0xa4   : > { %v891_v45 = vsel %vm879_vm4, %v2151_v31, %v777_v36 }
  0xa6   : > { %1043 = vrot.lane.b32.xlu1 %v2348_v34, %s1999_s15  ;;  %v872_v38 = vpop.permute.xlu1 %871 }
  0xa7   : > { %v856_v39 = vpop.permute.xlu0 %855  ;;  %v2361_v40 = vsel %vm912_vm5, %v905_v37, %v872_v38 }
  0xa8   : > { %v2364_v41 = vsel %vm912_vm5, %v889_v25, %v856_v39 }
  0xa9   : > { %1029 = vrot.lane.b32.xlu0 %v2364_v41, %s1999_s15 }
  0xaa   : > { %1045 = vrot.lane.b32.xlu1 %v2361_v40, %s1999_s15  ;;  %v874_v49 = vpop.permute.xlu1 %873 }
  0xab   : > { %v858_v43 = vpop.permute.xlu0 %857  ;;  %v2384_v53 = vsel %vm912_vm5, %v907_v51, %v874_v49 }
  0xac   : > { %v2379_v52 = vsel %vm912_vm5, %v891_v45, %v858_v43 }
  0xad   : > { %1060 = vrot.lane.b32.xlu0 %v2364_v41, %s2000_s16 }
  0xae   : > { %1076 = vrot.lane.b32.xlu1 %v2361_v40, %s2000_s16  ;;  %v795_v58 = vpop.permute.xlu1 %794 }
  0xaf   : > { %v779_v50 = vpop.permute.xlu0 %778  ;;  %v909_v63 = vsel %vm879_vm4, %v2161_v44, %v795_v58 }
  0xb0   : > { %v893_v57 = vsel %vm879_vm4, %v2168_v48, %v779_v50 }
  0xb1   : > { %1062 = vrot.lane.b32.xlu0 %v2379_v52, %s2000_s16 }
  0xb2   : > { %1078 = vrot.lane.b32.xlu1 %v2384_v53, %s2000_s16  ;;  %v797_v55 = vpop.permute.xlu1 %796 }
  0xb3   : > { %v781_v56 = vpop.permute.xlu0 %780  ;;  %v911_v5 = vsel %vm879_vm4, %v2185_v62, %v797_v55 }
  0xb4   : > { %v895_v1 = vsel %vm879_vm4, %v2190_v4, %v781_v56 }
  0xb5   : > { %1031 = vrot.lane.b32.xlu0 %v2379_v52, %s1999_s15 }
  0xb6   : > { %1047 = vrot.lane.b32.xlu1 %v2384_v53, %s1999_s15  ;;  %v876_v31 = vpop.permute.xlu1 %875 }
  0xb7   : > { %v860_v46 = vpop.permute.xlu0 %859  ;;  %v2397_v59 = vsel %vm912_vm5, %v909_v63, %v876_v31 }
  0xb8   : > { %v2400_v61 = vsel %vm912_vm5, %v893_v57, %v860_v46 }
  0xb9   : > { %1033 = vrot.lane.b32.xlu0 %v2400_v61, %s1999_s15 }
  0xba   : > { %1049 = vrot.lane.b32.xlu1 %v2397_v59, %s1999_s15  ;;  %v878_v44 = vpop.permute.xlu1 %877 }
  0xbb   : > { %v862_v60 = vpop.permute.xlu0 %861  ;;  %v2420_v9 = vsel %vm912_vm5, %v911_v5, %v878_v44 }
  0xbc   : > { %v2415_v7 = vsel %vm912_vm5, %v895_v1, %v862_v60 }
  0xbd   : > { %1064 = vrot.lane.b32.xlu0 %v2400_v61, %s2000_s16 }
  0xbe   : > { %1080 = vrot.lane.b32.xlu1 %v2397_v59, %s2000_s16  ;;  %v966_v48 = vpop.permute.xlu1 %965 }
  0xbf   : > { %v783_v3 = vpop.permute.xlu0 %782  ;;  %v973_v62 = vsel %vm879_vm4, %v2227_v35, %v966_v48 }
  0xc0   : > { %v897_v4 = vsel %vm879_vm4, %v2238_v42, %v783_v3 }
  0xc1   : > { %1066 = vrot.lane.b32.xlu0 %v2415_v7, %s2000_s16 }
  0xc2   : > { %1082 = vrot.lane.b32.xlu1 %v2420_v9, %s2000_s16  ;;  %v971_v10 = vpop.permute.xlu1 %970 }
  0xc3   : > { %v864_v11 = vpop.permute.xlu0 %863  ;;  %v975_v42 = vsel %vm912_vm5, %v973_v62, %v971_v10 }
  0xc4   : > { %v930_v15 = vsel %vm912_vm5, %v897_v4, %v864_v11 }
  0xc5   : > { %1035 = vrot.lane.b32.xlu0 %v2415_v7, %s1999_s15 }
  0xc6   : > { %1051 = vrot.lane.b32.xlu1 %v2420_v9, %s1999_s15  ;;  %v1002_v13 = vpop.permute.xlu1 %1001 }
  0xc7   : > { %v997_v14 = vpop.permute.xlu0 %996 }
  0xc8   : > { %v1004_v16 = vsel %vm879_vm4, %v2268_v18, %v997_v14 }
  0xc9   : > { %1037 = vrot.lane.b32.xlu0 %v930_v15, %s1999_s15  ;;  %v1006_v17 = vsel %vm912_vm5, %v1004_v16, %v1002_v13 }
  0xca   : > { %1053 = vrot.lane.b32.xlu1 %v975_v42, %s1999_s15  ;;  %v848_v20 = vpop.permute.xlu1 %847 }
  0xcb   : > { %v767_v35 = vpop.permute.xlu0 %766 }
  0xcc   : > { %v881_v21 = vsel %vm879_vm4, %v2248_v54, %v767_v35 }
  0xcd   : > { %1068 = vrot.lane.b32.xlu0 %v930_v15, %s2000_s16  ;;  %v914_v22 = vsel %vm912_vm5, %v881_v21, %v848_v20 }
  0xce   : > { %1084 = vrot.lane.b32.xlu1 %v975_v42, %s2000_s16 }
  0xd1   : > { %1070 = vrot.lane.b32.xlu0 %v2318_v24, %s2000_s16 }
  0xd2   : > { %1086 = vrot.lane.b32.xlu1 %v1006_v17, %s2000_s16 }
 0x104   : > { %v1024_v18 = vpop.permute.xlu0 %1023 }
 0x105   : > { %v1090_v8 = vsel %vm1088_vm6, %v914_v22, %v1024_v18 }
 0x108   : > { %v1040_v23 = vpop.permute.xlu1 %1039  ;;  %v1026_v19 = vpop.permute.xlu0 %1025 }
 0x109   : > { %v1106_v6 = vsel %vm1088_vm6, %v930_v15, %v1040_v23  ;;  %v1092_v28 = vsel %vm1088_vm6, %v2309_v12, %v1026_v19  ;;  %v2512_v19 = vld [vmem:[%s2629_s4] ss:$0 sm:$0xff] }
 0x10c   : > { %v1042_v54 = vpop.permute.xlu1 %1041  ;;  %v1057_v26 = vpop.permute.xlu0 %1056 }
 0x10d   : > { %v1123_v0 = vsel %vm1121_vm7, %v1090_v8, %v1057_v26  ;;  %v1108_v36 = vsel %vm1088_vm6, %v2318_v24, %v1042_v54 }
 0x10e   : > { %1866 = vmatprep.mubr.msk.bf16.mxu0 %vm1176_vm8, %v1123_v0 }
 0x110   : > { %v1073_v30 = vpop.permute.xlu1 %1072  ;;  %v1059_v32 = vpop.permute.xlu0 %1058 }
 0x111   : > { %v1125_v33 = vsel %vm1121_vm7, %v1092_v28, %v1059_v32  ;;  %v1139_v47 = vsel %vm1121_vm7, %v1106_v6, %v1073_v30 }
 0x112   : > { %1867 = vmatmul.mubr.msk.bf16.vlgmr.msra.gmra.mxu0 %vm1176_vm8, %v1125_v33  ;;  %1882 = vmatprep.mubr.msk.bf16.mxu1 %vm1176_vm8, %v1139_v47 }
 0x114   : > { %v1075_v37 = vpop.permute.xlu1 %1074  ;;  %v1028_v25 = vpop.permute.xlu0 %1027 }
 0x115   : > { %v1141_v38 = vsel %vm1121_vm7, %v1108_v36, %v1075_v37  ;;  %v1094_v43 = vsel %vm1088_vm6, %v2321_v2, %v1028_v25 }
 0x116   : > { %1883 = vmatmul.mubr.msk.bf16.vlgmr.msra.gmra.mxu1 %vm1176_vm8, %v1141_v38 }
 0x118   : > { %v1044_v12 = vpop.permute.xlu1 %1043 }
 0x119   : > { %v1110_v45 = vsel %vm1088_vm6, %v2330_v27, %v1044_v12 }
 0x11b   : > { %v1030_v39 = vpop.permute.xlu0 %1029 }
 0x11c   : > { %v1046_v49 = vpop.permute.xlu1 %1045  ;;  %v1096_v55 = vsel %vm1088_vm6, %v2339_v29, %v1030_v39 }
 0x11d   : > { %v1112_v2 = vsel %vm1088_vm6, %v2348_v34, %v1046_v49 }
 0x11f   : > { %v1061_v58 = vpop.permute.xlu0 %1060 }
 0x120   : > { %v1127_v50 = vsel %vm1121_vm7, %v1094_v43, %v1061_v58  ;;  %v1077_v51 = vpop.permute.xlu1 %1076 }
 0x121   : > { %v1143_v24 = vsel %vm1121_vm7, %v1110_v45, %v1077_v51  ;;  %1870 = vmatprep.mubr.msk.bf16.mxu0 %vm1176_vm8, %v1127_v50 }
 0x122   : > { %1886 = vmatprep.mubr.msk.bf16.mxu1 %vm1176_vm8, %v1143_v24 }
 0x123   : > { %v1063_v56 = vpop.permute.xlu0 %1062 }
 0x124   : > { %v1129_v63 = vsel %vm1121_vm7, %v1096_v55, %v1063_v56  ;;  %v1079_v31 = vpop.permute.xlu1 %1078 }
 0x125   : > { %v1145_v27 = vsel %vm1121_vm7, %v1112_v2, %v1079_v31  ;;  %1871 = vmatmul.mubr.msk.bf16.gmra.mxu0 %vm1176_vm8, %v1129_v63 }
 0x126   : > { %1887 = vmatmul.mubr.msk.bf16.gmra.mxu1 %vm1176_vm8, %v1145_v27 }
 0x127   : > { %v1032_v57 = vpop.permute.xlu0 %1031 }
 0x128   : > { %v1048_v46 = vpop.permute.xlu1 %1047  ;;  %v1098_v29 = vsel %vm1088_vm6, %v2364_v41, %v1032_v57 }
 0x129   : > { %v1114_v34 = vsel %vm1088_vm6, %v2361_v40, %v1048_v46 }
 0x12b   : > { %v1034_v44 = vpop.permute.xlu0 %1033 }
 0x12c   : > { %v1050_v60 = vpop.permute.xlu1 %1049  ;;  %v1100_v10 = vsel %vm1088_vm6, %v2379_v52, %v1034_v44 }
 0x12d   : > { %v1116_v41 = vsel %vm1088_vm6, %v2384_v53, %v1050_v60 }
 0x12f   : > { %v1065_v48 = vpop.permute.xlu0 %1064 }
 0x130   : > { %v1131_v1 = vsel %vm1121_vm7, %v1098_v29, %v1065_v48  ;;  %v1081_v3 = vpop.permute.xlu1 %1080 }
 0x131   : > { %v1147_v5 = vsel %vm1121_vm7, %v1114_v34, %v1081_v3  ;;  %1874 = vmatprep.mubr.msk.bf16.mxu0 %vm1176_vm8, %v1131_v1 }
 0x132   : > { %1890 = vmatprep.mubr.msk.bf16.mxu1 %vm1176_vm8, %v1147_v5 }
 0x133   : > { %v1067_v11 = vpop.permute.xlu0 %1066 }
 0x134   : > { %v1133_v4 = vsel %vm1121_vm7, %v1100_v10, %v1067_v11  ;;  %v1083_v62 = vpop.permute.xlu1 %1082 }
 0x135   : > { %v1149_v40 = vsel %vm1121_vm7, %v1116_v41, %v1083_v62  ;;  %1875 = vmatmul.mubr.msk.bf16.gmra.mxu0 %vm1176_vm8, %v1133_v4 }
 0x136   : > { %1891 = vmatmul.mubr.msk.bf16.gmra.mxu1 %vm1176_vm8, %v1149_v40 }
 0x137   : > { %v1036_v13 = vpop.permute.xlu0 %1035 }
 0x138   : > { %v1052_v14 = vpop.permute.xlu1 %1051  ;;  %v1102_v52 = vsel %vm1088_vm6, %v2400_v61, %v1036_v13 }
 0x139   : > { %v1118_v53 = vsel %vm1088_vm6, %v2397_v59, %v1052_v14 }
 0x13b   : > { %v1038_v15 = vpop.permute.xlu0 %1037 }
 0x13c   : > { %v1054_v16 = vpop.permute.xlu1 %1053  ;;  %v1104_v21 = vsel %vm1088_vm6, %v2415_v7, %v1038_v15 }
 0x13d   : > { %v1120_v61 = vsel %vm1088_vm6, %v2420_v9, %v1054_v16 }
 0x13f   : > { %v1069_v42 = vpop.permute.xlu0 %1068 }
 0x140   : > { %v1135_v17 = vsel %vm1121_vm7, %v1102_v52, %v1069_v42  ;;  %v1085_v20 = vpop.permute.xlu1 %1084 }
 0x141   : > { %v1151_v35 = vsel %vm1121_vm7, %v1118_v53, %v1085_v20  ;;  %1878 = vmatprep.mubr.msk.bf16.mxu0 %vm1176_vm8, %v1135_v17 }
 0x142   : > { %1894 = vmatprep.mubr.msk.bf16.mxu1 %vm1176_vm8, %v1151_v35 }
 0x143   : > { %v1071_v22 = vpop.permute.xlu0 %1070 }
 0x144   : > { %v1137_v18 = vsel %vm1121_vm7, %v1104_v21, %v1071_v22  ;;  %v1087_v59 = vpop.permute.xlu1 %1086 }
 0x145   : > { %v1153_v23 = vsel %vm1121_vm7, %v1120_v61, %v1087_v59  ;;  %1879 = vmatmul.mubr.msk.bf16.gmra.mxu0 %vm1176_vm8, %v1137_v18 }
 0x146   : > { %1895 = vmatmul.mubr.msk.bf16.gmra.mxu1 %vm1176_vm8, %v1153_v23 }
 0x1d2   : > { %v1868_v8 = vpop.f32.mrf.mxu0 }
 0x1d3   : > { %v1259_v7 = vadd.f32 %v1868_v8, %v2512_v19 }
 0x1d4   : > { %v1250_v54 = vpop.f32.mrf.mxu0 }
 0x1d5   : > { %v1379_v9 = vmax.f32 %v1259_v7, 0.0  ;;  %v1251_v26 = vadd.f32 %v2512_v19, %v1250_v54 }
 0x1d6   : > { %v1869_v0 = vpop.f32.mrf.mxu0  ;;  %v1884_v6 = vpop.f32.mrf.mxu1 }
 0x1d7   : > { %v1814_v28 = vpack.c.bf16 %v1379_v9, %v1379_v9  ;;  %v1377_v30 = vmax.f32 %v1251_v26, 0.0  ;;  %v1262_v32 = vadd.f32 %v1869_v0, %v2512_v19  ;;  %v1323_v33 = vadd.f32 %v1884_v6, %v2512_v19 }
 0x1d8   : > { %v1253_v47 = vpop.f32.mrf.mxu0  ;;  %v1314_v36 = vpop.f32.mrf.mxu1 }
 0x1d9   : > { %1540 = vst.msk [vmem:[%s2520_s26 + $0x8] sm:$0xf] %vm1537_vm9, %v1814_v28  ;;  %v1812_v37 = vpack.c.bf16 %v1377_v30, %v1377_v30  ;;  %v1380_v38 = vmax.f32 %v1262_v32, 0.0  ;;  %v1395_v25 = vmax.f32 %v1323_v33, 0.0  ;;  %v1254_v12 = vadd.f32 %v2512_v19, %v1253_v47 }
 0x1da   : > { %v1315_v39 = vadd.f32 %v2512_v19, %v1314_v36  ;;  %v1885_v49 = vpop.f32.mrf.mxu1 }
 0x1db   : > { %1538 = vst.msk [vmem:[%s2520_s26] sm:$0xf] %vm1537_vm9, %v1812_v37  ;;  %v1815_v43 = vpack.c.bf16 %v1380_v38, %v1380_v38  ;;  %v1830_v58 = vpack.c.bf16 %v1395_v25, %v1395_v25  ;;  %v1378_v45 = vmax.f32 %v1254_v12, 0.0  ;;  %v1326_v50 = vadd.f32 %v1885_v49, %v2512_v19 }
 0x1dc   : > { %v1393_v51 = vmax.f32 %v1315_v39, 0.0  ;;  %v1317_v24 = vpop.f32.mrf.mxu1 }
 0x1dd   : > { %1541 = vst.msk [vmem:[%s2520_s26 + $0xc] sm:$0xf] %vm1537_vm9, %v1815_v43  ;;  %1556 = vst.msk [vmem:[%s2520_s26 + $0x48] sm:$0xf] %vm1537_vm9, %v1830_v58  ;;  %v1813_v55 = vpack.c.bf16 %v1378_v45, %v1378_v45  ;;  %v1396_v56 = vmax.f32 %v1326_v50, 0.0  ;;  %v1318_v2 = vadd.f32 %v2512_v19, %v1317_v24 }
 0x1de   : > { %v1828_v63 = vpack.c.bf16 %v1393_v51, %v1393_v51 }
 0x1df   : > { %1539 = vst.msk [vmem:[%s2520_s26 + $0x4] sm:$0xf] %vm1537_vm9, %v1813_v55  ;;  %v1831_v31 = vpack.c.bf16 %v1396_v56, %v1396_v56  ;;  %v1394_v27 = vmax.f32 %v1318_v2, 0.0 }
 0x1e0   : > { %1554 = vst.msk [vmem:[%s2520_s26 + $0x40] sm:$0xf] %vm1537_vm9, %v1828_v63 }
 0x1e1   : > { %1557 = vst.msk [vmem:[%s2520_s26 + $0x4c] sm:$0xf] %vm1537_vm9, %v1831_v31  ;;  %v1829_v57 = vpack.c.bf16 %v1394_v27, %v1394_v27 }
 0x1e3   : > { %1555 = vst.msk [vmem:[%s2520_s26 + $0x44] sm:$0xf] %vm1537_vm9, %v1829_v57 }
 0x1e5   : > { %v1872_v46 = vpop.f32.mrf.mxu0 }
 0x1e6   : > { %v1275_v44 = vadd.f32 %v1872_v46, %v2512_v19  ;;  %v1888_v60 = vpop.f32.mrf.mxu1 }
 0x1e7   : > { %v1339_v29 = vadd.f32 %v1888_v60, %v2512_v19  ;;  %v1266_v48 = vpop.f32.mrf.mxu0 }
 0x1e8   : > { %v1383_v34 = vmax.f32 %v1275_v44, 0.0  ;;  %v1267_v1 = vadd.f32 %v2512_v19, %v1266_v48  ;;  %v1330_v3 = vpop.f32.mrf.mxu1 }
 0x1e9   : > { %v1399_v5 = vmax.f32 %v1339_v29, 0.0  ;;  %v1331_v10 = vadd.f32 %v2512_v19, %v1330_v3  ;;  %v1873_v11 = vpop.f32.mrf.mxu0 }
 0x1ea   : > { %v1818_v41 = vpack.c.bf16 %v1383_v34, %v1383_v34  ;;  %v1381_v4 = vmax.f32 %v1267_v1, 0.0  ;;  %v1278_v62 = vadd.f32 %v1873_v11, %v2512_v19  ;;  %v1889_v40 = vpop.f32.mrf.mxu1 }
 0x1eb   : > { %v1834_v13 = vpack.c.bf16 %v1399_v5, %v1399_v5  ;;  %v1397_v14 = vmax.f32 %v1331_v10, 0.0  ;;  %v1342_v15 = vadd.f32 %v1889_v40, %v2512_v19  ;;  %v1269_v16 = vpop.f32.mrf.mxu0 }
 0x1ec   : > { %1544 = vst.msk [vmem:[%s2520_s26 + $0x18] sm:$0xf] %vm1537_vm9, %v1818_v41  ;;  %v1816_v52 = vpack.c.bf16 %v1381_v4, %v1381_v4  ;;  %v1384_v42 = vmax.f32 %v1278_v62, 0.0  ;;  %v1270_v53 = vadd.f32 %v2512_v19, %v1269_v16  ;;  %v1333_v17 = vpop.f32.mrf.mxu1 }
 0x1ed   : > { %1560 = vst.msk [vmem:[%s2520_s26 + $0x58] sm:$0xf] %vm1537_vm9, %v1834_v13  ;;  %v1832_v20 = vpack.c.bf16 %v1397_v14, %v1397_v14  ;;  %v1400_v35 = vmax.f32 %v1342_v15, 0.0  ;;  %v1334_v21 = vadd.f32 %v2512_v19, %v1333_v17 }
 0x1ee   : > { %1542 = vst.msk [vmem:[%s2520_s26 + $0x10] sm:$0xf] %vm1537_vm9, %v1816_v52  ;;  %v1819_v22 = vpack.c.bf16 %v1384_v42, %v1384_v42  ;;  %v1382_v61 = vmax.f32 %v1270_v53, 0.0 }
 0x1ef   : > { %1558 = vst.msk [vmem:[%s2520_s26 + $0x50] sm:$0xf] %vm1537_vm9, %v1832_v20  ;;  %v1835_v18 = vpack.c.bf16 %v1400_v35, %v1400_v35  ;;  %v1398_v59 = vmax.f32 %v1334_v21, 0.0 }
 0x1f0   : > { %1545 = vst.msk [vmem:[%s2520_s26 + $0x1c] sm:$0xf] %vm1537_vm9, %v1819_v22  ;;  %v1817_v23 = vpack.c.bf16 %v1382_v61, %v1382_v61 }
 0x1f1   : > { %1561 = vst.msk [vmem:[%s2520_s26 + $0x5c] sm:$0xf] %vm1537_vm9, %v1835_v18  ;;  %v1833_v8 = vpack.c.bf16 %v1398_v59, %v1398_v59 }
 0x1f2   : > { %1543 = vst.msk [vmem:[%s2520_s26 + $0x14] sm:$0xf] %vm1537_vm9, %v1817_v23 }
 0x1f3   : > { %1559 = vst.msk [vmem:[%s2520_s26 + $0x54] sm:$0xf] %vm1537_vm9, %v1833_v8 }
 0x1f5   : > { %v1876_v7 = vpop.f32.mrf.mxu0 }
 0x1f6   : > { %v1291_v54 = vadd.f32 %v1876_v7, %v2512_v19  ;;  %v1892_v9 = vpop.f32.mrf.mxu1 }
 0x1f7   : > { %v1355_v26 = vadd.f32 %v1892_v9, %v2512_v19  ;;  %v1282_v0 = vpop.f32.mrf.mxu0 }
 0x1f8   : > { %v1387_v6 = vmax.f32 %v1291_v54, 0.0  ;;  %v1283_v28 = vadd.f32 %v2512_v19, %v1282_v0  ;;  %v1346_v30 = vpop.f32.mrf.mxu1 }
 0x1f9   : > { %v1403_v32 = vmax.f32 %v1355_v26, 0.0  ;;  %v1347_v33 = vadd.f32 %v2512_v19, %v1346_v30  ;;  %v1877_v47 = vpop.f32.mrf.mxu0 }
 0x1fa   : > { %v1822_v36 = vpack.c.bf16 %v1387_v6, %v1387_v6  ;;  %v1385_v37 = vmax.f32 %v1283_v28, 0.0  ;;  %v1294_v38 = vadd.f32 %v1877_v47, %v2512_v19  ;;  %v1893_v25 = vpop.f32.mrf.mxu1 }
 0x1fb   : > { %v1838_v12 = vpack.c.bf16 %v1403_v32, %v1403_v32  ;;  %v1401_v39 = vmax.f32 %v1347_v33, 0.0  ;;  %v1358_v49 = vadd.f32 %v1893_v25, %v2512_v19  ;;  %v1285_v43 = vpop.f32.mrf.mxu0 }
 0x1fc   : > { %1548 = vst.msk [vmem:[%s2520_s26 + $0x28] sm:$0xf] %vm1537_vm9, %v1822_v36  ;;  %v1820_v58 = vpack.c.bf16 %v1385_v37, %v1385_v37  ;;  %v1388_v45 = vmax.f32 %v1294_v38, 0.0  ;;  %v1286_v50 = vadd.f32 %v2512_v19, %v1285_v43  ;;  %v1349_v51 = vpop.f32.mrf.mxu1 }
 0x1fd   : > { %1564 = vst.msk [vmem:[%s2520_s26 + $0x68] sm:$0xf] %vm1537_vm9, %v1838_v12  ;;  %v1836_v24 = vpack.c.bf16 %v1401_v39, %v1401_v39  ;;  %v1404_v55 = vmax.f32 %v1358_v49, 0.0  ;;  %v1350_v56 = vadd.f32 %v2512_v19, %v1349_v51 }
 0x1fe   : > { %1546 = vst.msk [vmem:[%s2520_s26 + $0x20] sm:$0xf] %vm1537_vm9, %v1820_v58  ;;  %v1823_v2 = vpack.c.bf16 %v1388_v45, %v1388_v45  ;;  %v1386_v63 = vmax.f32 %v1286_v50, 0.0 }
 0x1ff   : > { %1562 = vst.msk [vmem:[%s2520_s26 + $0x60] sm:$0xf] %vm1537_vm9, %v1836_v24  ;;  %v1839_v31 = vpack.c.bf16 %v1404_v55, %v1404_v55  ;;  %v1402_v27 = vmax.f32 %v1350_v56, 0.0 }
 0x200   : > { %1549 = vst.msk [vmem:[%s2520_s26 + $0x2c] sm:$0xf] %vm1537_vm9, %v1823_v2  ;;  %v1821_v57 = vpack.c.bf16 %v1386_v63, %v1386_v63 }
 0x201   : > { %1565 = vst.msk [vmem:[%s2520_s26 + $0x6c] sm:$0xf] %vm1537_vm9, %v1839_v31  ;;  %v1837_v46 = vpack.c.bf16 %v1402_v27, %v1402_v27 }
 0x202   : > { %1547 = vst.msk [vmem:[%s2520_s26 + $0x24] sm:$0xf] %vm1537_vm9, %v1821_v57 }
 0x203   : > { %1563 = vst.msk [vmem:[%s2520_s26 + $0x64] sm:$0xf] %vm1537_vm9, %v1837_v46 }
 0x205   : > { %v1880_v44 = vpop.f32.mrf.mxu0 }
 0x206   : > { %v1307_v60 = vadd.f32 %v1880_v44, %v2512_v19  ;;  %v1896_v29 = vpop.f32.mrf.mxu1 }
 0x207   : > { %v1371_v48 = vadd.f32 %v1896_v29, %v2512_v19  ;;  %v1298_v34 = vpop.f32.mrf.mxu0 }
 0x208   : > { %v1391_v1 = vmax.f32 %v1307_v60, 0.0  ;;  %v1299_v3 = vadd.f32 %v2512_v19, %v1298_v34  ;;  %v1362_v5 = vpop.f32.mrf.mxu1 }
 0x209   : > { %v1407_v10 = vmax.f32 %v1371_v48, 0.0  ;;  %v1363_v11 = vadd.f32 %v2512_v19, %v1362_v5  ;;  %v1881_v41 = vpop.f32.mrf.mxu0 }
 0x20a   : > { %v1826_v4 = vpack.c.bf16 %v1391_v1, %v1391_v1  ;;  %v1389_v62 = vmax.f32 %v1299_v3, 0.0  ;;  %v1310_v40 = vadd.f32 %v1881_v41, %v2512_v19  ;;  %v1897_v13 = vpop.f32.mrf.mxu1 }
 0x20b   : > { %v1842_v14 = vpack.c.bf16 %v1407_v10, %v1407_v10  ;;  %v1405_v15 = vmax.f32 %v1363_v11, 0.0  ;;  %v1374_v16 = vadd.f32 %v1897_v13, %v2512_v19  ;;  %v1301_v52 = vpop.f32.mrf.mxu0 }
 0x20c   : > { %1552 = vst.msk [vmem:[%s2520_s26 + $0x38] sm:$0xf] %vm1537_vm9, %v1826_v4  ;;  %v1824_v42 = vpack.c.bf16 %v1389_v62, %v1389_v62  ;;  %v1392_v53 = vmax.f32 %v1310_v40, 0.0  ;;  %v1302_v17 = vadd.f32 %v2512_v19, %v1301_v52  ;;  %v1365_v20 = vpop.f32.mrf.mxu1 }
 0x20d   : > { %1568 = vst.msk [vmem:[%s2520_s26 + $0x78] sm:$0xf] %vm1537_vm9, %v1842_v14  ;;  %v1840_v35 = vpack.c.bf16 %v1405_v15, %v1405_v15  ;;  %v1408_v21 = vmax.f32 %v1374_v16, 0.0  ;;  %v1366_v22 = vadd.f32 %v2512_v19, %v1365_v20 }
 0x20e   : > { %1550 = vst.msk [vmem:[%s2520_s26 + $0x30] sm:$0xf] %vm1537_vm9, %v1824_v42  ;;  %v1827_v61 = vpack.c.bf16 %v1392_v53, %v1392_v53  ;;  %v1390_v18 = vmax.f32 %v1302_v17, 0.0 }
 0x20f   : > { %1566 = vst.msk [vmem:[%s2520_s26 + $0x70] sm:$0xf] %vm1537_vm9, %v1840_v35  ;;  %v1843_v59 = vpack.c.bf16 %v1408_v21, %v1408_v21  ;;  %v1406_v23 = vmax.f32 %v1366_v22, 0.0 }
 0x210   : > { %1553 = vst.msk [vmem:[%s2520_s26 + $0x3c] sm:$0xf] %vm1537_vm9, %v1827_v61  ;;  %v1825_v8 = vpack.c.bf16 %v1390_v18, %v1390_v18 }
 0x211   : > { %1569 = vst.msk [vmem:[%s2520_s26 + $0x7c] sm:$0xf] %vm1537_vm9, %v1843_v59  ;;  %v1841_v7 = vpack.c.bf16 %v1406_v23, %v1406_v23 }
 0x212   : > { %1551 = vst.msk [vmem:[%s2520_s26 + $0x34] sm:$0xf] %vm1537_vm9, %v1825_v8 }
 0x213   : > { %1567 = vst.msk [vmem:[%s2520_s26 + $0x74] sm:$0xf] %vm1537_vm9, %v1841_v7 }
 0x214 PF: > { %s15_s20 = sadd.s32 1, %s1994_s20   ;;  %s2631_s18 = smov %s1990_s19 }
 0x215   : > { %p12_p5 = scmp.ge.s32.totalorder %s15_s20, 6   ;;  %s2632_s19 = smov %s2634_s21 }
 0x217   :  { %14 = sbr.rel (!%p12_p5) target bundleno = 2 (0x2), region = 76 }

// kernel: _lambda_.13
= control target key start
LH: loop header
LB: loop body
LE: loop exit
PB: predicated region body
PF: predicated region fallthrough
CT: control target
= control target key end

     0   :  { %s2612_s18 = smov 0   ;;  %s2614_s19 = smov 0   ;;  %s3492_s0 = inlined_call_operand.vmem [shape: bf16[4,18,18,64], index: 0, kind: input, shape index: {}, may-alias: {0,1,2}]   ;;  %s3493_s1 = inlined_call_operand.vmem [shape: bf16[4,18,18,64], index: 1, kind: input, shape index: {}, may-alias: {0,1,2}]   ;;  %s3494_s2 = inlined_call_operand.vmem [shape: bf16[4,18,18,64], index: 2, kind: input, shape index: {}, may-alias: {0,1,2}]   ;;  %s3495_s3 = inlined_call_operand.vmem [shape: bf16[3,192,64], index: 3, kind: input, shape index: {}]   ;;  %s3496_s4 = inlined_call_operand.vmem [shape: f32[1,64], index: 4, kind: input, shape index: {}]   ;;  %s3497_s5 = inlined_call_operand.vmem [shape: bf16[4,16,16,64], index: 5, kind: output, shape index: {}]  }
   0x1   :  { %s2616_s20 = smov 0  }
   0x2 LB: > { %s27_s21 = sadd.s32 1, %s2574_s19  ;;  %p2185_p0 = scmp.ge.s32.totalorder %s2578_s20, 1  ;;  %s2578_s20 = sphi %s2616_s20, %s15_s20   ;;  %s2574_s19 = sphi %s2614_s19, %s3499_s19   ;;  %s2570_s18 = sphi %s2612_s18, %s3498_s18  }
   0x3   : > { %p29_p1 = scmp.ge.s32.totalorder %s27_s21, 4  ;;  %p267_p2 = scmp.lt.s32.totalorder %s2578_s20, 5 }
   0x5   : > { %s3501_s21 = smov (%p29_p1, %s27_s21), 0  ;;  %p268_p3 = pnand %p2185_p0, %p267_p2 }
   0x6   : > { %p338_p4 = scmp.lt.s32.totalorder (!%p268_p3), %s2570_s18, 3  ;;  %s2581_s14 = smov (!%p268_p3), 64  }
   0x7   : > { %271 = sbr.rel (%p268_p3) target bundleno = 534 (0x216), region = 40 }
   0xc   : > { %v2518_v0 = vld [vmem:[%s3495_s3 + $0x98] sm:$0xff]   ;;  %v2580_v1 = vmov 0   ;;  %s3503_s18 = smov (!%p338_p4, %s2570_s18), 3  ;;  %v2519_v2 = vld [vmem:[%s3495_s3 + $0x90] sm:$0xff]   ;;  %vm573_vm0 = vsmask.f32 7424 }
   0xd   : > { %2431 = vmatprep.subr.bf16.mxu1 %v2580_v1  ;;  %1093 = vmatprep.subr.bf16.mxu0 %v2580_v1  ;;  %s2643_s26 = smul.u32 216, %s3503_s18  ;;  %v2520_v3 = vld [vmem:[%s3495_s3 + $0x88] sm:$0xff]   ;;  %v2521_v6 = vld [vmem:[%s3495_s3 + $0x80] sm:$0xff]   ;;  %v2522_v18 = vld [vmem:[%s3495_s3 + $0x78] sm:$0xff]   ;;  %vm798_vm1 = vcmask 1046528   ;;  %vm847_vm2 = vcmask 523264  }
   0xe   : > { %2443 = vmatpush1.bf16.msra.mxu1 %v2518_v0  ;;  %1094 = vmatpush1.bf16.msra.mxu0 %v2518_v0  ;;  %v2523_v34 = vld [vmem:[%s3495_s3 + $0x70] sm:$0xff]   ;;  %s2398_s25 = sshll.u32 %s3503_s18, 7  ;;  %vm2010_vm3 = vcmask 519168  }
   0xf   : > { %2432 = vmatprep.subr.bf16.mxu1 %v2580_v1  ;;  %1095 = vmatprep.subr.bf16.mxu0 %v2580_v1  ;;  %s2649_s29 = scalar_lea.vmem %s3492_s0, %s2643_s26  ;;  %s2395_s9 = sadd.s32 192, %s2643_s26 }
  0x10   : > { %v2657_v4 = vld [vmem:[%s2649_s29 + $0x6c] sm:$0xff]   ;;  %v2660_v5 = vld [vmem:[%s2649_s29 + $0x74] ss:$0 sps:$4 sm:$0x11]   ;;  %v2681_v17 = vld [vmem:[%s2649_s29 + $0x78] sm:$0xff]   ;;  %s363_s17 = scalar_lea.vmem %s3493_s1, %s2395_s9  ;;  %s2397_s10 = sadd.s32 204, %s2643_s26 }
  0x11   : > { %v2666_v7 = vld [vmem:[%s2649_s29 + $0xc] sm:$0xff]   ;;  %v683_v8 = vshrl.u32 %v2657_v4, 16  ;;  %v685_v9 = vshll.u32 %v2657_v4, 16  ;;  %v690_v10 = vshll.u32 %v2660_v5, 16  ;;  %v695_v23 = vshrl.u32 %v2681_v17, 16  ;;  %v2692_v25 = vld [vmem:[%s2649_s29 + $0x18] sm:$0xff]   ;;  %s376_s13 = scalar_lea.vmem %s3494_s2, %s2397_s10 }
  0x12   : > { %2444 = vmatpush1.bf16.msra.mxu1 %v2519_v2  ;;  %1096 = vmatpush1.bf16.msra.mxu0 %v2519_v2  ;;  %v2673_v11 = vld [vmem:[%s2649_s29 + $0x14] ss:$0 sps:$4 sm:$0x11]   ;;  %v587_v12 = vshrl.u32 %v2666_v7, 16  ;;  %v589_v13 = vshll.u32 %v2666_v7, 16  ;;  %v697_v24 = vshll.u32 %v2681_v17, 16 }
  0x13   : > { %2433 = vmatprep.subr.bf16.mxu1 %v2580_v1  ;;  %1097 = vmatprep.subr.bf16.mxu0 %v2580_v1  ;;  %v687_v14 = vrot.slane %v685_v9, 1  ;;  %v692_v15 = vrot.slane %v690_v10, 1  ;;  %v594_v16 = vshll.u32 %v2673_v11, 16  ;;  %v2687_v20 = vld [vmem:[%s2649_s29 + $0x80] ss:$0 sps:$4 sm:$0x11]  }
  0x14   : > { %v591_v19 = vrot.slane %v589_v13, 1  ;;  %v702_v27 = vshll.u32 %v2687_v20, 16  ;;  %v2696_v28 = vld [vmem:[%s2649_s29 + $0x20] ss:$0 sps:$4 sm:$0x11]   ;;  %v699_v30 = vrot.slane %v697_v24, 1 }
  0x15   : > { %v688_v21 = vor.u32 %v687_v14, %v683_v8  ;;  %v596_v22 = vrot.slane %v594_v16, 1  ;;  %v599_v31 = vshrl.u32 %v2692_v25, 16  ;;  %v601_v32 = vshll.u32 %v2692_v25, 16  ;;  %v2704_v33 = vld [vmem:[%s2649_s29 + $0x84] sm:$0xff]   ;;  %v2732_v52 = vld [vmem:[%s2649_s29 + $0x90] sm:$0xff]   ;;  %v2753_v8 = vld [vmem:[%s2649_s29 + $0x9c] sm:$0xff]  }
  0x16   : > { %2445 = vmatpush1.bf16.msra.mxu1 %v2520_v3  ;;  %1098 = vmatpush1.bf16.msra.mxu0 %v2520_v3  ;;  %v592_v26 = vor.u32 %v591_v19, %v587_v12  ;;  %v704_v36 = vrot.slane %v702_v27, 1  ;;  %v606_v37 = vshll.u32 %v2696_v28, 16  ;;  %v700_v38 = vor.u32 %v699_v30, %v695_v23  ;;  %v2713_v40 = vld [vmem:[%s2649_s29 + $0x8c] ss:$0 sps:$4 sm:$0x11]   ;;  %v2718_v44 = vld [vmem:[%s2649_s29 + $0x24] sm:$0xff]  }
  0x17   : > { %2434 = vmatprep.subr.bf16.mxu1 %v2580_v1  ;;  %1099 = vmatprep.subr.bf16.mxu0 %v2580_v1  ;;  %v693_v29 = vsel %vm573_vm0, %v688_v21, %v692_v15  ;;  %v603_v39 = vrot.slane %v601_v32, 1  ;;  %v707_v41 = vshrl.u32 %v2704_v33, 16  ;;  %v709_v42 = vshll.u32 %v2704_v33, 16  ;;  %v2727_v49 = vld [vmem:[%s2649_s29 + $0x2c] ss:$0 sps:$4 sm:$0x11]  }
  0x18   : > { %784 = vrot.lane.b32.xlu0 %v693_v29, %s2581_s14  ;;  %v597_v35 = vsel %vm573_vm0, %v592_v26, %v596_v22  ;;  %v608_v43 = vrot.slane %v606_v37, 1  ;;  %v705_v45 = vsel %vm573_vm0, %v700_v38, %v704_v36  ;;  %v714_v48 = vshll.u32 %v2713_v40, 16  ;;  %v2736_v56 = vld [vmem:[%s2649_s29 + $0x30] sm:$0xff]   ;;  %v2740_v59 = vld [vmem:[%s2649_s29 + $0x98] ss:$0 sps:$4 sm:$0x11]  }
  0x19   : > { %v604_v46 = vor.u32 %v603_v39, %v599_v31  ;;  %v711_v47 = vrot.slane %v709_v42, 1  ;;  %786 = vrot.lane.b32.xlu1 %v705_v45, %s2581_s14  ;;  %v611_v50 = vshrl.u32 %v2718_v44, 16  ;;  %v613_v51 = vshll.u32 %v2718_v44, 16  ;;  %v2756_v10 = vld [vmem:[%s2649_s29 + $0x38] ss:$0 sps:$4 sm:$0x11]  }
  0x1a   : > { %2446 = vmatpush1.bf16.msra.mxu1 %v2521_v6  ;;  %1100 = vmatpush1.bf16.msra.mxu0 %v2521_v6  ;;  %v716_v55 = vrot.slane %v714_v48, 1  ;;  %v618_v58 = vshll.u32 %v2727_v49, 16  ;;  %v719_v60 = vshrl.u32 %v2732_v52, 16  ;;  %v721_v62 = vshll.u32 %v2732_v52, 16  ;;  %v2769_v29 = vld [vmem:[%s2649_s29 + $0x3c] sm:$0xff]   ;;  %v2776_v31 = vld [vmem:[%s2649_s29 + $0xa8] sm:$0xff]  }
  0x1b   : > { %2435 = vmatprep.subr.bf16.mxu1 %v2580_v1  ;;  %1101 = vmatprep.subr.bf16.mxu0 %v2580_v1  ;;  %v609_v53 = vsel %vm573_vm0, %v604_v46, %v608_v43  ;;  %v712_v54 = vor.u32 %v711_v47, %v707_v41  ;;  %v615_v57 = vrot.slane %v613_v51, 1  ;;  %v623_v63 = vshrl.u32 %v2736_v56, 16  ;;  %v2773_v30 = vld [vmem:[%s2649_s29 + $0x44] ss:$0 sps:$4 sm:$0x11]   ;;  %v2790_v45 = vld [vmem:[%s2649_s29 + $0x48] sm:$0xff]  }
  0x1c   : > { %768 = vrot.lane.b32.xlu0 %v597_v35, %s2581_s14  ;;  %v620_v2 = vrot.slane %v618_v58, 1  ;;  %v726_v3 = vshll.u32 %v2740_v59, 16  ;;  %v625_v6 = vshll.u32 %v2736_v56, 16  ;;  %v723_v9 = vrot.slane %v721_v62, 1 }
  0x1d   : > { %v717_v61 = vsel %vm573_vm0, %v712_v54, %v716_v55  ;;  %770 = vrot.lane.b32.xlu1 %v609_v53, %s2581_s14  ;;  %v616_v0 = vor.u32 %v615_v57, %v611_v50  ;;  %v630_v16 = vshll.u32 %v2756_v10, 16  ;;  %v731_v19 = vshrl.u32 %v2753_v8, 16  ;;  %v2784_v39 = vld [vmem:[%s2649_s29 + $0xb0] ss:$0 sps:$4 sm:$0x11]   ;;  %v2800_v55 = vld [vmem:[%s2649_s29 + $0xb4] sm:$0xff]  }
  0x1e   : > { %2447 = vmatpush1.bf16.msra.mxu1 %v2522_v18  ;;  %1102 = vmatpush1.bf16.msra.mxu0 %v2522_v18  ;;  %v728_v13 = vrot.slane %v726_v3, 1  ;;  %v627_v14 = vrot.slane %v625_v6, 1  ;;  %v724_v15 = vor.u32 %v723_v9, %v719_v60  ;;  %v2761_v18 = vld [vmem:[%s2649_s29 + $0xa4] ss:$0 sps:$4 sm:$0x11]   ;;  %v733_v21 = vshll.u32 %v2753_v8, 16 }
  0x1f   : > { %2436 = vmatprep.subr.bf16.mxu1 %v2580_v1  ;;  %1103 = vmatprep.subr.bf16.mxu0 %v2580_v1  ;;  %v621_v12 = vsel %vm573_vm0, %v616_v0, %v620_v2  ;;  %v632_v24 = vrot.slane %v630_v16, 1  ;;  %v738_v27 = vshll.u32 %v2761_v18, 16  ;;  %v635_v36 = vshrl.u32 %v2769_v29, 16  ;;  %v2795_v50 = vld [vmem:[%s2649_s29 + $0x50] ss:$0 sps:$4 sm:$0x11]  }
  0x20   : > { %788 = vrot.lane.b32.xlu0 %v717_v61, %s2581_s14  ;;  %v628_v22 = vor.u32 %v627_v14, %v623_v63  ;;  %v729_v23 = vsel %vm573_vm0, %v724_v15, %v728_v13  ;;  %v735_v26 = vrot.slane %v733_v21, 1  ;;  %v637_v37 = vshll.u32 %v2769_v29, 16  ;;  %v2804_v63 = vld [vmem:[%s2649_s29 + $0xbc] ss:$0 sps:$4 sm:$0x11]   ;;  %v2815_v9 = vld [vmem:[%s2649_s29 + $0x54] sm:$0xff]  }
  0x21   : > { %772 = vrot.lane.b32.xlu1 %v621_v12, %s2581_s14  ;;  %v740_v35 = vrot.slane %v738_v27, 1  ;;  %v642_v38 = vshll.u32 %v2773_v30, 16  ;;  %v743_v41 = vshrl.u32 %v2776_v31, 16  ;;  %v745_v43 = vshll.u32 %v2776_v31, 16  ;;  %v2830_v27 = vld [vmem:[%s2649_s29 + $0x60] sm:$0xff]  }
  0x22   : > { %2448 = vmatpush1.bf16.msra.mxu1 %v2523_v34  ;;  %1104 = vmatpush1.bf16.msra.mxu0 %v2523_v34  ;;  %v633_v32 = vsel %vm573_vm0, %v628_v22, %v632_v24  ;;  %v736_v34 = vor.u32 %v735_v26, %v731_v19  ;;  %v639_v46 = vrot.slane %v637_v37, 1  ;;  %v750_v48 = vshll.u32 %v2784_v39, 16  ;;  %v2822_v16 = vld [vmem:[%s2649_s29 + $0x5c] ss:$0 sps:$4 sm:$0x11]   ;;  %v2826_v22 = vld [vmem:[%s363_s17] sm:$0xff]  }
  0x23   : > { %2437 = vmatprep.subr.bf16.mxu1 %v2580_v1  ;;  %1105 = vmatprep.subr.bf16.mxu0 %v2580_v1  ;;  %v644_v47 = vrot.slane %v642_v38, 1  ;;  %v747_v51 = vrot.slane %v745_v43, 1  ;;  %v647_v53 = vshrl.u32 %v2790_v45, 16  ;;  %v649_v54 = vshll.u32 %v2790_v45, 16 }
  0x24   : > { %790 = vrot.lane.b32.xlu0 %v729_v23, %s2581_s14  ;;  %v741_v42 = vsel %vm573_vm0, %v736_v34, %v740_v35  ;;  %v640_v57 = vor.u32 %v639_v46, %v635_v36  ;;  %v752_v58 = vrot.slane %v750_v48, 1  ;;  %v654_v60 = vshll.u32 %v2795_v50, 16  ;;  %v2833_v35 = vld [vmem:[%s363_s17 + $0x8] ss:$0 sps:$4 sm:$0x11]   ;;  %v2844_v48 = vld [vmem:[%s2649_s29] sm:$0xff]  }
  0x25   : > { %774 = vrot.lane.b32.xlu1 %v633_v32, %s2581_s14  ;;  %v748_v61 = vor.u32 %v747_v51, %v743_v41  ;;  %v651_v62 = vrot.slane %v649_v54, 1  ;;  %v755_v0 = vshrl.u32 %v2800_v55, 16  ;;  %v757_v2 = vshll.u32 %v2800_v55, 16 }
  0x26   : > { %v645_v3 = vsel %vm573_vm0, %v640_v57, %v644_v47  ;;  %v656_v6 = vrot.slane %v654_v60, 1  ;;  %v762_v15 = vshll.u32 %v2804_v63, 16  ;;  %v659_v19 = vshrl.u32 %v2815_v9, 16 }
  0x27   : > { %v753_v12 = vsel %vm573_vm0, %v748_v61, %v752_v58  ;;  %v652_v13 = vor.u32 %v651_v62, %v647_v53  ;;  %v759_v14 = vrot.slane %v757_v2, 1  ;;  %v661_v21 = vshll.u32 %v2815_v9, 16  ;;  %v2847_v53 = vld [vmem:[%s2649_s29 + $0x68] ss:$0 sps:$4 sm:$0x11]  }
  0x28   : > { %792 = vrot.lane.b32.xlu0 %v741_v42, %s2581_s14  ;;  %v764_v26 = vrot.slane %v762_v15, 1  ;;  %v666_v34 = vshll.u32 %v2822_v16, 16  ;;  %v929_v36 = vshrl.u32 %v2826_v22, 16  ;;  %v931_v38 = vshll.u32 %v2826_v22, 16 }
  0x29   : > { %776 = vrot.lane.b32.xlu1 %v645_v3, %s2581_s14  ;;  %v657_v23 = vsel %vm573_vm0, %v652_v13, %v656_v6  ;;  %v760_v24 = vor.u32 %v759_v14, %v755_v0  ;;  %v663_v32 = vrot.slane %v661_v21, 1  ;;  %v671_v41 = vshrl.u32 %v2830_v27, 16  ;;  %v2853_v62 = vld [vmem:[%s2649_s29 + $0x8] ss:$0 sps:$4 sm:$0x11]   ;;  %v2525_v21 = vld [vmem:[%s3495_s3 + $0x60] sm:$0xff]   ;;  %s3356_s29 = scalar_lea.vmem %s3497_s5, %s2398_s25 }
  0x2a   : > { %v668_v43 = vrot.slane %v666_v34, 1  ;;  %v936_v46 = vshll.u32 %v2833_v35, 16  ;;  %v673_v47 = vshll.u32 %v2830_v27, 16  ;;  %v933_v51 = vrot.slane %v931_v38, 1  ;;  %v2524_v6 = vld [vmem:[%s3495_s3 + $0x68] sm:$0xff]   ;;  %v2526_v38 = vld [vmem:[%s3495_s3 + $0xb8] sm:$0xff]  }
  0x2b   : > { %v765_v37 = vsel %vm573_vm0, %v760_v24, %v764_v26  ;;  %v664_v42 = vor.u32 %v663_v32, %v659_v19  ;;  %v678_v61 = vshll.u32 %v2847_v53, 16  ;;  %v575_v0 = vshrl.u32 %v2844_v48, 16  ;;  %2449 = vmatpush1.bf16.msra.mxu1 %v2524_v6  ;;  %1106 = vmatpush1.bf16.msra.mxu0 %v2524_v6  ;;  %v2530_v6 = vld [vmem:[%s3495_s3 + $0x38] sm:$0xff]  }
  0x2c   : > { %794 = vrot.lane.b32.xlu0 %v753_v12, %s2581_s14  ;;  %v938_v57 = vrot.slane %v936_v46, 1  ;;  %v675_v58 = vrot.slane %v673_v47, 1  ;;  %v934_v60 = vor.u32 %v933_v51, %v929_v36  ;;  %v577_v2 = vshll.u32 %v2844_v48, 16  ;;  %2438 = vmatprep.subr.bf16.mxu1 %v2580_v1  ;;  %v2912_v46 = vld [vmem:[%s376_s13] sm:$0xff]  }
  0x2d   : > { %778 = vrot.lane.b32.xlu1 %v657_v23, %s2581_s14  ;;  %v669_v54 = vsel %vm573_vm0, %v664_v42, %v668_v43  ;;  %v826_v12 = vrot.slane %v2657_v4, 1  ;;  %v680_v14 = vrot.slane %v678_v61, 1  ;;  %v582_v19 = vshll.u32 %v2853_v62, 16  ;;  %1107 = vmatprep.subr.bf16.mxu0 %v2580_v1  ;;  %v2528_v42 = vld [vmem:[%s3495_s3 + $0xa8] sm:$0xff]   ;;  %v2529_v43 = vld [vmem:[%s3495_s3 + $0xa0] sm:$0xff]  }
  0x2e   : > { %v676_v3 = vor.u32 %v675_v58, %v671_v41  ;;  %v939_v13 = vsel %vm573_vm0, %v934_v60, %v938_v57  ;;  %v579_v15 = vrot.slane %v577_v2, 1  ;;  %v827_v23 = vrot.slane %v2660_v5, 1  ;;  %v2914_v47 = vld [vmem:[%s376_s13 + $0x8] ss:$0 sps:$4 sm:$0x11]  }
  0x2f   : > { %v584_v32 = vrot.slane %v582_v19, 1  ;;  %v802_v36 = vrot.slane %v2666_v7, 1  ;;  %v803_v5 = vrot.slane %v2673_v11, 1  ;;  %2450 = vmatpush1.bf16.msra.mxu1 %v2525_v21  ;;  %1108 = vmatpush1.bf16.msra.mxu0 %v2525_v21  ;;  %v2527_v11 = vld [vmem:[%s3495_s3 + $0xb0] sm:$0xff]   ;;  %v1499_v51 = vshrl.u32 %v2912_v46, 16 }
  0x30   : > { %796 = vrot.lane.b32.xlu0 %v765_v37, %s2581_s14  ;;  %v681_v24 = vsel %vm573_vm0, %v676_v3, %v680_v14  ;;  %v580_v26 = vor.u32 %v579_v15, %v575_v0  ;;  %v2873_v34 = vsel %vm798_vm1, %v826_v12, %v827_v23  ;;  %2439 = vmatprep.subr.bf16.mxu1 %v2580_v1  ;;  %v1506_v57 = vshll.u32 %v2914_v47, 16  ;;  %v2532_v21 = vld [vmem:[%s3495_s3 + $0x30] sm:$0xff]  }
  0x31   : > { %780 = vrot.lane.b32.xlu1 %v669_v54, %s2581_s14  ;;  %2269 = vmatprep.mubr.msk.bf16.mxu1 %vm847_vm2, %v2873_v34  ;;  %v2886_v41 = vsel %vm798_vm1, %v802_v36, %v803_v5  ;;  %v1501_v54 = vshll.u32 %v2912_v46, 16  ;;  %v829_v2 = vrot.slane %v2681_v17, 1  ;;  %v830_v3 = vrot.slane %v2687_v20, 1  ;;  %v2531_v20 = vld [vmem:[%s3495_s3 + $0xf8] sm:$0xff]  }
  0x32   : > { %v585_v37 = vsel %vm573_vm0, %v580_v26, %v584_v32  ;;  %1117 = vmatprep.subr.bf16.mxu0 %v2580_v1  ;;  %2261 = vmatprep.mubr.msk.bf16.mxu0 %vm847_vm2, %v2886_v41  ;;  %v1508_v60 = vrot.slane %v1506_v57, 1  ;;  %v805_v15 = vrot.slane %v2692_v25, 1  ;;  %v806_v19 = vrot.slane %v2696_v28, 1 }
  0x33   : > { %2451 = vmatpush2.bf16.msra.mxu1 %v2526_v38  ;;  %1118 = vmatpush2.bf16.msra.mxu0 %v2526_v38  ;;  %v1503_v58 = vrot.slane %v1501_v54, 1  ;;  %v832_v26 = vrot.slane %v2704_v33, 1  ;;  %v833_v32 = vrot.slane %v2713_v40, 1  ;;  %v808_v40 = vrot.slane %v2718_v44, 1 }
  0x34   : > { %940 = vrot.lane.b32.xlu0 %v939_v13, %s2581_s14  ;;  %2440 = vmatprep.subr.bf16.mxu1 %v2580_v1  ;;  %v2927_v13 = vsel %vm798_vm1, %v829_v2, %v830_v3  ;;  %v809_v38 = vrot.slane %v2727_v49, 1  ;;  %v835_v49 = vrot.slane %v2732_v52, 1  ;;  %v2539_v3 = vld [vmem:[%s3495_s3 + $0xd8] sm:$0xff]  }
  0x35   : > { %782 = vrot.lane.b32.xlu1 %v681_v24, %s2581_s14  ;;  %1119 = vmatprep.subr.bf16.mxu0 %v2580_v1  ;;  %v1504_v61 = vor.u32 %v1503_v58, %v1499_v51  ;;  %v2950_v24 = vsel %vm798_vm1, %v805_v15, %v806_v19  ;;  %v2537_v58 = vld [vmem:[%s3495_s3 + $0xe0] sm:$0xff]   ;;  %v839_v15 = vrot.slane %v2761_v18, 1 }
  0x36   : > { %v2992_v54 = vsel %vm798_vm1, %v808_v40, %v809_v38 }
  0x37   : > { %2452 = vmatpush2.bf16.msra.mxu1 %v2527_v11  ;;  %1120 = vmatpush2.bf16.msra.mxu0 %v2527_v11  ;;  %v1509_v0 = vsel %vm573_vm0, %v1504_v61, %v1508_v60  ;;  %v2538_v61 = vld [vmem:[%s3495_s3 + $0x18] sm:$0xff]  }
  0x38   : > { %766 = vrot.lane.b32.xlu0 %v585_v37, %s2581_s14  ;;  %2441 = vmatprep.subr.bf16.mxu1 %v2580_v1  ;;  %v2534_v37 = vld [vmem:[%s3495_s3 + $0x28] sm:$0xff]  }
  0x39   : > { %1121 = vmatprep.subr.bf16.mxu0 %v2580_v1  ;;  %1510 = vrot.lane.b32.xlu1 %v1509_v0, %s2581_s14  ;;  %v812_v0 = vrot.slane %v2756_v10, 1 }
  0x3b   : > { %2453 = vmatpush2.bf16.msra.mxu1 %v2528_v42  ;;  %1122 = vmatpush2.bf16.msra.mxu0 %v2528_v42  ;;  %v2535_v42 = vld [vmem:[%s3495_s3 + $0xe8] sm:$0xff]  }
  0x3c   : > { %2442 = vmatprep.subr.bf16.mxu1 %v2580_v1  ;;  %1123 = vmatprep.subr.bf16.mxu0 %v2580_v1 }
  0x3f   : > { %2454 = vmatpush2.bf16.msra.mxu1 %v2529_v43  ;;  %1124 = vmatpush2.bf16.msra.mxu0 %v2529_v43  ;;  %v2536_v43 = vld [vmem:[%s3495_s3 + $0x20] sm:$0xff]  }
  0x40   : > { %1329 = vmatprep.subr.bf16.mxu1 %v2580_v1  ;;  %1618 = vmatprep.subr.bf16.mxu0 %v2580_v1 }
  0x8a   : > { %v785_v12 = vpop.permute.xlu0 %784 }
  0x8b   : > { %v2931_v14 = vsel %vm847_vm2, %v2657_v4, %v785_v12  ;;  %v787_v23 = vpop.permute.xlu1 %786  ;;  %v838_v12 = vrot.slane %v2753_v8, 1 }
  0x8c   : > { %1190 = vmatmul.mubr.bf16.vlgmr.msra.gmra.mxu1 %v2931_v14  ;;  %v2957_v36 = vsel %vm847_vm2, %v2681_v17, %v787_v23  ;;  %v2970_v17 = vsel %vm798_vm1, %v832_v26, %v833_v32  ;;  %v815_v23 = vrot.slane %v2773_v30, 1  ;;  %v2543_v32 = vld [vmem:[%s3495_s3 + $0xc8] sm:$0xff]  }
  0x8d   : > { %1330 = vmatpush1.bf16.msra.mxu1 %v2530_v6  ;;  %2270 = vmatprep.mubr.msk.bf16.mxu1 %vm847_vm2, %v2927_v13  ;;  %v3046_v18 = vsel %vm798_vm1, %v838_v12, %v839_v15 }
  0x8e   : > { %v769_v4 = vpop.permute.xlu0 %768  ;;  %1331 = vmatprep.subr.bf16.mxu1 %v2580_v1 }
  0x8f   : > { %v2947_v28 = vsel %vm847_vm2, %v2666_v7, %v769_v4  ;;  %v2533_v7 = vld [vmem:[%s3495_s3 + $0xf0] sm:$0xff]   ;;  %v771_v5 = vpop.permute.xlu1 %770  ;;  %v814_v4 = vrot.slane %v2769_v29, 1 }
  0x90   : > { %1126 = vmatmul.mubr.bf16.vlgmr.msra.gmra.mxu0 %v2947_v28  ;;  %v2977_v11 = vsel %vm847_vm2, %v2692_v25, %v771_v5  ;;  %v836_v25 = vrot.slane %v2740_v59, 1  ;;  %v2544_v5 = vld [vmem:[%s3495_s3] sm:$0xff]  }
  0x91   : > { %1619 = vmatpush1.bf16.msra.mxu0 %v2531_v20  ;;  %1332 = vmatpush1.bf16.msra.mxu1 %v2532_v21  ;;  %v2541_v20 = vld [vmem:[%s3495_s3 + $0xd0] sm:$0xff]   ;;  %v3065_v30 = vsel %vm798_vm1, %v814_v4, %v815_v23 }
  0x92   : > { %1620 = vmatprep.subr.bf16.mxu0 %v2580_v1  ;;  %2262 = vmatprep.mubr.msk.bf16.mxu0 %vm847_vm2, %v2950_v24  ;;  %v789_v51 = vpop.permute.xlu0 %788  ;;  %v3006_v59 = vsel %vm798_vm1, %v835_v49, %v836_v25 }
  0x93   : > { %1333 = vmatprep.subr.bf16.mxu1 %v2580_v1  ;;  %v2997_v57 = vsel %vm847_vm2, %v2704_v33, %v789_v51  ;;  %v773_v60 = vpop.permute.xlu1 %772  ;;  %v811_v33 = vrot.slane %v2736_v56, 1  ;;  %v2546_v51 = vld [vmem:[%s3495_s3 + $0x58] sm:$0xff]  }
  0x94   : > { %1198 = vmatmul.mubr.bf16.gmra.mxu1 %v2957_v36  ;;  %v3017_v2 = vsel %vm847_vm2, %v2718_v44, %v773_v60  ;;  %v2540_v44 = vld [vmem:[%s3495_s3 + $0x10] sm:$0xff]   ;;  %v844_v60 = vrot.slane %v2800_v55, 1 }
  0x95   : > { %1621 = vmatpush1.bf16.msra.mxu0 %v2533_v7  ;;  %1334 = vmatpush1.bf16.msra.mxu1 %v2534_v37  ;;  %v3026_v10 = vsel %vm798_vm1, %v811_v33, %v812_v0  ;;  %v841_v37 = vrot.slane %v2776_v31, 1 }
  0x96   : > { %1622 = vmatprep.subr.bf16.mxu0 %v2580_v1  ;;  %2271 = vmatprep.mubr.msk.bf16.mxu1 %vm847_vm2, %v2970_v17  ;;  %v791_v6 = vpop.permute.xlu0 %790 }
  0x97   : > { %1335 = vmatprep.subr.bf16.mxu1 %v2580_v1  ;;  %v3037_v19 = vsel %vm847_vm2, %v2732_v52, %v791_v6  ;;  %v775_v21 = vpop.permute.xlu1 %774  ;;  %v2542_v52 = vld [vmem:[%s3495_s3 + $0x8] sm:$0xff]   ;;  %v820_v6 = vrot.slane %v2815_v9, 1 }
  0x98   : > { %1134 = vmatmul.mubr.bf16.gmra.mxu0 %v2977_v11  ;;  %v3057_v26 = vsel %vm847_vm2, %v2736_v56, %v775_v21  ;;  %v842_v56 = vrot.slane %v2784_v39, 1  ;;  %v2545_v39 = vld [vmem:[%s3495_s3 + $0xc0] sm:$0xff]   ;;  %v942_v21 = vrot.slane %v2826_v22, 1 }
  0x99   : > { %1623 = vmatpush1.bf16.msra.mxu0 %v2535_v42  ;;  %1336 = vmatpush1.bf16.msra.mxu1 %v2536_v43  ;;  %v817_v43 = vrot.slane %v2790_v45, 1 }
  0x9a   : > { %2263 = vmatprep.mubr.msk.bf16.mxu0 %vm847_vm2, %v2992_v54  ;;  %1624 = vmatprep.subr.bf16.mxu0 %v2580_v1  ;;  %v793_v7 = vpop.permute.xlu0 %792  ;;  %v3085_v42 = vsel %vm798_vm1, %v841_v37, %v842_v56  ;;  %v824_v37 = vrot.slane %v2847_v53, 1 }
  0x9b   : > { %1337 = vmatprep.subr.bf16.mxu1 %v2580_v1  ;;  %v3077_v40 = vsel %vm847_vm2, %v2753_v8, %v793_v7  ;;  %v777_v38 = vpop.permute.xlu1 %776  ;;  %v818_v8 = vrot.slane %v2795_v50, 1  ;;  %v2547_v50 = vld [vmem:[%s3495_s3 + $0x118] sm:$0xff]   ;;  %v823_v7 = vrot.slane %v2830_v27, 1 }
  0x9c   : > { %1206 = vmatmul.mubr.bf16.gmra.mxu1 %v2997_v57  ;;  %v3097_v49 = vsel %vm847_vm2, %v2769_v29, %v777_v38  ;;  %v845_v29 = vrot.slane %v2804_v63, 1  ;;  %v2549_v63 = vld [vmem:[%s3495_s3 + $0x110] sm:$0xff]   ;;  %v800_v38 = vrot.slane %v2853_v62, 1 }
  0x9d   : > { %1625 = vmatpush1.bf16.msra.mxu0 %v2537_v58  ;;  %2272 = vmatprep.mubr.msk.bf16.mxu1 %vm847_vm2, %v3006_v59  ;;  %v3105_v58 = vsel %vm798_vm1, %v817_v43, %v818_v8 }
  0x9e   : > { %1338 = vmatpush1.bf16.msra.mxu1 %v2538_v61  ;;  %1626 = vmatprep.subr.bf16.mxu0 %v2580_v1  ;;  %v795_v25 = vpop.permute.xlu0 %794  ;;  %v2548_v61 = vld [vmem:[%s3495_s3 + $0x50] sm:$0xff]  }
  0x9f   : > { %1339 = vmatprep.subr.bf16.mxu1 %v2580_v1  ;;  %v3117_v33 = vsel %vm847_vm2, %v2776_v31, %v795_v25  ;;  %v779_v0 = vpop.permute.xlu1 %778  ;;  %v2550_v31 = vld [vmem:[%s3495_s3 + $0x48] sm:$0xff]  }
  0xa0   : > { %1142 = vmatmul.mubr.bf16.gmra.mxu0 %v3017_v2  ;;  %v3137_v12 = vsel %vm847_vm2, %v2790_v45, %v779_v0  ;;  %v2552_v45 = vld [vmem:[%s3495_s3 + $0x40] sm:$0xff]  }
  0xa1   : > { %1627 = vmatpush1.bf16.msra.mxu0 %v2539_v3  ;;  %2264 = vmatprep.mubr.msk.bf16.mxu0 %vm847_vm2, %v3026_v10  ;;  %v3125_v3 = vsel %vm798_vm1, %v844_v60, %v845_v29 }
  0xa2   : > { %1340 = vmatpush1.bf16.msra.mxu1 %v2540_v44  ;;  %1628 = vmatprep.subr.bf16.mxu0 %v2580_v1  ;;  %v821_v44 = vrot.slane %v2822_v16, 1  ;;  %v2551_v16 = vld [vmem:[%s3495_s3 + $0x108] sm:$0xff]   ;;  %v797_v15 = vpop.permute.xlu0 %796 }
  0xa3   : > { %1341 = vmatprep.subr.bf16.mxu1 %v2580_v1  ;;  %v3157_v4 = vsel %vm847_vm2, %v2800_v55, %v797_v15  ;;  %v781_v23 = vpop.permute.xlu1 %780 }
  0xa4   : > { %1214 = vmatmul.mubr.bf16.gmra.mxu1 %v3037_v19  ;;  %v870_v55 = vsel %vm847_vm2, %v2815_v9, %v781_v23 }
  0xa5   : > { %2273 = vmatprep.mubr.msk.bf16.mxu1 %vm847_vm2, %v3046_v18  ;;  %1629 = vmatpush1.bf16.msra.mxu0 %v2541_v20  ;;  %v3145_v20 = vsel %vm798_vm1, %v820_v6, %v821_v44 }
  0xa6   : > { %1342 = vmatpush1.bf16.msra.mxu1 %v2542_v52  ;;  %1630 = vmatprep.subr.bf16.mxu0 %v2580_v1  ;;  %v943_v52 = vrot.slane %v2833_v35, 1  ;;  %v2553_v35 = vld [vmem:[%s3495_s3 + $0x100] sm:$0xff]   ;;  %v941_v56 = vpop.permute.xlu0 %940 }
  0xa7   : > { %1343 = vmatprep.subr.bf16.mxu1 %v2580_v1  ;;  %v783_v53 = vpop.permute.xlu1 %782 }
  0xa8   : > { %1150 = vmatmul.mubr.bf16.gmra.mxu0 %v3057_v26  ;;  %v873_v43 = vsel %vm847_vm2, %v2830_v27, %v783_v53  ;;  %v1513_v27 = vrot.slane %v2914_v47, 1 }
  0xa9   : > { %2265 = vmatprep.mubr.msk.bf16.mxu0 %vm847_vm2, %v3065_v30  ;;  %1631 = vmatpush1.bf16.msra.mxu0 %v2543_v32  ;;  %v3165_v32 = vsel %vm798_vm1, %v942_v21, %v943_v52 }
  0xaa   : > { %1344 = vmatpush1.bf16.msra.mxu1 %v2544_v5  ;;  %1632 = vmatprep.subr.bf16.mxu0 %v2580_v1  ;;  %v825_v5 = vsel %vm798_vm1, %v823_v7, %v824_v37  ;;  %v767_v8 = vpop.permute.xlu0 %766 }
  0xab   : > { %1353 = vmatprep.subr.bf16.mxu1 %v2580_v1  ;;  %v849_v62 = vsel %vm847_vm2, %v2844_v48, %v767_v8 }
  0xac   : > { %1222 = vmatmul.mubr.bf16.gmra.mxu1 %v3077_v40 }
  0xad   : > { %2274 = vmatprep.mubr.msk.bf16.mxu1 %vm847_vm2, %v3085_v42  ;;  %1633 = vmatpush1.bf16.msra.mxu0 %v2545_v39  ;;  %v799_v39 = vrot.slane %v2844_v48, 1 }
  0xae   : > { %1354 = vmatpush2.bf16.msra.mxu1 %v2546_v51  ;;  %1642 = vmatprep.subr.bf16.mxu0 %v2580_v1 }
  0xaf   : > { %1355 = vmatprep.subr.bf16.mxu1 %v2580_v1  ;;  %v801_v9 = vsel %vm798_vm1, %v799_v39, %v800_v38 }
  0xb0   : > { %1158 = vmatmul.mubr.bf16.gmra.mxu0 %v3097_v49 }
  0xb1   : > { %2266 = vmatprep.mubr.msk.bf16.mxu0 %vm847_vm2, %v3105_v58  ;;  %1643 = vmatpush2.bf16.msra.mxu0 %v2547_v50 }
  0xb2   : > { %1356 = vmatpush2.bf16.msra.mxu1 %v2548_v61  ;;  %1644 = vmatprep.subr.bf16.mxu0 %v2580_v1 }
  0xb3   : > { %1357 = vmatprep.subr.bf16.mxu1 %v2580_v1 }
  0xb4   : > { %1230 = vmatmul.mubr.bf16.gmra.mxu1 %v3117_v33 }
  0xb5   : > { %2275 = vmatprep.mubr.msk.bf16.mxu1 %vm847_vm2, %v3125_v3  ;;  %1645 = vmatpush2.bf16.msra.mxu0 %v2549_v63 }
  0xb6   : > { %1358 = vmatpush2.bf16.msra.mxu1 %v2550_v31  ;;  %1646 = vmatprep.subr.bf16.mxu0 %v2580_v1 }
  0xb7   : > { %1359 = vmatprep.subr.bf16.mxu1 %v2580_v1 }
  0xb8   : > { %1166 = vmatmul.mubr.bf16.gmra.mxu0 %v3137_v12 }
  0xb9   : > { %2267 = vmatprep.mubr.msk.bf16.mxu0 %vm847_vm2, %v3145_v20  ;;  %1647 = vmatpush2.bf16.msra.mxu0 %v2551_v16 }
  0xba   : > { %1360 = vmatpush2.bf16.msra.mxu1 %v2552_v45  ;;  %1648 = vmatprep.subr.bf16.mxu0 %v2580_v1  ;;  %v3180_v1 = vsel %vm847_vm2, %v2826_v22, %v941_v56  ;;  %v1512_v22 = vrot.slane %v2912_v46, 1 }
  0xbc   : > { %1238 = vmatmul.mubr.bf16.gmra.mxu1 %v3157_v4  ;;  %v1514_v48 = vsel %vm798_vm1, %v1512_v22, %v1513_v27 }
  0xbd   : > { %2276 = vmatprep.mubr.msk.bf16.mxu1 %vm847_vm2, %v3165_v32  ;;  %1649 = vmatpush2.bf16.msra.mxu0 %v2553_v35 }
  0xc0   : > { %1174 = vmatmul.mubr.bf16.gmra.mxu0 %v870_v55 }
  0xc1   : > { %2268 = vmatprep.mubr.msk.bf16.mxu0 %vm847_vm2, %v825_v5 }
  0xc4   : > { %1246 = vmatmul.mubr.bf16.gmra.mxu1 %v3180_v1 }
  0xc5   : > { %2289 = vmatprep.mubr.msk.bf16.mxu1 %vm847_vm2, %v801_v9 }
  0xc8   : > { %1182 = vmatmul.mubr.bf16.gmra.mxu0 %v873_v43 }
  0xc9   : > { %2343 = vmatprep.mubr.msk.bf16.mxu0 %vm847_vm2, %v2950_v24 }
  0xcc   : > { %1362 = vmatmul.mubr.bf16.vlgmr.msra.gmra.mxu1 %v849_v62 }
  0xcd   : > { %2290 = vmatprep.mubr.msk.bf16.mxu1 %vm847_vm2, %v2886_v41 }
  0xd0   : > { %1651 = vmatmul.mubr.bf16.vlgmr.msra.gmra.mxu0 %v2977_v11 }
  0xd1   : > { %2344 = vmatprep.mubr.msk.bf16.mxu0 %vm847_vm2, %v2992_v54 }
  0xd4   : > { %1370 = vmatmul.mubr.bf16.gmra.mxu1 %v2947_v28 }
  0xd5   : > { %2291 = vmatprep.mubr.msk.bf16.mxu1 %vm847_vm2, %v2950_v24 }
  0xd8   : > { %1659 = vmatmul.mubr.bf16.gmra.mxu0 %v3017_v2 }
  0xd9   : > { %2345 = vmatprep.mubr.msk.bf16.mxu0 %vm847_vm2, %v3026_v10 }
  0xdc   : > { %1378 = vmatmul.mubr.bf16.gmra.mxu1 %v2977_v11 }
  0xdd   : > { %2292 = vmatprep.mubr.msk.bf16.mxu1 %vm847_vm2, %v2992_v54 }
  0xe0   : > { %1667 = vmatmul.mubr.bf16.gmra.mxu0 %v3057_v26 }
  0xe1   : > { %2346 = vmatprep.mubr.msk.bf16.mxu0 %vm847_vm2, %v3065_v30 }
  0xe4   : > { %1386 = vmatmul.mubr.bf16.gmra.mxu1 %v3017_v2 }
  0xe5   : > { %2293 = vmatprep.mubr.msk.bf16.mxu1 %vm847_vm2, %v3026_v10 }
  0xe8   : > { %1675 = vmatmul.mubr.bf16.gmra.mxu0 %v3097_v49 }
  0xe9   : > { %2347 = vmatprep.mubr.msk.bf16.mxu0 %vm847_vm2, %v3105_v58 }
  0xec   : > { %1394 = vmatmul.mubr.bf16.gmra.mxu1 %v3057_v26 }
  0xed   : > { %2294 = vmatprep.mubr.msk.bf16.mxu1 %vm847_vm2, %v3065_v30 }
  0xf0   : > { %1683 = vmatmul.mubr.bf16.gmra.mxu0 %v3137_v12 }
  0xf1   : > { %2348 = vmatprep.mubr.msk.bf16.mxu0 %vm847_vm2, %v3145_v20 }
  0xf4   : > { %1402 = vmatmul.mubr.bf16.gmra.mxu1 %v3097_v49 }
  0xf5   : > { %2295 = vmatprep.mubr.msk.bf16.mxu1 %vm847_vm2, %v3105_v58 }
  0xf8   : > { %1691 = vmatmul.mubr.bf16.gmra.mxu0 %v870_v55 }
  0xf9   : > { %2349 = vmatprep.mubr.msk.bf16.mxu0 %vm847_vm2, %v825_v5 }
  0xfc   : > { %1410 = vmatmul.mubr.bf16.gmra.mxu1 %v3137_v12 }
  0xfd   : > { %2296 = vmatprep.mubr.msk.bf16.mxu1 %vm847_vm2, %v3145_v20 }
 0x100   : > { %1699 = vmatmul.mubr.bf16.gmra.mxu0 %v873_v43 }
 0x101   : > { %2350 = vmatprep.mubr.msk.bf16.mxu0 %vm847_vm2, %v2873_v34 }
 0x104   : > { %1418 = vmatmul.mubr.bf16.gmra.mxu1 %v870_v55 }
 0x105   : > { %2297 = vmatprep.mubr.msk.bf16.mxu1 %vm847_vm2, %v825_v5 }
 0x108   : > { %1707 = vmatmul.mubr.bf16.gmra.mxu0 %v2931_v14 }
 0x109   : > { %2351 = vmatprep.mubr.msk.bf16.mxu0 %vm847_vm2, %v2927_v13 }
 0x10c   : > { %1426 = vmatmul.mubr.bf16.gmra.mxu1 %v873_v43 }
 0x10d   : > { %2298 = vmatprep.mubr.msk.bf16.mxu1 %vm847_vm2, %v2873_v34  ;;  %v1511_v34 = vpop.permute.xlu1 %1510 }
 0x10e   : > { %v1516_v41 = vsel %vm847_vm2, %v2912_v46, %v1511_v34 }
 0x110   : > { %1715 = vmatmul.mubr.bf16.gmra.mxu0 %v2957_v36 }
 0x111   : > { %2352 = vmatprep.mubr.msk.bf16.mxu0 %vm847_vm2, %v2970_v17 }
 0x114   : > { %1434 = vmatmul.mubr.bf16.gmra.mxu1 %v2931_v14 }
 0x115   : > { %2299 = vmatprep.mubr.msk.bf16.mxu1 %vm847_vm2, %v2927_v13 }
 0x118   : > { %1723 = vmatmul.mubr.bf16.gmra.mxu0 %v2997_v57 }
 0x119   : > { %2353 = vmatprep.mubr.msk.bf16.mxu0 %vm847_vm2, %v3006_v59 }
 0x11c   : > { %1442 = vmatmul.mubr.bf16.gmra.mxu1 %v2957_v36 }
 0x11d   : > { %2300 = vmatprep.mubr.msk.bf16.mxu1 %vm847_vm2, %v2970_v17 }
 0x120   : > { %1731 = vmatmul.mubr.bf16.gmra.mxu0 %v3037_v19 }
 0x121   : > { %2354 = vmatprep.mubr.msk.bf16.mxu0 %vm847_vm2, %v3046_v18 }
 0x124   : > { %1450 = vmatmul.mubr.bf16.gmra.mxu1 %v2997_v57 }
 0x125   : > { %2301 = vmatprep.mubr.msk.bf16.mxu1 %vm847_vm2, %v3006_v59 }
 0x128   : > { %1739 = vmatmul.mubr.bf16.gmra.mxu0 %v3077_v40 }
 0x129   : > { %2355 = vmatprep.mubr.msk.bf16.mxu0 %vm847_vm2, %v3085_v42 }
 0x12c   : > { %1458 = vmatmul.mubr.bf16.gmra.mxu1 %v3037_v19 }
 0x12d   : > { %2302 = vmatprep.mubr.msk.bf16.mxu1 %vm847_vm2, %v3046_v18 }
 0x130   : > { %1747 = vmatmul.mubr.bf16.gmra.mxu0 %v3117_v33 }
 0x131   : > { %2356 = vmatprep.mubr.msk.bf16.mxu0 %vm847_vm2, %v3125_v3 }
 0x134   : > { %1466 = vmatmul.mubr.bf16.gmra.mxu1 %v3077_v40 }
 0x135   : > { %2303 = vmatprep.mubr.msk.bf16.mxu1 %vm847_vm2, %v3085_v42 }
 0x138   : > { %1755 = vmatmul.mubr.bf16.gmra.mxu0 %v3157_v4 }
 0x139   : > { %2357 = vmatprep.mubr.msk.bf16.mxu0 %vm847_vm2, %v3165_v32 }
 0x13c   : > { %1474 = vmatmul.mubr.bf16.gmra.mxu1 %v3117_v33 }
 0x13d   : > { %2304 = vmatprep.mubr.msk.bf16.mxu1 %vm847_vm2, %v3125_v3 }
 0x140   : > { %1763 = vmatmul.mubr.bf16.gmra.mxu0 %v3180_v1 }
 0x141   : > { %2358 = vmatprep.mubr.msk.bf16.mxu0 %vm847_vm2, %v1514_v48 }
 0x144   : > { %1482 = vmatmul.mubr.bf16.gmra.mxu1 %v3157_v4 }
 0x148   : > { %1771 = vmatmul.mubr.bf16.gmra.mxu0 %v1516_v41 }
 0x14c   : > { %v3280_v13 = vpop.f32.mrf.mxu1 }
 0x14e   : > { %v1193_v47 = vpop.f32.mrf.mxu1 }
 0x150   : > { %v3282_v14 = vpop.f32.mrf.mxu0  ;;  %v3284_v28 = vpop.f32.mrf.mxu1 }
 0x152   : > { %v1129_v24 = vpop.f32.mrf.mxu0  ;;  %v1196_v36 = vpop.f32.mrf.mxu1 }
 0x154   : > { %v3286_v17 = vpop.f32.mrf.mxu0  ;;  %v3288_v11 = vpop.f32.mrf.mxu1 }
 0x156   : > { %v1132_v54 = vpop.f32.mrf.mxu0  ;;  %v1201_v57 = vpop.f32.mrf.mxu1 }
 0x158   : > { %v3290_v59 = vpop.f32.mrf.mxu0  ;;  %v3292_v2 = vpop.f32.mrf.mxu1 }
 0x15a   : > { %v1137_v46 = vpop.f32.mrf.mxu0  ;;  %v1204_v10 = vpop.f32.mrf.mxu1 }
 0x15b   : > { %v3348_v46 = vld [vmem:[%s3496_s4] ss:$0 sm:$0xff] }
 0x15c   : > { %v3294_v19 = vpop.f32.mrf.mxu0  ;;  %v3296_v18 = vpop.f32.mrf.mxu1 }
 0x15e   : > { %v1140_v26 = vpop.f32.mrf.mxu0  ;;  %v1209_v30 = vpop.f32.mrf.mxu1 }
 0x160   : > { %v3298_v40 = vpop.f32.mrf.mxu0  ;;  %v3300_v42 = vpop.f32.mrf.mxu1 }
 0x162   : > { %v1145_v51 = vpop.f32.mrf.mxu0  ;;  %v1212_v49 = vpop.f32.mrf.mxu1 }
 0x164   : > { %v3302_v50 = vpop.f32.mrf.mxu0  ;;  %v3304_v25 = vpop.f32.mrf.mxu1 }
 0x166   : > { %v1148_v58 = vpop.f32.mrf.mxu0  ;;  %v1217_v60 = vpop.f32.mrf.mxu1 }
 0x168   : > { %v3306_v29 = vpop.f32.mrf.mxu0  ;;  %v3308_v61 = vpop.f32.mrf.mxu1 }
 0x16a   : > { %v1153_v33 = vpop.f32.mrf.mxu0  ;;  %v1220_v63 = vpop.f32.mrf.mxu1 }
 0x16c   : > { %v3310_v0 = vpop.f32.mrf.mxu0  ;;  %v3312_v3 = vpop.f32.mrf.mxu1 }
 0x16e   : > { %v1156_v6 = vpop.f32.mrf.mxu0  ;;  %v1225_v44 = vpop.f32.mrf.mxu1 }
 0x170   : > { %v3314_v31 = vpop.f32.mrf.mxu0  ;;  %v3316_v12 = vpop.f32.mrf.mxu1 }
 0x172   : > { %v1161_v16 = vpop.f32.mrf.mxu0  ;;  %v1228_v15 = vpop.f32.mrf.mxu1 }
 0x174   : > { %v3318_v20 = vpop.f32.mrf.mxu0  ;;  %v3320_v21 = vpop.f32.mrf.mxu1 }
 0x176   : > { %v1164_v52 = vpop.f32.mrf.mxu0  ;;  %v1233_v45 = vpop.f32.mrf.mxu1 }
 0x178   : > { %v3322_v4 = vpop.f32.mrf.mxu0  ;;  %v3324_v35 = vpop.f32.mrf.mxu1 }
 0x17a   : > { %v1169_v23 = vpop.f32.mrf.mxu0  ;;  %v1236_v32 = vpop.f32.mrf.mxu1 }
 0x17c   : > { %v3326_v7 = vpop.f32.mrf.mxu0  ;;  %v3328_v37 = vpop.f32.mrf.mxu1 }
 0x17e   : > { %v1172_v55 = vpop.f32.mrf.mxu0  ;;  %v1241_v56 = vpop.f32.mrf.mxu1 }
 0x180   : > { %v3330_v5 = vpop.f32.mrf.mxu0  ;;  %v3332_v39 = vpop.f32.mrf.mxu1 }
 0x182   : > { %v1177_v38 = vpop.f32.mrf.mxu0  ;;  %v1244_v1 = vpop.f32.mrf.mxu1 }
 0x184   : > { %v3334_v53 = vpop.f32.mrf.mxu0  ;;  %v3336_v9 = vpop.f32.mrf.mxu1 }
 0x186   : > { %v1180_v43 = vpop.f32.mrf.mxu0  ;;  %v1249_v8 = vpop.f32.mrf.mxu1 }
 0x188   : > { %v3338_v62 = vpop.f32.mrf.mxu0  ;;  %v3340_v22 = vpop.f32.mrf.mxu1 }
 0x18a   : > { %v1185_v27 = vpop.f32.mrf.mxu0  ;;  %v1252_v48 = vpop.f32.mrf.mxu1 }
 0x18c   : > { %v3342_v34 = vpop.f32.mrf.mxu0  ;;  %v1363_v41 = vpop.f32.mrf.mxu1 }
 0x18d   : > { %v1364_v36 = vadd.f32 %v1363_v41, %v3282_v14 }
 0x18e   : > { %v1188_v47 = vpop.f32.mrf.mxu0  ;;  %v1365_v24 = vpop.f32.mrf.mxu1 }
 0x190   : > { %v1366_v54 = vpop.f32.mrf.mxu1  ;;  %v1652_v57 = vpop.f32.mrf.mxu0 }
 0x191   : > { %v1779_v10 = vadd.f32 %v1652_v57, %v1364_v36  ;;  %v1367_v51 = vadd.f32 %v1366_v54, %v3286_v17 }
 0x192   : > { %v1368_v26 = vpop.f32.mrf.mxu1  ;;  %v1654_v30 = vpop.f32.mrf.mxu0 }
 0x193   : > { %v1818_v49 = vadd.f32 %v3348_v46, %v1779_v10 }
 0x194   : > { %v1371_v58 = vpop.f32.mrf.mxu1  ;;  %v1655_v60 = vpop.f32.mrf.mxu0 }
 0x195   : > { %v1850_v33 = vmax.f32 %v1818_v49, 0.0  ;;  %v1780_v63 = vadd.f32 %v1655_v60, %v1367_v51  ;;  %v1372_v17 = vadd.f32 %v1371_v58, %v3290_v59 }
 0x196   : > { %v1373_v14 = vpop.f32.mrf.mxu1  ;;  %v1657_v6 = vpop.f32.mrf.mxu0 }
 0x197   : > { %v2399_v44 = vpack.c.bf16 %v1850_v33, %v1850_v33  ;;  %v1819_v16 = vadd.f32 %v3348_v46, %v1780_v63 }
 0x198   : > { %v1374_v15 = vpop.f32.mrf.mxu1  ;;  %v1660_v52 = vpop.f32.mrf.mxu0 }
 0x199   : > { %2011 = vst.msk [vmem:[%s3356_s29] sm:$0xf] %vm2010_vm3, %v2399_v44  ;;  %v1851_v45 = vmax.f32 %v1819_v16, 0.0  ;;  %v1781_v23 = vadd.f32 %v1660_v52, %v1372_v17  ;;  %v1375_v38 = vadd.f32 %v1374_v15, %v3294_v19 }
 0x19a   : > { %v1376_v32 = vpop.f32.mrf.mxu1  ;;  %v1662_v55 = vpop.f32.mrf.mxu0 }
 0x19b   : > { %v2400_v56 = vpack.c.bf16 %v1851_v45, %v1851_v45  ;;  %v1820_v1 = vadd.f32 %v3348_v46, %v1781_v23 }
 0x19c   : > { %v1379_v43 = vpop.f32.mrf.mxu1  ;;  %v1663_v8 = vpop.f32.mrf.mxu0 }
 0x19d   : > { %2012 = vst.msk [vmem:[%s3356_s29 + $0x4] sm:$0xf] %vm2010_vm3, %v2400_v56  ;;  %v1852_v59 = vmax.f32 %v1820_v1, 0.0  ;;  %v1782_v27 = vadd.f32 %v1663_v8, %v1375_v38  ;;  %v1380_v24 = vadd.f32 %v1379_v43, %v3298_v40 }
 0x19e   : > { %v1381_v48 = vpop.f32.mrf.mxu1  ;;  %v1665_v41 = vpop.f32.mrf.mxu0 }
 0x19f   : > { %v2401_v47 = vpack.c.bf16 %v1852_v59, %v1852_v59  ;;  %v1821_v36 = vadd.f32 %v3348_v46, %v1782_v27 }
 0x1a0   : > { %v1382_v54 = vpop.f32.mrf.mxu1  ;;  %v1668_v57 = vpop.f32.mrf.mxu0 }
 0x1a1   : > { %2013 = vst.msk [vmem:[%s3356_s29 + $0x8] sm:$0xf] %vm2010_vm3, %v2401_v47  ;;  %v1853_v19 = vmax.f32 %v1821_v36, 0.0  ;;  %v1783_v10 = vadd.f32 %v1668_v57, %v1380_v24  ;;  %v1383_v49 = vadd.f32 %v1382_v54, %v3302_v50 }
 0x1a2   : > { %v1384_v26 = vpop.f32.mrf.mxu1  ;;  %v1670_v30 = vpop.f32.mrf.mxu0 }
 0x1a3   : > { %v2402_v51 = vpack.c.bf16 %v1853_v19, %v1853_v19  ;;  %v1822_v58 = vadd.f32 %v3348_v46, %v1783_v10 }
 0x1a4   : > { %v1387_v60 = vpop.f32.mrf.mxu1  ;;  %v1671_v33 = vpop.f32.mrf.mxu0 }
 0x1a5   : > { %2014 = vst.msk [vmem:[%s3356_s29 + $0xc] sm:$0xf] %vm2010_vm3, %v2402_v51  ;;  %v1854_v40 = vmax.f32 %v1822_v58, 0.0  ;;  %v1784_v63 = vadd.f32 %v1671_v33, %v1383_v49  ;;  %v1388_v17 = vadd.f32 %v1387_v60, %v3306_v29 }
 0x1a6   : > { %v1389_v14 = vpop.f32.mrf.mxu1  ;;  %v1673_v6 = vpop.f32.mrf.mxu0 }
 0x1a7   : > { %v2403_v44 = vpack.c.bf16 %v1854_v40, %v1854_v40  ;;  %v1823_v16 = vadd.f32 %v3348_v46, %v1784_v63 }
 0x1a8   : > { %v1390_v15 = vpop.f32.mrf.mxu1  ;;  %v1676_v52 = vpop.f32.mrf.mxu0 }
 0x1a9   : > { %2015 = vst.msk [vmem:[%s3356_s29 + $0x10] sm:$0xf] %vm2010_vm3, %v2403_v44  ;;  %v1855_v50 = vmax.f32 %v1823_v16, 0.0  ;;  %v1785_v45 = vadd.f32 %v1676_v52, %v1388_v17  ;;  %v1391_v56 = vadd.f32 %v1390_v15, %v3310_v0 }
 0x1aa   : > { %v1392_v23 = vpop.f32.mrf.mxu1  ;;  %v1678_v32 = vpop.f32.mrf.mxu0 }
 0x1ab   : > { %v2404_v55 = vpack.c.bf16 %v1855_v50, %v1855_v50  ;;  %v1824_v38 = vadd.f32 %v3348_v46, %v1785_v45 }
 0x1ac   : > { %v1395_v1 = vpop.f32.mrf.mxu1  ;;  %v1679_v43 = vpop.f32.mrf.mxu0 }
 0x1ad   : > { %2016 = vst.msk [vmem:[%s3356_s29 + $0x14] sm:$0xf] %vm2010_vm3, %v2404_v55  ;;  %v1856_v29 = vmax.f32 %v1824_v38, 0.0  ;;  %v1786_v8 = vadd.f32 %v1679_v43, %v1391_v56  ;;  %v1396_v41 = vadd.f32 %v1395_v1, %v3314_v31 }
 0x1ae   : > { %v1397_v59 = vpop.f32.mrf.mxu1  ;;  %v1681_v27 = vpop.f32.mrf.mxu0 }
 0x1af   : > { %v2405_v48 = vpack.c.bf16 %v1856_v29, %v1856_v29  ;;  %v1825_v47 = vadd.f32 %v3348_v46, %v1786_v8 }
 0x1b0   : > { %v1398_v24 = vpop.f32.mrf.mxu1  ;;  %v1684_v36 = vpop.f32.mrf.mxu0 }
 0x1b1   : > { %2017 = vst.msk [vmem:[%s3356_s29 + $0x18] sm:$0xf] %vm2010_vm3, %v2405_v48  ;;  %v1857_v0 = vmax.f32 %v1825_v47, 0.0  ;;  %v1787_v54 = vadd.f32 %v1684_v36, %v1396_v41  ;;  %v1399_v26 = vadd.f32 %v1398_v24, %v3318_v20 }
 0x1b2   : > { %v1400_v57 = vpop.f32.mrf.mxu1  ;;  %v1686_v19 = vpop.f32.mrf.mxu0 }
 0x1b3   : > { %v2406_v10 = vpack.c.bf16 %v1857_v0, %v1857_v0  ;;  %v1826_v30 = vadd.f32 %v3348_v46, %v1787_v54 }
 0x1b4   : > { %v1403_v51 = vpop.f32.mrf.mxu1  ;;  %v1687_v49 = vpop.f32.mrf.mxu0 }
 0x1b5   : > { %2018 = vst.msk [vmem:[%s3356_s29 + $0x1c] sm:$0xf] %vm2010_vm3, %v2406_v10  ;;  %v1858_v31 = vmax.f32 %v1826_v30, 0.0  ;;  %v1788_v58 = vadd.f32 %v1687_v49, %v1399_v26  ;;  %v1404_v63 = vadd.f32 %v1403_v51, %v3322_v4 }
 0x1b6   : > { %v1405_v60 = vpop.f32.mrf.mxu1  ;;  %v1689_v33 = vpop.f32.mrf.mxu0 }
 0x1b7   : > { %v2407_v40 = vpack.c.bf16 %v1858_v31, %v1858_v31  ;;  %v1827_v14 = vadd.f32 %v3348_v46, %v1788_v58 }
 0x1b8   : > { %v1406_v6 = vpop.f32.mrf.mxu1  ;;  %v1692_v44 = vpop.f32.mrf.mxu0 }
 0x1b9   : > { %2019 = vst.msk [vmem:[%s3356_s29 + $0x20] sm:$0xf] %vm2010_vm3, %v2407_v40  ;;  %v1859_v20 = vmax.f32 %v1827_v14, 0.0  ;;  %v1789_v17 = vadd.f32 %v1692_v44, %v1404_v63  ;;  %v1407_v50 = vadd.f32 %v1406_v6, %v3326_v7 }
 0x1ba   : > { %v1408_v16 = vpop.f32.mrf.mxu1  ;;  %v1694_v15 = vpop.f32.mrf.mxu0 }
 0x1bb   : > { %v2408_v52 = vpack.c.bf16 %v1859_v20, %v1859_v20  ;;  %v1828_v45 = vadd.f32 %v3348_v46, %v1789_v17 }
 0x1bc   : > { %v1411_v23 = vpop.f32.mrf.mxu1  ;;  %v1695_v32 = vpop.f32.mrf.mxu0 }
 0x1bd   : > { %2020 = vst.msk [vmem:[%s3356_s29 + $0x24] sm:$0xf] %vm2010_vm3, %v2408_v52  ;;  %v1860_v4 = vmax.f32 %v1828_v45, 0.0  ;;  %v1790_v55 = vadd.f32 %v1695_v32, %v1407_v50  ;;  %v1412_v43 = vadd.f32 %v1411_v23, %v3330_v5 }
 0x1be   : > { %v1413_v56 = vpop.f32.mrf.mxu1  ;;  %v1697_v38 = vpop.f32.mrf.mxu0 }
 0x1bf   : > { %v2409_v1 = vpack.c.bf16 %v1860_v4, %v1860_v4  ;;  %v1829_v29 = vadd.f32 %v3348_v46, %v1790_v55 }
 0x1c0   : > { %v1414_v8 = vpop.f32.mrf.mxu1  ;;  %v1700_v59 = vpop.f32.mrf.mxu0 }
 0x1c1   : > { %2021 = vst.msk [vmem:[%s3356_s29 + $0x28] sm:$0xf] %vm2010_vm3, %v2409_v1  ;;  %v1861_v7 = vmax.f32 %v1829_v29, 0.0  ;;  %v1791_v27 = vadd.f32 %v1700_v59, %v1412_v43  ;;  %v1415_v24 = vadd.f32 %v1414_v8, %v3334_v53 }
 0x1c2   : > { %v1416_v48 = vpop.f32.mrf.mxu1  ;;  %v1702_v41 = vpop.f32.mrf.mxu0 }
 0x1c3   : > { %v2410_v47 = vpack.c.bf16 %v1861_v7, %v1861_v7  ;;  %v1830_v36 = vadd.f32 %v3348_v46, %v1791_v27 }
 0x1c4   : > { %v1419_v0 = vpop.f32.mrf.mxu1  ;;  %v1703_v54 = vpop.f32.mrf.mxu0 }
 0x1c5   : > { %2022 = vst.msk [vmem:[%s3356_s29 + $0x2c] sm:$0xf] %vm2010_vm3, %v2410_v47  ;;  %v1862_v5 = vmax.f32 %v1830_v36, 0.0  ;;  %v1792_v57 = vadd.f32 %v1703_v54, %v1415_v24  ;;  %v1420_v30 = vadd.f32 %v1419_v0, %v3338_v62 }
 0x1c6   : > { %v1421_v19 = vpop.f32.mrf.mxu1  ;;  %v1705_v10 = vpop.f32.mrf.mxu0 }
 0x1c7   : > { %v2411_v26 = vpack.c.bf16 %v1862_v5, %v1862_v5  ;;  %v1831_v51 = vadd.f32 %v3348_v46, %v1792_v57 }
 0x1c8   : > { %v1422_v49 = vpop.f32.mrf.mxu1  ;;  %v1708_v31 = vpop.f32.mrf.mxu0 }
 0x1c9   : > { %2023 = vst.msk [vmem:[%s3356_s29 + $0x30] sm:$0xf] %vm2010_vm3, %v2411_v26  ;;  %v1863_v53 = vmax.f32 %v1831_v51, 0.0  ;;  %v1793_v58 = vadd.f32 %v1708_v31, %v1420_v30  ;;  %v1423_v63 = vadd.f32 %v1422_v49, %v3342_v34 }
 0x1ca   : > { %v1424_v60 = vpop.f32.mrf.mxu1  ;;  %v1710_v33 = vpop.f32.mrf.mxu0 }
 0x1cb   : > { %v2412_v40 = vpack.c.bf16 %v1863_v53, %v1863_v53  ;;  %v1832_v14 = vadd.f32 %v3348_v46, %v1793_v58 }
 0x1cc   : > { %v1427_v6 = vpop.f32.mrf.mxu1  ;;  %v1711_v44 = vpop.f32.mrf.mxu0 }
 0x1cd   : > { %2024 = vst.msk [vmem:[%s3356_s29 + $0x34] sm:$0xf] %vm2010_vm3, %v2412_v40  ;;  %v1864_v62 = vmax.f32 %v1832_v14, 0.0  ;;  %v1794_v20 = vadd.f32 %v1711_v44, %v1423_v63  ;;  %v1428_v52 = vadd.f32 %v1427_v6, %v3280_v13 }
 0x1ce   : > { %v1429_v17 = vpop.f32.mrf.mxu1  ;;  %v1713_v16 = vpop.f32.mrf.mxu0 }
 0x1cf   : > { %v2413_v15 = vpack.c.bf16 %v1864_v62, %v1864_v62  ;;  %v1833_v50 = vadd.f32 %v3348_v46, %v1794_v20 }
 0x1d0   : > { %v1430_v45 = vpop.f32.mrf.mxu1  ;;  %v1716_v23 = vpop.f32.mrf.mxu0 }
 0x1d1   : > { %2025 = vst.msk [vmem:[%s3356_s29 + $0x38] sm:$0xf] %vm2010_vm3, %v2413_v15  ;;  %v1865_v34 = vmax.f32 %v1833_v50, 0.0  ;;  %v1795_v32 = vadd.f32 %v1716_v23, %v1428_v52  ;;  %v1431_v38 = vadd.f32 %v1430_v45, %v3284_v28 }
 0x1d2   : > { %v1432_v4 = vpop.f32.mrf.mxu1  ;;  %v1718_v55 = vpop.f32.mrf.mxu0 }
 0x1d3   : > { %v2414_v56 = vpack.c.bf16 %v1865_v34, %v1865_v34  ;;  %v1834_v1 = vadd.f32 %v3348_v46, %v1795_v32 }
 0x1d4   : > { %v1435_v43 = vpop.f32.mrf.mxu1  ;;  %v1719_v29 = vpop.f32.mrf.mxu0 }
 0x1d5   : > { %2026 = vst.msk [vmem:[%s3356_s29 + $0x3c] sm:$0xf] %vm2010_vm3, %v2414_v56  ;;  %v1866_v13 = vmax.f32 %v1834_v1, 0.0  ;;  %v1796_v8 = vadd.f32 %v1719_v29, %v1431_v38  ;;  %v1436_v48 = vadd.f32 %v1435_v43, %v3288_v11 }
 0x1d6   : > { %v1437_v59 = vpop.f32.mrf.mxu1  ;;  %v1721_v7 = vpop.f32.mrf.mxu0 }
 0x1d7   : > { %v2415_v27 = vpack.c.bf16 %v1866_v13, %v1866_v13  ;;  %v1835_v41 = vadd.f32 %v3348_v46, %v1796_v8 }
 0x1d8   : > { %v1438_v47 = vpop.f32.mrf.mxu1  ;;  %v1724_v24 = vpop.f32.mrf.mxu0 }
 0x1d9   : > { %2027 = vst.msk [vmem:[%s3356_s29 + $0x40] sm:$0xf] %vm2010_vm3, %v2415_v27  ;;  %v1867_v28 = vmax.f32 %v1835_v41, 0.0  ;;  %v1797_v36 = vadd.f32 %v1724_v24, %v1436_v48  ;;  %v1439_v57 = vadd.f32 %v1438_v47, %v3292_v2 }
 0x1da   : > { %v1440_v0 = vpop.f32.mrf.mxu1  ;;  %v1726_v54 = vpop.f32.mrf.mxu0 }
 0x1db   : > { %v2416_v5 = vpack.c.bf16 %v1867_v28, %v1867_v28  ;;  %v1836_v19 = vadd.f32 %v3348_v46, %v1797_v36 }
 0x1dc   : > { %v1443_v10 = vpop.f32.mrf.mxu1  ;;  %v1727_v26 = vpop.f32.mrf.mxu0 }
 0x1dd   : > { %2028 = vst.msk [vmem:[%s3356_s29 + $0x44] sm:$0xf] %vm2010_vm3, %v2416_v5  ;;  %v1868_v11 = vmax.f32 %v1836_v19, 0.0  ;;  %v1798_v30 = vadd.f32 %v1727_v26, %v1439_v57  ;;  %v1444_v53 = vadd.f32 %v1443_v10, %v3296_v18 }
 0x1de   : > { %v1445_v51 = vpop.f32.mrf.mxu1  ;;  %v1729_v49 = vpop.f32.mrf.mxu0 }
 0x1df   : > { %v2417_v31 = vpack.c.bf16 %v1868_v11, %v1868_v11  ;;  %v1837_v58 = vadd.f32 %v3348_v46, %v1798_v30 }
 0x1e0   : > { %v1446_v60 = vpop.f32.mrf.mxu1  ;;  %v1732_v33 = vpop.f32.mrf.mxu0 }
 0x1e1   : > { %2029 = vst.msk [vmem:[%s3356_s29 + $0x48] sm:$0xf] %vm2010_vm3, %v2417_v31  ;;  %v1869_v2 = vmax.f32 %v1837_v58, 0.0  ;;  %v1799_v40 = vadd.f32 %v1732_v33, %v1444_v53  ;;  %v1447_v44 = vadd.f32 %v1446_v60, %v3300_v42 }
 0x1e2   : > { %v1448_v63 = vpop.f32.mrf.mxu1  ;;  %v1734_v14 = vpop.f32.mrf.mxu0 }
 0x1e3   : > { %v2418_v6 = vpack.c.bf16 %v1869_v2, %v1869_v2  ;;  %v1838_v62 = vadd.f32 %v3348_v46, %v1799_v40 }
 0x1e4   : > { %v1451_v20 = vpop.f32.mrf.mxu1  ;;  %v1735_v17 = vpop.f32.mrf.mxu0 }
 0x1e5   : > { %2030 = vst.msk [vmem:[%s3356_s29 + $0x4c] sm:$0xf] %vm2010_vm3, %v2418_v6  ;;  %v1870_v18 = vmax.f32 %v1838_v62, 0.0  ;;  %v1800_v16 = vadd.f32 %v1735_v17, %v1447_v44  ;;  %v1452_v45 = vadd.f32 %v1451_v20, %v3304_v25 }
 0x1e6   : > { %v1453_v15 = vpop.f32.mrf.mxu1  ;;  %v1737_v52 = vpop.f32.mrf.mxu0 }
 0x1e7   : > { %v2419_v50 = vpack.c.bf16 %v1870_v18, %v1870_v18  ;;  %v1839_v23 = vadd.f32 %v3348_v46, %v1800_v16 }
 0x1e8   : > { %v1454_v34 = vpop.f32.mrf.mxu1  ;;  %v1740_v32 = vpop.f32.mrf.mxu0 }
 0x1e9   : > { %2031 = vst.msk [vmem:[%s3356_s29 + $0x50] sm:$0xf] %vm2010_vm3, %v2419_v50  ;;  %v1871_v42 = vmax.f32 %v1839_v23, 0.0  ;;  %v1801_v4 = vadd.f32 %v1740_v32, %v1452_v45  ;;  %v1455_v1 = vadd.f32 %v1454_v34, %v3308_v61 }
 0x1ea   : > { %v1456_v55 = vpop.f32.mrf.mxu1  ;;  %v1742_v56 = vpop.f32.mrf.mxu0 }
 0x1eb   : > { %v2420_v38 = vpack.c.bf16 %v1871_v42, %v1871_v42  ;;  %v1840_v43 = vadd.f32 %v3348_v46, %v1801_v4 }
 0x1ec   : > { %v1459_v29 = vpop.f32.mrf.mxu1  ;;  %v1743_v13 = vpop.f32.mrf.mxu0 }
 0x1ed   : > { %2032 = vst.msk [vmem:[%s3356_s29 + $0x54] sm:$0xf] %vm2010_vm3, %v2420_v38  ;;  %v1872_v25 = vmax.f32 %v1840_v43, 0.0  ;;  %v1802_v8 = vadd.f32 %v1743_v13, %v1455_v1  ;;  %v1460_v48 = vadd.f32 %v1459_v29, %v3312_v3 }
 0x1ee   : > { %v1461_v59 = vpop.f32.mrf.mxu1  ;;  %v1745_v7 = vpop.f32.mrf.mxu0 }
 0x1ef   : > { %v2421_v27 = vpack.c.bf16 %v1872_v25, %v1872_v25  ;;  %v1841_v41 = vadd.f32 %v3348_v46, %v1802_v8 }
 0x1f0   : > { %v1462_v47 = vpop.f32.mrf.mxu1  ;;  %v1748_v24 = vpop.f32.mrf.mxu0 }
 0x1f1   : > { %2033 = vst.msk [vmem:[%s3356_s29 + $0x58] sm:$0xf] %vm2010_vm3, %v2421_v27  ;;  %v1873_v61 = vmax.f32 %v1841_v41, 0.0  ;;  %v1803_v28 = vadd.f32 %v1748_v24, %v1460_v48  ;;  %v1463_v5 = vadd.f32 %v1462_v47, %v3316_v12 }
 0x1f2   : > { %v1464_v36 = vpop.f32.mrf.mxu1  ;;  %v1750_v0 = vpop.f32.mrf.mxu0 }
 0x1f3   : > { %v2422_v54 = vpack.c.bf16 %v1873_v61, %v1873_v61  ;;  %v1842_v57 = vadd.f32 %v3348_v46, %v1803_v28 }
 0x1f4   : > { %v1467_v19 = vpop.f32.mrf.mxu1  ;;  %v1751_v10 = vpop.f32.mrf.mxu0 }
 0x1f5   : > { %2034 = vst.msk [vmem:[%s3356_s29 + $0x5c] sm:$0xf] %vm2010_vm3, %v2422_v54  ;;  %v1874_v3 = vmax.f32 %v1842_v57, 0.0  ;;  %v1804_v26 = vadd.f32 %v1751_v10, %v1463_v5  ;;  %v1468_v49 = vadd.f32 %v1467_v19, %v3320_v21 }
 0x1f6   : > { %v1469_v11 = vpop.f32.mrf.mxu1  ;;  %v1753_v30 = vpop.f32.mrf.mxu0 }
 0x1f7   : > { %v2423_v51 = vpack.c.bf16 %v1874_v3, %v1874_v3  ;;  %v1843_v31 = vadd.f32 %v3348_v46, %v1804_v26 }
 0x1f8   : > { %v1470_v53 = vpop.f32.mrf.mxu1  ;;  %v1756_v58 = vpop.f32.mrf.mxu0 }
 0x1f9   : > { %2035 = vst.msk [vmem:[%s3356_s29 + $0x60] sm:$0xf] %vm2010_vm3, %v2423_v51  ;;  %v1875_v12 = vmax.f32 %v1843_v31, 0.0  ;;  %v1805_v60 = vadd.f32 %v1756_v58, %v1468_v49  ;;  %v1471_v63 = vadd.f32 %v1470_v53, %v3324_v35 }
 0x1fa   : > { %v1472_v33 = vpop.f32.mrf.mxu1  ;;  %v1758_v2 = vpop.f32.mrf.mxu0 }
 0x1fb   : > { %v2424_v40 = vpack.c.bf16 %v1875_v12, %v1875_v12  ;;  %v1844_v14 = vadd.f32 %v3348_v46, %v1805_v60 }
 0x1fc   : > { %v1475_v6 = vpop.f32.mrf.mxu1  ;;  %v1759_v44 = vpop.f32.mrf.mxu0 }
 0x1fd   : > { %2036 = vst.msk [vmem:[%s3356_s29 + $0x64] sm:$0xf] %vm2010_vm3, %v2424_v40  ;;  %v1876_v21 = vmax.f32 %v1844_v14, 0.0  ;;  %v1806_v62 = vadd.f32 %v1759_v44, %v1471_v63  ;;  %v1476_v16 = vadd.f32 %v1475_v6, %v3328_v37 }
 0x1fe   : > { %v1477_v20 = vpop.f32.mrf.mxu1  ;;  %v1761_v17 = vpop.f32.mrf.mxu0 }
 0x1ff   : > { %v2425_v18 = vpack.c.bf16 %v1876_v21, %v1876_v21  ;;  %v1845_v15 = vadd.f32 %v3348_v46, %v1806_v62 }
 0x200   : > { %v1478_v52 = vpop.f32.mrf.mxu1  ;;  %v1764_v50 = vpop.f32.mrf.mxu0 }
 0x201   : > { %2037 = vst.msk [vmem:[%s3356_s29 + $0x68] sm:$0xf] %vm2010_vm3, %v2425_v18  ;;  %v1877_v35 = vmax.f32 %v1845_v15, 0.0  ;;  %v1807_v45 = vadd.f32 %v1764_v50, %v1476_v16  ;;  %v1479_v42 = vadd.f32 %v1478_v52, %v3332_v39 }
 0x202   : > { %v1480_v23 = vpop.f32.mrf.mxu1  ;;  %v1766_v34 = vpop.f32.mrf.mxu0 }
 0x203   : > { %v2426_v32 = vpack.c.bf16 %v1877_v35, %v1877_v35  ;;  %v1846_v4 = vadd.f32 %v3348_v46, %v1807_v45 }
 0x204   : > { %v1483_v55 = vpop.f32.mrf.mxu1  ;;  %v1767_v56 = vpop.f32.mrf.mxu0 }
 0x205   : > { %2038 = vst.msk [vmem:[%s3356_s29 + $0x6c] sm:$0xf] %vm2010_vm3, %v2426_v32  ;;  %v1878_v37 = vmax.f32 %v1846_v4, 0.0  ;;  %v1808_v38 = vadd.f32 %v1767_v56, %v1479_v42  ;;  %v1484_v13 = vadd.f32 %v1483_v55, %v3336_v9 }
 0x206   : > { %v1485_v1 = vpop.f32.mrf.mxu1  ;;  %v1769_v43 = vpop.f32.mrf.mxu0 }
 0x207   : > { %v2427_v29 = vpack.c.bf16 %v1878_v37, %v1878_v37  ;;  %v1847_v25 = vadd.f32 %v3348_v46, %v1808_v38 }
 0x208   : > { %v1486_v8 = vpop.f32.mrf.mxu1  ;;  %v1772_v59 = vpop.f32.mrf.mxu0 }
 0x209   : > { %2039 = vst.msk [vmem:[%s3356_s29 + $0x70] sm:$0xf] %vm2010_vm3, %v2427_v29  ;;  %v1879_v39 = vmax.f32 %v1847_v25, 0.0  ;;  %v1809_v7 = vadd.f32 %v1772_v59, %v1484_v13  ;;  %v1487_v47 = vadd.f32 %v1486_v8, %v3340_v22 }
 0x20a   : > { %v1488_v27 = vpop.f32.mrf.mxu1  ;;  %v1774_v48 = vpop.f32.mrf.mxu0 }
 0x20b   : > { %v2428_v41 = vpack.c.bf16 %v1879_v39, %v1879_v39  ;;  %v1848_v24 = vadd.f32 %v3348_v46, %v1809_v7 }
 0x20c   : > { %v1775_v61 = vpop.f32.mrf.mxu0 }
 0x20d   : > { %2040 = vst.msk [vmem:[%s3356_s29 + $0x74] sm:$0xf] %vm2010_vm3, %v2428_v41  ;;  %v1880_v9 = vmax.f32 %v1848_v24, 0.0  ;;  %v1810_v28 = vadd.f32 %v1775_v61, %v1487_v47 }
 0x20e   : > { %v1777_v36 = vpop.f32.mrf.mxu0 }
 0x20f   : > { %v2429_v0 = vpack.c.bf16 %v1880_v9, %v1880_v9  ;;  %v1849_v54 = vadd.f32 %v3348_v46, %v1810_v28 }
 0x211   : > { %2041 = vst.msk [vmem:[%s3356_s29 + $0x78] sm:$0xf] %vm2010_vm3, %v2429_v0  ;;  %v1881_v5 = vmax.f32 %v1849_v54, 0.0 }
 0x213   : > { %v2430_v57 = vpack.c.bf16 %v1881_v5, %v1881_v5 }
 0x215   : > { %2042 = vst.msk [vmem:[%s3356_s29 + $0x7c] sm:$0xf] %vm2010_vm3, %v2430_v57 }
 0x216 PF: > { %s15_s20 = sadd.s32 1, %s2578_s20   ;;  %s3498_s18 = smov %s2574_s19 }
 0x217   : > { %p12_p5 = scmp.ge.s32.totalorder %s15_s20, 6   ;;  %s3499_s19 = smov %s3501_s21 }
 0x219   :  { %14 = sbr.rel (!%p12_p5) target bundleno = 2 (0x2), region = 78 }

// kernel: _lambda_.14
= control target key start
LH: loop header
LB: loop body
LE: loop exit
PB: predicated region body
PF: predicated region fallthrough
CT: control target
= control target key end

     0   :  { %s1698_s18 = smov 0   ;;  %s1700_s19 = smov 0   ;;  %s2079_s0 = inlined_call_operand.vmem [shape: bf16[4,10,10,64], index: 0, kind: input, shape index: {}, may-alias: {0,1,2}]   ;;  %s2080_s1 = inlined_call_operand.vmem [shape: bf16[4,10,10,64], index: 1, kind: input, shape index: {}, may-alias: {0,1,2}]   ;;  %s2081_s2 = inlined_call_operand.vmem [shape: bf16[4,10,10,64], index: 2, kind: input, shape index: {}, may-alias: {0,1,2}]   ;;  %s2082_s3 = inlined_call_operand.vmem [shape: bf16[3,192,128], index: 3, kind: input, shape index: {}]   ;;  %s2083_s4 = inlined_call_operand.vmem [shape: f32[1,128], index: 4, kind: input, shape index: {}]   ;;  %s2084_s5 = inlined_call_operand.vmem [shape: bf16[4,8,8,128], index: 5, kind: output, shape index: {}]  }
   0x1   :  { %s1702_s20 = smov 0  }
   0x2 LB: > { %s27_s21 = sadd.s32 1, %s1660_s19  ;;  %p1366_p0 = scmp.ge.s32.totalorder %s1664_s20, 1  ;;  %s1664_s20 = sphi %s1702_s20, %s15_s20   ;;  %s1660_s19 = sphi %s1700_s19, %s2086_s19   ;;  %s1656_s18 = sphi %s1698_s18, %s2085_s18  }
   0x3   : > { %p29_p1 = scmp.ge.s32.totalorder %s27_s21, 4  ;;  %p267_p2 = scmp.lt.s32.totalorder %s1664_s20, 5 }
   0x5   : > { %s2088_s21 = smov (%p29_p1, %s27_s21), 0  ;;  %p268_p3 = pnand %p1366_p0, %p267_p2 }
   0x6   : > { %p337_p4 = scmp.lt.s32.totalorder (!%p268_p3), %s1656_s18, 3  ;;  %s1667_s27 = smov (!%p268_p3), 64  }
   0x7   : > { %271 = sbr.rel (%p268_p3) target bundleno = 410 (0x19a), region = 40 }
   0xc   : > { %v1606_v0 = vld [vmem:[%s2082_s3 + $0x98] sm:$0xff]   ;;  %v1666_v1 = vmov 0   ;;  %s2090_s18 = smov (!%p337_p4, %s1656_s18), 3  ;;  %v1608_v3 = vld [vmem:[%s2082_s3 + $0x90] sm:$0xff]   ;;  %v1610_v5 = vld [vmem:[%s2082_s3 + $0x88] sm:$0xff]   ;;  %vm529_vm0 = vcmask 523264  }
   0xd   : > { %744 = vmatprep.subr.bf16.mxu0 %v1666_v1  ;;  %905 = vmatprep.subr.bf16.mxu1 %v1666_v1  ;;  %v1607_v2 = vld [vmem:[%s2082_s3 + $0x38] sm:$0xff]   ;;  %s1731_s28 = smul.u32 80, %s2090_s18  ;;  %v1609_v4 = vld [vmem:[%s2082_s3 + $0x30] sm:$0xff]   ;;  %v1611_v6 = vld [vmem:[%s2082_s3 + $0x28] sm:$0xff]   ;;  %s1511_s25 = sshll.u32 %s2090_s18, 5 }
   0xe   : > { %745 = vmatpush1.bf16.msra.mxu0 %v1606_v0  ;;  %906 = vmatpush1.bf16.msra.mxu1 %v1607_v2  ;;  %v1612_v44 = vld [vmem:[%s2082_s3 + $0x80] sm:$0xff]   ;;  %v1614_v61 = vld [vmem:[%s2082_s3 + $0x78] sm:$0xff]   ;;  %s386_s29 = scalar_lea.vmem %s2084_s5, %s1511_s25 }
   0xf   : > { %746 = vmatprep.subr.bf16.mxu0 %v1666_v1  ;;  %907 = vmatprep.subr.bf16.mxu1 %v1666_v1  ;;  %s1744_s10 = scalar_lea.vmem %s2079_s0, %s1731_s28  ;;  %s1508_s11 = sadd.s32 64, %s1731_s28  ;;  %v1613_v56 = vld [vmem:[%s2082_s3 + $0x20] sm:$0xff]   ;;  %v1615_v63 = vld [vmem:[%s2082_s3 + $0x18] sm:$0xff]  }
  0x10   : > { %v1751_v7 = vld [vmem:[%s1744_s10 + $0x10] sm:$0xf]  ;;  %v394_v8 = vld [vmem:[%s1744_s10 + $0x14] sm:$0x1]  ;;  %v1755_v9 = vld [vmem:[%s1744_s10] sm:$0xf]  ;;  %s362_s16 = scalar_lea.vmem %s2080_s1, %s1508_s11 }
  0x11   : > { %v1759_v10 = vcombine.low %v1751_v7, %v394_v8  ;;  %v390_v11 = vld [vmem:[%s1744_s10 + $0x4] sm:$0x1]  ;;  %v1763_v12 = vld [vmem:[%s1744_s10 + $0x18] sm:$0xf]  ;;  %v396_v13 = vld [vmem:[%s1744_s10 + $0x1c] sm:$0x1] }
  0x12   : > { %747 = vmatpush1.bf16.msra.mxu0 %v1608_v3  ;;  %908 = vmatpush1.bf16.msra.mxu1 %v1609_v4  ;;  %v1767_v14 = vcombine.low %v1755_v9, %v390_v11  ;;  %v1770_v15 = vcombine.low %v1763_v12, %v396_v13  ;;  %v1773_v16 = vld [vmem:[%s1744_s10 + $0x8] sm:$0xf]  ;;  %v392_v17 = vld [vmem:[%s1744_s10 + $0xc] sm:$0x1]  ;;  %v1777_v18 = vld [vmem:[%s1744_s10 + $0x20] sm:$0xf] }
  0x13   : > { %748 = vmatprep.subr.bf16.mxu0 %v1666_v1  ;;  %909 = vmatprep.subr.bf16.mxu1 %v1666_v1  ;;  %v464_v19 = vshrl.u32 %v1759_v10, 16  ;;  %v466_v20 = vshll.u32 %v1759_v10, 16  ;;  %v1783_v21 = vcombine.low %v1773_v16, %v392_v17  ;;  %v398_v22 = vld [vmem:[%s1744_s10 + $0x24] sm:$0x1]  ;;  %v1787_v23 = vld [vmem:[%s1744_s10 + $0x28] sm:$0xf] }
  0x14   : > { %v450_v24 = vshrl.u32 %v1767_v14, 16  ;;  %v452_v25 = vshll.u32 %v1767_v14, 16  ;;  %v471_v26 = vshrl.u32 %v1770_v15, 16  ;;  %v473_v27 = vshll.u32 %v1770_v15, 16  ;;  %v400_v28 = vld [vmem:[%s1744_s10 + $0x2c] sm:$0x1] }
  0x15   : > { %v468_v29 = vrot.slane %v466_v20, 1  ;;  %v457_v30 = vshrl.u32 %v1783_v21, 16  ;;  %v459_v31 = vshll.u32 %v1783_v21, 16  ;;  %v1798_v32 = vcombine.low %v1777_v18, %v398_v22  ;;  %v1801_v33 = vld [vmem:[%s1744_s10 + $0x30] sm:$0xf]  ;;  %s1510_s17 = sadd.s32 72, %s1731_s28 }
  0x16   : > { %749 = vmatpush1.bf16.msra.mxu0 %v1610_v5  ;;  %910 = vmatpush1.bf16.msra.mxu1 %v1611_v6  ;;  %v454_v34 = vrot.slane %v452_v25, 1  ;;  %v475_v35 = vrot.slane %v473_v27, 1  ;;  %v1810_v36 = vcombine.low %v1787_v23, %v400_v28  ;;  %v402_v37 = vld [vmem:[%s1744_s10 + $0x34] sm:$0x1]  ;;  %v1814_v38 = vld [vmem:[%s1744_s10 + $0x38] sm:$0xf]  ;;  %s375_s24 = scalar_lea.vmem %s2081_s2, %s1510_s17 }
  0x17   : > { %750 = vmatprep.subr.bf16.mxu0 %v1666_v1  ;;  %911 = vmatprep.subr.bf16.mxu1 %v1666_v1  ;;  %v469_v39 = vor.u32 %v468_v29, %v464_v19  ;;  %v461_v40 = vrot.slane %v459_v31, 1  ;;  %v478_v41 = vshrl.u32 %v1798_v32, 16  ;;  %v480_v42 = vshll.u32 %v1798_v32, 16  ;;  %v404_v43 = vld [vmem:[%s1744_s10 + $0x3c] sm:$0x1]  ;;  %v1616_v13 = vld [vmem:[%s2082_s3 + $0x70] sm:$0xff]  }
  0x18   : > { %v455_v45 = vor.u32 %v454_v34, %v450_v24  ;;  %v485_v46 = vshrl.u32 %v1810_v36, 16  ;;  %v487_v47 = vshll.u32 %v1810_v36, 16  ;;  %v1828_v48 = vld [vmem:[%s362_s16] sm:$0xf]  ;;  %v406_v49 = vld [vmem:[%s362_s16 + $0x4] sm:$0x1]  ;;  %v476_v50 = vor.u32 %v475_v35, %v471_v26 }
  0x19   : > { %509 = vrot.lane.b32.xlu1 %v469_v39, %s1667_s27  ;;  %v482_v51 = vrot.slane %v480_v42, 1  ;;  %v1832_v52 = vcombine.low %v1801_v33, %v402_v37  ;;  %v1835_v53 = vcombine.low %v1814_v38, %v404_v43  ;;  %v1837_v54 = vld [vmem:[%s375_s24] sm:$0xf]  ;;  %v408_v55 = vld [vmem:[%s375_s24 + $0x4] sm:$0x1]  ;;  %v462_v57 = vor.u32 %v461_v40, %v457_v30  ;;  %v1617_v24 = vld [vmem:[%s2082_s3 + $0x10] sm:$0xff]  }
  0x1a   : > { %751 = vmatpush1.bf16.msra.mxu0 %v1612_v44  ;;  %505 = vrot.lane.b32.xlu0 %v455_v45, %s1667_s27  ;;  %v489_v58 = vrot.slane %v487_v47, 1  ;;  %v1844_v59 = vcombine.low %v1828_v48, %v406_v49  ;;  %v1847_v60 = vcombine.low %v1837_v54, %v408_v55  ;;  %v1618_v26 = vld [vmem:[%s2082_s3 + $0x68] sm:$0xff]   ;;  %v522_v27 = vrot.slane %v1783_v21, 1  ;;  %v1621_v42 = vld [vmem:[%s2082_s3] sm:$0xff]   ;;  %v1623_v47 = vld [vmem:[%s2082_s3 + $0x58] sm:$0xff]  }
  0x1b   : > { %752 = vmatprep.subr.bf16.mxu0 %v1666_v1  ;;  %v494_v62 = vshll.u32 %v1832_v52, 16  ;;  %912 = vmatpush1.bf16.msra.mxu1 %v1613_v56  ;;  %v492_v0 = vshrl.u32 %v1832_v52, 16  ;;  %v499_v2 = vshrl.u32 %v1835_v53, 16  ;;  %v501_v3 = vshll.u32 %v1835_v53, 16  ;;  %v1619_v31 = vld [vmem:[%s2082_s3 + $0x8] sm:$0xff]  }
  0x1c   : > { %v608_v4 = vshrl.u32 %v1844_v59, 16  ;;  %913 = vmatprep.subr.bf16.mxu1 %v1666_v1  ;;  %v490_v5 = vor.u32 %v489_v58, %v485_v46  ;;  %v610_v8 = vshll.u32 %v1844_v59, 16  ;;  %v978_v11 = vshll.u32 %v1847_v60, 16  ;;  %v1626_v55 = vld [vmem:[%s2082_s3 + $0xa8] sm:$0xff]   ;;  %v1629_v58 = vld [vmem:[%s2082_s3 + $0x40] sm:$0xff]  }
  0x1d   : > { %511 = vrot.lane.b32.xlu1 %v476_v50, %s1667_s27  ;;  %v496_v6 = vrot.slane %v494_v62, 1  ;;  %v483_v17 = vor.u32 %v482_v51, %v478_v41  ;;  %v503_v19 = vrot.slane %v501_v3, 1  ;;  %v976_v20 = vshrl.u32 %v1847_v60, 16  ;;  %v1624_v51 = vld [vmem:[%s2082_s3 + $0xb0] sm:$0xff]   ;;  %v1627_v56 = vld [vmem:[%s2082_s3 + $0x48] sm:$0xff]  }
  0x1e   : > { %753 = vmatpush1.bf16.msra.mxu0 %v1614_v61  ;;  %507 = vrot.lane.b32.xlu0 %v462_v57, %s1667_s27  ;;  %v980_v22 = vrot.slane %v978_v11, 1  ;;  %v612_v29 = vrot.slane %v610_v8, 1  ;;  %v523_v30 = vrot.slane %v1759_v10, 1  ;;  %v524_v34 = vrot.slane %v1770_v15, 1  ;;  %v1620_v10 = vld [vmem:[%s2082_s3 + $0x60] sm:$0xff]  }
  0x1f   : > { %754 = vmatprep.subr.bf16.mxu0 %v1666_v1  ;;  %914 = vmatpush1.bf16.msra.mxu1 %v1615_v63  ;;  %v504_v25 = vor.u32 %v503_v19, %v499_v2  ;;  %v497_v28 = vor.u32 %v496_v6, %v492_v0  ;;  %v521_v21 = vrot.slane %v1767_v14, 1  ;;  %v525_v40 = vrot.slane %v1798_v32, 1  ;;  %v1628_v57 = vld [vmem:[%s2082_s3 + $0xa0] sm:$0xff]  }
  0x20   : > { %915 = vmatprep.subr.bf16.mxu1 %v1666_v1  ;;  %v1406_v35 = vcombine.low %v522_v27, %v523_v30  ;;  %v981_v37 = vor.u32 %v980_v22, %v976_v20  ;;  %v1893_v39 = vcombine.low %v523_v30, %v524_v34  ;;  %v613_v15 = vor.u32 %v612_v29, %v608_v4  ;;  %v1633_v20 = vld [vmem:[%s2082_s3 + $0xe0] sm:$0xff]  }
  0x21   : > { %515 = vrot.lane.b32.xlu1 %v490_v5, %s1667_s27  ;;  %v1430_v41 = vcombine.low %v521_v21, %v522_v27  ;;  %v526_v14 = vrot.slane %v1810_v36, 1  ;;  %v1903_v43 = vcombine.low %v524_v34, %v525_v40  ;;  %v527_v32 = vrot.slane %v1832_v52, 1  ;;  %v1622_v36 = vld [vmem:[%s2082_s3 + $0xb8] sm:$0xff]   ;;  %v1639_v21 = vld [vmem:[%s2082_s3 + $0x110] sm:$0xff]  }
  0x22   : > { %755 = vmatpush1.bf16.msra.mxu0 %v1616_v13  ;;  %513 = vrot.lane.b32.xlu0 %v483_v17, %s1667_s27  ;;  %v528_v46 = vrot.slane %v1835_v53, 1  ;;  %v616_v50 = vrot.slane %v1844_v59, 1  ;;  %v1625_v53 = vld [vmem:[%s2082_s3 + $0x50] sm:$0xff]   ;;  %v984_v59 = vrot.slane %v1847_v60, 1  ;;  %v1630_v5 = vld [vmem:[%s2082_s3 + $0xf8] sm:$0xff]  }
  0x23   : > { %756 = vmatprep.subr.bf16.mxu0 %v1666_v1  ;;  %916 = vmatpush1.bf16.msra.mxu1 %v1617_v24  ;;  %v1908_v44 = vcombine.low %v525_v40, %v526_v14  ;;  %v1914_v45 = vcombine.low %v526_v14, %v527_v32 }
  0x24   : > { %917 = vmatprep.subr.bf16.mxu1 %v1666_v1  ;;  %1425 = vmatprep.mubr.msk.bf16.mxu0 %vm529_vm0, %v1406_v35  ;;  %v1922_v49 = vcombine.low %v527_v32, %v528_v46  ;;  %v1929_v52 = vcombine.low %v528_v46, %v616_v50  ;;  %v1955_v61 = vcombine.low %v616_v50, %v984_v59  ;;  %v1638_v35 = vld [vmem:[%s2082_s3 + $0x118] sm:$0xff]  }
  0x25   : > { %519 = vrot.lane.b32.xlu1 %v504_v25, %s1667_s27  ;;  %1449 = vmatprep.mubr.msk.bf16.mxu1 %vm529_vm0, %v1430_v41 }
  0x26   : > { %757 = vmatpush1.bf16.msra.mxu0 %v1618_v26  ;;  %517 = vrot.lane.b32.xlu0 %v497_v28, %s1667_s27  ;;  %v1635_v28 = vld [vmem:[%s2082_s3 + $0xd0] sm:$0xff]  }
  0x27   : > { %758 = vmatprep.subr.bf16.mxu0 %v1666_v1  ;;  %918 = vmatpush1.bf16.msra.mxu1 %v1619_v31 }
  0x28   : > { %919 = vmatprep.subr.bf16.mxu1 %v1666_v1 }
  0x29   : > { %982 = vrot.lane.b32.xlu1 %v981_v37, %s1667_s27  ;;  %v1640_v37 = vld [vmem:[%s2082_s3 + $0x108] sm:$0xff]  }
  0x2a   : > { %759 = vmatpush1.bf16.msra.mxu0 %v1620_v10  ;;  %614 = vrot.lane.b32.xlu0 %v613_v15, %s1667_s27  ;;  %v1641_v10 = vld [vmem:[%s2082_s3 + $0x100] sm:$0xff]  }
  0x2b   : > { %768 = vmatprep.subr.bf16.mxu0 %v1666_v1  ;;  %920 = vmatpush1.bf16.msra.mxu1 %v1621_v42 }
  0x2c   : > { %929 = vmatprep.subr.bf16.mxu1 %v1666_v1 }
  0x2e   : > { %769 = vmatpush2.bf16.msra.mxu0 %v1622_v36 }
  0x2f   : > { %770 = vmatprep.subr.bf16.mxu0 %v1666_v1  ;;  %930 = vmatpush2.bf16.msra.mxu1 %v1623_v47 }
  0x30   : > { %931 = vmatprep.subr.bf16.mxu1 %v1666_v1 }
  0x32   : > { %771 = vmatpush2.bf16.msra.mxu0 %v1624_v51 }
  0x33   : > { %772 = vmatprep.subr.bf16.mxu0 %v1666_v1  ;;  %932 = vmatpush2.bf16.msra.mxu1 %v1625_v53 }
  0x34   : > { %933 = vmatprep.subr.bf16.mxu1 %v1666_v1 }
  0x36   : > { %773 = vmatpush2.bf16.msra.mxu0 %v1626_v55 }
  0x37   : > { %774 = vmatprep.subr.bf16.mxu0 %v1666_v1  ;;  %934 = vmatpush2.bf16.msra.mxu1 %v1627_v56 }
  0x38   : > { %935 = vmatprep.subr.bf16.mxu1 %v1666_v1 }
  0x3a   : > { %775 = vmatpush2.bf16.msra.mxu0 %v1628_v57 }
  0x3b   : > { %1094 = vmatprep.subr.bf16.mxu0 %v1666_v1  ;;  %936 = vmatpush2.bf16.msra.mxu1 %v1629_v58 }
  0x3c   : > { %1543 = vmatprep.subr.bf16.mxu1 %v1666_v1 }
  0x8b   : > { %v510_v63 = vpop.permute.xlu1 %509 }
  0x8c   : > { %v506_v62 = vpop.permute.xlu0 %505  ;;  %v538_v0 = vsel %vm529_vm0, %v1751_v7, %v510_v63  ;;  %v1631_v7 = vld [vmem:[%s2082_s3 + $0xf0] sm:$0xff]  }
  0x8d   : > { %v532_v3 = vsel %vm529_vm0, %v1755_v9, %v506_v62 }
  0x8f   : > { %v512_v8 = vpop.permute.xlu1 %511 }
  0x90   : > { %v508_v2 = vpop.permute.xlu0 %507 }
  0x91   : > { %v535_v4 = vsel %vm529_vm0, %v1773_v16, %v508_v2  ;;  %v541_v16 = vsel %vm529_vm0, %v1763_v12, %v512_v8 }
  0x92   : > { %v1405_v6 = vcombine.low %v535_v4, %v538_v0  ;;  %v1429_v60 = vcombine.low %v532_v3, %v535_v4  ;;  %v1982_v17 = vcombine.low %v538_v0, %v541_v16 }
  0x93   : > { %v516_v12 = vpop.permute.xlu1 %515 }
  0x94   : > { %777 = vmatmul.mubr.bf16.vlgmr.msra.gmra.mxu0 %v1405_v6  ;;  %938 = vmatmul.mubr.bf16.vlgmr.msra.gmra.mxu1 %v1429_v60  ;;  %v514_v11 = vpop.permute.xlu0 %513  ;;  %v547_v22 = vsel %vm529_vm0, %v1787_v23, %v516_v12  ;;  %v1634_v23 = vld [vmem:[%s2082_s3 + $0xd8] sm:$0xff]  }
  0x95   : > { %1095 = vmatpush1.bf16.msra.mxu0 %v1630_v5  ;;  %1555 = vmatpush1.bf16.msra.mxu1 %v1630_v5  ;;  %v544_v9 = vsel %vm529_vm0, %v1777_v18, %v514_v11  ;;  %v1632_v18 = vld [vmem:[%s2082_s3 + $0xe8] sm:$0xff]  }
  0x96   : > { %1096 = vmatprep.subr.bf16.mxu0 %v1666_v1  ;;  %1544 = vmatprep.subr.bf16.mxu1 %v1666_v1  ;;  %v1407_v13 = vcombine.low %v541_v16, %v544_v9  ;;  %v2000_v25 = vcombine.low %v544_v9, %v547_v22 }
  0x97   : > { %1426 = vmatprep.mubr.msk.bf16.mxu0 %vm529_vm0, %v1903_v43  ;;  %1450 = vmatprep.mubr.msk.bf16.mxu1 %vm529_vm0, %v1893_v39 }
  0x98   : > { %v518_v19 = vpop.permute.xlu0 %517 }
  0x99   : > { %1097 = vmatpush1.bf16.msra.mxu0 %v1631_v7  ;;  %1556 = vmatpush1.bf16.msra.mxu1 %v1631_v7  ;;  %v550_v24 = vsel %vm529_vm0, %v1801_v33, %v518_v19  ;;  %v520_v33 = vpop.permute.xlu1 %519 }
  0x9a   : > { %1098 = vmatprep.subr.bf16.mxu0 %v1666_v1  ;;  %1545 = vmatprep.subr.bf16.mxu1 %v1666_v1  ;;  %v1409_v26 = vcombine.low %v547_v22, %v550_v24  ;;  %v553_v29 = vsel %vm529_vm0, %v1814_v38, %v520_v33  ;;  %v1636_v38 = vld [vmem:[%s2082_s3 + $0xc8] sm:$0xff]  }
  0x9b   : > { %v1435_v31 = vcombine.low %v550_v24, %v553_v29 }
  0x9c   : > { %785 = vmatmul.mubr.bf16.gmra.mxu0 %v1407_v13  ;;  %946 = vmatmul.mubr.bf16.gmra.mxu1 %v1982_v17  ;;  %v615_v27 = vpop.permute.xlu0 %614  ;;  %v1496_v13 = vld [vmem:[%s2083_s4] ss:$0 sm:$0xff] }
  0x9d   : > { %1099 = vmatpush1.bf16.msra.mxu0 %v1632_v18  ;;  %1557 = vmatpush1.bf16.msra.mxu1 %v1632_v18  ;;  %v619_v30 = vsel %vm529_vm0, %v1828_v48, %v615_v27  ;;  %v1637_v48 = vld [vmem:[%s2082_s3 + $0xc0] sm:$0xff]  }
  0x9e   : > { %1100 = vmatprep.subr.bf16.mxu0 %v1666_v1  ;;  %1546 = vmatprep.subr.bf16.mxu1 %v1666_v1  ;;  %v1411_v34 = vcombine.low %v553_v29, %v619_v30 }
  0x9f   : > { %1451 = vmatprep.mubr.msk.bf16.mxu1 %vm529_vm0, %v1908_v44  ;;  %1427 = vmatprep.mubr.msk.bf16.mxu0 %vm529_vm0, %v1914_v45 }
  0xa1   : > { %1101 = vmatpush1.bf16.msra.mxu0 %v1633_v20  ;;  %1558 = vmatpush1.bf16.msra.mxu1 %v1633_v20 }
  0xa2   : > { %1102 = vmatprep.subr.bf16.mxu0 %v1666_v1  ;;  %1547 = vmatprep.subr.bf16.mxu1 %v1666_v1 }
  0xa4   : > { %954 = vmatmul.mubr.bf16.gmra.mxu1 %v2000_v25  ;;  %793 = vmatmul.mubr.bf16.gmra.mxu0 %v1409_v26 }
  0xa5   : > { %1103 = vmatpush1.bf16.msra.mxu0 %v1634_v23  ;;  %1559 = vmatpush1.bf16.msra.mxu1 %v1634_v23 }
  0xa6   : > { %1104 = vmatprep.subr.bf16.mxu0 %v1666_v1  ;;  %1548 = vmatprep.subr.bf16.mxu1 %v1666_v1 }
  0xa7   : > { %1452 = vmatprep.mubr.msk.bf16.mxu1 %vm529_vm0, %v1922_v49  ;;  %1428 = vmatprep.mubr.msk.bf16.mxu0 %vm529_vm0, %v1929_v52 }
  0xa9   : > { %1105 = vmatpush1.bf16.msra.mxu0 %v1635_v28  ;;  %1560 = vmatpush1.bf16.msra.mxu1 %v1635_v28 }
  0xaa   : > { %1106 = vmatprep.subr.bf16.mxu0 %v1666_v1  ;;  %1549 = vmatprep.subr.bf16.mxu1 %v1666_v1 }
  0xac   : > { %962 = vmatmul.mubr.bf16.gmra.mxu1 %v1435_v31  ;;  %801 = vmatmul.mubr.bf16.gmra.mxu0 %v1411_v34 }
  0xad   : > { %1107 = vmatpush1.bf16.msra.mxu0 %v1636_v38  ;;  %1561 = vmatpush1.bf16.msra.mxu1 %v1636_v38 }
  0xae   : > { %1108 = vmatprep.subr.bf16.mxu0 %v1666_v1  ;;  %1550 = vmatprep.subr.bf16.mxu1 %v1666_v1 }
  0xaf   : > { %1492 = vmatprep.mubr.msk.bf16.mxu0 %vm529_vm0, %v1893_v39  ;;  %1494 = vmatprep.mubr.msk.bf16.mxu1 %vm529_vm0, %v1922_v49  ;;  %v983_v39 = vpop.permute.xlu1 %982 }
  0xb0   : > { %v987_v40 = vsel %vm529_vm0, %v1837_v54, %v983_v39 }
  0xb1   : > { %1109 = vmatpush1.bf16.msra.mxu0 %v1637_v48  ;;  %1562 = vmatpush1.bf16.msra.mxu1 %v1637_v48  ;;  %v1478_v15 = vcombine.low %v619_v30, %v987_v40 }
  0xb2   : > { %1118 = vmatprep.subr.bf16.mxu0 %v1666_v1  ;;  %1551 = vmatprep.subr.bf16.mxu1 %v1666_v1 }
  0xb5   : > { %1119 = vmatpush2.bf16.msra.mxu0 %v1638_v35  ;;  %1563 = vmatpush2.bf16.msra.mxu1 %v1638_v35 }
  0xb6   : > { %1120 = vmatprep.subr.bf16.mxu0 %v1666_v1  ;;  %1552 = vmatprep.subr.bf16.mxu1 %v1666_v1 }
  0xb9   : > { %1121 = vmatpush2.bf16.msra.mxu0 %v1639_v21  ;;  %1564 = vmatpush2.bf16.msra.mxu1 %v1639_v21 }
  0xba   : > { %1122 = vmatprep.subr.bf16.mxu0 %v1666_v1  ;;  %1553 = vmatprep.subr.bf16.mxu1 %v1666_v1 }
  0xbd   : > { %1123 = vmatpush2.bf16.msra.mxu0 %v1640_v37  ;;  %1565 = vmatpush2.bf16.msra.mxu1 %v1640_v37 }
  0xbe   : > { %1124 = vmatprep.subr.bf16.mxu0 %v1666_v1  ;;  %1554 = vmatprep.subr.bf16.mxu1 %v1666_v1 }
  0xc1   : > { %1125 = vmatpush2.bf16.msra.mxu0 %v1641_v10  ;;  %1566 = vmatpush2.bf16.msra.mxu1 %v1641_v10 }
  0xc4   : > { %1127 = vmatmul.mubr.bf16.vlgmr.msra.gmra.mxu0 %v1982_v17  ;;  %1143 = vmatmul.mubr.bf16.vlgmr.msra.gmra.mxu1 %v1435_v31 }
  0xc5   : > { %1493 = vmatprep.mubr.msk.bf16.mxu0 %vm529_vm0, %v1908_v44  ;;  %1495 = vmatprep.mubr.msk.bf16.mxu1 %vm529_vm0, %v1955_v61 }
  0xcc   : > { %1135 = vmatmul.mubr.bf16.gmra.mxu0 %v2000_v25  ;;  %1151 = vmatmul.mubr.bf16.gmra.mxu1 %v1478_v15 }
 0x154   : > { %v778_v1 = vpop.f32.mrf.mxu0  ;;  %v939_v41 = vpop.f32.mrf.mxu1 }
 0x155   : > { %v940_v8 = vadd.f32 %v939_v41, %v778_v1 }
 0x156   : > { %v780_v14 = vpop.f32.mrf.mxu0  ;;  %v941_v42 = vpop.f32.mrf.mxu1 }
 0x158   : > { %v781_v43 = vpop.f32.mrf.mxu0  ;;  %v942_v32 = vpop.f32.mrf.mxu1 }
 0x159   : > { %v943_v19 = vadd.f32 %v942_v32, %v781_v43 }
 0x15a   : > { %v783_v36 = vpop.f32.mrf.mxu0  ;;  %v944_v45 = vpop.f32.mrf.mxu1 }
 0x15c   : > { %v786_v46 = vpop.f32.mrf.mxu0  ;;  %v947_v44 = vpop.f32.mrf.mxu1 }
 0x15d   : > { %v948_v29 = vadd.f32 %v947_v44, %v786_v46 }
 0x15e   : > { %v788_v47 = vpop.f32.mrf.mxu0  ;;  %v949_v49 = vpop.f32.mrf.mxu1 }
 0x160   : > { %v789_v50 = vpop.f32.mrf.mxu0  ;;  %v950_v51 = vpop.f32.mrf.mxu1 }
 0x161   : > { %v951_v41 = vadd.f32 %v950_v51, %v789_v50 }
 0x162   : > { %v952_v52 = vpop.f32.mrf.mxu1  ;;  %v791_v54 = vpop.f32.mrf.mxu0 }
 0x164   : > { %v955_v53 = vpop.f32.mrf.mxu1  ;;  %v794_v55 = vpop.f32.mrf.mxu0 }
 0x165   : > { %v956_v11 = vadd.f32 %v955_v53, %v794_v55 }
 0x166   : > { %v957_v56 = vpop.f32.mrf.mxu1  ;;  %v796_v57 = vpop.f32.mrf.mxu0 }
 0x168   : > { %v958_v58 = vpop.f32.mrf.mxu1  ;;  %v797_v59 = vpop.f32.mrf.mxu0 }
 0x169   : > { %v959_v20 = vadd.f32 %v958_v58, %v797_v59 }
 0x16a   : > { %v960_v61 = vpop.f32.mrf.mxu1  ;;  %v799_v62 = vpop.f32.mrf.mxu0 }
 0x16c   : > { %v963_v63 = vpop.f32.mrf.mxu1  ;;  %v802_v0 = vpop.f32.mrf.mxu0 }
 0x16d   : > { %v964_v30 = vadd.f32 %v963_v63, %v802_v0 }
 0x16e   : > { %v965_v2 = vpop.f32.mrf.mxu1  ;;  %v804_v3 = vpop.f32.mrf.mxu0 }
 0x170   : > { %v966_v4 = vpop.f32.mrf.mxu1  ;;  %v805_v5 = vpop.f32.mrf.mxu0 }
 0x171   : > { %v967_v14 = vadd.f32 %v966_v4, %v805_v5 }
 0x172   : > { %v968_v6 = vpop.f32.mrf.mxu1  ;;  %v807_v60 = vpop.f32.mrf.mxu0 }
 0x184   : > { %v1128_v7 = vpop.f32.mrf.mxu0  ;;  %v1144_v9 = vpop.f32.mrf.mxu1 }
 0x185   : > { %v1159_v16 = vadd.f32 %v1128_v7, %v940_v8  ;;  %v1163_v18 = vadd.f32 %v1144_v9, %v956_v11 }
 0x186   : > { %v1130_v17 = vpop.f32.mrf.mxu0  ;;  %v1146_v12 = vpop.f32.mrf.mxu1 }
 0x187   : > { %v1174_v22 = vadd.f32 %v1496_v13, %v1159_v16  ;;  %v1178_v24 = vadd.f32 %v1496_v13, %v1163_v18 }
 0x188   : > { %v1131_v25 = vpop.f32.mrf.mxu0  ;;  %v1147_v26 = vpop.f32.mrf.mxu1 }
 0x189   : > { %v1160_v23 = vadd.f32 %v1131_v25, %v943_v19  ;;  %v1164_v33 = vadd.f32 %v1147_v26, %v959_v20  ;;  %v1182_v38 = vmax.f32 %v1174_v22, 0.0  ;;  %v1186_v48 = vmax.f32 %v1178_v24, 0.0 }
 0x18a   : > { %v1133_v27 = vpop.f32.mrf.mxu0  ;;  %v1149_v28 = vpop.f32.mrf.mxu1 }
 0x18b   : > { %v1175_v31 = vadd.f32 %v1496_v13, %v1160_v23  ;;  %v1179_v34 = vadd.f32 %v1496_v13, %v1164_v33 }
 0x18c   : > { %v1136_v35 = vpop.f32.mrf.mxu0  ;;  %v1152_v21 = vpop.f32.mrf.mxu1 }
 0x18d   : > { %v1183_v37 = vmax.f32 %v1175_v31, 0.0  ;;  %v1187_v10 = vmax.f32 %v1179_v34, 0.0  ;;  %v1161_v39 = vadd.f32 %v1136_v35, %v948_v29  ;;  %v1165_v40 = vadd.f32 %v1152_v21, %v964_v30 }
 0x18e   : > { %v1138_v15 = vpop.f32.mrf.mxu0  ;;  %v1154_v1 = vpop.f32.mrf.mxu1 }
 0x18f   : > { %v1523_v42 = vpack.c.bf16 %v1183_v37, %v1182_v38  ;;  %v1533_v43 = vpack.c.bf16 %v1187_v10, %v1186_v48  ;;  %v1176_v45 = vadd.f32 %v1496_v13, %v1161_v39  ;;  %v1180_v46 = vadd.f32 %v1496_v13, %v1165_v40 }
 0x190   : > { %v1139_v32 = vpop.f32.mrf.mxu0  ;;  %v1155_v36 = vpop.f32.mrf.mxu1 }
 0x191   : > { %1524 = vst [vmem:[%s386_s29] sm:$0xff] %v1523_v42   ;;  %1541 = vst [vmem:[%s386_s29 + $0x10] sm:$0xff] %v1533_v43   ;;  %v1162_v44 = vadd.f32 %v1139_v32, %v951_v41  ;;  %v1166_v47 = vadd.f32 %v1155_v36, %v967_v14  ;;  %v1184_v55 = vmax.f32 %v1176_v45, 0.0  ;;  %v1188_v56 = vmax.f32 %v1180_v46, 0.0 }
 0x192   : > { %v1141_v49 = vpop.f32.mrf.mxu0  ;;  %v1157_v52 = vpop.f32.mrf.mxu1 }
 0x193   : > { %v1177_v54 = vadd.f32 %v1496_v13, %v1162_v44  ;;  %v1181_v53 = vadd.f32 %v1496_v13, %v1166_v47 }
 0x195   : > { %v1185_v57 = vmax.f32 %v1177_v54, 0.0  ;;  %v1189_v58 = vmax.f32 %v1181_v53, 0.0 }
 0x197   : > { %v1528_v50 = vpack.c.bf16 %v1185_v57, %v1184_v55  ;;  %v1538_v51 = vpack.c.bf16 %v1189_v58, %v1188_v56 }
 0x199   : > { %1540 = vst [vmem:[%s386_s29 + $0x8] sm:$0xff] %v1528_v50   ;;  %1542 = vst [vmem:[%s386_s29 + $0x18] sm:$0xff] %v1538_v51  }
 0x19a PF: > { %s15_s20 = sadd.s32 1, %s1664_s20   ;;  %s2085_s18 = smov %s1660_s19 }
 0x19b   : > { %p12_p5 = scmp.ge.s32.totalorder %s15_s20, 6   ;;  %s2086_s19 = smov %s2088_s21 }
 0x19d   :  { %14 = sbr.rel (!%p12_p5) target bundleno = 2 (0x2), region = 78 }

// kernel: _lambda_.20
= control target key start
LH: loop header
LB: loop body
LE: loop exit
PB: predicated region body
PF: predicated region fallthrough
CT: control target
= control target key end

     0   :  { %s237_s0 = inlined_call_operand.vmem [shape: bf16[16,1024], index: 0, kind: input, shape index: {}]   ;;  %s238_s1 = inlined_call_operand.vmem [shape: bf16[16,1024], index: 1, kind: input, shape index: {}]   ;;  %s239_s2 = inlined_call_operand.hbm [shape: f32[1,1], index: 2, kind: output, shape index: {}]  }
   0x1   :  { %v18_v0 = vld [vmem:[%s237_s0] sm:$0xff]  ;;  %v19_v2 = vld [vmem:[%s237_s0 + $0x8] sm:$0xff] }
   0x2   :  { %v42_v1 = vld [vmem:[%s238_s1] sm:$0xff]  ;;  %v43_v3 = vld [vmem:[%s238_s1 + $0x8] sm:$0xff]  ;;  %v26_v4 = vunpack.c.l.bf16 %v18_v0  ;;  %v27_v5 = vunpack.c.h.bf16 %v18_v0 }
   0x3   :  { %v50_v6 = vunpack.c.l.bf16 %v42_v1  ;;  %v51_v7 = vunpack.c.h.bf16 %v42_v1 }
   0x4   :  { %7 = vsyncpa [#allocation3], 0  ;;  %v28_v8 = vunpack.c.l.bf16 %v19_v2  ;;  %v52_v9 = vunpack.c.l.bf16 %v43_v3  ;;  %v20_v10 = vld [vmem:[%s237_s0 + $0x10] sm:$0xff]  ;;  %v29_v12 = vunpack.c.h.bf16 %v19_v2  ;;  %v53_v13 = vunpack.c.h.bf16 %v43_v3  ;;  %v21_v19 = vld [vmem:[%s237_s0 + $0x18] sm:$0xff] }
   0x5   :  { %v44_v11 = vld [vmem:[%s238_s1 + $0x10] sm:$0xff]  ;;  %v66_v14 = vsub.f32 %v26_v4, %v50_v6  ;;  %v67_v15 = vsub.f32 %v27_v5, %v51_v7  ;;  %v30_v16 = vunpack.c.l.bf16 %v20_v10  ;;  %v31_v20 = vunpack.c.h.bf16 %v20_v10  ;;  %v45_v21 = vld [vmem:[%s238_s1 + $0x18] sm:$0xff]  ;;  %v22_v26 = vld [vmem:[%s237_s0 + $0x20] sm:$0xff] }
   0x6   :  { %v54_v17 = vunpack.c.l.bf16 %v44_v11  ;;  %v68_v18 = vsub.f32 %v28_v8, %v52_v9  ;;  %v55_v22 = vunpack.c.h.bf16 %v44_v11  ;;  %v69_v23 = vsub.f32 %v29_v12, %v53_v13  ;;  %v46_v32 = vld [vmem:[%s238_s1 + $0x20] sm:$0xff]  ;;  %v23_v38 = vld [vmem:[%s237_s0 + $0x28] sm:$0xff]  ;;  %v24_v50 = vld [vmem:[%s237_s0 + $0x30] sm:$0xff] }
   0x7   :  { %v83_v24 = vmul.f32 %v66_v14, %v66_v14  ;;  %v84_v25 = vmul.f32 %v67_v15, %v67_v15  ;;  %v32_v27 = vunpack.c.l.bf16 %v21_v19  ;;  %v56_v28 = vunpack.c.l.bf16 %v45_v21  ;;  %v47_v44 = vld [vmem:[%s238_s1 + $0x28] sm:$0xff]  ;;  %v48_v56 = vld [vmem:[%s238_s1 + $0x30] sm:$0xff]  ;;  %v25_v62 = vld [vmem:[%s237_s0 + $0x38] sm:$0xff]  ;;  %s168_s0 = smov [#allocation2]  }
   0x8   :  { %v70_v29 = vsub.f32 %v30_v16, %v54_v17  ;;  %v85_v30 = vmul.f32 %v68_v18, %v68_v18  ;;  %v33_v31 = vunpack.c.h.bf16 %v21_v19  ;;  %v57_v33 = vunpack.c.h.bf16 %v45_v21  ;;  %v49_v4 = vld [vmem:[%s238_s1 + $0x38] sm:$0xff]  ;;  %s133_s1 = sshll.u32 %s168_s0, 4  ;;  %s134_s1 = int_to_ptr.vmem [resolvable:$true] %s133_s1 }
   0x9   :  { %v71_v34 = vsub.f32 %v31_v20, %v55_v22  ;;  %v86_v35 = vmul.f32 %v69_v23, %v69_v23  ;;  %v99_v36 = vadd.f32 %v84_v25, %v83_v24  ;;  %v34_v37 = vunpack.c.l.bf16 %v22_v26  ;;  %s145_s14 = scalar_lea.vmem %s134_s1, 16  ;;  %s149_s15 = scalar_lea.vmem %s134_s1, 32 }
   0xa   :  { %v58_v39 = vunpack.c.l.bf16 %v46_v32  ;;  %v72_v40 = vsub.f32 %v32_v27, %v56_v28  ;;  %v87_v41 = vmul.f32 %v70_v29, %v70_v29  ;;  %v35_v43 = vunpack.c.h.bf16 %v22_v26  ;;  %p146_p0 = scmp.ne.s32.totalorder %s134_s1, %s145_s14  ;;  %p150_p1 = scmp.lt.s32.totalorder %s134_s1, %s134_s1 }
   0xb   :  { %v100_v42 = vadd.f32 %v99_v36, %v85_v30  ;;  %v59_v45 = vunpack.c.h.bf16 %v46_v32  ;;  %v73_v46 = vsub.f32 %v33_v31, %v57_v33  ;;  %v88_v47 = vmul.f32 %v71_v34, %v71_v34  ;;  %p151_p2 = scmp.lt.s32.totalorder %s149_s15, %s145_s14 }
   0xc   :  { %v36_v49 = vunpack.c.l.bf16 %v23_v38  ;;  %v60_v51 = vunpack.c.l.bf16 %v47_v44  ;;  %v74_v52 = vsub.f32 %v34_v37, %v58_v39  ;;  %v89_v53 = vmul.f32 %v72_v40, %v72_v40 }
   0xd   :  { %v101_v48 = vadd.f32 %v100_v42, %v86_v35  ;;  %v37_v55 = vunpack.c.h.bf16 %v23_v38  ;;  %v61_v57 = vunpack.c.h.bf16 %v47_v44  ;;  %v75_v58 = vsub.f32 %v35_v43, %v59_v45  ;;  %p152_p3 = por %p151_p2, %p150_p1 }
   0xe   :  { %v90_v59 = vmul.f32 %v73_v46, %v73_v46  ;;  %v38_v61 = vunpack.c.l.bf16 %v24_v50  ;;  %v62_v63 = vunpack.c.l.bf16 %v48_v56  ;;  %v76_v0 = vsub.f32 %v36_v49, %v60_v51 }
   0xf   :  { %v102_v54 = vadd.f32 %v101_v48, %v87_v41  ;;  %v91_v1 = vmul.f32 %v74_v52, %v74_v52  ;;  %v39_v3 = vunpack.c.h.bf16 %v24_v50  ;;  %v63_v5 = vunpack.c.h.bf16 %v48_v56  ;;  %p153_p4 = pnand %p152_p3, %p146_p0 }
  0x10   :  { %v77_v6 = vsub.f32 %v37_v55, %v61_v57  ;;  %v92_v7 = vmul.f32 %v75_v58, %v75_v58  ;;  %v40_v9 = vunpack.c.l.bf16 %v25_v62  ;;  %v64_v10 = vunpack.c.l.bf16 %v49_v4 }
  0x11   :  { %v103_v60 = vadd.f32 %v102_v54, %v88_v47  ;;  %v78_v11 = vsub.f32 %v38_v61, %v62_v63  ;;  %v93_v12 = vmul.f32 %v76_v0, %v76_v0  ;;  %v41_v14 = vunpack.c.h.bf16 %v25_v62 }
  0x12   :  { %v65_v15 = vunpack.c.h.bf16 %v49_v4  ;;  %v79_v16 = vsub.f32 %v39_v3, %v63_v5  ;;  %v94_v17 = vmul.f32 %v77_v6, %v77_v6  ;;  %v80_v19 = vsub.f32 %v40_v9, %v64_v10 }
  0x13   :  { %v104_v2 = vadd.f32 %v103_v60, %v89_v53  ;;  %v95_v20 = vmul.f32 %v78_v11, %v78_v11  ;;  %vm16_vm0 = vcmask 0   ;;  %v167_v31 = vmov 0.0  }
  0x14   :  { %v81_v22 = vsub.f32 %v41_v14, %v65_v15  ;;  %v96_v23 = vmul.f32 %v79_v16, %v79_v16  ;;  %v97_v25 = vmul.f32 %v80_v19, %v80_v19  ;;  %17 = vst.msk [vmem:[#allocation2] sm:$0x1] %vm16_vm0, %v167_v31 }
  0x15   :  { %v105_v8 = vadd.f32 %v104_v2, %v90_v59 }
  0x16   :  { %v98_v27 = vmul.f32 %v81_v22, %v81_v22 }
  0x17   :  { %v106_v13 = vadd.f32 %v105_v8, %v91_v1 }
  0x19   :  { %v107_v18 = vadd.f32 %v106_v13, %v92_v7 }
  0x1b   :  { %v108_v21 = vadd.f32 %v107_v18, %v93_v12  ;;  %v82_v39 = vld [vmem:[#allocation2] sm:$0x1] }
  0x1d   :  { %v109_v24 = vadd.f32 %v108_v21, %v94_v17 }
  0x1f   :  { %v110_v26 = vadd.f32 %v109_v24, %v95_v20 }
  0x21   :  { %v111_v28 = vadd.f32 %v110_v26, %v96_v23 }
  0x23   :  { %v112_v29 = vadd.f32 %v111_v28, %v97_v25 }
  0x25   :  { %v113_v30 = vadd.f32 %v112_v29, %v98_v27 }
  0x27   :  { %114 = vadd.xlane.f32.xlu0 %v113_v30 }
  0xb0   :  { %v115_v32 = vpop.xlane.xlu0 %114 }
  0xb1   :  { %v116_v33 = vrot.slane %v115_v32, 4 }
  0xb3   :  { %v117_v34 = vadd.f32 %v116_v33, %v115_v32 }
  0xb5   :  { %v118_v35 = vrot.slane %v117_v34, 2 }
  0xb7   :  { %v119_v36 = vadd.f32 %v118_v35, %v117_v34 }
  0xb9   :  { %v120_v37 = vrot.slane %v119_v36, 1 }
  0xbb   :  { %v121_v38 = vadd.f32 %v120_v37, %v119_v36 }
  0xbd   :  { %141 = vpush %v121_v38 }
  0xee   :  { %s142_s13 = spop %141 }
  0xef   :  { %v123_v40 = vstv %s142_s13 }
  0xf0   :  { %v124_v41 = vadd.f32 %v123_v40, %v82_v39 }
  0xf2   :  { %126 = vst.msk [vmem:[#allocation2] sm:$0x1] %vm16_vm0, %v124_v41 }
  0xf3   :  { %156 = shalt.err (!%p153_p4)
}
  0xf4   :  { %136 = dma.vmem_to_hbm [thread:$0]  %s134_s1, 16, %s239_s2, [#allocation3]  }
  0xf5   :  { %165 = dma.done.wait [#allocation3], 16  }
  0xf6   :  { %166 = vsyncadd [#allocation3], 4294967280 }
  0xf7   :  { %140 = vsyncpa [#allocation3], 1 }

// kernel: _lambda_.15
= control target key start
LH: loop header
LB: loop body
LE: loop exit
PB: predicated region body
PF: predicated region fallthrough
CT: control target
= control target key end

     0   :  { %s2444_s18 = smov 0   ;;  %s2446_s19 = smov 0   ;;  %s2971_s0 = inlined_call_operand.vmem [shape: bf16[4,10,10,128], index: 0, kind: input, shape index: {}, may-alias: {0,1,2}]   ;;  %s2972_s1 = inlined_call_operand.vmem [shape: bf16[4,10,10,128], index: 1, kind: input, shape index: {}, may-alias: {0,1,2}]   ;;  %s2973_s2 = inlined_call_operand.vmem [shape: bf16[4,10,10,128], index: 2, kind: input, shape index: {}, may-alias: {0,1,2}]   ;;  %s2974_s3 = inlined_call_operand.vmem [shape: bf16[3,384,128], index: 3, kind: input, shape index: {}]   ;;  %s2975_s4 = inlined_call_operand.vmem [shape: f32[1,128], index: 4, kind: input, shape index: {}]   ;;  %s2976_s5 = inlined_call_operand.vmem [shape: bf16[4,8,8,128], index: 5, kind: output, shape index: {}]  }
   0x1   :  { %s2448_s20 = smov 0  }
   0x2 LB: > { %s27_s21 = sadd.s32 1, %s2408_s19  ;;  %p1788_p0 = scmp.ge.s32.totalorder %s2412_s20, 1  ;;  %s2412_s20 = sphi %s2448_s20, %s15_s20   ;;  %s2408_s19 = sphi %s2446_s19, %s2978_s19   ;;  %s2404_s18 = sphi %s2444_s18, %s2977_s18  }
   0x3   : > { %p29_p1 = scmp.ge.s32.totalorder %s27_s21, 4  ;;  %p267_p2 = scmp.lt.s32.totalorder %s2412_s20, 5 }
   0x5   : > { %s2980_s21 = smov (%p29_p1, %s27_s21), 0  ;;  %p268_p3 = pnand %p1788_p0, %p267_p2 }
   0x6   : > { %p337_p4 = scmp.lt.s32.totalorder (!%p268_p3), %s2404_s18, 3 }
   0x7   : > { %271 = sbr.rel (%p268_p3) target bundleno = 345 (0x159), region = 40 }
   0xc   : > { %v2301_v0 = vld [vmem:[%s2974_s3 + $0x138] sm:$0xff]   ;;  %v2304_v3 = vld [vmem:[%s2974_s3 + $0x130] sm:$0xff]   ;;  %s2982_s18 = smov (!%p337_p4, %s2404_s18), 3  ;;  %v2307_v6 = vld [vmem:[%s2974_s3 + $0x128] sm:$0xff]  }
   0xd   : > { %v2302_v1 = vld [vmem:[%s2974_s3 + $0xf8] sm:$0xff]   ;;  %2046 = vmatprep.subr.bf16.mxu0 %v2301_v0  ;;  %v2305_v4 = vld [vmem:[%s2974_s3 + $0xf0] sm:$0xff]   ;;  %v2308_v7 = vld [vmem:[%s2974_s3 + $0xe8] sm:$0xff]   ;;  %s2513_s8 = smul.u32 80, %s2982_s18  ;;  %s2014_s14 = sshll.u32 %s2982_s18, 5 }
   0xe   : > { %v2303_v2 = vld [vmem:[%s2974_s3 + $0x178] sm:$0xff]   ;;  %2047 = vmatpush3.bf16.msra.mxu0 %v2302_v1  ;;  %v2306_v5 = vld [vmem:[%s2974_s3 + $0x170] sm:$0xff]   ;;  %v2309_v8 = vld [vmem:[%s2974_s3 + $0x168] sm:$0xff]   ;;  %s2934_s18 = scalar_lea.vmem %s2976_s5, %s2014_s14 }
   0xf   : > { %2202 = vmatprep.subr.bf16.mxu1 %v2303_v2  ;;  %2048 = vmatprep.subr.bf16.mxu0 %v2304_v3  ;;  %v2310_v9 = vld [vmem:[%s2974_s3 + $0x120] sm:$0xff]   ;;  %v2313_v12 = vld [vmem:[%s2974_s3 + $0x118] sm:$0xff]   ;;  %v2316_v15 = vld [vmem:[%s2974_s3 + $0x110] sm:$0xff]   ;;  %s2531_s23 = scalar_lea.vmem %s2971_s0, %s2513_s8  ;;  %s2011_s29 = sadd.s32 64, %s2513_s8 }
  0x10   : > { %2203 = vmatpush3.bf16.msra.mxu1 %v2303_v2  ;;  %v2311_v10 = vld [vmem:[%s2974_s3 + $0xe0] sm:$0xff]   ;;  %v2315_v13 = vld [vmem:[%s2974_s3 + $0x158] sm:$0xff]   ;;  %v2318_v16 = vld [vmem:[%s2974_s3 + $0x150] sm:$0xff]   ;;  %s362_s12 = scalar_lea.vmem %s2972_s1, %s2011_s29  ;;  %s2013_s28 = sadd.s32 72, %s2513_s8 }
  0x11   : > { %2204 = vmatprep.subr.bf16.mxu1 %v2306_v5  ;;  %v2312_v11 = vld [vmem:[%s2974_s3 + $0x160] sm:$0xff]   ;;  %v2314_v14 = vld [vmem:[%s2974_s3 + $0xd8] sm:$0xff]   ;;  %v2317_v17 = vld [vmem:[%s2974_s3 + $0xd0] sm:$0xff]   ;;  %s2823_s11 = scalar_lea.vmem %s2973_s2, %s2013_s28 }
  0x12   : > { %2049 = vmatpush3.bf16.msra.mxu0 %v2305_v4  ;;  %v2319_v18 = vld [vmem:[%s2974_s3 + $0x108] sm:$0xff]   ;;  %v2322_v21 = vld [vmem:[%s2974_s3 + $0x100] sm:$0xff]   ;;  %v2544_v24 = vld [vmem:[%s2531_s23 + $0x10] sm:$0xf] }
  0x13   : > { %2050 = vmatprep.subr.bf16.mxu0 %v2307_v6  ;;  %v2320_v19 = vld [vmem:[%s2974_s3 + $0xc8] sm:$0xff]   ;;  %v394_v25 = vld [vmem:[%s2531_s23 + $0x14] sm:$0x1]  ;;  %v2324_v27 = vld [vmem:[%s2974_s3 + $0x140] sm:$0xff]  }
  0x14   : > { %2205 = vmatpush3.bf16.msra.mxu1 %v2306_v5  ;;  %v2321_v20 = vld [vmem:[%s2974_s3 + $0x148] sm:$0xff]   ;;  %v2554_v28 = vcombine.low %v2544_v24, %v394_v25  ;;  %v2557_v29 = vld [vmem:[%s2531_s23 + $0x18] sm:$0xf]  ;;  %v396_v30 = vld [vmem:[%s2531_s23 + $0x1c] sm:$0x1] }
  0x15   : > { %2206 = vmatprep.subr.bf16.mxu1 %v2309_v8  ;;  %v2540_v22 = vld [vmem:[%s2531_s23 + $0x8] sm:$0xf]  ;;  %v392_v23 = vld [vmem:[%s2531_s23 + $0xc] sm:$0x1]  ;;  %v2323_v31 = vld [vmem:[%s2974_s3 + $0xc0] sm:$0xff]   ;;  %v2566_v34 = vcombine.low %v2557_v29, %v396_v30 }
  0x16   : > { %2051 = vmatpush3.bf16.msra.mxu0 %v2308_v7  ;;  %v2548_v26 = vcombine.low %v2540_v22, %v392_v23  ;;  %v464_v36 = vshrl.u32 %v2554_v28, 16  ;;  %v466_v37 = vshll.u32 %v2554_v28, 16  ;;  %v2328_v38 = vld [vmem:[%s2974_s3 + $0x78] sm:$0xff]   ;;  %v507_v39 = vrot.slane %v2554_v28, 1  ;;  %v2576_v41 = vld [vmem:[%s2531_s23 + $0x20] sm:$0xf] }
  0x17   : > { %2052 = vmatprep.subr.bf16.mxu0 %v2310_v9  ;;  %v398_v42 = vld [vmem:[%s2531_s23 + $0x24] sm:$0x1]  ;;  %v2332_v43 = vld [vmem:[%s2974_s3 + $0xb8] sm:$0xff]   ;;  %v508_v45 = vrot.slane %v2566_v34, 1  ;;  %v1851_v51 = vcombine.low %v2540_v22, %v2544_v24  ;;  %v2335_v53 = vld [vmem:[%s2974_s3 + $0xb0] sm:$0xff]   ;;  %v471_v54 = vshrl.u32 %v2566_v34, 16  ;;  %v1854_v9 = vcombine.low %v2557_v29, %v2576_v41 }
  0x18   : > { %2207 = vmatpush3.bf16.msra.mxu1 %v2309_v8  ;;  %v457_v32 = vshrl.u32 %v2548_v26, 16  ;;  %v459_v33 = vshll.u32 %v2548_v26, 16  ;;  %v506_v35 = vrot.slane %v2548_v26, 1  ;;  %v468_v44 = vrot.slane %v466_v37, 1  ;;  %v2330_v52 = vld [vmem:[%s2974_s3 + $0x38] sm:$0xff]   ;;  %v2333_v60 = vld [vmem:[%s2974_s3 + $0x70] sm:$0xff]  }
  0x19   : > { %2208 = vmatprep.subr.bf16.mxu1 %v2312_v11  ;;  %v2588_v47 = vcombine.low %v2576_v41, %v398_v42  ;;  %v473_v55 = vshll.u32 %v2566_v34, 16  ;;  %v2334_v63 = vld [vmem:[%s2974_s3 + $0x30] sm:$0xff]   ;;  %v2337_v2 = vld [vmem:[%s2974_s3 + $0x68] sm:$0xff]   ;;  %v404_v23 = vld [vmem:[%s2531_s23 + $0x3c] sm:$0x1] }
  0x1a   : > { %2053 = vmatpush3.bf16.msra.mxu0 %v2311_v10  ;;  %v461_v40 = vrot.slane %v459_v33, 1  ;;  %v1853_v46 = vcombine.low %v506_v35, %v507_v39  ;;  %v2592_v49 = vor.u32 %v468_v44, %v464_v36  ;;  %v2339_v3 = vld [vmem:[%s2974_s3 + $0xa8] sm:$0xff]   ;;  %v2640_v8 = vld [vmem:[%s2531_s23 + $0x30] sm:$0xf]  ;;  %v402_v10 = vld [vmem:[%s2531_s23 + $0x34] sm:$0x1] }
  0x1b   : > { %2054 = vmatprep.subr.bf16.mxu0 %v2313_v12  ;;  %v509_v50 = vrot.slane %v2588_v47, 1  ;;  %v478_v58 = vshrl.u32 %v2588_v47, 16  ;;  %v480_v59 = vshll.u32 %v2588_v47, 16  ;;  %v475_v61 = vrot.slane %v473_v55, 1  ;;  %v2338_v5 = vld [vmem:[%s2974_s3 + $0x28] sm:$0xff]   ;;  %v2342_v12 = vld [vmem:[%s2974_s3 + $0xa0] sm:$0xff]  }
  0x1c   : > { %2209 = vmatpush3.bf16.msra.mxu1 %v2312_v11  ;;  %v2590_v48 = vor.u32 %v461_v40, %v457_v32  ;;  %2218 = vmatprep.mubr.bf16.mxu1 %v1853_v46  ;;  %v2636_v6 = vld [vmem:[%s2531_s23 + $0x28] sm:$0xf]  ;;  %v400_v7 = vld [vmem:[%s2531_s23 + $0x2c] sm:$0x1]  ;;  %v2341_v25 = vld [vmem:[%s2974_s3 + $0x20] sm:$0xff]  }
  0x1d   : > { %2210 = vmatprep.subr.bf16.mxu1 %v2315_v13  ;;  %v1856_v57 = vcombine.low %v508_v45, %v509_v50  ;;  %v482_v62 = vrot.slane %v480_v59, 1  ;;  %v2619_v0 = vor.u32 %v475_v61, %v471_v54  ;;  %v2646_v11 = vcombine.low %v2636_v6, %v400_v7  ;;  %v2673_v30 = vld [vmem:[%s362_s12] sm:$0xf]  ;;  %v2346_v42 = vld [vmem:[%s2974_s3 + $0x58] sm:$0xff]   ;;  %v2365_v28 = vld [vmem:[%s2974_s3 + $0x1f0] sm:$0xff]  }
  0x1e   : > { %2055 = vmatpush3.bf16.msra.mxu0 %v2314_v14  ;;  %v1852_v56 = vcombine.low %v2590_v48, %v2592_v49  ;;  %v2340_v14 = vld [vmem:[%s2974_s3 + $0x60] sm:$0xff]   ;;  %v2347_v46 = vld [vmem:[%s2974_s3 + $0x18] sm:$0xff]   ;;  %v2369_v47 = vld [vmem:[%s2974_s3 + $0x1e8] sm:$0xff]  }
  0x1f   : > { %2056 = vmatprep.subr.bf16.mxu0 %v2316_v15  ;;  %v2621_v1 = vor.u32 %v482_v62, %v478_v58  ;;  %v485_v15 = vshrl.u32 %v2646_v11, 16  ;;  %v2774_v34 = vcombine.low %v2592_v49, %v2619_v0  ;;  %v1890_v49 = vcombine.low %v2544_v24, %v2557_v29  ;;  %v2373_v24 = vld [vmem:[%s2974_s3 + $0x1a0] sm:$0xff]   ;;  %v2378_v29 = vld [vmem:[%s2974_s3 + $0x218] sm:$0xff]  }
  0x20   : > { %2211 = vmatpush3.bf16.msra.mxu1 %v2315_v13  ;;  %841 = vmatprep.mubr.bf16.mxu0 %v1852_v56  ;;  %v2652_v13 = vcombine.low %v2640_v8, %v402_v10  ;;  %v390_v10 = vld [vmem:[%s2531_s23 + $0x4] sm:$0x1] }
  0x21   : > { %2212 = vmatprep.subr.bf16.mxu1 %v2318_v16  ;;  %v1855_v4 = vcombine.low %v2619_v0, %v2621_v1  ;;  %v2374_v0 = vld [vmem:[%s2974_s3 + $0x220] sm:$0xff]  }
  0x22   : > { %2057 = vmatpush3.bf16.msra.mxu0 %v2317_v17  ;;  %v510_v17 = vrot.slane %v2646_v11, 1 }
  0x23   : > { %2058 = vmatprep.subr.bf16.mxu0 %v2319_v18  ;;  %v2664_v18 = vld [vmem:[%s2531_s23 + $0x38] sm:$0xf] }
  0x24   : > { %2213 = vmatpush3.bf16.msra.mxu1 %v2318_v16  ;;  %v487_v16 = vshll.u32 %v2646_v11, 16  ;;  %v2676_v32 = vcombine.low %v2664_v18, %v404_v23  ;;  %v2372_v11 = vld [vmem:[%s2974_s3 + $0x1e0] sm:$0xff]  }
  0x25   : > { %2214 = vmatprep.subr.bf16.mxu1 %v2321_v20 }
  0x26   : > { %2059 = vmatpush3.bf16.msra.mxu0 %v2320_v19  ;;  %v492_v19 = vshrl.u32 %v2652_v13, 16  ;;  %v499_v54 = vshrl.u32 %v2676_v32, 16  ;;  %v501_v55 = vshll.u32 %v2676_v32, 16 }
  0x27   : > { %2060 = vmatprep.subr.bf16.mxu0 %v2322_v21  ;;  %v511_v21 = vrot.slane %v2652_v13, 1 }
  0x28   : > { %2215 = vmatpush3.bf16.msra.mxu1 %v2321_v20  ;;  %v494_v20 = vshll.u32 %v2652_v13, 16  ;;  %v503_v61 = vrot.slane %v501_v55, 1  ;;  %v2383_v55 = vld [vmem:[%s2974_s3 + $0x1c8] sm:$0xff]  }
  0x29   : > { %2216 = vmatprep.subr.bf16.mxu1 %v2324_v27  ;;  %v1859_v36 = vcombine.low %v510_v17, %v511_v21 }
  0x2a   : > { %2061 = vmatpush3.bf16.msra.mxu0 %v2323_v31  ;;  %v406_v31 = vld [vmem:[%s362_s12 + $0x4] sm:$0x1]  ;;  %v496_v33 = vrot.slane %v494_v20, 1 }
  0x2b   : > { %2098 = vmatprep.subr.bf16.mxu0 %v2328_v38  ;;  %v2683_v37 = vcombine.low %v2673_v30, %v406_v31  ;;  %v2350_v38 = vld [vmem:[%s2974_s3 + $0x98] sm:$0xff]  }
  0x2c   : > { %2217 = vmatpush3.bf16.msra.mxu1 %v2324_v27  ;;  %v489_v27 = vrot.slane %v487_v16, 1  ;;  %v2694_v44 = vor.u32 %v496_v33, %v492_v19  ;;  %v2359_v16 = vld [vmem:[%s2974_s3 + $0x80] sm:$0xff]  }
  0x2d   : > { %2226 = vmatprep.subr.bf16.mxu1 %v2332_v43  ;;  %842 = vmatmul.mubr.bf16.vlgmr.msra.gmra.mxu0 %v1851_v51  ;;  %v589_v51 = vrot.slane %v2683_v37, 1  ;;  %v583_v58 = vshrl.u32 %v2683_v37, 16  ;;  %v585_v59 = vshll.u32 %v2683_v37, 16  ;;  %v2357_v19 = vld [vmem:[%s2974_s3 + $0x40] sm:$0xff]  }
  0x2e   : > { %2099 = vmatpush3.bf16.msra.mxu0 %v2330_v52  ;;  %849 = vmatprep.mubr.bf16.mxu0 %v1855_v4  ;;  %v2688_v40 = vor.u32 %v489_v27, %v485_v15  ;;  %v2353_v52 = vld [vmem:[%s2974_s3 + $0x90] sm:$0xff]   ;;  %v2354_v4 = vld [vmem:[%s2974_s3 + $0x48] sm:$0xff]   ;;  %v2358_v27 = vld [vmem:[%s2974_s3] sm:$0xff]  }
  0x2f   : > { %2219 = vmatmul.mubr.bf16.vlgmr.msra.gmra.mxu1 %v1856_v57  ;;  %2100 = vmatprep.subr.bf16.mxu0 %v2333_v60  ;;  %v2351_v60 = vld [vmem:[%s2974_s3 + $0x50] sm:$0xff]   ;;  %v587_v62 = vrot.slane %v585_v59, 1  ;;  %v408_v59 = vld [vmem:[%s2823_s11 + $0x4] sm:$0x1] }
  0x30   : > { %2227 = vmatpush3.bf16.msra.mxu1 %v2332_v43  ;;  %v512_v43 = vrot.slane %v2676_v32, 1  ;;  %2222 = vmatprep.mubr.bf16.mxu1 %v1859_v36  ;;  %v1858_v56 = vcombine.low %v2688_v40, %v2694_v44  ;;  %v2364_v36 = vld [vmem:[%s2974_s3 + $0x238] sm:$0xff]   ;;  %v1894_v13 = vcombine.low %v2621_v1, %v2688_v40  ;;  %v2381_v40 = vld [vmem:[%s2974_s3 + $0x210] sm:$0xff]  }
  0x31   : > { %2228 = vmatprep.subr.bf16.mxu1 %v2335_v53  ;;  %v2376_v1 = vld [vmem:[%s2974_s3 + $0x1d8] sm:$0xff]  }
  0x32   : > { %2101 = vmatpush3.bf16.msra.mxu0 %v2334_v63  ;;  %v1862_v57 = vcombine.low %v512_v43, %v589_v51  ;;  %v2352_v63 = vld [vmem:[%s2974_s3 + $0x10] sm:$0xff]   ;;  %v2377_v32 = vld [vmem:[%s2974_s3 + $0x198] sm:$0xff]  }
  0x33   : > { %2102 = vmatprep.subr.bf16.mxu0 %v2337_v2  ;;  %v2721_v2 = vor.u32 %v503_v61, %v499_v54  ;;  %v2379_v54 = vld [vmem:[%s2974_s3 + $0x1d0] sm:$0xff]  }
  0x34   : > { %2229 = vmatpush3.bf16.msra.mxu1 %v2335_v53  ;;  %v1857_v53 = vcombine.low %v2636_v6, %v2640_v8 }
  0x35   : > { %2230 = vmatprep.subr.bf16.mxu1 %v2339_v3  ;;  %850 = vmatmul.mubr.bf16.gmra.mxu0 %v1854_v9  ;;  %v389_v9 = vld [vmem:[%s2531_s23] sm:$0xf] }
  0x36   : > { %2103 = vmatpush3.bf16.msra.mxu0 %v2338_v5  ;;  %857 = vmatprep.mubr.bf16.mxu0 %v1858_v56  ;;  %v2356_v5 = vld [vmem:[%s2974_s3 + $0x88] sm:$0xff]   ;;  %v1794_v15 = vcombine.low %v389_v9, %v390_v10 }
  0x37   : > { %2104 = vmatprep.subr.bf16.mxu0 %v2340_v14  ;;  %2223 = vmatmul.mubr.bf16.gmra.mxu1 %v1862_v57  ;;  %v2355_v14 = vld [vmem:[%s2974_s3 + $0x8] sm:$0xff]   ;;  %v2388_v57 = vld [vmem:[%s2974_s3 + $0x200] sm:$0xff]  }
  0x38   : > { %2231 = vmatpush3.bf16.msra.mxu1 %v2339_v3  ;;  %v2723_v3 = vor.u32 %v587_v62, %v583_v58  ;;  %v450_v20 = vshrl.u32 %v1794_v15, 16  ;;  %v452_v23 = vshll.u32 %v1794_v15, 16  ;;  %v2384_v56 = vld [vmem:[%s2974_s3 + $0x188] sm:$0xff]   ;;  %v2386_v58 = vld [vmem:[%s2974_s3 + $0x1c0] sm:$0xff]  }
  0x39   : > { %2232 = vmatprep.subr.bf16.mxu1 %v2342_v12 }
  0x3a   : > { %2105 = vmatpush3.bf16.msra.mxu0 %v2341_v25  ;;  %v1861_v7 = vcombine.low %v2721_v2, %v2723_v3  ;;  %v505_v25 = vrot.slane %v1794_v15, 1  ;;  %v454_v31 = vrot.slane %v452_v23, 1 }
  0x3b   : > { %2106 = vmatprep.subr.bf16.mxu0 %v2346_v42  ;;  %v2362_v42 = vld [vmem:[%s2974_s3 + $0x1f8] sm:$0xff]  }
  0x3c   : > { %2233 = vmatpush3.bf16.msra.mxu1 %v2342_v12  ;;  %v1860_v12 = vcombine.low %v2664_v18, %v2673_v30  ;;  %v1889_v33 = vcombine.low %v505_v25, %v506_v35  ;;  %v1887_v35 = vcombine.low %v389_v9, %v2540_v22  ;;  %v2780_v22 = vcombine.low %v509_v50, %v510_v17  ;;  %v2370_v50 = vld [vmem:[%s2974_s3 + $0x1a8] sm:$0xff]  }
  0x3d   : > { %2234 = vmatprep.subr.bf16.mxu1 %v2350_v38  ;;  %858 = vmatmul.mubr.bf16.gmra.mxu0 %v1857_v53  ;;  %v2367_v53 = vld [vmem:[%s2974_s3 + $0x230] sm:$0xff]   ;;  %v1893_v17 = vcombine.low %v2576_v41, %v2636_v6  ;;  %v1897_v41 = vcombine.low %v2694_v44, %v2721_v2  ;;  %v1896_v44 = vcombine.low %v2640_v8, %v2664_v18  ;;  %v2387_v8 = vld [vmem:[%s2974_s3 + $0x180] sm:$0xff]  }
  0x3e   : > { %2107 = vmatpush3.bf16.msra.mxu0 %v2347_v46  ;;  %865 = vmatprep.mubr.bf16.mxu0 %v1861_v7  ;;  %v1892_v46 = vcombine.low %v507_v39, %v508_v45  ;;  %v2366_v39 = vld [vmem:[%s2974_s3 + $0x1b0] sm:$0xff]   ;;  %v2371_v45 = vld [vmem:[%s2974_s3 + $0x228] sm:$0xff]  }
  0x3f   : > { %2108 = vmatprep.subr.bf16.mxu0 %v2351_v60  ;;  %2242 = vmatprep.mubr.bf16.mxu1 %v1889_v33  ;;  %v2380_v6 = vld [vmem:[%s2974_s3 + $0x190] sm:$0xff]  }
  0x40   : > { %2235 = vmatpush3.bf16.msra.mxu1 %v2350_v38  ;;  %v455_v38 = vor.u32 %v454_v31, %v450_v20 }
  0x41   : > { %2236 = vmatprep.subr.bf16.mxu1 %v2353_v52 }
  0x42   : > { %2109 = vmatpush3.bf16.msra.mxu0 %v2352_v63  ;;  %v1888_v26 = vcombine.low %v455_v38, %v2590_v48  ;;  %v2797_v48 = vcombine.low %v511_v21, %v512_v43  ;;  %v407_v21 = vld [vmem:[%s2823_s11] sm:$0xf] }
  0x43   : > { %2110 = vmatprep.subr.bf16.mxu0 %v2354_v4  ;;  %v1972_v43 = vcombine.low %v2673_v30, %v407_v21  ;;  %v2385_v30 = vld [vmem:[%s2974_s3 + $0x208] sm:$0xff]   ;;  %v1923_v18 = vcombine.low %v407_v21, %v408_v59 }
  0x44   : > { %2237 = vmatpush3.bf16.msra.mxu1 %v2353_v52  ;;  %v2363_v52 = vld [vmem:[%s2974_s3 + $0x1b8] sm:$0xff]  }
  0x45   : > { %2238 = vmatprep.subr.bf16.mxu1 %v2356_v5  ;;  %866 = vmatmul.mubr.bf16.gmra.mxu0 %v1860_v12  ;;  %v1249_v60 = vrot.slane %v1923_v18, 1  ;;  %v1245_v61 = vshll.u32 %v1923_v18, 16  ;;  %v1243_v63 = vshrl.u32 %v1923_v18, 16 }
  0x46   : > { %2111 = vmatpush3.bf16.msra.mxu0 %v2355_v14  ;;  %1139 = vmatprep.mubr.bf16.mxu0 %v1888_v26 }
  0x47   : > { %2112 = vmatprep.subr.bf16.mxu0 %v2357_v19  ;;  %v1974_v62 = vcombine.low %v589_v51, %v1249_v60  ;;  %v1247_v2 = vrot.slane %v1245_v61, 1 }
  0x48   : > { %2239 = vmatpush3.bf16.msra.mxu1 %v2356_v5 }
  0x49   : > { %2240 = vmatprep.subr.bf16.mxu1 %v2359_v16  ;;  %v1248_v4 = vor.u32 %v1247_v2, %v1243_v63 }
  0x4a   : > { %2113 = vmatpush3.bf16.msra.mxu0 %v2358_v27 }
  0x4b   : > { %2150 = vmatprep.subr.bf16.mxu0 %v2362_v42  ;;  %v1973_v5 = vcombine.low %v2723_v3, %v1248_v4 }
  0x4c   : > { %2241 = vmatpush3.bf16.msra.mxu1 %v2359_v16 }
  0x4d   : > { %2250 = vmatprep.subr.bf16.mxu1 %v2364_v36  ;;  %1140 = vmatmul.mubr.bf16.vlgmr.msra.gmra.mxu0 %v1887_v35 }
  0x4e   : > { %2151 = vmatpush3.bf16.msra.mxu0 %v2363_v52  ;;  %1147 = vmatprep.mubr.bf16.mxu0 %v2774_v34 }
  0x4f   : > { %2243 = vmatmul.mubr.bf16.vlgmr.msra.gmra.mxu1 %v1892_v46  ;;  %2152 = vmatprep.subr.bf16.mxu0 %v2365_v28 }
  0x50   : > { %2251 = vmatpush3.bf16.msra.mxu1 %v2364_v36  ;;  %2246 = vmatprep.mubr.bf16.mxu1 %v2780_v22 }
  0x51   : > { %2252 = vmatprep.subr.bf16.mxu1 %v2367_v53 }
  0x52   : > { %2153 = vmatpush3.bf16.msra.mxu0 %v2366_v39 }
  0x53   : > { %2154 = vmatprep.subr.bf16.mxu0 %v2369_v47 }
  0x54   : > { %2253 = vmatpush3.bf16.msra.mxu1 %v2367_v53 }
  0x55   : > { %2254 = vmatprep.subr.bf16.mxu1 %v2371_v45  ;;  %1148 = vmatmul.mubr.bf16.gmra.mxu0 %v1890_v49 }
  0x56   : > { %2155 = vmatpush3.bf16.msra.mxu0 %v2370_v50  ;;  %1155 = vmatprep.mubr.bf16.mxu0 %v1894_v13 }
  0x57   : > { %2247 = vmatmul.mubr.bf16.gmra.mxu1 %v2797_v48  ;;  %2156 = vmatprep.subr.bf16.mxu0 %v2372_v11 }
  0x58   : > { %2255 = vmatpush3.bf16.msra.mxu1 %v2371_v45  ;;  %2266 = vmatprep.mubr.bf16.mxu1 %v1892_v46 }
  0x59   : > { %2256 = vmatprep.subr.bf16.mxu1 %v2374_v0 }
  0x5a   : > { %2157 = vmatpush3.bf16.msra.mxu0 %v2373_v24 }
  0x5b   : > { %2158 = vmatprep.subr.bf16.mxu0 %v2376_v1 }
  0x5c   : > { %2257 = vmatpush3.bf16.msra.mxu1 %v2374_v0 }
  0x5d   : > { %2258 = vmatprep.subr.bf16.mxu1 %v2378_v29  ;;  %1156 = vmatmul.mubr.bf16.gmra.mxu0 %v1893_v17 }
  0x5e   : > { %2159 = vmatpush3.bf16.msra.mxu0 %v2377_v32  ;;  %1163 = vmatprep.mubr.bf16.mxu0 %v1897_v41 }
  0x5f   : > { %2160 = vmatprep.subr.bf16.mxu0 %v2379_v54 }
  0x60   : > { %2259 = vmatpush3.bf16.msra.mxu1 %v2378_v29 }
  0x61   : > { %2260 = vmatprep.subr.bf16.mxu1 %v2381_v40 }
  0x62   : > { %2161 = vmatpush3.bf16.msra.mxu0 %v2380_v6 }
  0x63   : > { %2162 = vmatprep.subr.bf16.mxu0 %v2383_v55 }
  0x64   : > { %2261 = vmatpush3.bf16.msra.mxu1 %v2381_v40 }
  0x65   : > { %2262 = vmatprep.subr.bf16.mxu1 %v2385_v30  ;;  %1164 = vmatmul.mubr.bf16.gmra.mxu0 %v1896_v44 }
  0x66   : > { %2163 = vmatpush3.bf16.msra.mxu0 %v2384_v56  ;;  %1483 = vmatprep.mubr.bf16.mxu0 %v2774_v34 }
  0x67   : > { %2164 = vmatprep.subr.bf16.mxu0 %v2386_v58 }
  0x68   : > { %2263 = vmatpush3.bf16.msra.mxu1 %v2385_v30 }
  0x69   : > { %2264 = vmatprep.subr.bf16.mxu1 %v2388_v57 }
  0x6a   : > { %2165 = vmatpush3.bf16.msra.mxu0 %v2387_v8 }
  0x6c   : > { %2265 = vmatpush3.bf16.msra.mxu1 %v2388_v57 }
  0x6d   : > { %1484 = vmatmul.mubr.bf16.vlgmr.msra.gmra.mxu0 %v1890_v49 }
  0x6e   : > { %1491 = vmatprep.mubr.bf16.mxu0 %v1894_v13 }
  0x6f   : > { %2267 = vmatmul.mubr.bf16.vlgmr.msra.gmra.mxu1 %v2780_v22 }
  0x70   : > { %2270 = vmatprep.mubr.bf16.mxu1 %v2797_v48 }
  0x75   : > { %1492 = vmatmul.mubr.bf16.gmra.mxu0 %v1893_v17 }
  0x76   : > { %1499 = vmatprep.mubr.bf16.mxu0 %v1897_v41 }
  0x77   : > { %2271 = vmatmul.mubr.bf16.gmra.mxu1 %v1974_v62 }
  0x7d   : > { %1500 = vmatmul.mubr.bf16.gmra.mxu0 %v1896_v44 }
  0x7e   : > { %1507 = vmatprep.mubr.bf16.mxu0 %v1973_v5 }
  0x85   : > { %1508 = vmatmul.mubr.bf16.gmra.mxu0 %v1972_v43 }
  0xed   : > { %v2062_v7 = vpop.f32.mrf.mxu0 }
  0xef   : > { %v2063_v9 = vpop.f32.mrf.mxu0  ;;  %v2873_v15 = vpop.f32.mrf.mxu1 }
  0xf0   : > { %v2064_v10 = vadd.f32 %v2063_v9, %v2062_v7 }
  0xf1   : > { %v2065_v12 = vpop.f32.mrf.mxu0  ;;  %v908_v16 = vpop.f32.mrf.mxu1 }
  0xf2   : > { %v909_v58 = vadd.f32 %v2064_v10, %v908_v16 }
  0xf3   : > { %v2066_v14 = vpop.f32.mrf.mxu0  ;;  %v2875_v25 = vpop.f32.mrf.mxu1 }
  0xf4   : > { %v2067_v59 = vadd.f32 %v2066_v14, %v2065_v12 }
  0xf5   : > { %v2068_v37 = vpop.f32.mrf.mxu0  ;;  %v911_v31 = vpop.f32.mrf.mxu1 }
  0xf6   : > { %v912_v2 = vadd.f32 %v2067_v59, %v911_v31  ;;  %v2919_v31 = vld [vmem:[%s2975_s4] ss:$0 sm:$0xff] }
  0xf7   : > { %v2069_v51 = vpop.f32.mrf.mxu0  ;;  %v2881_v38 = vpop.f32.mrf.mxu1 }
  0xf8   : > { %v2070_v19 = vadd.f32 %v2069_v51, %v2068_v37 }
  0xf9   : > { %v2071_v20 = vpop.f32.mrf.mxu0  ;;  %v2885_v26 = vpop.f32.mrf.mxu1 }
  0xfb   : > { %v2072_v23 = vpop.f32.mrf.mxu0  ;;  %v2891_v28 = vpop.f32.mrf.mxu1 }
  0xfc   : > { %v2073_v10 = vadd.f32 %v2072_v23, %v2071_v20 }
  0xfd   : > { %v2074_v27 = vpop.f32.mrf.mxu0  ;;  %v2895_v39 = vpop.f32.mrf.mxu1 }
  0xff   : > { %v2075_v3 = vpop.f32.mrf.mxu0 }
 0x100   : > { %v2877_v33 = vadd.f32 %v2075_v3, %v2074_v27  ;;  %v917_v3 = vadd.f32 %v2873_v15, %v2070_v19  ;;  %v920_v15 = vadd.f32 %v2875_v25, %v2073_v10 }
 0x101   : > { %v2879_v36 = vpop.f32.mrf.mxu0 }
 0x103   : > { %v2883_v42 = vpop.f32.mrf.mxu0 }
 0x105   : > { %v2080_v46 = vpop.f32.mrf.mxu0 }
 0x107   : > { %v2081_v35 = vpop.f32.mrf.mxu0 }
 0x108   : > { %v2887_v52 = vadd.f32 %v2081_v35, %v2080_v46 }
 0x109   : > { %v2889_v53 = vpop.f32.mrf.mxu0 }
 0x10b   : > { %v2893_v34 = vpop.f32.mrf.mxu0 }
 0x10d   : > { %v2114_v22 = vpop.f32.mrf.mxu0 }
 0x10f   : > { %v2115_v45 = vpop.f32.mrf.mxu0  ;;  %v2244_v47 = vpop.f32.mrf.mxu1 }
 0x110   : > { %v2116_v44 = vadd.f32 %v2115_v45, %v2114_v22 }
 0x111   : > { %v2117_v48 = vpop.f32.mrf.mxu0  ;;  %v1206_v50 = vpop.f32.mrf.mxu1 }
 0x112   : > { %v1142_v61 = vadd.f32 %v2116_v44, %v909_v58 }
 0x113   : > { %v2118_v49 = vpop.f32.mrf.mxu0  ;;  %v2897_v13 = vpop.f32.mrf.mxu1 }
 0x114   : > { %v2119_v60 = vadd.f32 %v2118_v49, %v2117_v48  ;;  %v1207_v37 = vadd.f32 %v1206_v50, %v1142_v61 }
 0x115   : > { %v2120_v0 = vpop.f32.mrf.mxu0  ;;  %v1209_v1 = vpop.f32.mrf.mxu1 }
 0x116   : > { %v1145_v51 = vadd.f32 %v2119_v60, %v912_v2 }
 0x117   : > { %v2121_v11 = vpop.f32.mrf.mxu0  ;;  %v2899_v21 = vpop.f32.mrf.mxu1 }
 0x118   : > { %v2122_v7 = vadd.f32 %v2121_v11, %v2120_v0  ;;  %v1210_v45 = vadd.f32 %v1209_v1, %v1145_v51 }
 0x119   : > { %v2123_v24 = vpop.f32.mrf.mxu0  ;;  %v2901_v43 = vpop.f32.mrf.mxu1 }
 0x11a   : > { %v1150_v16 = vadd.f32 %v2122_v7, %v917_v3 }
 0x11b   : > { %v2124_v29 = vpop.f32.mrf.mxu0  ;;  %v2905_v6 = vpop.f32.mrf.mxu1 }
 0x11c   : > { %v2125_v48 = vadd.f32 %v2124_v29, %v2123_v24  ;;  %v1215_v11 = vadd.f32 %v2244_v47, %v1150_v16  ;;  %v925_v24 = vadd.f32 %v2877_v33, %v2885_v26  ;;  %v2079_v29 = vadd.f32 %v2883_v42, %v2879_v36 }
 0x11d   : > { %v2126_v17 = vpop.f32.mrf.mxu0  ;;  %v2911_v56 = vpop.f32.mrf.mxu1 }
 0x11e   : > { %v1153_v58 = vadd.f32 %v2125_v48, %v920_v15  ;;  %v928_v36 = vadd.f32 %v2079_v29, %v2895_v39  ;;  %v933_v39 = vadd.f32 %v2881_v38, %v2887_v52 }
 0x11f   : > { %v2127_v32 = vpop.f32.mrf.mxu0 }
 0x120   : > { %v2128_v59 = vadd.f32 %v2127_v32, %v2126_v17  ;;  %v1218_v32 = vadd.f32 %v2897_v13, %v1153_v58 }
 0x121   : > { %v2129_v40 = vpop.f32.mrf.mxu0 }
 0x122   : > { %v1158_v33 = vadd.f32 %v2128_v59, %v925_v24 }
 0x123   : > { %v2130_v54 = vpop.f32.mrf.mxu0 }
 0x124   : > { %v2131_v47 = vadd.f32 %v2130_v54, %v2129_v40  ;;  %v1223_v51 = vadd.f32 %v2901_v43, %v1158_v33 }
 0x125   : > { %v2903_v41 = vpop.f32.mrf.mxu0 }
 0x127   : > { %v2907_v30 = vpop.f32.mrf.mxu0 }
 0x129   : > { %v2909_v55 = vpop.f32.mrf.mxu0 }
 0x12b   : > { %v2913_v57 = vpop.f32.mrf.mxu0 }
 0x12d   : > { %v2166_v18 = vpop.f32.mrf.mxu0 }
 0x12f   : > { %v2268_v8 = vpop.f32.mrf.mxu1  ;;  %v2167_v63 = vpop.f32.mrf.mxu0 }
 0x130   : > { %v2168_v4 = vadd.f32 %v2167_v63, %v2166_v18 }
 0x131   : > { %v1550_v62 = vpop.f32.mrf.mxu1  ;;  %v2169_v9 = vpop.f32.mrf.mxu0 }
 0x132   : > { %v1551_v27 = vadd.f32 %v2168_v4, %v1550_v62 }
 0x133   : > { %v2269_v5 = vpop.f32.mrf.mxu1  ;;  %v2170_v46 = vpop.f32.mrf.mxu0 }
 0x134   : > { %v1581_v12 = vadd.f32 %v1551_v27, %v1207_v37  ;;  %v2171_v14 = vadd.f32 %v2170_v46, %v2169_v9  ;;  %v1161_v9 = vadd.f32 %v2131_v47, %v928_v36  ;;  %v2134_v27 = vadd.f32 %v2907_v30, %v2903_v41 }
 0x135   : > { %v1553_v35 = vpop.f32.mrf.mxu1  ;;  %v2172_v22 = vpop.f32.mrf.mxu0  ;;  %v2137_v30 = vadd.f32 %v2913_v57, %v2909_v55 }
 0x136   : > { %v1554_v49 = vadd.f32 %v2171_v14, %v1553_v35  ;;  %v1596_v19 = vadd.f32 %v2919_v31, %v1581_v12  ;;  %v1226_v43 = vadd.f32 %v2911_v56, %v1161_v9  ;;  %v1166_v41 = vadd.f32 %v2134_v27, %v933_v39 }
 0x137   : > { %v2173_v50 = vpop.f32.mrf.mxu0  ;;  %v2921_v0 = vpop.f32.mrf.mxu1 }
 0x138   : > { %v1582_v20 = vadd.f32 %v1554_v49, %v1210_v45  ;;  %v2174_v23 = vadd.f32 %v2173_v50, %v2172_v22  ;;  %v1604_v61 = vmax.f32 %v1596_v19, 0.0  ;;  %v1231_v15 = vadd.f32 %v2899_v21, %v1166_v41 }
 0x139   : > { %v2175_v44 = vpop.f32.mrf.mxu0  ;;  %v1566_v25 = vpop.f32.mrf.mxu1 }
 0x13a   : > { %v1597_v18 = vadd.f32 %v2919_v31, %v1582_v20  ;;  %v1559_v60 = vadd.f32 %v2268_v8, %v2174_v23 }
 0x13b   : > { %v2176_v1 = vpop.f32.mrf.mxu0  ;;  %v2273_v4 = vpop.f32.mrf.mxu1 }
 0x13c   : > { %v1605_v62 = vmax.f32 %v1597_v18, 0.0  ;;  %v1583_v63 = vadd.f32 %v1559_v60, %v1215_v11  ;;  %v2177_v2 = vadd.f32 %v2176_v1, %v2175_v44 }
 0x13d   : > { %v2178_v17 = vpop.f32.mrf.mxu0  ;;  %v1569_v35 = vpop.f32.mrf.mxu1 }
 0x13e   : > { %v2026_v26 = vpack.c.bf16 %v1605_v62, %v1604_v61  ;;  %v1562_v8 = vadd.f32 %v2269_v5, %v2177_v2  ;;  %v1598_v7 = vadd.f32 %v2919_v31, %v1583_v63  ;;  %v2085_v5 = vadd.f32 %v2893_v34, %v2889_v53 }
 0x13f   : > { %v2179_v42 = vpop.f32.mrf.mxu0 }
 0x140   : > { %2027 = vst [vmem:[%s2934_s18] sm:$0xff] %v2026_v26   ;;  %v1584_v40 = vadd.f32 %v1562_v8, %v1218_v32  ;;  %v2180_v54 = vadd.f32 %v2179_v42, %v2178_v17  ;;  %v1606_v10 = vmax.f32 %v1598_v7, 0.0  ;;  %v936_v52 = vadd.f32 %v2891_v28, %v2085_v5 }
 0x141   : > { %v2181_v37 = vpop.f32.mrf.mxu0 }
 0x142   : > { %v1599_v13 = vadd.f32 %v2919_v31, %v1584_v40  ;;  %v1567_v3 = vadd.f32 %v2180_v54, %v1566_v25  ;;  %v1169_v56 = vadd.f32 %v2137_v30, %v936_v52 }
 0x143   : > { %v2182_v46 = vpop.f32.mrf.mxu0 }
 0x144   : > { %v1607_v12 = vmax.f32 %v1599_v13, 0.0  ;;  %v1585_v14 = vadd.f32 %v1567_v3, %v1223_v51  ;;  %v2183_v16 = vadd.f32 %v2182_v46, %v2181_v37  ;;  %v1234_v44 = vadd.f32 %v2905_v6, %v1169_v56 }
 0x145   : > { %v2184_v22 = vpop.f32.mrf.mxu0 }
 0x146   : > { %v2031_v45 = vpack.c.bf16 %v1607_v12, %v1606_v10  ;;  %v1570_v48 = vadd.f32 %v2183_v16, %v1569_v35  ;;  %v1600_v53 = vadd.f32 %v2919_v31, %v1585_v14 }
 0x147   : > { %v2185_v38 = vpop.f32.mrf.mxu0 }
 0x148   : > { %2043 = vst [vmem:[%s2934_s18 + $0x8] sm:$0xff] %v2031_v45   ;;  %v1586_v34 = vadd.f32 %v1570_v48, %v1226_v43  ;;  %v2186_v49 = vadd.f32 %v2185_v38, %v2184_v22  ;;  %v1608_v57 = vmax.f32 %v1600_v53, 0.0 }
 0x149   : > { %v2187_v50 = vpop.f32.mrf.mxu0 }
 0x14a   : > { %v1601_v19 = vadd.f32 %v2919_v31, %v1586_v34  ;;  %v1575_v20 = vadd.f32 %v2921_v0, %v2186_v49 }
 0x14b   : > { %v2188_v55 = vpop.f32.mrf.mxu0 }
 0x14c   : > { %v1609_v23 = vmax.f32 %v1601_v19, 0.0  ;;  %v1587_v11 = vadd.f32 %v1575_v20, %v1231_v15  ;;  %v2189_v28 = vadd.f32 %v2188_v55, %v2187_v50 }
 0x14e   : > { %v2036_v58 = vpack.c.bf16 %v1609_v23, %v1608_v57  ;;  %v1578_v59 = vadd.f32 %v2273_v4, %v2189_v28  ;;  %v1602_v18 = vadd.f32 %v2919_v31, %v1587_v11 }
 0x150   : > { %2044 = vst [vmem:[%s2934_s18 + $0x10] sm:$0xff] %v2036_v58   ;;  %v1588_v60 = vadd.f32 %v1578_v59, %v1234_v44  ;;  %v1610_v24 = vmax.f32 %v1602_v18, 0.0 }
 0x152   : > { %v1603_v21 = vadd.f32 %v2919_v31, %v1588_v60 }
 0x154   : > { %v1611_v29 = vmax.f32 %v1603_v21, 0.0 }
 0x156   : > { %v2041_v1 = vpack.c.bf16 %v1611_v29, %v1610_v24 }
 0x158   : > { %2045 = vst [vmem:[%s2934_s18 + $0x18] sm:$0xff] %v2041_v1  }
 0x159 PF: > { %s15_s20 = sadd.s32 1, %s2412_s20   ;;  %s2977_s18 = smov %s2408_s19 }
 0x15a   : > { %p12_p5 = scmp.ge.s32.totalorder %s15_s20, 6   ;;  %s2978_s19 = smov %s2980_s21 }
 0x15c   :  { %14 = sbr.rel (!%p12_p5) target bundleno = 2 (0x2), region = 78 }

// kernel: _lambda_.19
= control target key start
LH: loop header
LB: loop body
LE: loop exit
PB: predicated region body
PF: predicated region fallthrough
CT: control target
= control target key end

     0   :  { %7 = vsyncpa [#allocation3], 0  ;;  %vm16_vm0 = vcmask 0   ;;  %s381_s0 = inlined_call_operand.vmem [shape: bf16[32,1024], index: 0, kind: input, shape index: {}]   ;;  %s382_s1 = inlined_call_operand.vmem [shape: bf16[32,1024], index: 1, kind: input, shape index: {}]   ;;  %s383_s2 = inlined_call_operand.hbm [shape: f32[1,1], index: 2, kind: output, shape index: {}]  }
   0x1   :  { %v18_v0 = vld [vmem:[%s381_s0] sm:$0xff]  ;;  %v19_v2 = vld [vmem:[%s381_s0 + $0x8] sm:$0xff]  ;;  %v20_v10 = vld [vmem:[%s381_s0 + $0x10] sm:$0xff] }
   0x2   :  { %v66_v1 = vld [vmem:[%s382_s1] sm:$0xff]  ;;  %v67_v3 = vld [vmem:[%s382_s1 + $0x8] sm:$0xff]  ;;  %v34_v4 = vunpack.c.l.bf16 %v18_v0  ;;  %v35_v5 = vunpack.c.h.bf16 %v18_v0  ;;  %v36_v8 = vunpack.c.l.bf16 %v19_v2  ;;  %v68_v11 = vld [vmem:[%s382_s1 + $0x10] sm:$0xff]  ;;  %v37_v12 = vunpack.c.h.bf16 %v19_v2 }
   0x3   :  { %v82_v6 = vunpack.c.l.bf16 %v66_v1  ;;  %v83_v7 = vunpack.c.h.bf16 %v66_v1  ;;  %v84_v9 = vunpack.c.l.bf16 %v67_v3  ;;  %v85_v13 = vunpack.c.h.bf16 %v67_v3  ;;  %v21_v19 = vld [vmem:[%s381_s0 + $0x18] sm:$0xff]  ;;  %v22_v26 = vld [vmem:[%s381_s0 + $0x20] sm:$0xff]  ;;  %v23_v38 = vld [vmem:[%s381_s0 + $0x28] sm:$0xff] }
   0x4   :  { %v38_v16 = vunpack.c.l.bf16 %v20_v10  ;;  %v86_v17 = vunpack.c.l.bf16 %v68_v11  ;;  %v39_v20 = vunpack.c.h.bf16 %v20_v10  ;;  %v69_v21 = vld [vmem:[%s382_s1 + $0x18] sm:$0xff]  ;;  %v87_v22 = vunpack.c.h.bf16 %v68_v11  ;;  %v70_v32 = vld [vmem:[%s382_s1 + $0x20] sm:$0xff]  ;;  %v71_v44 = vld [vmem:[%s382_s1 + $0x28] sm:$0xff] }
   0x5   :  { %v114_v14 = vsub.f32 %v34_v4, %v82_v6  ;;  %v115_v15 = vsub.f32 %v35_v5, %v83_v7  ;;  %v116_v18 = vsub.f32 %v36_v8, %v84_v9  ;;  %v117_v23 = vsub.f32 %v37_v12, %v85_v13  ;;  %v24_v50 = vld [vmem:[%s381_s0 + $0x30] sm:$0xff]  ;;  %v25_v62 = vld [vmem:[%s381_s0 + $0x38] sm:$0xff]  ;;  %v26_v10 = vld [vmem:[%s381_s0 + $0x40] sm:$0xff] }
   0x6   :  { %v40_v27 = vunpack.c.l.bf16 %v21_v19  ;;  %v88_v28 = vunpack.c.l.bf16 %v69_v21  ;;  %v118_v29 = vsub.f32 %v38_v16, %v86_v17  ;;  %v41_v31 = vunpack.c.h.bf16 %v21_v19  ;;  %v72_v56 = vld [vmem:[%s382_s1 + $0x30] sm:$0xff]  ;;  %v73_v4 = vld [vmem:[%s382_s1 + $0x38] sm:$0xff]  ;;  %v74_v16 = vld [vmem:[%s382_s1 + $0x40] sm:$0xff] }
   0x7   :  { %v147_v24 = vmul.f32 %v114_v14, %v114_v14  ;;  %v148_v25 = vmul.f32 %v115_v15, %v115_v15  ;;  %v149_v30 = vmul.f32 %v116_v18, %v116_v18  ;;  %v89_v33 = vunpack.c.h.bf16 %v69_v21 }
   0x8   :  { %v119_v34 = vsub.f32 %v39_v20, %v87_v22  ;;  %v150_v35 = vmul.f32 %v117_v23, %v117_v23  ;;  %v42_v37 = vunpack.c.l.bf16 %v22_v26  ;;  %v90_v39 = vunpack.c.l.bf16 %v70_v32  ;;  %v27_v22 = vld [vmem:[%s381_s0 + $0x48] sm:$0xff] }
   0x9   :  { %v179_v36 = vadd.f32 %v148_v25, %v147_v24  ;;  %v120_v40 = vsub.f32 %v40_v27, %v88_v28  ;;  %v151_v41 = vmul.f32 %v118_v29, %v118_v29  ;;  %v43_v43 = vunpack.c.h.bf16 %v22_v26  ;;  %v75_v28 = vld [vmem:[%s382_s1 + $0x48] sm:$0xff] }
   0xa   :  { %v91_v45 = vunpack.c.h.bf16 %v70_v32  ;;  %v121_v46 = vsub.f32 %v41_v31, %v89_v33  ;;  %v152_v47 = vmul.f32 %v119_v34, %v119_v34  ;;  %v44_v49 = vunpack.c.l.bf16 %v23_v38  ;;  %v28_v34 = vld [vmem:[%s381_s0 + $0x50] sm:$0xff] }
   0xb   :  { %v180_v42 = vadd.f32 %v179_v36, %v149_v30  ;;  %v92_v51 = vunpack.c.l.bf16 %v71_v44  ;;  %v122_v52 = vsub.f32 %v42_v37, %v90_v39  ;;  %v153_v53 = vmul.f32 %v120_v40, %v120_v40  ;;  %v76_v40 = vld [vmem:[%s382_s1 + $0x50] sm:$0xff] }
   0xc   :  { %v45_v55 = vunpack.c.h.bf16 %v23_v38  ;;  %v93_v57 = vunpack.c.h.bf16 %v71_v44  ;;  %v123_v58 = vsub.f32 %v43_v43, %v91_v45  ;;  %v154_v59 = vmul.f32 %v121_v46, %v121_v46  ;;  %v29_v46 = vld [vmem:[%s381_s0 + $0x58] sm:$0xff] }
   0xd   :  { %v181_v48 = vadd.f32 %v180_v42, %v150_v35  ;;  %v46_v61 = vunpack.c.l.bf16 %v24_v50  ;;  %v94_v63 = vunpack.c.l.bf16 %v72_v56  ;;  %v124_v0 = vsub.f32 %v44_v49, %v92_v51 }
   0xe   :  { %v155_v1 = vmul.f32 %v122_v52, %v122_v52  ;;  %v47_v3 = vunpack.c.h.bf16 %v24_v50  ;;  %v95_v5 = vunpack.c.h.bf16 %v72_v56  ;;  %v125_v6 = vsub.f32 %v45_v55, %v93_v57  ;;  %v77_v52 = vld [vmem:[%s382_s1 + $0x58] sm:$0xff] }
   0xf   :  { %v182_v54 = vadd.f32 %v181_v48, %v151_v41  ;;  %v156_v7 = vmul.f32 %v123_v58, %v123_v58  ;;  %v48_v9 = vunpack.c.l.bf16 %v25_v62  ;;  %v96_v11 = vunpack.c.l.bf16 %v73_v4  ;;  %v30_v58 = vld [vmem:[%s381_s0 + $0x60] sm:$0xff] }
  0x10   :  { %v126_v12 = vsub.f32 %v46_v61, %v94_v63  ;;  %v157_v13 = vmul.f32 %v124_v0, %v124_v0  ;;  %v49_v15 = vunpack.c.h.bf16 %v25_v62  ;;  %v97_v17 = vunpack.c.h.bf16 %v73_v4  ;;  %v78_v0 = vld [vmem:[%s382_s1 + $0x60] sm:$0xff] }
  0x11   :  { %v183_v60 = vadd.f32 %v182_v54, %v152_v47  ;;  %v127_v18 = vsub.f32 %v47_v3, %v95_v5  ;;  %v158_v19 = vmul.f32 %v125_v6, %v125_v6  ;;  %v50_v21 = vunpack.c.l.bf16 %v26_v10  ;;  %v31_v6 = vld [vmem:[%s381_s0 + $0x68] sm:$0xff] }
  0x12   :  { %v98_v23 = vunpack.c.l.bf16 %v74_v16  ;;  %v128_v24 = vsub.f32 %v48_v9, %v96_v11  ;;  %v159_v25 = vmul.f32 %v126_v12, %v126_v12  ;;  %v51_v27 = vunpack.c.h.bf16 %v26_v10  ;;  %v79_v12 = vld [vmem:[%s382_s1 + $0x68] sm:$0xff] }
  0x13   :  { %v184_v2 = vadd.f32 %v183_v60, %v153_v53  ;;  %v99_v29 = vunpack.c.h.bf16 %v74_v16  ;;  %v129_v30 = vsub.f32 %v49_v15, %v97_v17  ;;  %v160_v31 = vmul.f32 %v127_v18, %v127_v18  ;;  %v32_v18 = vld [vmem:[%s381_s0 + $0x70] sm:$0xff] }
  0x14   :  { %v52_v33 = vunpack.c.l.bf16 %v27_v22  ;;  %v100_v35 = vunpack.c.l.bf16 %v75_v28  ;;  %v130_v36 = vsub.f32 %v50_v21, %v98_v23  ;;  %v161_v37 = vmul.f32 %v128_v24, %v128_v24  ;;  %v80_v24 = vld [vmem:[%s382_s1 + $0x70] sm:$0xff] }
  0x15   :  { %v185_v8 = vadd.f32 %v184_v2, %v154_v59  ;;  %v53_v39 = vunpack.c.h.bf16 %v27_v22  ;;  %v101_v41 = vunpack.c.h.bf16 %v75_v28  ;;  %v131_v42 = vsub.f32 %v51_v27, %v99_v29 }
  0x16   :  { %v162_v43 = vmul.f32 %v129_v30, %v129_v30  ;;  %v54_v45 = vunpack.c.l.bf16 %v28_v34  ;;  %v102_v47 = vunpack.c.l.bf16 %v76_v40  ;;  %v132_v48 = vsub.f32 %v52_v33, %v100_v35  ;;  %v33_v30 = vld [vmem:[%s381_s0 + $0x78] sm:$0xff]  ;;  %s264_s0 = smov [#allocation2]  }
  0x17   :  { %v186_v14 = vadd.f32 %v185_v8, %v155_v1  ;;  %v163_v49 = vmul.f32 %v130_v36, %v130_v36  ;;  %v55_v51 = vunpack.c.h.bf16 %v28_v34  ;;  %v103_v53 = vunpack.c.h.bf16 %v76_v40  ;;  %v81_v36 = vld [vmem:[%s382_s1 + $0x78] sm:$0xff]  ;;  %s229_s1 = sshll.u32 %s264_s0, 4  ;;  %s230_s1 = int_to_ptr.vmem [resolvable:$true] %s229_s1 }
  0x18   :  { %v133_v54 = vsub.f32 %v53_v39, %v101_v41  ;;  %v164_v55 = vmul.f32 %v131_v42, %v131_v42  ;;  %v56_v57 = vunpack.c.l.bf16 %v29_v46  ;;  %v104_v59 = vunpack.c.l.bf16 %v77_v52  ;;  %s241_s18 = scalar_lea.vmem %s230_s1, 16  ;;  %s245_s19 = scalar_lea.vmem %s230_s1, 32 }
  0x19   :  { %v187_v20 = vadd.f32 %v186_v14, %v156_v7  ;;  %v134_v60 = vsub.f32 %v54_v45, %v102_v47  ;;  %v165_v61 = vmul.f32 %v132_v48, %v132_v48  ;;  %v57_v63 = vunpack.c.h.bf16 %v29_v46  ;;  %p242_p0 = scmp.ne.s32.totalorder %s230_s1, %s241_s18  ;;  %p246_p1 = scmp.lt.s32.totalorder %s230_s1, %s230_s1 }
  0x1a   :  { %v105_v1 = vunpack.c.h.bf16 %v77_v52  ;;  %v135_v2 = vsub.f32 %v55_v51, %v103_v53  ;;  %v166_v3 = vmul.f32 %v133_v54, %v133_v54  ;;  %v58_v5 = vunpack.c.l.bf16 %v30_v58  ;;  %p247_p2 = scmp.lt.s32.totalorder %s245_s19, %s241_s18 }
  0x1b   :  { %v188_v26 = vadd.f32 %v187_v20, %v157_v13  ;;  %v106_v7 = vunpack.c.l.bf16 %v78_v0  ;;  %v136_v8 = vsub.f32 %v56_v57, %v104_v59  ;;  %v167_v9 = vmul.f32 %v134_v60, %v134_v60 }
  0x1c   :  { %v59_v11 = vunpack.c.h.bf16 %v30_v58  ;;  %v107_v13 = vunpack.c.h.bf16 %v78_v0  ;;  %v137_v14 = vsub.f32 %v57_v63, %v105_v1  ;;  %v168_v15 = vmul.f32 %v135_v2, %v135_v2  ;;  %p248_p3 = por %p247_p2, %p246_p1 }
  0x1d   :  { %v189_v32 = vadd.f32 %v188_v26, %v158_v19  ;;  %v60_v17 = vunpack.c.l.bf16 %v31_v6  ;;  %v108_v19 = vunpack.c.l.bf16 %v79_v12  ;;  %v138_v20 = vsub.f32 %v58_v5, %v106_v7 }
  0x1e   :  { %v169_v21 = vmul.f32 %v136_v8, %v136_v8  ;;  %v61_v23 = vunpack.c.h.bf16 %v31_v6  ;;  %v139_v26 = vsub.f32 %v59_v11, %v107_v13  ;;  %v170_v27 = vmul.f32 %v137_v14, %v137_v14  ;;  %p249_p4 = pnand %p248_p3, %p242_p0 }
  0x1f   :  { %v190_v38 = vadd.f32 %v189_v32, %v159_v25  ;;  %v109_v25 = vunpack.c.h.bf16 %v79_v12  ;;  %v62_v29 = vunpack.c.l.bf16 %v32_v18  ;;  %v140_v32 = vsub.f32 %v60_v17, %v108_v19 }
  0x20   :  { %v171_v33 = vmul.f32 %v138_v20, %v138_v20  ;;  %v63_v35 = vunpack.c.h.bf16 %v32_v18  ;;  %v172_v39 = vmul.f32 %v139_v26, %v139_v26  ;;  %v64_v41 = vunpack.c.l.bf16 %v33_v30 }
  0x21   :  { %v191_v44 = vadd.f32 %v190_v38, %v160_v31  ;;  %v110_v31 = vunpack.c.l.bf16 %v80_v24  ;;  %v141_v38 = vsub.f32 %v61_v23, %v109_v25  ;;  %v112_v42 = vunpack.c.l.bf16 %v81_v36 }
  0x22   :  { %v65_v46 = vunpack.c.h.bf16 %v33_v30  ;;  %v113_v47 = vunpack.c.h.bf16 %v81_v36  ;;  %v263_v63 = vmov 0.0  }
  0x23   :  { %v192_v50 = vadd.f32 %v191_v44, %v161_v37  ;;  %v111_v37 = vunpack.c.h.bf16 %v80_v24  ;;  %v173_v44 = vmul.f32 %v140_v32, %v140_v32  ;;  %v144_v51 = vsub.f32 %v64_v41, %v112_v42  ;;  %17 = vst.msk [vmem:[#allocation2] sm:$0x1] %vm16_vm0, %v263_v63 }
  0x24   :  { %v145_v54 = vsub.f32 %v65_v46, %v113_v47 }
  0x25   :  { %v193_v56 = vadd.f32 %v192_v50, %v162_v43  ;;  %v142_v43 = vsub.f32 %v62_v29, %v110_v31  ;;  %v143_v48 = vsub.f32 %v63_v35, %v111_v37  ;;  %v177_v57 = vmul.f32 %v144_v51, %v144_v51 }
  0x26   :  { %v178_v59 = vmul.f32 %v145_v54, %v145_v54 }
  0x27   :  { %v194_v62 = vadd.f32 %v193_v56, %v163_v49  ;;  %v174_v49 = vmul.f32 %v141_v38, %v141_v38  ;;  %v175_v52 = vmul.f32 %v142_v43, %v142_v43 }
  0x29   :  { %v195_v4 = vadd.f32 %v194_v62, %v164_v55  ;;  %v176_v55 = vmul.f32 %v143_v48, %v143_v48 }
  0x2a   :  { %v146_v7 = vld [vmem:[#allocation2] sm:$0x1] }
  0x2b   :  { %v196_v10 = vadd.f32 %v195_v4, %v165_v61 }
  0x2d   :  { %v197_v16 = vadd.f32 %v196_v10, %v166_v3 }
  0x2f   :  { %v198_v22 = vadd.f32 %v197_v16, %v167_v9 }
  0x31   :  { %v199_v28 = vadd.f32 %v198_v22, %v168_v15 }
  0x33   :  { %v200_v34 = vadd.f32 %v199_v28, %v169_v21 }
  0x35   :  { %v201_v40 = vadd.f32 %v200_v34, %v170_v27 }
  0x37   :  { %v202_v45 = vadd.f32 %v201_v40, %v171_v33 }
  0x39   :  { %v203_v50 = vadd.f32 %v202_v45, %v172_v39 }
  0x3b   :  { %v204_v53 = vadd.f32 %v203_v50, %v173_v44 }
  0x3d   :  { %v205_v56 = vadd.f32 %v204_v53, %v174_v49 }
  0x3f   :  { %v206_v58 = vadd.f32 %v205_v56, %v175_v52 }
  0x41   :  { %v207_v60 = vadd.f32 %v206_v58, %v176_v55 }
  0x43   :  { %v208_v61 = vadd.f32 %v207_v60, %v177_v57 }
  0x45   :  { %v209_v62 = vadd.f32 %v208_v61, %v178_v59 }
  0x47   :  { %210 = vadd.xlane.f32.xlu0 %v209_v62 }
  0xd0   :  { %v211_v0 = vpop.xlane.xlu0 %210 }
  0xd1   :  { %v212_v1 = vrot.slane %v211_v0, 4 }
  0xd3   :  { %v213_v2 = vadd.f32 %v212_v1, %v211_v0 }
  0xd5   :  { %v214_v3 = vrot.slane %v213_v2, 2 }
  0xd7   :  { %v215_v4 = vadd.f32 %v214_v3, %v213_v2 }
  0xd9   :  { %v216_v5 = vrot.slane %v215_v4, 1 }
  0xdb   :  { %v217_v6 = vadd.f32 %v216_v5, %v215_v4 }
  0xdd   :  { %237 = vpush %v217_v6 }
 0x10e   :  { %s238_s17 = spop %237 }
 0x10f   :  { %v219_v8 = vstv %s238_s17 }
 0x110   :  { %v220_v9 = vadd.f32 %v219_v8, %v146_v7 }
 0x112   :  { %222 = vst.msk [vmem:[#allocation2] sm:$0x1] %vm16_vm0, %v220_v9 }
 0x113   :  { %252 = shalt.err (!%p249_p4)
}
 0x114   :  { %232 = dma.vmem_to_hbm [thread:$0]  %s230_s1, 16, %s383_s2, [#allocation3]  }
 0x115   :  { %261 = dma.done.wait [#allocation3], 16  }
 0x116   :  { %262 = vsyncadd [#allocation3], 4294967280 }
 0x117   :  { %236 = vsyncpa [#allocation3], 1 }

// kernel: _lambda_.16
= control target key start
LH: loop header
LB: loop body
LE: loop exit
PB: predicated region body
PF: predicated region fallthrough
CT: control target
= control target key end

     0   :  { %s2534_s18 = smov 0   ;;  %s2536_s19 = smov 0   ;;  %s3131_s0 = inlined_call_operand.vmem [shape: bf16[4,6,6,128], index: 0, kind: input, shape index: {}, may-alias: {0,1,2}]   ;;  %s3132_s1 = inlined_call_operand.vmem [shape: bf16[4,6,6,128], index: 1, kind: input, shape index: {}, may-alias: {0,1,2}]   ;;  %s3133_s2 = inlined_call_operand.vmem [shape: bf16[4,6,6,128], index: 2, kind: input, shape index: {}, may-alias: {0,1,2}]   ;;  %s3134_s3 = inlined_call_operand.vmem [shape: bf16[3,384,256], index: 3, kind: input, shape index: {}]   ;;  %s3135_s4 = inlined_call_operand.vmem [shape: f32[1,256], index: 4, kind: input, shape index: {}]   ;;  %s3136_s5 = inlined_call_operand.vmem [shape: bf16[4,4,4,256], index: 5, kind: output, shape index: {}]  }
   0x1   :  { %s2538_s20 = smov 0  }
   0x2 LB: > { %s27_s21 = sadd.s32 1, %s2496_s19  ;;  %p1954_p0 = scmp.ge.s32.totalorder %s2500_s20, 1  ;;  %s2500_s20 = sphi %s2538_s20, %s15_s20   ;;  %s2496_s19 = sphi %s2536_s19, %s3138_s19   ;;  %s2492_s18 = sphi %s2534_s18, %s3137_s18  }
   0x3   : > { %p29_p1 = scmp.ge.s32.totalorder %s27_s21, 4  ;;  %p262_p2 = scmp.lt.s32.totalorder %s2500_s20, 5 }
   0x5   : > { %s3140_s21 = smov (%p29_p1, %s27_s21), 0  ;;  %p263_p3 = pnand %p1954_p0, %p262_p2 }
   0x6   : > { %p328_p4 = scmp.lt.s32.totalorder (!%p263_p3), %s2492_s18, 3 }
   0x7   : > { %266 = sbr.rel (%p263_p3) target bundleno = 387 (0x183), region = 40 }
   0xc   : > { %v2256_v0 = vld [vmem:[%s3134_s3 + $0x1f4] ss:$8 sps:$4 sm:$0xff]   ;;  %v2502_v2 = vmov 0   ;;  %v2260_v3 = vld [vmem:[%s3134_s3 + $0x1f0] ss:$8 sps:$4 sm:$0xff]   ;;  %s3142_s18 = smov (!%p328_p4, %s2492_s18), 3  ;;  %v431_v24 = vlaneseq }
   0xd   : > { %v2258_v1 = vld [vmem:[%s3134_s3 + $0x2f4] ss:$8 sps:$4 sm:$0xff]   ;;  %968 = vmatprep.mubr.bf16.mxu1 %v2502_v2  ;;  %893 = vmatprep.subr.bf16.mxu0 %v2256_v0  ;;  %v2261_v4 = vld [vmem:[%s3134_s3 + $0x2f0] ss:$8 sps:$4 sm:$0xff]   ;;  %v2262_v5 = vld [vmem:[%s3134_s3 + $0x1e4] ss:$8 sps:$4 sm:$0xff]  }
   0xe   : > { %936 = vmatprep.subr.bf16.mxu1 %v2258_v1  ;;  %894 = vmatpush1.bf16.msra.mxu0 %v2260_v3  ;;  %v2264_v6 = vld [vmem:[%s3134_s3 + $0x2e4] ss:$8 sps:$4 sm:$0xff]   ;;  %v2266_v7 = vld [vmem:[%s3134_s3 + $0x1e0] ss:$8 sps:$4 sm:$0xff]   ;;  %v2268_v9 = vld [vmem:[%s3134_s3 + $0x1d4] ss:$8 sps:$4 sm:$0xff]  }
   0xf   : > { %937 = vmatpush1.bf16.msra.mxu1 %v2261_v4  ;;  %895 = vmatprep.subr.bf16.mxu0 %v2262_v5  ;;  %v2267_v8 = vld [vmem:[%s3134_s3 + $0x2e0] ss:$8 sps:$4 sm:$0xff]   ;;  %v2270_v10 = vld [vmem:[%s3134_s3 + $0x2d4] ss:$8 sps:$4 sm:$0xff]   ;;  %v2272_v11 = vld [vmem:[%s3134_s3 + $0x1d0] ss:$8 sps:$4 sm:$0xff]  }
  0x10   : > { %938 = vmatprep.subr.bf16.mxu1 %v2264_v6  ;;  %v2273_v12 = vld [vmem:[%s3134_s3 + $0x2d0] ss:$8 sps:$4 sm:$0xff]   ;;  %v2274_v13 = vld [vmem:[%s3134_s3 + $0x1c4] ss:$8 sps:$4 sm:$0xff]   ;;  %v2278_v15 = vld [vmem:[%s3134_s3 + $0x1c0] ss:$8 sps:$4 sm:$0xff]  }
  0x11   : > { %v2276_v14 = vld [vmem:[%s3134_s3 + $0x2c4] ss:$8 sps:$4 sm:$0xff]   ;;  %v2279_v16 = vld [vmem:[%s3134_s3 + $0x2c0] ss:$8 sps:$4 sm:$0xff]   ;;  %v2280_v17 = vld [vmem:[%s3134_s3 + $0x1b4] ss:$8 sps:$4 sm:$0xff]  }
  0x12   : > { %896 = vmatpush1.bf16.msra.mxu0 %v2266_v7  ;;  %v2282_v18 = vld [vmem:[%s3134_s3 + $0x2b4] ss:$8 sps:$4 sm:$0xff]   ;;  %v2284_v19 = vld [vmem:[%s3134_s3 + $0x1b0] ss:$8 sps:$4 sm:$0xff]   ;;  %s2616_s16 = smul.u32 24, %s3142_s18  ;;  %v2634_v30 = vshrl.u32 %v431_v24, 7 }
  0x13   : > { %939 = vmatpush1.bf16.msra.mxu1 %v2267_v8  ;;  %897 = vmatprep.subr.bf16.mxu0 %v2268_v9  ;;  %v2285_v20 = vld [vmem:[%s3134_s3 + $0x2b0] ss:$8 sps:$4 sm:$0xff]   ;;  %v2286_v21 = vld [vmem:[%s3134_s3 + $0x1a4] ss:$8 sps:$4 sm:$0xff]   ;;  %v2503_v22 = vmov 1983009808  }
  0x14   : > { %940 = vmatprep.subr.bf16.mxu1 %v2270_v10  ;;  %v429_v23 = vunpack.c.l.s4 %v2503_v22  ;;  %v2288_v25 = vld [vmem:[%s3134_s3 + $0x2a4] ss:$8 sps:$4 sm:$0xff]   ;;  %v2290_v26 = vld [vmem:[%s3134_s3 + $0x1a0] ss:$8 sps:$4 sm:$0xff]   ;;  %s2223_s27 = sadd.s32 16, %s2616_s16  ;;  %s2643_s11 = scalar_lea.vmem %s3131_s0, %s2616_s16 }
  0x15   : > { %v2291_v27 = vld [vmem:[%s3134_s3 + $0x2a0] ss:$8 sps:$4 sm:$0xff]   ;;  %v2292_v28 = vld [vmem:[%s3134_s3 + $0x194] ss:$8 sps:$4 sm:$0xff]   ;;  %v2296_v32 = vld [vmem:[%s3134_s3 + $0x190] ss:$8 sps:$4 sm:$0xff]   ;;  %s350_s17 = scalar_lea.vmem %s3132_s1, %s2223_s27 }
  0x16   : > { %898 = vmatpush1.bf16.msra.mxu0 %v2272_v11  ;;  %v430_v29 = vunpack.c.0.s8 %v429_v23  ;;  %v2294_v31 = vld [vmem:[%s3134_s3 + $0x294] ss:$8 sps:$4 sm:$0xff]   ;;  %v2297_v33 = vld [vmem:[%s3134_s3 + $0x290] ss:$8 sps:$4 sm:$0xff]   ;;  %v2298_v34 = vld [vmem:[%s3134_s3 + $0x184] ss:$8 sps:$4 sm:$0xff]  }
  0x17   : > { %941 = vmatpush1.bf16.msra.mxu1 %v2273_v12  ;;  %899 = vmatprep.subr.bf16.mxu0 %v2274_v13  ;;  %v2300_v35 = vld [vmem:[%s3134_s3 + $0x284] ss:$8 sps:$4 sm:$0xff]   ;;  %v2664_v37 = vld [vmem:[%s2643_s11 + $0x8] sm:$0x7]  ;;  %v2672_v40 = vld [vmem:[%s350_s17] sm:$0x7] }
  0x18   : > { %942 = vmatprep.subr.bf16.mxu1 %v2276_v14  ;;  %v2661_v36 = vld [vmem:[%s2643_s11 + $0x4] sm:$0x7]  ;;  %v2667_v38 = vld [vmem:[%s2643_s11 + $0xc] sm:$0x7]  ;;  %v2670_v39 = vsub.s32 %v430_v29, %v2634_v30  ;;  %v1962_v42 = vcombine.low %v2664_v37, %v2664_v37  ;;  %v2682_v44 = vcombine.low %v2672_v40, %v2672_v40  ;;  %v2302_v45 = vld [vmem:[%s3134_s3 + $0x180] ss:$8 sps:$4 sm:$0xff]  }
  0x19   : > { %v1961_v41 = vcombine.low %v2661_v36, %v2661_v36  ;;  %v1963_v43 = vcombine.low %v2667_v38, %v2667_v38  ;;  %v2303_v49 = vld [vmem:[%s3134_s3 + $0x280] ss:$8 sps:$4 sm:$0xff]   ;;  %v2304_v50 = vld [vmem:[%s3134_s3 + $0x274] ss:$8 sps:$4 sm:$0xff]   ;;  %v2309_v60 = vld [vmem:[%s3134_s3 + $0x270] ss:$8 sps:$4 sm:$0xff]  }
  0x1a   : > { %900 = vmatpush1.bf16.msra.mxu0 %v2278_v15  ;;  %v425_v47 = vrot.slane %v1962_v42, 1  ;;  %v549_v51 = vrot.slane %v2682_v44, 1  ;;  %v2308_v52 = vld [vmem:[%s3134_s3 + $0x74] ss:$8 sps:$4 sm:$0xff]   ;;  %v410_v62 = vshrl.u32 %v1962_v42, 16  ;;  %v412_v63 = vshll.u32 %v1962_v42, 16 }
  0x1b   : > { %943 = vmatpush1.bf16.msra.mxu1 %v2279_v16  ;;  %901 = vmatprep.subr.bf16.mxu0 %v2280_v17  ;;  %v424_v46 = vrot.slane %v1961_v41, 1  ;;  %v426_v48 = vrot.slane %v1963_v43, 1  ;;  %v403_v58 = vshrl.u32 %v1961_v41, 16  ;;  %v405_v59 = vshll.u32 %v1961_v41, 16  ;;  %v2314_v1 = vld [vmem:[%s3134_s3 + $0x264] ss:$8 sps:$4 sm:$0xff]  }
  0x1c   : > { %944 = vmatprep.subr.bf16.mxu1 %v2282_v18  ;;  %v2701_v54 = vrot.slane %v425_v47, %v2670_v39  ;;  %v2707_v56 = vrot.slane %v549_v51, %v2670_v39  ;;  %v414_v5 = vrot.slane %v412_v63, 1  ;;  %v417_v6 = vshrl.u32 %v1963_v43, 16  ;;  %v2306_v8 = vld [vmem:[%s3134_s3 + $0x70] ss:$8 sps:$4 sm:$0xff]   ;;  %v2318_v9 = vld [vmem:[%s3134_s3 + $0x64] ss:$8 sps:$4 sm:$0xff]  }
  0x1d   : > { %v2698_v53 = vrot.slane %v424_v46, %v2670_v39  ;;  %v2704_v55 = vrot.slane %v426_v48, %v2670_v39  ;;  %v407_v3 = vrot.slane %v405_v59, 1  ;;  %v419_v7 = vshll.u32 %v1963_v43, 16  ;;  %v2319_v12 = vld [vmem:[%s3134_s3 + $0x260] ss:$8 sps:$4 sm:$0xff]   ;;  %v2320_v16 = vld [vmem:[%s3134_s3 + $0x254] ss:$8 sps:$4 sm:$0xff]  }
  0x1e   : > { %902 = vmatpush1.bf16.msra.mxu0 %v2284_v19  ;;  %v415_v13 = vor.u32 %v414_v5, %v410_v62  ;;  %v545_v15 = vshll.u32 %v2682_v44, 16  ;;  %v543_v18 = vshrl.u32 %v2682_v44, 16  ;;  %v2316_v19 = vld [vmem:[%s3134_s3 + $0x60] ss:$8 sps:$4 sm:$0xff]   ;;  %v2324_v22 = vld [vmem:[%s3134_s3 + $0x54] ss:$8 sps:$4 sm:$0xff]  }
  0x1f   : > { %945 = vmatpush1.bf16.msra.mxu1 %v2285_v20  ;;  %903 = vmatprep.subr.bf16.mxu0 %v2286_v21  ;;  %v2014_v57 = vcombine.low %v2698_v53, %v2701_v54  ;;  %v2016_v61 = vcombine.low %v2704_v55, %v2707_v56  ;;  %v408_v10 = vor.u32 %v407_v3, %v403_v58  ;;  %v421_v14 = vrot.slane %v419_v7, 1  ;;  %v2336_v41 = vld [vmem:[%s3134_s3 + $0x34] ss:$8 sps:$4 sm:$0xff]   ;;  %v2337_v44 = vld [vmem:[%s3134_s3 + $0x230] ss:$8 sps:$4 sm:$0xff]   ;;  %s2225_s13 = sadd.s32 20, %s2616_s16 }
  0x20   : > { %946 = vmatprep.subr.bf16.mxu1 %v2288_v25  ;;  %v459_v21 = vcombine.low %v2664_v37, %v415_v13  ;;  %v547_v24 = vrot.slane %v545_v15, 1  ;;  %v2325_v25 = vld [vmem:[%s3134_s3 + $0x250] ss:$8 sps:$4 sm:$0xff]   ;;  %v2332_v37 = vld [vmem:[%s3134_s3 + $0x234] ss:$8 sps:$4 sm:$0xff]   ;;  %s362_s28 = scalar_lea.vmem %s3133_s2, %s2225_s13  ;;  %s2226_s17 = sshll.u32 %s3142_s18, 4 }
  0x21   : > { %v632_v0 = vrot.slane %v2014_v57, %v2670_v39  ;;  %v646_v4 = vrot.slane %v2016_v61, %v2670_v39  ;;  %v443_v17 = vcombine.low %v2661_v36, %v408_v10  ;;  %v422_v20 = vor.u32 %v421_v14, %v417_v6  ;;  %v2331_v36 = vld [vmem:[%s3134_s3 + $0x240] ss:$8 sps:$4 sm:$0xff]   ;;  %v2334_v47 = vld [vmem:[%s3134_s3 + $0x30] ss:$8 sps:$4 sm:$0xff]   ;;  %v2342_v48 = vld [vmem:[%s3134_s3 + $0x24] ss:$8 sps:$4 sm:$0xff]   ;;  %s374_s24 = scalar_lea.vmem %s3136_s5, %s2226_s17 }
  0x22   : > { %904 = vmatpush1.bf16.msra.mxu0 %v2290_v26  ;;  %v2750_v26 = vrot.slane %v459_v21, %v2670_v39  ;;  %v548_v29 = vor.u32 %v547_v24, %v543_v18  ;;  %v2344_v51 = vld [vmem:[%s3134_s3 + $0x214] ss:$8 sps:$4 sm:$0xff]   ;;  %v2349_v58 = vld [vmem:[%s3134_s3 + $0x210] ss:$8 sps:$4 sm:$0xff]   ;;  %v2350_v59 = vld [vmem:[%s3134_s3 + $0x204] ss:$8 sps:$4 sm:$0xff]  }
  0x23   : > { %947 = vmatpush1.bf16.msra.mxu1 %v2291_v27  ;;  %905 = vmatprep.subr.bf16.mxu0 %v2292_v28  ;;  %v649_v11 = vcombine.low %v632_v0, %v646_v4  ;;  %v2744_v23 = vrot.slane %v443_v17, %v2670_v39  ;;  %v475_v27 = vcombine.low %v2667_v38, %v422_v20  ;;  %v2326_v28 = vld [vmem:[%s3134_s3 + $0x244] ss:$8 sps:$4 sm:$0xff]   ;;  %v2348_v57 = vld [vmem:[%s3134_s3 + $0x14] ss:$8 sps:$4 sm:$0xff]   ;;  %v2355_v62 = vld [vmem:[%s3134_s3 + $0x200] ss:$8 sps:$4 sm:$0xff]  }
  0x24   : > { %948 = vmatprep.subr.bf16.mxu1 %v2294_v31  ;;  %v2322_v31 = vld [vmem:[%s3134_s3 + $0x50] ss:$8 sps:$4 sm:$0xff]   ;;  %v2354_v61 = vld [vmem:[%s3134_s3 + $0x4] ss:$8 sps:$4 sm:$0xff]   ;;  %v2361_v63 = vld [vmem:[%s3134_s3 + $0x174] ss:$8 sps:$4 sm:$0xff]  }
  0x25   : > { %v2352_v0 = vld [vmem:[%s3134_s3] ss:$8 sps:$4 sm:$0xff]   ;;  %v2358_v3 = vld [vmem:[%s3134_s3 + $0xf4] ss:$8 sps:$4 sm:$0xff]   ;;  %v2359_v4 = vld [vmem:[%s3134_s3 + $0x170] ss:$8 sps:$4 sm:$0xff]  }
  0x26   : > { %906 = vmatpush1.bf16.msra.mxu0 %v2296_v32  ;;  %v2330_v32 = vld [vmem:[%s3134_s3 + $0x44] ss:$8 sps:$4 sm:$0xff]   ;;  %v377_v6 = vld [vmem:[%s2643_s11] sm:$0x7]  ;;  %v2356_v7 = vld [vmem:[%s3134_s3 + $0xf0] ss:$8 sps:$4 sm:$0xff]  }
  0x27   : > { %949 = vmatpush1.bf16.msra.mxu1 %v2297_v33  ;;  %907 = vmatprep.subr.bf16.mxu0 %v2298_v34  ;;  %v2763_v33 = vrot.slane %v475_v27, %v2670_v39  ;;  %v550_v34 = vcombine.low %v2672_v40, %v548_v29  ;;  %v2328_v40 = vld [vmem:[%s3134_s3 + $0x40] ss:$8 sps:$4 sm:$0xff]   ;;  %v2367_v5 = vld [vmem:[%s3134_s3 + $0x164] ss:$8 sps:$4 sm:$0xff]   ;;  %v2373_v13 = vld [vmem:[%s3134_s3 + $0x154] ss:$8 sps:$4 sm:$0xff]  }
  0x28   : > { %950 = vmatprep.subr.bf16.mxu1 %v2300_v35  ;;  %v2013_v35 = vcombine.low %v2744_v23, %v2750_v26  ;;  %v2365_v10 = vld [vmem:[%s3134_s3 + $0x160] ss:$8 sps:$4 sm:$0xff]   ;;  %v2371_v17 = vld [vmem:[%s3134_s3 + $0x150] ss:$8 sps:$4 sm:$0xff]   ;;  %v2376_v24 = vld [vmem:[%s3134_s3 + $0xc4] ss:$8 sps:$4 sm:$0xff]  }
  0x29   : > { %v2775_v38 = vrot.slane %v550_v34, %v2670_v39  ;;  %v2362_v15 = vld [vmem:[%s3134_s3 + $0xe0] ss:$8 sps:$4 sm:$0xff]   ;;  %v2067_v20 = vcombine.low %v2750_v26, %v2763_v33  ;;  %v2385_v26 = vld [vmem:[%s3134_s3 + $0x134] ss:$8 sps:$4 sm:$0xff]   ;;  %v2383_v34 = vld [vmem:[%s3134_s3 + $0x130] ss:$8 sps:$4 sm:$0xff]  }
  0x2a   : > { %908 = vmatpush1.bf16.msra.mxu0 %v2302_v45  ;;  %v625_v43 = vrot.slane %v2013_v35, %v2670_v39  ;;  %v2338_v45 = vld [vmem:[%s3134_s3 + $0x224] ss:$8 sps:$4 sm:$0xff]  }
  0x2b   : > { %951 = vmatpush1.bf16.msra.mxu1 %v2303_v49  ;;  %909 = vmatprep.subr.bf16.mxu0 %v2304_v50  ;;  %v2015_v42 = vcombine.low %v2763_v33, %v2775_v38  ;;  %v2343_v50 = vld [vmem:[%s3134_s3 + $0x220] ss:$8 sps:$4 sm:$0xff]   ;;  %v2382_v33 = vld [vmem:[%s3134_s3 + $0xb4] ss:$8 sps:$4 sm:$0xff]  }
  0x2c   : > { %1257 = vmatprep.subr.bf16.mxu1 %v2308_v52  ;;  %v2340_v52 = vld [vmem:[%s3134_s3 + $0x20] ss:$8 sps:$4 sm:$0xff]  }
  0x2d   : > { %v639_v46 = vrot.slane %v2015_v42, %v2670_v39  ;;  %v2389_v42 = vld [vmem:[%s3134_s3 + $0x120] ss:$8 sps:$4 sm:$0xff]  }
  0x2e   : > { %910 = vmatpush2.bf16.msra.mxu0 %v2309_v60  ;;  %969 = vmatmul.mubr.bf16.vlgmr.msra.gmra.mxu1 %v649_v11  ;;  %v2346_v60 = vld [vmem:[%s3134_s3 + $0x10] ss:$8 sps:$4 sm:$0xff]  }
  0x2f   : > { %911 = vmatprep.subr.bf16.mxu0 %v2314_v1  ;;  %1258 = vmatpush1.bf16.msra.mxu1 %v2306_v8  ;;  %v648_v49 = vcombine.high %v625_v43, %v639_v46  ;;  %v647_v1 = vcombine.low %v625_v43, %v639_v46  ;;  %v1960_v8 = vcombine.low %v377_v6, %v377_v6  ;;  %v2397_v43 = vld [vmem:[%s3134_s3 + $0x114] ss:$8 sps:$4 sm:$0xff]  }
  0x30   : > { %1259 = vmatprep.subr.bf16.mxu1 %v2318_v9  ;;  %v2364_v9 = vld [vmem:[%s3134_s3 + $0xe4] ss:$8 sps:$4 sm:$0xff]   ;;  %v2068_v46 = vcombine.low %v2701_v54, %v2704_v55 }
  0x31   : > { %925 = vmatprep.mubr.bf16.mxu0 %v648_v49  ;;  %v396_v11 = vshrl.u32 %v1960_v8, 16  ;;  %v2403_v49 = vld [vmem:[%s3134_s3 + $0x104] ss:$8 sps:$4 sm:$0xff]  }
  0x32   : > { %912 = vmatpush2.bf16.msra.mxu0 %v2319_v12  ;;  %v398_v12 = vshll.u32 %v1960_v8, 16  ;;  %v2933_v55 = vrot.slane %v2068_v46, %v2670_v39  ;;  %v2435_v46 = vld [vmem:[%s3134_s3 + $0x3f0] ss:$8 sps:$4 sm:$0xff]  }
  0x33   : > { %913 = vmatprep.subr.bf16.mxu0 %v2320_v16  ;;  %1260 = vmatpush1.bf16.msra.mxu1 %v2316_v19  ;;  %v2370_v16 = vld [vmem:[%s3134_s3 + $0xd4] ss:$8 sps:$4 sm:$0xff]   ;;  %v2379_v19 = vld [vmem:[%s3134_s3 + $0x144] ss:$8 sps:$4 sm:$0xff]  }
  0x34   : > { %1261 = vmatprep.subr.bf16.mxu1 %v2324_v22  ;;  %v400_v14 = vrot.slane %v398_v12, 1  ;;  %v2368_v22 = vld [vmem:[%s3134_s3 + $0xd0] ss:$8 sps:$4 sm:$0xff]  }
  0x36   : > { %914 = vmatpush2.bf16.msra.mxu0 %v2325_v25  ;;  %v401_v18 = vor.u32 %v400_v14, %v396_v11  ;;  %v2377_v25 = vld [vmem:[%s3134_s3 + $0x140] ss:$8 sps:$4 sm:$0xff]   ;;  %v2440_v11 = vld [vmem:[%s3134_s3 + $0x454] ss:$8 sps:$4 sm:$0xff]  }
  0x37   : > { %915 = vmatprep.subr.bf16.mxu0 %v2326_v28  ;;  %1262 = vmatpush1.bf16.msra.mxu1 %v2322_v31  ;;  %v2883_v28 = vrot.slane %v2067_v20, %v2670_v39  ;;  %v2374_v31 = vld [vmem:[%s3134_s3 + $0xc0] ss:$8 sps:$4 sm:$0xff]  }
  0x38   : > { %1263 = vmatprep.subr.bf16.mxu1 %v2330_v32  ;;  %v427_v21 = vcombine.low %v377_v6, %v401_v18  ;;  %v423_v32 = vrot.slane %v1960_v8, 1  ;;  %v2419_v18 = vld [vmem:[%s3134_s3 + $0x334] ss:$8 sps:$4 sm:$0xff]   ;;  %v2444_v20 = vld [vmem:[%s3134_s3 + $0x440] ss:$8 sps:$4 sm:$0xff]  }
  0x3a   : > { %916 = vmatpush2.bf16.msra.mxu0 %v2331_v36  ;;  %v434_v27 = vrot.slane %v427_v21, %v2670_v39  ;;  %v2417_v21 = vld [vmem:[%s3134_s3 + $0x330] ss:$8 sps:$4 sm:$0xff]  }
  0x3b   : > { %917 = vmatprep.subr.bf16.mxu0 %v2332_v37  ;;  %1264 = vmatpush1.bf16.msra.mxu1 %v2328_v40  ;;  %v2380_v37 = vld [vmem:[%s3134_s3 + $0xb0] ss:$8 sps:$4 sm:$0xff]   ;;  %v441_v40 = vrot.slane %v423_v32, %v2670_v39  ;;  %v2458_v32 = vld [vmem:[%s3134_s3 + $0x424] ss:$8 sps:$4 sm:$0xff]  }
  0x3c   : > { %1265 = vmatprep.subr.bf16.mxu1 %v2336_v41  ;;  %v2065_v29 = vcombine.low %v434_v27, %v2744_v23  ;;  %v2391_v23 = vld [vmem:[%s3134_s3 + $0x124] ss:$8 sps:$4 sm:$0xff]  }
  0x3d   : > { %v2388_v41 = vld [vmem:[%s3134_s3 + $0xa4] ss:$8 sps:$4 sm:$0xff]  }
  0x3e   : > { %918 = vmatpush2.bf16.msra.mxu0 %v2337_v44  ;;  %v989_v35 = vrot.slane %v2065_v29, %v2670_v39  ;;  %v2386_v44 = vld [vmem:[%s3134_s3 + $0xa0] ss:$8 sps:$4 sm:$0xff]   ;;  %v2450_v29 = vld [vmem:[%s3134_s3 + $0x430] ss:$8 sps:$4 sm:$0xff]  }
  0x3f   : > { %919 = vmatprep.subr.bf16.mxu0 %v2338_v45  ;;  %1266 = vmatpush1.bf16.msra.mxu1 %v2334_v47  ;;  %v2066_v45 = vcombine.low %v441_v40, %v2698_v53  ;;  %v2394_v47 = vld [vmem:[%s3134_s3 + $0x94] ss:$8 sps:$4 sm:$0xff]   ;;  %v2392_v53 = vld [vmem:[%s3134_s3 + $0x90] ss:$8 sps:$4 sm:$0xff]  }
  0x40   : > { %1267 = vmatprep.subr.bf16.mxu1 %v2342_v48  ;;  %v1012_v36 = vcombine.high %v989_v35, %v2883_v28  ;;  %v2395_v48 = vld [vmem:[%s3134_s3 + $0x110] ss:$8 sps:$4 sm:$0xff]  }
  0x41   : > { %v996_v54 = vrot.slane %v2066_v45, %v2670_v39  ;;  %v2468_v45 = vld [vmem:[%s3134_s3 + $0x400] ss:$8 sps:$4 sm:$0xff]  }
  0x42   : > { %920 = vmatpush2.bf16.msra.mxu0 %v2343_v50  ;;  %1289 = vmatprep.mubr.bf16.mxu1 %v1012_v36  ;;  %v2400_v50 = vld [vmem:[%s3134_s3 + $0x84] ss:$8 sps:$4 sm:$0xff]   ;;  %v2464_v36 = vld [vmem:[%s3134_s3 + $0x414] ss:$8 sps:$4 sm:$0xff]  }
  0x43   : > { %921 = vmatprep.subr.bf16.mxu0 %v2344_v51  ;;  %1268 = vmatpush1.bf16.msra.mxu1 %v2340_v52  ;;  %v2401_v51 = vld [vmem:[%s3134_s3 + $0x100] ss:$8 sps:$4 sm:$0xff]   ;;  %v2407_v52 = vld [vmem:[%s3134_s3 + $0x374] ss:$8 sps:$4 sm:$0xff]  }
  0x44   : > { %1269 = vmatprep.subr.bf16.mxu1 %v2348_v57  ;;  %v2398_v57 = vld [vmem:[%s3134_s3 + $0x80] ss:$8 sps:$4 sm:$0xff]  }
  0x46   : > { %922 = vmatpush2.bf16.msra.mxu0 %v2349_v58  ;;  %v1013_v58 = vcombine.low %v996_v54, %v2933_v55  ;;  %v2447_v54 = vld [vmem:[%s3134_s3 + $0x3d0] ss:$8 sps:$4 sm:$0xff]  }
  0x47   : > { %923 = vmatprep.subr.bf16.mxu0 %v2350_v59  ;;  %1270 = vmatpush1.bf16.msra.mxu1 %v2346_v60  ;;  %v2405_v59 = vld [vmem:[%s3134_s3 + $0x370] ss:$8 sps:$4 sm:$0xff]   ;;  %v2410_v60 = vld [vmem:[%s3134_s3 + $0x364] ss:$8 sps:$4 sm:$0xff]  }
  0x48   : > { %1271 = vmatprep.subr.bf16.mxu1 %v2354_v61  ;;  %v2428_v61 = vld [vmem:[%s3134_s3 + $0x474] ss:$8 sps:$4 sm:$0xff]  }
  0x4a   : > { %924 = vmatpush2.bf16.msra.mxu0 %v2355_v62  ;;  %v382_v62 = vld [vmem:[%s362_s28] sm:$0x7] }
  0x4b   : > { %1300 = vmatprep.subr.bf16.mxu0 %v2361_v63  ;;  %1272 = vmatpush1.bf16.msra.mxu1 %v2352_v0  ;;  %v1011_v63 = vcombine.low %v989_v35, %v2883_v28  ;;  %v2117_v0 = vcombine.low %v382_v62, %v382_v62  ;;  %v2456_v35 = vld [vmem:[%s3134_s3 + $0x420] ss:$8 sps:$4 sm:$0xff]  }
  0x4c   : > { %1273 = vmatprep.subr.bf16.mxu1 %v2358_v3  ;;  %v2408_v3 = vld [vmem:[%s3134_s3 + $0x360] ss:$8 sps:$4 sm:$0xff]  }
  0x4d   : > { %926 = vmatmul.mubr.bf16.vlgmr.msra.gmra.mxu0 %v647_v1  ;;  %v2426_v1 = vld [vmem:[%s3134_s3 + $0x470] ss:$8 sps:$4 sm:$0xff]   ;;  %v1349_v6 = vshll.u32 %v2117_v0, 16 }
  0x4e   : > { %1301 = vmatpush1.bf16.msra.mxu0 %v2359_v4  ;;  %1332 = vmatprep.mubr.bf16.mxu0 %v2502_v2  ;;  %v2434_v4 = vld [vmem:[%s3134_s3 + $0x464] ss:$8 sps:$4 sm:$0xff]  }
  0x4f   : > { %1302 = vmatprep.subr.bf16.mxu0 %v2367_v5  ;;  %1274 = vmatpush2.bf16.msra.mxu1 %v2356_v7  ;;  %v1347_v5 = vshrl.u32 %v2117_v0, 16  ;;  %v2413_v7 = vld [vmem:[%s3134_s3 + $0x354] ss:$8 sps:$4 sm:$0xff]   ;;  %v1351_v8 = vrot.slane %v1349_v6, 1 }
  0x50   : > { %1275 = vmatprep.subr.bf16.mxu1 %v2364_v9  ;;  %v2432_v9 = vld [vmem:[%s3134_s3 + $0x460] ss:$8 sps:$4 sm:$0xff]  }
  0x51   : > { %v1352_v12 = vor.u32 %v1351_v8, %v1347_v5 }
  0x52   : > { %1303 = vmatpush1.bf16.msra.mxu0 %v2365_v10  ;;  %v2411_v10 = vld [vmem:[%s3134_s3 + $0x350] ss:$8 sps:$4 sm:$0xff]  }
  0x53   : > { %1304 = vmatprep.subr.bf16.mxu0 %v2373_v13  ;;  %1276 = vmatpush2.bf16.msra.mxu1 %v2362_v15  ;;  %v2416_v13 = vld [vmem:[%s3134_s3 + $0x344] ss:$8 sps:$4 sm:$0xff]   ;;  %v1354_v14 = vcombine.low %v382_v62, %v1352_v12  ;;  %v2414_v15 = vld [vmem:[%s3134_s3 + $0x340] ss:$8 sps:$4 sm:$0xff]  }
  0x54   : > { %1277 = vmatprep.subr.bf16.mxu1 %v2370_v16  ;;  %v2446_v16 = vld [vmem:[%s3134_s3 + $0x444] ss:$8 sps:$4 sm:$0xff]   ;;  %v2475_v62 = vld [vmem:[%s3134_s3 + $0x380] ss:$8 sps:$4 sm:$0xff]  }
  0x56   : > { %1305 = vmatpush1.bf16.msra.mxu0 %v2371_v17  ;;  %v1361_v17 = vrot.slane %v1354_v14, %v2670_v39 }
  0x57   : > { %1306 = vmatprep.subr.bf16.mxu0 %v2379_v19  ;;  %1278 = vmatpush2.bf16.msra.mxu1 %v2368_v22  ;;  %v2452_v22 = vld [vmem:[%s3134_s3 + $0x434] ss:$8 sps:$4 sm:$0xff]  }
  0x58   : > { %1279 = vmatprep.subr.bf16.mxu1 %v2376_v24  ;;  %v2166_v19 = vcombine.low %v2775_v38, %v1361_v17  ;;  %v2422_v38 = vld [vmem:[%s3134_s3 + $0x324] ss:$8 sps:$4 sm:$0xff]  }
  0x5a   : > { %1307 = vmatpush1.bf16.msra.mxu0 %v2377_v25  ;;  %v3011_v24 = vrot.slane %v2166_v19, %v2670_v39  ;;  %v1353_v25 = vrot.slane %v2117_v0, 1 }
  0x5b   : > { %1308 = vmatprep.subr.bf16.mxu0 %v2385_v26  ;;  %1280 = vmatpush2.bf16.msra.mxu1 %v2374_v31  ;;  %v2420_v31 = vld [vmem:[%s3134_s3 + $0x320] ss:$8 sps:$4 sm:$0xff]  }
  0x5c   : > { %1281 = vmatprep.subr.bf16.mxu1 %v2382_v33  ;;  %v1436_v27 = vcombine.high %v2883_v28, %v3011_v24  ;;  %v1435_v26 = vcombine.low %v2883_v28, %v3011_v24  ;;  %v2425_v33 = vld [vmem:[%s3134_s3 + $0x314] ss:$8 sps:$4 sm:$0xff]   ;;  %v1775_v28 = vsub.s32 0, %v2634_v30 }
  0x5e   : > { %1309 = vmatpush1.bf16.msra.mxu0 %v2383_v34  ;;  %v1368_v34 = vrot.slane %v1353_v25, %v2670_v39 }
  0x5f   : > { %1310 = vmatprep.subr.bf16.mxu0 %v2391_v23  ;;  %1282 = vmatpush2.bf16.msra.mxu1 %v2380_v37  ;;  %v2423_v23 = vld [vmem:[%s3134_s3 + $0x310] ss:$8 sps:$4 sm:$0xff]   ;;  %v2431_v37 = vld [vmem:[%s3134_s3 + $0x304] ss:$8 sps:$4 sm:$0xff]  }
  0x60   : > { %1283 = vmatprep.subr.bf16.mxu1 %v2388_v41  ;;  %v2167_v40 = vcombine.low %v2707_v56, %v1368_v34  ;;  %v2462_v41 = vld [vmem:[%s3134_s3 + $0x410] ss:$8 sps:$4 sm:$0xff]   ;;  %v2437_v56 = vld [vmem:[%s3134_s3 + $0x3f4] ss:$8 sps:$4 sm:$0xff]  }
  0x62   : > { %1311 = vmatpush1.bf16.msra.mxu0 %v2389_v42  ;;  %v2429_v42 = vld [vmem:[%s3134_s3 + $0x300] ss:$8 sps:$4 sm:$0xff]  }
  0x63   : > { %1312 = vmatprep.subr.bf16.mxu0 %v2397_v43  ;;  %1284 = vmatpush2.bf16.msra.mxu1 %v2386_v44  ;;  %v2470_v43 = vld [vmem:[%s3134_s3 + $0x404] ss:$8 sps:$4 sm:$0xff]   ;;  %v1434_v44 = vrot.slane %v2167_v40, %v2670_v39 }
  0x64   : > { %1285 = vmatprep.subr.bf16.mxu1 %v2394_v47  ;;  %v2443_v47 = vld [vmem:[%s3134_s3 + $0x3e4] ss:$8 sps:$4 sm:$0xff]  }
  0x66   : > { %1313 = vmatpush1.bf16.msra.mxu0 %v2395_v48  ;;  %v1437_v48 = vcombine.low %v2933_v55, %v1434_v44  ;;  %v2455_v55 = vld [vmem:[%s3134_s3 + $0x3c4] ss:$8 sps:$4 sm:$0xff]  }
  0x67   : > { %1314 = vmatprep.subr.bf16.mxu0 %v2403_v49  ;;  %1286 = vmatpush2.bf16.msra.mxu1 %v2392_v53  ;;  %v2441_v49 = vld [vmem:[%s3134_s3 + $0x3e0] ss:$8 sps:$4 sm:$0xff]   ;;  %v2449_v53 = vld [vmem:[%s3134_s3 + $0x3d4] ss:$8 sps:$4 sm:$0xff]  }
  0x68   : > { %1287 = vmatprep.subr.bf16.mxu1 %v2400_v50  ;;  %v2453_v50 = vld [vmem:[%s3134_s3 + $0x3c0] ss:$8 sps:$4 sm:$0xff]  }
  0x6a   : > { %1315 = vmatpush1.bf16.msra.mxu0 %v2401_v51  ;;  %v2461_v51 = vld [vmem:[%s3134_s3 + $0x3b4] ss:$8 sps:$4 sm:$0xff]  }
  0x6b   : > { %1681 = vmatprep.subr.bf16.mxu0 %v2407_v52  ;;  %1288 = vmatpush2.bf16.msra.mxu1 %v2398_v57  ;;  %v2459_v52 = vld [vmem:[%s3134_s3 + $0x3b0] ss:$8 sps:$4 sm:$0xff]   ;;  %v2467_v57 = vld [vmem:[%s3134_s3 + $0x3a4] ss:$8 sps:$4 sm:$0xff]  }
  0x6c   : > { %1724 = vmatprep.subr.bf16.mxu1 %v2428_v61  ;;  %v2477_v61 = vld [vmem:[%s3134_s3 + $0x384] ss:$8 sps:$4 sm:$0xff]  }
  0x6d   : > { %1333 = vmatmul.mubr.bf16.vlgmr.msra.gmra.mxu0 %v1013_v58  ;;  %v2465_v58 = vld [vmem:[%s3134_s3 + $0x3a0] ss:$8 sps:$4 sm:$0xff]  }
  0x6e   : > { %1682 = vmatpush1.bf16.msra.mxu0 %v2405_v59  ;;  %1290 = vmatmul.mubr.bf16.vlgmr.msra.gmra.mxu1 %v1011_v63  ;;  %v2473_v59 = vld [vmem:[%s3134_s3 + $0x394] ss:$8 sps:$4 sm:$0xff]  }
  0x6f   : > { %1683 = vmatprep.subr.bf16.mxu0 %v2410_v60  ;;  %1725 = vmatpush1.bf16.msra.mxu1 %v2426_v1  ;;  %v2471_v60 = vld [vmem:[%s3134_s3 + $0x390] ss:$8 sps:$4 sm:$0xff]  }
  0x70   : > { %1756 = vmatprep.mubr.bf16.mxu1 %v2502_v2  ;;  %1726 = vmatprep.subr.bf16.mxu1 %v2434_v4  ;;  %v2438_v2 = vld [vmem:[%s3134_s3 + $0x450] ss:$8 sps:$4 sm:$0xff]  }
  0x71   : > { %1713 = vmatprep.mubr.bf16.mxu0 %v1436_v27 }
  0x72   : > { %1684 = vmatpush1.bf16.msra.mxu0 %v2408_v3 }
  0x73   : > { %1685 = vmatprep.subr.bf16.mxu0 %v2413_v7  ;;  %1727 = vmatpush1.bf16.msra.mxu1 %v2432_v9 }
  0x74   : > { %1728 = vmatprep.subr.bf16.mxu1 %v2440_v11 }
  0x76   : > { %1686 = vmatpush1.bf16.msra.mxu0 %v2411_v10 }
  0x77   : > { %1687 = vmatprep.subr.bf16.mxu0 %v2416_v13  ;;  %1729 = vmatpush1.bf16.msra.mxu1 %v2438_v2 }
  0x78   : > { %1730 = vmatprep.subr.bf16.mxu1 %v2446_v16 }
  0x7a   : > { %1688 = vmatpush1.bf16.msra.mxu0 %v2414_v15 }
  0x7b   : > { %1689 = vmatprep.subr.bf16.mxu0 %v2419_v18  ;;  %1731 = vmatpush1.bf16.msra.mxu1 %v2444_v20  ;;  %v1771_v18 = vld [vmem:[%s3135_s4] sm:$0x3] }
  0x7c   : > { %1732 = vmatprep.subr.bf16.mxu1 %v2452_v22  ;;  %v1776_v25 = vrot.slane %v1771_v18, %v1775_v28 }
  0x7e   : > { %1690 = vmatpush1.bf16.msra.mxu0 %v2417_v21  ;;  %v1779_v21 = vsub.s32 1, %v2634_v30 }
  0x7f   : > { %1691 = vmatprep.subr.bf16.mxu0 %v2422_v38  ;;  %1733 = vmatpush1.bf16.msra.mxu1 %v2450_v29 }
  0x80   : > { %1734 = vmatprep.subr.bf16.mxu1 %v2458_v32  ;;  %v1780_v34 = vrot.slane %v1771_v18, %v1779_v21 }
  0x82   : > { %1692 = vmatpush1.bf16.msra.mxu0 %v2420_v31 }
  0x83   : > { %1693 = vmatprep.subr.bf16.mxu0 %v2425_v33  ;;  %1735 = vmatpush1.bf16.msra.mxu1 %v2456_v35 }
  0x84   : > { %1736 = vmatprep.subr.bf16.mxu1 %v2464_v36 }
  0x86   : > { %1694 = vmatpush1.bf16.msra.mxu0 %v2423_v23 }
  0x87   : > { %1695 = vmatprep.subr.bf16.mxu0 %v2431_v37  ;;  %1737 = vmatpush1.bf16.msra.mxu1 %v2462_v41 }
  0x88   : > { %1738 = vmatprep.subr.bf16.mxu1 %v2470_v43 }
  0x8a   : > { %1696 = vmatpush1.bf16.msra.mxu0 %v2429_v42 }
  0x8b   : > { %1697 = vmatprep.subr.bf16.mxu0 %v2437_v56  ;;  %1739 = vmatpush1.bf16.msra.mxu1 %v2468_v45 }
  0x8e   : > { %1698 = vmatpush2.bf16.msra.mxu0 %v2435_v46  ;;  %1757 = vmatmul.mubr.bf16.vlgmr.msra.gmra.mxu1 %v1437_v48 }
  0x8f   : > { %1699 = vmatprep.subr.bf16.mxu0 %v2443_v47 }
  0x92   : > { %1700 = vmatpush2.bf16.msra.mxu0 %v2441_v49 }
  0x93   : > { %1701 = vmatprep.subr.bf16.mxu0 %v2449_v53 }
  0x96   : > { %1702 = vmatpush2.bf16.msra.mxu0 %v2447_v54 }
  0x97   : > { %1703 = vmatprep.subr.bf16.mxu0 %v2455_v55 }
  0x9a   : > { %1704 = vmatpush2.bf16.msra.mxu0 %v2453_v50 }
  0x9b   : > { %1705 = vmatprep.subr.bf16.mxu0 %v2461_v51 }
  0x9e   : > { %1706 = vmatpush2.bf16.msra.mxu0 %v2459_v52 }
  0x9f   : > { %1707 = vmatprep.subr.bf16.mxu0 %v2467_v57 }
  0xa2   : > { %1708 = vmatpush2.bf16.msra.mxu0 %v2465_v58 }
  0xa3   : > { %1709 = vmatprep.subr.bf16.mxu0 %v2473_v59 }
  0xa6   : > { %1710 = vmatpush2.bf16.msra.mxu0 %v2471_v60 }
  0xa7   : > { %1711 = vmatprep.subr.bf16.mxu0 %v2477_v61 }
  0xaa   : > { %1712 = vmatpush2.bf16.msra.mxu0 %v2475_v62 }
  0xad   : > { %1714 = vmatmul.mubr.bf16.vlgmr.msra.gmra.mxu0 %v1435_v26 }
  0xee   : > { %v970_v63 = vpop.f32.mrf.mxu1 }
  0xf0   : > { %v972_v0 = vpop.f32.mrf.mxu1 }
  0xf2   : > { %v974_v3 = vpop.f32.mrf.mxu1 }
  0xf4   : > { %v976_v5 = vpop.f32.mrf.mxu1 }
 0x10d   : > { %v927_v1 = vpop.f32.mrf.mxu0 }
 0x10e   : > { %v971_v15 = vadd.f32 %v970_v63, %v927_v1 }
 0x10f   : > { %v929_v4 = vpop.f32.mrf.mxu0 }
 0x110   : > { %v973_v16 = vadd.f32 %v972_v0, %v929_v4 }
 0x111   : > { %v931_v6 = vpop.f32.mrf.mxu0 }
 0x112   : > { %v975_v22 = vadd.f32 %v974_v3, %v931_v6 }
 0x113   : > { %v933_v8 = vpop.f32.mrf.mxu0 }
 0x114   : > { %v977_v27 = vadd.f32 %v976_v5, %v933_v8 }
 0x12d   : > { %v1334_v10 = vpop.f32.mrf.mxu0 }
 0x12e   : > { %v1291_v7 = vpop.f32.mrf.mxu1 }
 0x12f   : > { %v1336_v12 = vpop.f32.mrf.mxu0  ;;  %v1292_v17 = vadd.f32 %v1291_v7, %v971_v15 }
 0x130   : > { %v1293_v9 = vpop.f32.mrf.mxu1 }
 0x131   : > { %v1338_v14 = vpop.f32.mrf.mxu0  ;;  %v1294_v24 = vadd.f32 %v1293_v9, %v973_v16  ;;  %v1335_v26 = vadd.f32 %v1334_v10, %v1292_v17 }
 0x132   : > { %v1295_v11 = vpop.f32.mrf.mxu1 }
 0x133   : > { %v1340_v19 = vpop.f32.mrf.mxu0  ;;  %v1296_v29 = vadd.f32 %v1295_v11, %v975_v22  ;;  %v1337_v35 = vadd.f32 %v1336_v12, %v1294_v24 }
 0x134   : > { %v1297_v13 = vpop.f32.mrf.mxu1 }
 0x135   : > { %v1298_v23 = vadd.f32 %v1297_v13, %v977_v27  ;;  %v1339_v41 = vadd.f32 %v1338_v14, %v1296_v29 }
 0x137   : > { %v1341_v45 = vadd.f32 %v1340_v19, %v1298_v23 }
 0x14e   : > { %v1758_v2 = vpop.f32.mrf.mxu1 }
 0x150   : > { %v1760_v20 = vpop.f32.mrf.mxu1 }
 0x152   : > { %v1762_v32 = vpop.f32.mrf.mxu1 }
 0x154   : > { %v1764_v56 = vpop.f32.mrf.mxu1 }
 0x16d   : > { %v1715_v38 = vpop.f32.mrf.mxu0 }
 0x16e   : > { %v1759_v31 = vadd.f32 %v1758_v2, %v1715_v38 }
 0x16f   : > { %v1717_v33 = vpop.f32.mrf.mxu0 }
 0x170   : > { %v1767_v36 = vadd.f32 %v1759_v31, %v1335_v26  ;;  %v1761_v37 = vadd.f32 %v1760_v20, %v1717_v33 }
 0x171   : > { %v1719_v40 = vpop.f32.mrf.mxu0 }
 0x172   : > { %v1783_v42 = vadd.f32 %v1776_v25, %v1767_v36  ;;  %v1768_v30 = vadd.f32 %v1761_v37, %v1337_v35  ;;  %v1763_v43 = vadd.f32 %v1762_v32, %v1719_v40 }
 0x173   : > { %v1721_v44 = vpop.f32.mrf.mxu0 }
 0x174   : > { %v1784_v46 = vadd.f32 %v1780_v34, %v1768_v30  ;;  %v1769_v47 = vadd.f32 %v1763_v43, %v1339_v41  ;;  %v1765_v48 = vadd.f32 %v1764_v56, %v1721_v44  ;;  %v1787_v49 = vmax.f32 %v1783_v42, 0.0 }
 0x176   : > { %v1788_v53 = vmax.f32 %v1784_v46, 0.0  ;;  %v1785_v54 = vadd.f32 %v1776_v25, %v1769_v47  ;;  %v1770_v55 = vadd.f32 %v1765_v48, %v1341_v45 }
 0x178   : > { %v2216_v50 = vpack.c.bf16 %v1788_v53, %v1787_v49  ;;  %v1786_v51 = vadd.f32 %v1780_v34, %v1770_v55  ;;  %v1789_v57 = vmax.f32 %v1785_v54, 0.0 }
 0x17a   : > { %v1803_v52 = vrot.slane %v2216_v50, %v2670_v39  ;;  %2218 = vst.sshfl [vmem:[%s374_s24] sm:$0x33 pattern:$0x76325410] %v2216_v50  ;;  %v1790_v58 = vmax.f32 %v1786_v51, 0.0 }
 0x17c   : > { %v1811_v59 = vcombine.high %v1803_v52, %v1803_v52  ;;  %v2217_v60 = vpack.c.bf16 %v1790_v58, %v1789_v57 }
 0x17e   : > { %1818 = vst [vmem:[%s374_s24 + $0x4] sm:$0xf] %v1811_v59  ;;  %v1810_v61 = vrot.slane %v2217_v60, %v2670_v39  ;;  %2219 = vst.sshfl [vmem:[%s374_s24 + $0x8] sm:$0x33 pattern:$0x76325410] %v2217_v60 }
 0x180   : > { %v1812_v62 = vcombine.high %v1810_v61, %v1810_v61 }
 0x182   : > { %1820 = vst [vmem:[%s374_s24 + $0xc] sm:$0xf] %v1812_v62 }
 0x183 PF: > { %s15_s20 = sadd.s32 1, %s2500_s20   ;;  %s3137_s18 = smov %s2496_s19 }
 0x184   : > { %p12_p5 = scmp.ge.s32.totalorder %s15_s20, 6   ;;  %s3138_s19 = smov %s3140_s21 }
 0x186   :  { %14 = sbr.rel (!%p12_p5) target bundleno = 2 (0x2), region = 78 }

// kernel: _lambda_.21
= control target key start
LH: loop header
LB: loop body
LE: loop exit
PB: predicated region body
PF: predicated region fallthrough
CT: control target
= control target key end

     0   :  { %s165_s0 = inlined_call_operand.vmem [shape: bf16[8,1024], index: 0, kind: input, shape index: {}]   ;;  %s166_s1 = inlined_call_operand.vmem [shape: bf16[8,1024], index: 1, kind: input, shape index: {}]   ;;  %s167_s2 = inlined_call_operand.hbm [shape: f32[1,1], index: 2, kind: output, shape index: {}]  }
   0x1   :  { %v18_v0 = vld [vmem:[%s165_s0] sm:$0xff]  ;;  %v19_v1 = vld [vmem:[%s165_s0 + $0x8] sm:$0xff]  ;;  %v20_v2 = vld [vmem:[%s165_s0 + $0x10] sm:$0xff] }
   0x2   :  { %v22_v3 = vunpack.c.l.bf16 %v18_v0  ;;  %v23_v4 = vunpack.c.h.bf16 %v18_v0  ;;  %v24_v5 = vunpack.c.l.bf16 %v19_v1  ;;  %v25_v6 = vunpack.c.h.bf16 %v19_v1  ;;  %v30_v7 = vld [vmem:[%s166_s1] sm:$0xff]  ;;  %v31_v8 = vld [vmem:[%s166_s1 + $0x8] sm:$0xff]  ;;  %v32_v10 = vld [vmem:[%s166_s1 + $0x10] sm:$0xff] }
   0x3   :  { %v26_v9 = vunpack.c.l.bf16 %v20_v2 }
   0x4   :  { %7 = vsyncpa [#allocation3], 0  ;;  %v21_v11 = vld [vmem:[%s165_s0 + $0x18] sm:$0xff]  ;;  %v34_v13 = vunpack.c.l.bf16 %v30_v7  ;;  %v35_v14 = vunpack.c.h.bf16 %v30_v7  ;;  %v36_v15 = vunpack.c.l.bf16 %v31_v8  ;;  %v37_v16 = vunpack.c.h.bf16 %v31_v8  ;;  %s120_s0 = smov [#allocation2]  }
   0x5   :  { %v33_v12 = vld [vmem:[%s166_s1 + $0x18] sm:$0xff]  ;;  %v27_v17 = vunpack.c.h.bf16 %v20_v2  ;;  %v38_v18 = vunpack.c.l.bf16 %v32_v10  ;;  %v39_v19 = vunpack.c.h.bf16 %v32_v10  ;;  %v28_v24 = vunpack.c.l.bf16 %v21_v11  ;;  %s85_s1 = sshll.u32 %s120_s0, 4  ;;  %s86_s1 = int_to_ptr.vmem [resolvable:$true] %s85_s1 }
   0x6   :  { %v42_v20 = vsub.f32 %v22_v3, %v34_v13  ;;  %v43_v21 = vsub.f32 %v23_v4, %v35_v14  ;;  %v44_v22 = vsub.f32 %v24_v5, %v36_v15  ;;  %v45_v23 = vsub.f32 %v25_v6, %v37_v16  ;;  %s97_s26 = scalar_lea.vmem %s86_s1, 16  ;;  %s101_s27 = scalar_lea.vmem %s86_s1, 32 }
   0x7   :  { %v40_v25 = vunpack.c.l.bf16 %v33_v12  ;;  %v46_v26 = vsub.f32 %v26_v9, %v38_v18  ;;  %v29_v30 = vunpack.c.h.bf16 %v21_v11  ;;  %v41_v31 = vunpack.c.h.bf16 %v33_v12  ;;  %p98_p0 = scmp.ne.s32.totalorder %s86_s1, %s97_s26  ;;  %p102_p1 = scmp.lt.s32.totalorder %s86_s1, %s86_s1 }
   0x8   :  { %v51_v27 = vmul.f32 %v42_v20, %v42_v20  ;;  %v52_v28 = vmul.f32 %v43_v21, %v43_v21  ;;  %v53_v29 = vmul.f32 %v44_v22, %v44_v22  ;;  %v47_v32 = vsub.f32 %v27_v17, %v39_v19  ;;  %p103_p2 = scmp.lt.s32.totalorder %s101_s27, %s97_s26 }
   0x9   :  { %v54_v33 = vmul.f32 %v45_v23, %v45_v23  ;;  %v48_v35 = vsub.f32 %v28_v24, %v40_v25  ;;  %v55_v36 = vmul.f32 %v46_v26, %v46_v26  ;;  %v49_v38 = vsub.f32 %v29_v30, %v41_v31 }
   0xa   :  { %v59_v34 = vadd.f32 %v52_v28, %v51_v27  ;;  %v56_v39 = vmul.f32 %v47_v32, %v47_v32  ;;  %vm16_vm0 = vcmask 0   ;;  %v119_v47 = vmov 0.0   ;;  %p104_p3 = por %p103_p2, %p102_p1 }
   0xb   :  { %v57_v41 = vmul.f32 %v48_v35, %v48_v35  ;;  %v58_v43 = vmul.f32 %v49_v38, %v49_v38  ;;  %17 = vst.msk [vmem:[#allocation2] sm:$0x1] %vm16_vm0, %v119_v47 }
   0xc   :  { %v60_v37 = vadd.f32 %v59_v34, %v53_v29  ;;  %p105_p4 = pnand %p104_p3, %p98_p0 }
   0xe   :  { %v61_v40 = vadd.f32 %v60_v37, %v54_v33 }
  0x10   :  { %v62_v42 = vadd.f32 %v61_v40, %v55_v36 }
  0x12   :  { %v63_v44 = vadd.f32 %v62_v42, %v56_v39  ;;  %v50_v55 = vld [vmem:[#allocation2] sm:$0x1] }
  0x14   :  { %v64_v45 = vadd.f32 %v63_v44, %v57_v41 }
  0x16   :  { %v65_v46 = vadd.f32 %v64_v45, %v58_v43 }
  0x18   :  { %66 = vadd.xlane.f32.xlu0 %v65_v46 }
  0xa1   :  { %v67_v48 = vpop.xlane.xlu0 %66 }
  0xa2   :  { %v68_v49 = vrot.slane %v67_v48, 4 }
  0xa4   :  { %v69_v50 = vadd.f32 %v68_v49, %v67_v48 }
  0xa6   :  { %v70_v51 = vrot.slane %v69_v50, 2 }
  0xa8   :  { %v71_v52 = vadd.f32 %v70_v51, %v69_v50 }
  0xaa   :  { %v72_v53 = vrot.slane %v71_v52, 1 }
  0xac   :  { %v73_v54 = vadd.f32 %v72_v53, %v71_v52 }
  0xae   :  { %93 = vpush %v73_v54 }
  0xdf   :  { %s94_s25 = spop %93 }
  0xe0   :  { %v75_v56 = vstv %s94_s25 }
  0xe1   :  { %v76_v57 = vadd.f32 %v75_v56, %v50_v55 }
  0xe3   :  { %78 = vst.msk [vmem:[#allocation2] sm:$0x1] %vm16_vm0, %v76_v57 }
  0xe4   :  { %108 = shalt.err (!%p105_p4)
}
  0xe5   :  { %88 = dma.vmem_to_hbm [thread:$0]  %s86_s1, 16, %s167_s2, [#allocation3]  }
  0xe6   :  { %117 = dma.done.wait [#allocation3], 16  }
  0xe7   :  { %118 = vsyncadd [#allocation3], 4294967280 }
  0xe8   :  { %92 = vsyncpa [#allocation3], 1 }

// kernel: _lambda_.11
= control target key start
LH: loop header
LB: loop body
LE: loop exit
PB: predicated region body
PF: predicated region fallthrough
CT: control target
= control target key end

     0   :  { %s259_s0 = inlined_call_operand.vmem [shape: f32[8,1024], index: 0, kind: input, shape index: {}]   ;;  %s260_s1 = inlined_call_operand.vmem [shape: f32[8,1024], index: 1, kind: input, shape index: {}]   ;;  %s261_s2 = inlined_call_operand.hbm [shape: f32[1,1], index: 2, kind: output, shape index: {}]  }
   0x1   :  { %v18_v0 = vld [vmem:[%s259_s0] sm:$0xff]  ;;  %v19_v1 = vld [vmem:[%s259_s0 + $0x8] sm:$0xff]  ;;  %v20_v3 = vld [vmem:[%s259_s0 + $0x10] sm:$0xff] }
   0x2   :  { %v26_v2 = vld [vmem:[%s260_s1] sm:$0xff]  ;;  %v27_v4 = vld [vmem:[%s260_s1 + $0x8] sm:$0xff]  ;;  %v28_v5 = vld [vmem:[%s260_s1 + $0x10] sm:$0xff] }
   0x3   :  { %v21_v6 = vld [vmem:[%s259_s0 + $0x18] sm:$0xff]  ;;  %v22_v8 = vld [vmem:[%s259_s0 + $0x20] sm:$0xff]  ;;  %v34_v10 = vsub.f32 %v18_v0, %v26_v2  ;;  %v35_v11 = vsub.f32 %v19_v1, %v27_v4 }
   0x4   :  { %v29_v7 = vld [vmem:[%s260_s1 + $0x18] sm:$0xff]  ;;  %v30_v9 = vld [vmem:[%s260_s1 + $0x20] sm:$0xff] }
   0x5   :  { %7 = vsyncpa [#allocation3], 0  ;;  %v36_v12 = vsub.f32 %v20_v3, %v28_v5  ;;  %v23_v13 = vld [vmem:[%s259_s0 + $0x28] sm:$0xff]  ;;  %v37_v14 = vsub.f32 %v21_v6, %v29_v7  ;;  %v24_v15 = vld [vmem:[%s259_s0 + $0x30] sm:$0xff]  ;;  %v38_v18 = vsub.f32 %v22_v8, %v30_v9  ;;  %v42_v21 = vand.u32 2147483647, %v34_v10 }
   0x6   :  { %v31_v16 = vld [vmem:[%s260_s1 + $0x28] sm:$0xff]  ;;  %v32_v17 = vld [vmem:[%s260_s1 + $0x30] sm:$0xff]  ;;  %v25_v19 = vld [vmem:[%s259_s0 + $0x38] sm:$0xff]  ;;  %v43_v22 = vand.u32 2147483647, %v35_v11  ;;  %v58_v24 = vmul.f32 0.5, %v34_v10 }
   0x7   :  { %v33_v20 = vld [vmem:[%s260_s1 + $0x38] sm:$0xff]  ;;  %v44_v23 = vand.u32 2147483647, %v36_v12  ;;  %v59_v25 = vmul.f32 0.5, %v35_v11  ;;  %v60_v26 = vmul.f32 0.5, %v36_v12  ;;  %v39_v27 = vsub.f32 %v23_v13, %v31_v16  ;;  %s160_s0 = smov [#allocation2]  }
   0x8   :  { %v40_v28 = vsub.f32 %v24_v15, %v32_v17  ;;  %v45_v29 = vand.u32 2147483647, %v37_v14  ;;  %v61_v30 = vmul.f32 0.5, %v37_v14  ;;  %v41_v31 = vsub.f32 %v25_v19, %v33_v20  ;;  %s117_s1 = sshll.u32 %s160_s0, 4  ;;  %s118_s1 = int_to_ptr.vmem [resolvable:$true] %s117_s1 }
   0x9   :  { %v46_v32 = vand.u32 2147483647, %v38_v18  ;;  %v66_v33 = vmul.f32 %v58_v24, %v34_v10  ;;  %v67_v34 = vmul.f32 %v59_v25, %v35_v11  ;;  %vm224_vm0 = vcmp.lt.f32.partialorder %v42_v21, 1.0  ;;  %s137_s14 = scalar_lea.vmem %s118_s1, 16  ;;  %s141_s15 = scalar_lea.vmem %s118_s1, 32 }
   0xa   :  { %vm228_vm1 = vcmp.lt.f32.partialorder %v43_v22, 1.0  ;;  %v62_v37 = vmul.f32 0.5, %v38_v18  ;;  %v68_v38 = vmul.f32 %v60_v26, %v36_v12  ;;  %vm232_vm2 = vcmp.lt.f32.partialorder %v44_v23, 1.0  ;;  %p138_p0 = scmp.ne.s32.totalorder %s118_s1, %s137_s14  ;;  %p142_p1 = scmp.lt.s32.totalorder %s118_s1, %s118_s1 }
   0xb   :  { %v125_v40 = vadd.f32 -0.5, %v42_v21  ;;  %v126_v41 = vadd.f32 -0.5, %v43_v22  ;;  %v127_v42 = vadd.f32 -0.5, %v44_v23  ;;  %v47_v43 = vand.u32 2147483647, %v39_v27  ;;  %p143_p2 = scmp.lt.s32.totalorder %s141_s15, %s137_s14 }
   0xc   :  { %v63_v44 = vmul.f32 0.5, %v39_v27  ;;  %v69_v45 = vmul.f32 %v61_v30, %v37_v14  ;;  %v128_v46 = vadd.f32 -0.5, %v45_v29  ;;  %v48_v47 = vand.u32 2147483647, %v40_v28 }
   0xd   :  { %vm236_vm3 = vcmp.lt.f32.partialorder %v45_v29, 1.0  ;;  %v82_v49 = vsel %vm224_vm0, %v66_v33, %v125_v40  ;;  %v83_v50 = vsel %vm228_vm1, %v67_v34, %v126_v41  ;;  %v64_v51 = vmul.f32 0.5, %v40_v28  ;;  %p144_p3 = por %p143_p2, %p142_p1 }
   0xe   :  { %v70_v52 = vmul.f32 %v62_v37, %v38_v18  ;;  %v129_v53 = vadd.f32 -0.5, %v46_v32  ;;  %v84_v54 = vsel %vm232_vm2, %v68_v38, %v127_v42  ;;  %v49_v55 = vand.u32 2147483647, %v41_v31 }
   0xf   :  { %vm246_vm4 = vcmp.lt.f32.partialorder %v46_v32, 1.0  ;;  %v91_v57 = vadd.f32 %v83_v50, %v82_v49  ;;  %v65_v58 = vmul.f32 0.5, %v41_v31  ;;  %v71_v59 = vmul.f32 %v63_v44, %v39_v27  ;;  %p145_p4 = pnand %p144_p3, %p138_p0 }
  0x10   :  { %v130_v60 = vadd.f32 -0.5, %v47_v43  ;;  %v85_v61 = vsel %vm236_vm3, %v69_v45, %v128_v46  ;;  %vm55_vm5 = vcmp.lt.f32.partialorder %v47_v43, 1.0  ;;  %v72_v63 = vmul.f32 %v64_v51, %v40_v28 }
  0x11   :  { %v92_v62 = vadd.f32 %v91_v57, %v84_v54  ;;  %v131_v0 = vadd.f32 -0.5, %v48_v47  ;;  %v86_v1 = vsel %vm246_vm4, %v70_v52, %v129_v53  ;;  %vm56_vm6 = vcmp.lt.f32.partialorder %v48_v47, 1.0 }
  0x12   :  { %v73_v3 = vmul.f32 %v65_v58, %v41_v31  ;;  %v132_v4 = vadd.f32 -0.5, %v49_v55  ;;  %v87_v5 = vsel %vm55_vm5, %v71_v59, %v130_v60  ;;  %vm57_vm7 = vcmp.lt.f32.partialorder %v49_v55, 1.0 }
  0x13   :  { %v93_v2 = vadd.f32 %v92_v62, %v85_v61  ;;  %v88_v7 = vsel %vm56_vm6, %v72_v63, %v131_v0  ;;  %vm16_vm8 = vcmask 0   ;;  %v159_v12 = vmov 0.0  }
  0x14   :  { %v89_v9 = vsel %vm57_vm7, %v73_v3, %v132_v4  ;;  %17 = vst.msk [vmem:[#allocation2] sm:$0x1] %vm16_vm8, %v159_v12 }
  0x15   :  { %v94_v6 = vadd.f32 %v93_v2, %v86_v1 }
  0x17   :  { %v95_v8 = vadd.f32 %v94_v6, %v87_v5 }
  0x19   :  { %v96_v10 = vadd.f32 %v95_v8, %v88_v7 }
  0x1b   :  { %v97_v11 = vadd.f32 %v96_v10, %v89_v9  ;;  %v90_v20 = vld [vmem:[#allocation2] sm:$0x1] }
  0x1d   :  { %98 = vadd.xlane.f32.xlu0 %v97_v11 }
  0xa6   :  { %v99_v13 = vpop.xlane.xlu0 %98 }
  0xa7   :  { %v100_v14 = vrot.slane %v99_v13, 4 }
  0xa9   :  { %v101_v15 = vadd.f32 %v100_v14, %v99_v13 }
  0xab   :  { %v102_v16 = vrot.slane %v101_v15, 2 }
  0xad   :  { %v103_v17 = vadd.f32 %v102_v16, %v101_v15 }
  0xaf   :  { %v104_v18 = vrot.slane %v103_v17, 1 }
  0xb1   :  { %v105_v19 = vadd.f32 %v104_v18, %v103_v17 }
  0xb3   :  { %133 = vpush %v105_v19 }
  0xe4   :  { %s134_s13 = spop %133 }
  0xe5   :  { %v107_v21 = vstv %s134_s13 }
  0xe6   :  { %v108_v22 = vadd.f32 %v107_v21, %v90_v20 }
  0xe8   :  { %110 = vst.msk [vmem:[#allocation2] sm:$0x1] %vm16_vm8, %v108_v22 }
  0xe9   :  { %148 = shalt.err (!%p145_p4)
}
  0xea   :  { %120 = dma.vmem_to_hbm [thread:$0]  %s118_s1, 16, %s261_s2, [#allocation3]  }
  0xeb   :  { %157 = dma.done.wait [#allocation3], 16  }
  0xec   :  { %158 = vsyncadd [#allocation3], 4294967280 }
  0xed   :  { %124 = vsyncpa [#allocation3], 1 }

// kernel: _lambda_.17
= control target key start
LH: loop header
LB: loop body
LE: loop exit
PB: predicated region body
PF: predicated region fallthrough
CT: control target
= control target key end

     0   :  { %s4187_s18 = smov 0   ;;  %s4189_s19 = smov 0   ;;  %s5305_s0 = inlined_call_operand.vmem [shape: bf16[4,6,6,256], index: 0, kind: input, shape index: {}, may-alias: {0,1,2}]   ;;  %s5306_s1 = inlined_call_operand.vmem [shape: bf16[4,6,6,256], index: 1, kind: input, shape index: {}, may-alias: {0,1,2}]   ;;  %s5307_s2 = inlined_call_operand.vmem [shape: bf16[4,6,6,256], index: 2, kind: input, shape index: {}, may-alias: {0,1,2}]   ;;  %s5308_s3 = inlined_call_operand.vmem [shape: bf16[3,768,256], index: 3, kind: input, shape index: {}]   ;;  %s5309_s4 = inlined_call_operand.vmem [shape: f32[1,256], index: 4, kind: input, shape index: {}]   ;;  %s5310_s5 = inlined_call_operand.vmem [shape: bf16[4,4,4,256], index: 5, kind: output, shape index: {}]  }
   0x1   :  { %s4191_s20 = smov 0  }
   0x2 LB: > { %s27_s21 = sadd.s32 1, %s4150_s19  ;;  %p3141_p0 = scmp.ge.s32.totalorder %s4154_s20, 1  ;;  %s4154_s20 = sphi %s4191_s20, %s15_s20   ;;  %s4150_s19 = sphi %s4189_s19, %s5312_s19   ;;  %s4146_s18 = sphi %s4187_s18, %s5311_s18  }
   0x3   : > { %p29_p1 = scmp.ge.s32.totalorder %s27_s21, 4  ;;  %p267_p2 = scmp.lt.s32.totalorder %s4154_s20, 5 }
   0x5   : > { %s5314_s21 = smov (%p29_p1, %s27_s21), 0  ;;  %p268_p3 = pnand %p3141_p0, %p267_p2 }
   0x6   : > { %p338_p4 = scmp.lt.s32.totalorder (!%p268_p3), %s4146_s18, 3 }
   0x7   : > { %271 = sbr.rel (%p268_p3) target bundleno = 547 (0x223), region = 40 }
   0xc   : > { %v3688_v0 = vld [vmem:[%s5308_s3 + $0x374] ss:$8 sps:$4 sm:$0xff]   ;;  %v3692_v2 = vld [vmem:[%s5308_s3 + $0x370] ss:$8 sps:$4 sm:$0xff]   ;;  %v3694_v4 = vld [vmem:[%s5308_s3 + $0x364] ss:$8 sps:$4 sm:$0xff]   ;;  %v485_v38 = vlaneseq }
   0xd   : > { %v3690_v1 = vld [vmem:[%s5308_s3 + $0x474] ss:$8 sps:$4 sm:$0xff]   ;;  %1359 = vmatprep.subr.bf16.mxu0 %v3688_v0  ;;  %v3693_v3 = vld [vmem:[%s5308_s3 + $0x470] ss:$8 sps:$4 sm:$0xff]   ;;  %s5316_s18 = smov (!%p338_p4, %s4146_s18), 3 }
   0xe   : > { %1402 = vmatprep.subr.bf16.mxu1 %v3690_v1  ;;  %1360 = vmatpush1.bf16.msra.mxu0 %v3692_v2  ;;  %v3696_v5 = vld [vmem:[%s5308_s3 + $0x464] ss:$8 sps:$4 sm:$0xff]   ;;  %v3698_v6 = vld [vmem:[%s5308_s3 + $0x360] ss:$8 sps:$4 sm:$0xff]   ;;  %v3700_v8 = vld [vmem:[%s5308_s3 + $0x354] ss:$8 sps:$4 sm:$0xff]  }
   0xf   : > { %1403 = vmatpush1.bf16.msra.mxu1 %v3693_v3  ;;  %1361 = vmatprep.subr.bf16.mxu0 %v3694_v4  ;;  %v3699_v7 = vld [vmem:[%s5308_s3 + $0x460] ss:$8 sps:$4 sm:$0xff]   ;;  %v3702_v9 = vld [vmem:[%s5308_s3 + $0x454] ss:$8 sps:$4 sm:$0xff]   ;;  %v3704_v10 = vld [vmem:[%s5308_s3 + $0x350] ss:$8 sps:$4 sm:$0xff]  }
  0x10   : > { %1404 = vmatprep.subr.bf16.mxu1 %v3696_v5  ;;  %v3705_v11 = vld [vmem:[%s5308_s3 + $0x450] ss:$8 sps:$4 sm:$0xff]   ;;  %v3706_v12 = vld [vmem:[%s5308_s3 + $0x344] ss:$8 sps:$4 sm:$0xff]   ;;  %v3710_v14 = vld [vmem:[%s5308_s3 + $0x340] ss:$8 sps:$4 sm:$0xff]  }
  0x11   : > { %v3708_v13 = vld [vmem:[%s5308_s3 + $0x444] ss:$8 sps:$4 sm:$0xff]   ;;  %v3711_v15 = vld [vmem:[%s5308_s3 + $0x440] ss:$8 sps:$4 sm:$0xff]   ;;  %v3712_v16 = vld [vmem:[%s5308_s3 + $0x334] ss:$8 sps:$4 sm:$0xff]  }
  0x12   : > { %1362 = vmatpush1.bf16.msra.mxu0 %v3698_v6  ;;  %v3714_v17 = vld [vmem:[%s5308_s3 + $0x434] ss:$8 sps:$4 sm:$0xff]   ;;  %v3716_v18 = vld [vmem:[%s5308_s3 + $0x330] ss:$8 sps:$4 sm:$0xff]   ;;  %v3718_v20 = vld [vmem:[%s5308_s3 + $0x324] ss:$8 sps:$4 sm:$0xff]  }
  0x13   : > { %1405 = vmatpush1.bf16.msra.mxu1 %v3699_v7  ;;  %1363 = vmatprep.subr.bf16.mxu0 %v3700_v8  ;;  %v3717_v19 = vld [vmem:[%s5308_s3 + $0x430] ss:$8 sps:$4 sm:$0xff]   ;;  %v3720_v21 = vld [vmem:[%s5308_s3 + $0x424] ss:$8 sps:$4 sm:$0xff]   ;;  %v3722_v22 = vld [vmem:[%s5308_s3 + $0x320] ss:$8 sps:$4 sm:$0xff]  }
  0x14   : > { %1406 = vmatprep.subr.bf16.mxu1 %v3702_v9  ;;  %v3723_v23 = vld [vmem:[%s5308_s3 + $0x420] ss:$8 sps:$4 sm:$0xff]   ;;  %v3724_v24 = vld [vmem:[%s5308_s3 + $0x314] ss:$8 sps:$4 sm:$0xff]   ;;  %v3728_v26 = vld [vmem:[%s5308_s3 + $0x310] ss:$8 sps:$4 sm:$0xff]  }
  0x15   : > { %v3726_v25 = vld [vmem:[%s5308_s3 + $0x414] ss:$8 sps:$4 sm:$0xff]   ;;  %v3729_v27 = vld [vmem:[%s5308_s3 + $0x410] ss:$8 sps:$4 sm:$0xff]   ;;  %v3730_v28 = vld [vmem:[%s5308_s3 + $0x304] ss:$8 sps:$4 sm:$0xff]  }
  0x16   : > { %1364 = vmatpush1.bf16.msra.mxu0 %v3704_v10  ;;  %v3732_v29 = vld [vmem:[%s5308_s3 + $0x404] ss:$8 sps:$4 sm:$0xff]   ;;  %v3734_v30 = vld [vmem:[%s5308_s3 + $0x300] ss:$8 sps:$4 sm:$0xff]   ;;  %v3736_v32 = vld [vmem:[%s5308_s3 + $0x3f4] ss:$8 sps:$4 sm:$0xff]  }
  0x17   : > { %1407 = vmatpush1.bf16.msra.mxu1 %v3705_v11  ;;  %1365 = vmatprep.subr.bf16.mxu0 %v3706_v12  ;;  %v3735_v31 = vld [vmem:[%s5308_s3 + $0x400] ss:$8 sps:$4 sm:$0xff]   ;;  %v3738_v33 = vld [vmem:[%s5308_s3 + $0x4f4] ss:$8 sps:$4 sm:$0xff]   ;;  %v3740_v34 = vld [vmem:[%s5308_s3 + $0x3f0] ss:$8 sps:$4 sm:$0xff]  }
  0x18   : > { %1408 = vmatprep.subr.bf16.mxu1 %v3708_v13  ;;  %v3741_v35 = vld [vmem:[%s5308_s3 + $0x4f0] ss:$8 sps:$4 sm:$0xff]   ;;  %v4156_v36 = vmov 1983009808   ;;  %v3742_v39 = vld [vmem:[%s5308_s3 + $0x3e4] ss:$8 sps:$4 sm:$0xff]  }
  0x19   : > { %v483_v37 = vunpack.c.l.s4 %v4156_v36  ;;  %v3744_v40 = vld [vmem:[%s5308_s3 + $0x4e4] ss:$8 sps:$4 sm:$0xff]   ;;  %s4322_s10 = smul.u32 48, %s5316_s18  ;;  %v3746_v41 = vld [vmem:[%s5308_s3 + $0x3e0] ss:$8 sps:$4 sm:$0xff]   ;;  %v4327_v43 = vshrl.u32 %v485_v38, 7 }
  0x1a   : > { %1366 = vmatpush1.bf16.msra.mxu0 %v3710_v14  ;;  %v3747_v44 = vld [vmem:[%s5308_s3 + $0x4e0] ss:$8 sps:$4 sm:$0xff]   ;;  %v3748_v45 = vld [vmem:[%s5308_s3 + $0x3d4] ss:$8 sps:$4 sm:$0xff]   ;;  %v3752_v47 = vld [vmem:[%s5308_s3 + $0x3d0] ss:$8 sps:$4 sm:$0xff]  }
  0x1b   : > { %1409 = vmatpush1.bf16.msra.mxu1 %v3711_v15  ;;  %1367 = vmatprep.subr.bf16.mxu0 %v3712_v16  ;;  %v484_v42 = vunpack.c.0.s8 %v483_v37  ;;  %v3750_v46 = vld [vmem:[%s5308_s3 + $0x4d4] ss:$8 sps:$4 sm:$0xff]   ;;  %s3656_s23 = sadd.s32 32, %s4322_s10  ;;  %v3753_v48 = vld [vmem:[%s5308_s3 + $0x4d0] ss:$8 sps:$4 sm:$0xff]   ;;  %s4349_s30 = scalar_lea.vmem %s5305_s0, %s4322_s10 }
  0x1c   : > { %1410 = vmatprep.subr.bf16.mxu1 %v3714_v17  ;;  %v3754_v50 = vld [vmem:[%s5308_s3 + $0x3c4] ss:$8 sps:$4 sm:$0xff]   ;;  %s363_s13 = scalar_lea.vmem %s5306_s1, %s3656_s23  ;;  %v3758_v52 = vld [vmem:[%s5308_s3 + $0x3c0] ss:$8 sps:$4 sm:$0xff]   ;;  %v3760_v55 = vld [vmem:[%s5308_s3 + $0x3b4] ss:$8 sps:$4 sm:$0xff]  }
  0x1d   : > { %v4352_v49 = vsub.s32 %v484_v42, %v4327_v43  ;;  %v3756_v51 = vld [vmem:[%s5308_s3 + $0x4c4] ss:$8 sps:$4 sm:$0xff]   ;;  %v3759_v53 = vld [vmem:[%s5308_s3 + $0x4c0] ss:$8 sps:$4 sm:$0xff]   ;;  %v392_v56 = vld [vmem:[%s4349_s30 + $0x10] sm:$0x77] }
  0x1e   : > { %1368 = vmatpush1.bf16.msra.mxu0 %v3716_v18  ;;  %v391_v54 = vld [vmem:[%s4349_s30 + $0x8] sm:$0x77]  ;;  %v393_v57 = vld [vmem:[%s4349_s30 + $0x18] sm:$0x77]  ;;  %v394_v61 = vld [vmem:[%s363_s13] sm:$0x77]  ;;  %v4382_v62 = vcombine.low %v392_v56, %v392_v56  ;;  %v4384_v63 = vcombine.high %v392_v56, %v392_v56 }
  0x1f   : > { %1411 = vmatpush1.bf16.msra.mxu1 %v3717_v19  ;;  %1369 = vmatprep.subr.bf16.mxu0 %v3718_v20  ;;  %v4375_v58 = vcombine.low %v391_v54, %v391_v54  ;;  %v4377_v59 = vcombine.high %v391_v54, %v391_v54  ;;  %v4380_v60 = vrot.slane %v391_v54, %v4352_v49  ;;  %v3762_v0 = vld [vmem:[%s5308_s3 + $0x4b4] ss:$8 sps:$4 sm:$0xff]   ;;  %v3764_v8 = vld [vmem:[%s5308_s3 + $0x3b0] ss:$8 sps:$4 sm:$0xff]   ;;  %v3766_v18 = vld [vmem:[%s5308_s3 + $0x3a4] ss:$8 sps:$4 sm:$0xff]  }
  0x20   : > { %1412 = vmatprep.subr.bf16.mxu1 %v3720_v21  ;;  %v4389_v1 = vcombine.low %v393_v57, %v393_v57  ;;  %v4392_v2 = vrot.slane %v392_v56, %v4352_v49  ;;  %v4395_v3 = vrot.slane %v393_v57, %v4352_v49  ;;  %v4397_v4 = vcombine.high %v393_v57, %v393_v57  ;;  %v3765_v13 = vld [vmem:[%s5308_s3 + $0x4b0] ss:$8 sps:$4 sm:$0xff]   ;;  %v3768_v19 = vld [vmem:[%s5308_s3 + $0x4a4] ss:$8 sps:$4 sm:$0xff]   ;;  %s3658_s6 = sadd.s32 40, %s4322_s10  ;;  %s3659_s16 = sshll.u32 %s5316_s18, 4 }
  0x21   : > { %v4400_v5 = vrot.slane %v394_v61, %v4352_v49  ;;  %v431_v6 = vshrl.u32 %v4375_v58, 16  ;;  %v433_v7 = vshll.u32 %v4375_v58, 16  ;;  %v4407_v9 = vcombine.low %v394_v61, %v394_v61  ;;  %v3777_v54 = vld [vmem:[%s5308_s3 + $0x490] ss:$8 sps:$4 sm:$0xff]   ;;  %s376_s13 = scalar_lea.vmem %s5307_s2, %s3658_s6  ;;  %s388_s24 = scalar_lea.vmem %s5310_s5, %s3659_s16 }
  0x22   : > { %1370 = vmatpush1.bf16.msra.mxu0 %v3722_v22  ;;  %v3253_v10 = vcombine.low %v4380_v60, %v4392_v2  ;;  %v438_v11 = vshrl.u32 %v4377_v59, 16  ;;  %v440_v12 = vshll.u32 %v4377_v59, 16  ;;  %v445_v16 = vshrl.u32 %v4382_v62, 16 }
  0x23   : > { %1413 = vmatpush1.bf16.msra.mxu1 %v3723_v23  ;;  %1371 = vmatprep.subr.bf16.mxu0 %v3724_v24  ;;  %v3255_v14 = vcombine.low %v4395_v3, %v4400_v5  ;;  %v435_v15 = vrot.slane %v433_v7, 1  ;;  %v447_v17 = vshll.u32 %v4382_v62, 16  ;;  %v4426_v20 = vcombine.high %v394_v61, %v394_v61  ;;  %v3770_v24 = vld [vmem:[%s5308_s3 + $0x3a0] ss:$8 sps:$4 sm:$0xff]  }
  0x24   : > { %1414 = vmatprep.subr.bf16.mxu1 %v3726_v25  ;;  %v4429_v21 = vrot.slane %v3253_v10, %v4352_v49  ;;  %v442_v22 = vrot.slane %v440_v12, 1  ;;  %v452_v23 = vshrl.u32 %v4384_v63, 16  ;;  %v468_v38 = vshll.u32 %v4397_v4, 16 }
  0x25   : > { %v4436_v25 = vrot.slane %v3255_v14, %v4352_v49  ;;  %v682_v42 = vshrl.u32 %v4407_v9, 16  ;;  %v474_v61 = vrot.slane %v4375_v58, 1  ;;  %v476_v58 = vrot.slane %v4382_v62, 1 }
  0x26   : > { %1372 = vmatpush1.bf16.msra.mxu0 %v3728_v26  ;;  %v436_v26 = vor.u32 %v435_v15, %v431_v6  ;;  %v3780_v6 = vld [vmem:[%s5308_s3 + $0x484] ss:$8 sps:$4 sm:$0xff]   ;;  %v477_v14 = vrot.slane %v4384_v63, 1  ;;  %v478_v15 = vrot.slane %v4389_v1, 1 }
  0x27   : > { %1415 = vmatpush1.bf16.msra.mxu1 %v3729_v27  ;;  %1373 = vmatprep.subr.bf16.mxu0 %v3730_v28  ;;  %v449_v27 = vrot.slane %v447_v17, 1  ;;  %v454_v28 = vshll.u32 %v4384_v63, 16  ;;  %v3794_v63 = vld [vmem:[%s5308_s3 + $0x574] ss:$8 sps:$4 sm:$0xff]  }
  0x28   : > { %1416 = vmatprep.subr.bf16.mxu1 %v3732_v29  ;;  %v3771_v29 = vld [vmem:[%s5308_s3 + $0x4a0] ss:$8 sps:$4 sm:$0xff]  }
  0x29   : > { %v450_v36 = vor.u32 %v449_v27, %v445_v16  ;;  %v456_v37 = vrot.slane %v454_v28, 1  ;;  %v851_v28 = vcombine.low %v4429_v21, %v4436_v25 }
  0x2a   : > { %1374 = vmatpush1.bf16.msra.mxu0 %v3734_v30  ;;  %v443_v30 = vor.u32 %v442_v22, %v438_v11 }
  0x2b   : > { %1417 = vmatpush1.bf16.msra.mxu1 %v3735_v31  ;;  %1375 = vmatprep.subr.bf16.mxu0 %v3736_v32  ;;  %v459_v31 = vshrl.u32 %v4389_v1, 16  ;;  %v461_v32 = vshll.u32 %v4389_v1, 16  ;;  %v3797_v1 = vld [vmem:[%s5308_s3 + $0x74] ss:$8 sps:$4 sm:$0xff]  }
  0x2c   : > { %1418 = vmatprep.subr.bf16.mxu1 %v3738_v33  ;;  %v466_v33 = vshrl.u32 %v4397_v4, 16 }
  0x2e   : > { %1376 = vmatpush2.bf16.msra.mxu0 %v3740_v34  ;;  %v3772_v34 = vld [vmem:[%s5308_s3 + $0x394] ss:$8 sps:$4 sm:$0xff]  }
  0x2f   : > { %1419 = vmatpush2.bf16.msra.mxu1 %v3741_v35  ;;  %1377 = vmatprep.subr.bf16.mxu0 %v3742_v39  ;;  %v852_v35 = vcombine.high %v4429_v21, %v4436_v25  ;;  %v3774_v39 = vld [vmem:[%s5308_s3 + $0x494] ss:$8 sps:$4 sm:$0xff]  }
  0x30   : > { %1420 = vmatprep.subr.bf16.mxu1 %v3744_v40  ;;  %v463_v40 = vrot.slane %v461_v32, 1  ;;  %v3792_v32 = vld [vmem:[%s5308_s3 + $0x570] ss:$8 sps:$4 sm:$0xff]  }
  0x31   : > { %1391 = vmatprep.mubr.bf16.mxu0 %v852_v35 }
  0x32   : > { %1378 = vmatpush2.bf16.msra.mxu0 %v3746_v41  ;;  %v506_v41 = vcombine.low %v436_v26, %v443_v30  ;;  %v696_v30 = vrot.slane %v4426_v20, 1 }
  0x33   : > { %1421 = vmatpush2.bf16.msra.mxu1 %v3747_v44  ;;  %1379 = vmatprep.subr.bf16.mxu0 %v3748_v45  ;;  %v684_v44 = vshll.u32 %v4407_v9, 16  ;;  %v457_v45 = vor.u32 %v456_v37, %v452_v23  ;;  %v547_v23 = vcombine.low %v476_v58, %v477_v14  ;;  %v3830_v58 = vld [vmem:[%s5308_s3 + $0x514] ss:$8 sps:$4 sm:$0xff]   ;;  %v3825_v14 = vld [vmem:[%s5308_s3 + $0x20] ss:$8 sps:$4 sm:$0xff]  }
  0x34   : > { %1422 = vmatprep.subr.bf16.mxu1 %v3750_v46  ;;  %v470_v46 = vrot.slane %v468_v38, 1 }
  0x35   : > { %v531_v56 = vcombine.low %v450_v36, %v457_v45  ;;  %v3795_v36 = vld [vmem:[%s5308_s3 + $0x70] ss:$8 sps:$4 sm:$0xff]  }
  0x36   : > { %1380 = vmatpush2.bf16.msra.mxu0 %v3752_v47  ;;  %v689_v47 = vshrl.u32 %v4426_v20, 16 }
  0x37   : > { %1423 = vmatpush2.bf16.msra.mxu1 %v3753_v48  ;;  %1381 = vmatprep.subr.bf16.mxu0 %v3754_v50  ;;  %v691_v48 = vshll.u32 %v4426_v20, 16  ;;  %v3776_v50 = vld [vmem:[%s5308_s3 + $0x390] ss:$8 sps:$4 sm:$0xff]   ;;  %v4476_v10 = vrot.slane %v531_v56, %v4352_v49  ;;  %v3800_v20 = vld [vmem:[%s5308_s3 + $0x564] ss:$8 sps:$4 sm:$0xff]  }
  0x38   : > { %1424 = vmatprep.subr.bf16.mxu1 %v3756_v51  ;;  %v464_v51 = vor.u32 %v463_v40, %v459_v31  ;;  %v3798_v40 = vld [vmem:[%s5308_s3 + $0x560] ss:$8 sps:$4 sm:$0xff]   ;;  %v3815_v56 = vld [vmem:[%s5308_s3 + $0x44] ss:$8 sps:$4 sm:$0xff]  }
  0x39   : > { %v693_v57 = vrot.slane %v691_v48, 1  ;;  %v3804_v48 = vld [vmem:[%s5308_s3 + $0x550] ss:$8 sps:$4 sm:$0xff]  }
  0x3a   : > { %1382 = vmatpush2.bf16.msra.mxu0 %v3758_v52  ;;  %v4462_v52 = vrot.slane %v506_v41, %v4352_v49  ;;  %v3803_v41 = vld [vmem:[%s5308_s3 + $0x64] ss:$8 sps:$4 sm:$0xff]  }
  0x3b   : > { %1425 = vmatpush2.bf16.msra.mxu1 %v3759_v53  ;;  %1383 = vmatprep.subr.bf16.mxu0 %v3760_v55  ;;  %v686_v53 = vrot.slane %v684_v44, 1  ;;  %v471_v55 = vor.u32 %v470_v46, %v466_v33  ;;  %v694_v12 = vor.u32 %v693_v57, %v689_v47  ;;  %v3801_v46 = vld [vmem:[%s5308_s3 + $0x60] ss:$8 sps:$4 sm:$0xff]   ;;  %v3818_v57 = vld [vmem:[%s5308_s3 + $0x534] ss:$8 sps:$4 sm:$0xff]  }
  0x3c   : > { %1426 = vmatprep.subr.bf16.mxu1 %v3762_v0  ;;  %v3778_v0 = vld [vmem:[%s5308_s3 + $0x384] ss:$8 sps:$4 sm:$0xff]   ;;  %v3254_v62 = vcombine.low %v4462_v52, %v4476_v10 }
  0x3d   : > { %v687_v7 = vor.u32 %v686_v53, %v682_v42  ;;  %v556_v11 = vcombine.low %v464_v51, %v471_v55  ;;  %v3806_v42 = vld [vmem:[%s5308_s3 + $0x554] ss:$8 sps:$4 sm:$0xff]   ;;  %v3812_v51 = vld [vmem:[%s5308_s3 + $0x544] ss:$8 sps:$4 sm:$0xff]   ;;  %v3810_v55 = vld [vmem:[%s5308_s3 + $0x540] ss:$8 sps:$4 sm:$0xff]  }
  0x3e   : > { %1384 = vmatpush2.bf16.msra.mxu0 %v3764_v8  ;;  %v475_v8 = vrot.slane %v4377_v59, 1  ;;  %v3783_v59 = vld [vmem:[%s5308_s3 + $0x480] ss:$8 sps:$4 sm:$0xff]   ;;  %v836_v31 = vrot.slane %v3254_v62, %v4352_v49 }
  0x3f   : > { %1427 = vmatpush2.bf16.msra.mxu1 %v3765_v13  ;;  %1385 = vmatprep.subr.bf16.mxu0 %v3766_v18  ;;  %v3782_v13 = vld [vmem:[%s5308_s3 + $0x380] ss:$8 sps:$4 sm:$0xff]   ;;  %v4488_v17 = vrot.slane %v556_v11, %v4352_v49  ;;  %v698_v18 = vcombine.low %v687_v7, %v694_v12  ;;  %v3824_v7 = vld [vmem:[%s5308_s3 + $0x524] ss:$8 sps:$4 sm:$0xff]  }
  0x40   : > { %1428 = vmatprep.subr.bf16.mxu1 %v3768_v19  ;;  %v522_v16 = vcombine.low %v474_v61, %v475_v8  ;;  %v479_v19 = vrot.slane %v4397_v4, 1  ;;  %v3813_v61 = vld [vmem:[%s5308_s3 + $0x40] ss:$8 sps:$4 sm:$0xff]   ;;  %v3819_v8 = vld [vmem:[%s5308_s3 + $0x30] ss:$8 sps:$4 sm:$0xff]  }
  0x41   : > { %v4504_v26 = vrot.slane %v698_v18, %v4352_v49  ;;  %v3356_v4 = vcombine.low %v4476_v10, %v4488_v17  ;;  %v3822_v11 = vld [vmem:[%s5308_s3 + $0x520] ss:$8 sps:$4 sm:$0xff]   ;;  %v3827_v12 = vld [vmem:[%s5308_s3 + $0x24] ss:$8 sps:$4 sm:$0xff]   ;;  %v3890_v10 = vld [vmem:[%s5308_s3 + $0x170] ss:$8 sps:$4 sm:$0xff]  }
  0x42   : > { %1386 = vmatpush2.bf16.msra.mxu0 %v3770_v24  ;;  %v4500_v22 = vrot.slane %v522_v16, %v4352_v49  ;;  %v695_v24 = vrot.slane %v4407_v9, 1  ;;  %v572_v27 = vcombine.low %v478_v15, %v479_v19  ;;  %v3828_v15 = vld [vmem:[%s5308_s3 + $0x510] ss:$8 sps:$4 sm:$0xff]   ;;  %v390_v16 = vld [vmem:[%s4349_s30] sm:$0x77] }
  0x43   : > { %1429 = vmatpush2.bf16.msra.mxu1 %v3771_v29  ;;  %1387 = vmatprep.subr.bf16.mxu0 %v3772_v34  ;;  %v4511_v29 = vrot.slane %v547_v23, %v4352_v49  ;;  %v3256_v9 = vcombine.low %v4488_v17, %v4504_v26  ;;  %v3831_v19 = vld [vmem:[%s5308_s3 + $0x10] ss:$8 sps:$4 sm:$0xff]   ;;  %v3895_v17 = vld [vmem:[%s5308_s3 + $0x274] ss:$8 sps:$4 sm:$0xff]  }
  0x44   : > { %1430 = vmatprep.subr.bf16.mxu1 %v3774_v39  ;;  %v4521_v33 = vrot.slane %v572_v27, %v4352_v49  ;;  %v714_v21 = vcombine.low %v695_v24, %v696_v30  ;;  %v3837_v27 = vld [vmem:[%s5308_s3] ss:$8 sps:$4 sm:$0xff]   ;;  %v3845_v30 = vld [vmem:[%s5308_s3 + $0xf4] ss:$8 sps:$4 sm:$0xff]  }
  0x45   : > { %v855_v25 = vcombine.low %v4500_v22, %v4511_v29  ;;  %v850_v34 = vrot.slane %v3256_v9, %v4352_v49  ;;  %v3848_v9 = vld [vmem:[%s5308_s3 + $0x5e4] ss:$8 sps:$4 sm:$0xff]  }
  0x46   : > { %1388 = vmatpush2.bf16.msra.mxu0 %v3776_v50  ;;  %v1525_v35 = vcombine.low %v4511_v29, %v4521_v33  ;;  %v4535_v37 = vrot.slane %v714_v21, %v4352_v49  ;;  %v3809_v50 = vld [vmem:[%s5308_s3 + $0x54] ss:$8 sps:$4 sm:$0xff]   ;;  %v3846_v21 = vld [vmem:[%s5308_s3 + $0x5e0] ss:$8 sps:$4 sm:$0xff]   ;;  %v3901_v29 = vld [vmem:[%s5308_s3 + $0x264] ss:$8 sps:$4 sm:$0xff]  }
  0x47   : > { %1431 = vmatpush2.bf16.msra.mxu1 %v3777_v54  ;;  %1389 = vmatprep.subr.bf16.mxu0 %v3778_v0  ;;  %v854_v38 = vcombine.high %v836_v31, %v850_v34  ;;  %v853_v39 = vcombine.low %v836_v31, %v850_v34  ;;  %v4549_v45 = vrot.slane %v855_v25, %v4352_v49  ;;  %v3807_v54 = vld [vmem:[%s5308_s3 + $0x50] ss:$8 sps:$4 sm:$0xff]   ;;  %v3851_v25 = vld [vmem:[%s5308_s3 + $0xe4] ss:$8 sps:$4 sm:$0xff]   ;;  %v3854_v34 = vld [vmem:[%s5308_s3 + $0x5d4] ss:$8 sps:$4 sm:$0xff]  }
  0x48   : > { %1432 = vmatprep.subr.bf16.mxu1 %v3780_v6  ;;  %v856_v44 = vcombine.low %v4521_v33, %v4535_v37  ;;  %v3816_v0 = vld [vmem:[%s5308_s3 + $0x530] ss:$8 sps:$4 sm:$0xff]   ;;  %v3821_v6 = vld [vmem:[%s5308_s3 + $0x34] ss:$8 sps:$4 sm:$0xff]   ;;  %v3147_v31 = vcombine.low %v390_v16, %v390_v16 }
  0x49   : > { %1434 = vmatprep.mubr.bf16.mxu1 %v854_v38  ;;  %v3904_v33 = vld [vmem:[%s5308_s3 + $0x154] ss:$8 sps:$4 sm:$0xff]  }
  0x4a   : > { %1390 = vmatpush2.bf16.msra.mxu0 %v3782_v13  ;;  %v4555_v47 = vrot.slane %v856_v44, %v4352_v49  ;;  %v3355_v13 = vcombine.low %v4392_v2, %v4395_v3  ;;  %v3836_v2 = vld [vmem:[%s5308_s3 + $0x504] ss:$8 sps:$4 sm:$0xff]   ;;  %v488_v3 = vrot.slane %v390_v16, %v4352_v49  ;;  %v417_v44 = vshrl.u32 %v3147_v31, 16 }
  0x4b   : > { %1433 = vmatpush2.bf16.msra.mxu1 %v3783_v59  ;;  %1445 = vmatprep.subr.bf16.mxu0 %v3794_v63  ;;  %v3833_v59 = vld [vmem:[%s5308_s3 + $0x14] ss:$8 sps:$4 sm:$0xff]   ;;  %v3834_v63 = vld [vmem:[%s5308_s3 + $0x500] ss:$8 sps:$4 sm:$0xff]  }
  0x4c   : > { %2028 = vmatprep.subr.bf16.mxu1 %v3797_v1  ;;  %v872_v53 = vcombine.high %v4549_v45, %v4555_v47  ;;  %v4621_v18 = vrot.slane %v3355_v13, %v4352_v49  ;;  %v3353_v62 = vcombine.low %v488_v3, %v4380_v60  ;;  %v3839_v1 = vld [vmem:[%s5308_s3 + $0x4] ss:$8 sps:$4 sm:$0xff]   ;;  %v3842_v60 = vld [vmem:[%s5308_s3 + $0x5f4] ss:$8 sps:$4 sm:$0xff]   ;;  %v3870_v13 = vld [vmem:[%s5308_s3 + $0x5a0] ss:$8 sps:$4 sm:$0xff]  }
  0x4d   : > { %1392 = vmatmul.mubr.bf16.vlgmr.msra.gmra.mxu0 %v851_v28  ;;  %v3840_v28 = vld [vmem:[%s5308_s3 + $0x5f0] ss:$8 sps:$4 sm:$0xff]  }
  0x4e   : > { %1446 = vmatpush1.bf16.msra.mxu0 %v3792_v32  ;;  %1435 = vmatmul.mubr.bf16.vlgmr.msra.gmra.mxu1 %v853_v39  ;;  %v4637_v23 = vrot.slane %v3353_v62, %v4352_v49  ;;  %v3148_v32 = vcombine.high %v390_v16, %v390_v16  ;;  %v3849_v39 = vld [vmem:[%s5308_s3 + $0xe0] ss:$8 sps:$4 sm:$0xff]   ;;  %v3876_v3 = vld [vmem:[%s5308_s3 + $0x590] ss:$8 sps:$4 sm:$0xff]   ;;  %v3881_v62 = vld [vmem:[%s5308_s3 + $0x94] ss:$8 sps:$4 sm:$0xff]  }
  0x4f   : > { %1447 = vmatprep.subr.bf16.mxu0 %v3800_v20  ;;  %2029 = vmatpush1.bf16.msra.mxu1 %v3795_v36  ;;  %v3843_v20 = vld [vmem:[%s5308_s3 + $0xf0] ss:$8 sps:$4 sm:$0xff]   ;;  %v419_v36 = vshll.u32 %v3147_v31, 16 }
  0x50   : > { %2030 = vmatprep.subr.bf16.mxu1 %v3803_v41  ;;  %1477 = vmatprep.mubr.bf16.mxu0 %v872_v53  ;;  %v1521_v24 = vcombine.high %v4637_v23, %v4621_v18  ;;  %v426_v38 = vshll.u32 %v3148_v32, 16  ;;  %v3857_v41 = vld [vmem:[%s5308_s3 + $0xd4] ss:$8 sps:$4 sm:$0xff]   ;;  %v3858_v53 = vld [vmem:[%s5308_s3 + $0x5c0] ss:$8 sps:$4 sm:$0xff]  }
  0x52   : > { %1448 = vmatpush1.bf16.msra.mxu0 %v3798_v40  ;;  %2060 = vmatprep.mubr.bf16.mxu1 %v1521_v24  ;;  %v3852_v40 = vld [vmem:[%s5308_s3 + $0x5d0] ss:$8 sps:$4 sm:$0xff]   ;;  %v3882_v24 = vld [vmem:[%s5308_s3 + $0x580] ss:$8 sps:$4 sm:$0xff]  }
  0x53   : > { %1449 = vmatprep.subr.bf16.mxu0 %v3806_v42  ;;  %2031 = vmatpush1.bf16.msra.mxu1 %v3801_v46  ;;  %v3860_v42 = vld [vmem:[%s5308_s3 + $0x5c4] ss:$8 sps:$4 sm:$0xff]   ;;  %v421_v46 = vrot.slane %v419_v36, 1  ;;  %v3907_v36 = vld [vmem:[%s5308_s3 + $0x254] ss:$8 sps:$4 sm:$0xff]  }
  0x54   : > { %2032 = vmatprep.subr.bf16.mxu1 %v3809_v50  ;;  %v428_v50 = vrot.slane %v426_v38, 1  ;;  %v3910_v38 = vld [vmem:[%s5308_s3 + $0x144] ss:$8 sps:$4 sm:$0xff]  }
  0x56   : > { %1450 = vmatpush1.bf16.msra.mxu0 %v3804_v48  ;;  %v424_v48 = vshrl.u32 %v3148_v32, 16 }
  0x57   : > { %1451 = vmatprep.subr.bf16.mxu0 %v3812_v51  ;;  %2033 = vmatpush1.bf16.msra.mxu1 %v3807_v54  ;;  %v3855_v51 = vld [vmem:[%s5308_s3 + $0xd0] ss:$8 sps:$4 sm:$0xff]   ;;  %v3863_v54 = vld [vmem:[%s5308_s3 + $0xc4] ss:$8 sps:$4 sm:$0xff]  }
  0x58   : > { %2034 = vmatprep.subr.bf16.mxu1 %v3815_v56  ;;  %v422_v56 = vor.u32 %v421_v46, %v417_v44  ;;  %v3911_v44 = vld [vmem:[%s5308_s3 + $0x240] ss:$8 sps:$4 sm:$0xff]   ;;  %v3914_v46 = vld [vmem:[%s5308_s3 + $0x130] ss:$8 sps:$4 sm:$0xff]  }
  0x5a   : > { %1452 = vmatpush1.bf16.msra.mxu0 %v3810_v55  ;;  %v3866_v55 = vld [vmem:[%s5308_s3 + $0x5b4] ss:$8 sps:$4 sm:$0xff]  }
  0x5b   : > { %1453 = vmatprep.subr.bf16.mxu0 %v3818_v57  ;;  %2035 = vmatpush1.bf16.msra.mxu1 %v3813_v61  ;;  %v429_v57 = vor.u32 %v428_v50, %v424_v48  ;;  %v3861_v61 = vld [vmem:[%s5308_s3 + $0xc0] ss:$8 sps:$4 sm:$0xff]   ;;  %v3919_v48 = vld [vmem:[%s5308_s3 + $0x234] ss:$8 sps:$4 sm:$0xff]   ;;  %v3922_v50 = vld [vmem:[%s5308_s3 + $0x124] ss:$8 sps:$4 sm:$0xff]  }
  0x5c   : > { %2036 = vmatprep.subr.bf16.mxu1 %v3821_v6  ;;  %v3869_v6 = vld [vmem:[%s5308_s3 + $0xb4] ss:$8 sps:$4 sm:$0xff]  }
  0x5e   : > { %1454 = vmatpush1.bf16.msra.mxu0 %v3816_v0  ;;  %v3864_v0 = vld [vmem:[%s5308_s3 + $0x5b0] ss:$8 sps:$4 sm:$0xff]  }
  0x5f   : > { %1455 = vmatprep.subr.bf16.mxu0 %v3824_v7  ;;  %2037 = vmatpush1.bf16.msra.mxu1 %v3819_v8  ;;  %v3872_v7 = vld [vmem:[%s5308_s3 + $0x5a4] ss:$8 sps:$4 sm:$0xff]   ;;  %v481_v8 = vcombine.low %v422_v56, %v429_v57  ;;  %v3923_v56 = vld [vmem:[%s5308_s3 + $0x220] ss:$8 sps:$4 sm:$0xff]   ;;  %v3926_v57 = vld [vmem:[%s5308_s3 + $0x110] ss:$8 sps:$4 sm:$0xff]  }
  0x60   : > { %2038 = vmatprep.subr.bf16.mxu1 %v3827_v12  ;;  %v473_v12 = vrot.slane %v3148_v32, 1  ;;  %v3885_v32 = vld [vmem:[%s5308_s3 + $0x80] ss:$8 sps:$4 sm:$0xff]  }
  0x61   : > { %v495_v16 = vrot.slane %v481_v8, %v4352_v49  ;;  %v3937_v8 = vld [vmem:[%s5308_s3 + $0x204] ss:$8 sps:$4 sm:$0xff]  }
  0x62   : > { %1456 = vmatpush1.bf16.msra.mxu0 %v3822_v11  ;;  %v472_v11 = vrot.slane %v3147_v31, 1  ;;  %v871_v31 = vcombine.low %v4549_v45, %v4555_v47  ;;  %v4773_v47 = vrot.slane %v1525_v35, %v4352_v49 }
  0x63   : > { %1457 = vmatprep.subr.bf16.mxu0 %v3830_v58  ;;  %2039 = vmatpush1.bf16.msra.mxu1 %v3825_v14  ;;  %v3867_v58 = vld [vmem:[%s5308_s3 + $0xb0] ss:$8 sps:$4 sm:$0xff]   ;;  %v3875_v14 = vld [vmem:[%s5308_s3 + $0xa4] ss:$8 sps:$4 sm:$0xff]  }
  0x64   : > { %2040 = vmatprep.subr.bf16.mxu1 %v3833_v59  ;;  %v497_v59 = vcombine.low %v472_v11, %v473_v12  ;;  %v3940_v11 = vld [vmem:[%s5308_s3 + $0x1f4] ss:$8 sps:$4 sm:$0xff]   ;;  %v3935_v12 = vld [vmem:[%s5308_s3 + $0x200] ss:$8 sps:$4 sm:$0xff]  }
  0x66   : > { %1458 = vmatpush1.bf16.msra.mxu0 %v3828_v15  ;;  %v3878_v15 = vld [vmem:[%s5308_s3 + $0x594] ss:$8 sps:$4 sm:$0xff]  }
  0x67   : > { %1459 = vmatprep.subr.bf16.mxu0 %v3836_v2  ;;  %2041 = vmatpush1.bf16.msra.mxu1 %v3831_v19  ;;  %v3873_v2 = vld [vmem:[%s5308_s3 + $0xa0] ss:$8 sps:$4 sm:$0xff]   ;;  %v3884_v19 = vld [vmem:[%s5308_s3 + $0x584] ss:$8 sps:$4 sm:$0xff]  }
  0x68   : > { %2042 = vmatprep.subr.bf16.mxu1 %v3839_v1  ;;  %v504_v1 = vrot.slane %v497_v59, %v4352_v49  ;;  %v3949_v59 = vld [vmem:[%s5308_s3 + $0x2e4] ss:$8 sps:$4 sm:$0xff]  }
  0x6a   : > { %1460 = vmatpush1.bf16.msra.mxu0 %v3834_v63  ;;  %v3354_v63 = vcombine.low %v495_v16, %v4462_v52  ;;  %v3892_v52 = vld [vmem:[%s5308_s3 + $0x174] ss:$8 sps:$4 sm:$0xff]   ;;  %v3944_v16 = vld [vmem:[%s5308_s3 + $0x1e0] ss:$8 sps:$4 sm:$0xff]  }
  0x6b   : > { %1461 = vmatprep.subr.bf16.mxu0 %v3842_v60  ;;  %2043 = vmatpush1.bf16.msra.mxu1 %v3837_v27  ;;  %v3879_v60 = vld [vmem:[%s5308_s3 + $0x90] ss:$8 sps:$4 sm:$0xff]   ;;  %v3887_v27 = vld [vmem:[%s5308_s3 + $0x84] ss:$8 sps:$4 sm:$0xff]  }
  0x6c   : > { %2044 = vmatprep.subr.bf16.mxu1 %v3845_v30  ;;  %v4747_v30 = vrot.slane %v3354_v63, %v4352_v49  ;;  %v3958_v63 = vld [vmem:[%s5308_s3 + $0x1c4] ss:$8 sps:$4 sm:$0xff]  }
  0x6e   : > { %1462 = vmatpush2.bf16.msra.mxu0 %v3840_v28  ;;  %v4744_v28 = vrot.slane %v3356_v4, %v4352_v49 }
  0x6f   : > { %1463 = vmatprep.subr.bf16.mxu0 %v3848_v9  ;;  %2045 = vmatpush2.bf16.msra.mxu1 %v3843_v20  ;;  %v1524_v9 = vcombine.low %v504_v1, %v4500_v22  ;;  %v3898_v22 = vld [vmem:[%s5308_s3 + $0x164] ss:$8 sps:$4 sm:$0xff]   ;;  %v1520_v20 = vcombine.low %v4637_v23, %v4621_v18  ;;  %v3899_v23 = vld [vmem:[%s5308_s3 + $0x260] ss:$8 sps:$4 sm:$0xff]   ;;  %v3953_v1 = vld [vmem:[%s5308_s3 + $0x2d0] ss:$8 sps:$4 sm:$0xff]  }
  0x70   : > { %2046 = vmatprep.subr.bf16.mxu1 %v3851_v25  ;;  %v1523_v4 = vcombine.high %v4747_v30, %v4744_v28  ;;  %v3896_v25 = vld [vmem:[%s5308_s3 + $0x160] ss:$8 sps:$4 sm:$0xff]  }
  0x71   : > { %v4767_v45 = vrot.slane %v1524_v9, %v4352_v49  ;;  %v3959_v9 = vld [vmem:[%s5308_s3 + $0x2c0] ss:$8 sps:$4 sm:$0xff]  }
  0x72   : > { %1464 = vmatpush2.bf16.msra.mxu0 %v3846_v21  ;;  %v3893_v21 = vld [vmem:[%s5308_s3 + $0x270] ss:$8 sps:$4 sm:$0xff]  }
  0x73   : > { %1465 = vmatprep.subr.bf16.mxu0 %v3854_v34  ;;  %2047 = vmatpush2.bf16.msra.mxu1 %v3849_v39  ;;  %v1541_v35 = vcombine.high %v4767_v45, %v4773_v47  ;;  %v3902_v34 = vld [vmem:[%s5308_s3 + $0x150] ss:$8 sps:$4 sm:$0xff]  }
  0x74   : > { %2048 = vmatprep.subr.bf16.mxu1 %v3857_v41  ;;  %v3905_v39 = vld [vmem:[%s5308_s3 + $0x250] ss:$8 sps:$4 sm:$0xff]   ;;  %v3913_v41 = vld [vmem:[%s5308_s3 + $0x244] ss:$8 sps:$4 sm:$0xff]  }
  0x76   : > { %1466 = vmatpush2.bf16.msra.mxu0 %v3852_v40  ;;  %v3908_v40 = vld [vmem:[%s5308_s3 + $0x140] ss:$8 sps:$4 sm:$0xff]  }
  0x77   : > { %1467 = vmatprep.subr.bf16.mxu0 %v3860_v42  ;;  %2049 = vmatpush2.bf16.msra.mxu1 %v3855_v51  ;;  %v3916_v42 = vld [vmem:[%s5308_s3 + $0x134] ss:$8 sps:$4 sm:$0xff]   ;;  %v3917_v51 = vld [vmem:[%s5308_s3 + $0x230] ss:$8 sps:$4 sm:$0xff]  }
  0x78   : > { %2050 = vmatprep.subr.bf16.mxu1 %v3863_v54  ;;  %v3925_v54 = vld [vmem:[%s5308_s3 + $0x224] ss:$8 sps:$4 sm:$0xff]  }
  0x7a   : > { %1468 = vmatpush2.bf16.msra.mxu0 %v3858_v53  ;;  %v3920_v53 = vld [vmem:[%s5308_s3 + $0x120] ss:$8 sps:$4 sm:$0xff]  }
  0x7b   : > { %1469 = vmatprep.subr.bf16.mxu0 %v3866_v55  ;;  %2051 = vmatpush2.bf16.msra.mxu1 %v3861_v61  ;;  %v3928_v55 = vld [vmem:[%s5308_s3 + $0x114] ss:$8 sps:$4 sm:$0xff]  }
  0x7c   : > { %2052 = vmatprep.subr.bf16.mxu1 %v3869_v6  ;;  %v3931_v61 = vld [vmem:[%s5308_s3 + $0x214] ss:$8 sps:$4 sm:$0xff]   ;;  %v3929_v6 = vld [vmem:[%s5308_s3 + $0x210] ss:$8 sps:$4 sm:$0xff]  }
  0x7e   : > { %1470 = vmatpush2.bf16.msra.mxu0 %v3864_v0  ;;  %v3934_v0 = vld [vmem:[%s5308_s3 + $0x104] ss:$8 sps:$4 sm:$0xff]  }
  0x7f   : > { %1471 = vmatprep.subr.bf16.mxu0 %v3872_v7  ;;  %2053 = vmatpush2.bf16.msra.mxu1 %v3867_v58  ;;  %v3932_v7 = vld [vmem:[%s5308_s3 + $0x100] ss:$8 sps:$4 sm:$0xff]   ;;  %v3938_v58 = vld [vmem:[%s5308_s3 + $0x1f0] ss:$8 sps:$4 sm:$0xff]  }
  0x80   : > { %2054 = vmatprep.subr.bf16.mxu1 %v3875_v14  ;;  %v3946_v14 = vld [vmem:[%s5308_s3 + $0x1e4] ss:$8 sps:$4 sm:$0xff]  }
  0x82   : > { %1472 = vmatpush2.bf16.msra.mxu0 %v3870_v13  ;;  %v3943_v13 = vld [vmem:[%s5308_s3 + $0x2f4] ss:$8 sps:$4 sm:$0xff]  }
  0x83   : > { %1473 = vmatprep.subr.bf16.mxu0 %v3878_v15  ;;  %2055 = vmatpush2.bf16.msra.mxu1 %v3873_v2  ;;  %v3941_v15 = vld [vmem:[%s5308_s3 + $0x2f0] ss:$8 sps:$4 sm:$0xff]   ;;  %v3952_v2 = vld [vmem:[%s5308_s3 + $0x1d4] ss:$8 sps:$4 sm:$0xff]  }
  0x84   : > { %2056 = vmatprep.subr.bf16.mxu1 %v3881_v62  ;;  %v3950_v62 = vld [vmem:[%s5308_s3 + $0x1d0] ss:$8 sps:$4 sm:$0xff]  }
  0x86   : > { %1474 = vmatpush2.bf16.msra.mxu0 %v3876_v3  ;;  %v3947_v3 = vld [vmem:[%s5308_s3 + $0x2e0] ss:$8 sps:$4 sm:$0xff]  }
  0x87   : > { %1475 = vmatprep.subr.bf16.mxu0 %v3884_v19  ;;  %2057 = vmatpush2.bf16.msra.mxu1 %v3879_v60  ;;  %v3955_v19 = vld [vmem:[%s5308_s3 + $0x2d4] ss:$8 sps:$4 sm:$0xff]   ;;  %v3956_v60 = vld [vmem:[%s5308_s3 + $0x1c0] ss:$8 sps:$4 sm:$0xff]  }
  0x88   : > { %2058 = vmatprep.subr.bf16.mxu1 %v3887_v27  ;;  %v3964_v27 = vld [vmem:[%s5308_s3 + $0x1b4] ss:$8 sps:$4 sm:$0xff]  }
  0x8a   : > { %1476 = vmatpush2.bf16.msra.mxu0 %v3882_v24  ;;  %v3961_v24 = vld [vmem:[%s5308_s3 + $0x2c4] ss:$8 sps:$4 sm:$0xff]  }
  0x8b   : > { %2071 = vmatprep.subr.bf16.mxu0 %v3892_v52  ;;  %2059 = vmatpush2.bf16.msra.mxu1 %v3885_v32  ;;  %v395_v52 = vld [vmem:[%s376_s13] sm:$0x77] }
  0x8c   : > { %2114 = vmatprep.subr.bf16.mxu1 %v3895_v17  ;;  %v3453_v32 = vcombine.low %v395_v52, %v395_v52  ;;  %v3967_v17 = vld [vmem:[%s5308_s3 + $0x2b4] ss:$8 sps:$4 sm:$0xff]  }
  0x8d   : > { %1478 = vmatmul.mubr.bf16.vlgmr.msra.gmra.mxu0 %v871_v31  ;;  %v3962_v31 = vld [vmem:[%s5308_s3 + $0x1b0] ss:$8 sps:$4 sm:$0xff]  }
  0x8e   : > { %2072 = vmatpush1.bf16.msra.mxu0 %v3890_v10  ;;  %2103 = vmatprep.mubr.bf16.mxu0 %v1523_v4  ;;  %v3454_v10 = vcombine.high %v395_v52, %v395_v52  ;;  %v2163_v4 = vshrl.u32 %v3453_v32, 16 }
  0x8f   : > { %2073 = vmatprep.subr.bf16.mxu0 %v3898_v22  ;;  %2061 = vmatmul.mubr.bf16.vlgmr.msra.gmra.mxu1 %v1520_v20  ;;  %v3970_v22 = vld [vmem:[%s5308_s3 + $0x1a4] ss:$8 sps:$4 sm:$0xff]   ;;  %v2165_v20 = vshll.u32 %v3453_v32, 16 }
  0x90   : > { %2115 = vmatpush1.bf16.msra.mxu1 %v3893_v21  ;;  %2146 = vmatprep.mubr.bf16.mxu1 %v1541_v35  ;;  %v2170_v21 = vshrl.u32 %v3454_v10, 16  ;;  %v3968_v35 = vld [vmem:[%s5308_s3 + $0x1a0] ss:$8 sps:$4 sm:$0xff]  }
  0x91   : > { %2116 = vmatprep.subr.bf16.mxu1 %v3901_v29  ;;  %v3965_v29 = vld [vmem:[%s5308_s3 + $0x2b0] ss:$8 sps:$4 sm:$0xff]  }
  0x92   : > { %2074 = vmatpush1.bf16.msra.mxu0 %v3896_v25  ;;  %v2172_v25 = vshll.u32 %v3454_v10, 16 }
  0x93   : > { %2075 = vmatprep.subr.bf16.mxu0 %v3904_v33  ;;  %v2167_v33 = vrot.slane %v2165_v20, 1  ;;  %v4022_v20 = vld [vmem:[%s5308_s3 + $0x610] ss:$8 sps:$4 sm:$0xff]  }
  0x94   : > { %2117 = vmatpush1.bf16.msra.mxu1 %v3899_v23  ;;  %v3973_v23 = vld [vmem:[%s5308_s3 + $0x2a4] ss:$8 sps:$4 sm:$0xff]  }
  0x95   : > { %2118 = vmatprep.subr.bf16.mxu1 %v3907_v36  ;;  %v3976_v36 = vld [vmem:[%s5308_s3 + $0x194] ss:$8 sps:$4 sm:$0xff]  }
  0x96   : > { %2076 = vmatpush1.bf16.msra.mxu0 %v3902_v34  ;;  %v2174_v34 = vrot.slane %v2172_v25, 1  ;;  %v4030_v25 = vld [vmem:[%s5308_s3 + $0x604] ss:$8 sps:$4 sm:$0xff]  }
  0x97   : > { %2077 = vmatprep.subr.bf16.mxu0 %v3910_v38  ;;  %v2168_v38 = vor.u32 %v2167_v33, %v2163_v4  ;;  %v4019_v4 = vld [vmem:[%s5308_s3 + $0x720] ss:$8 sps:$4 sm:$0xff]  }
  0x98   : > { %2119 = vmatpush1.bf16.msra.mxu1 %v3905_v39  ;;  %v2186_v39 = vrot.slane %v395_v52, %v4352_v49  ;;  %v4010_v52 = vld [vmem:[%s5308_s3 + $0x630] ss:$8 sps:$4 sm:$0xff]   ;;  %v4028_v33 = vld [vmem:[%s5308_s3 + $0x600] ss:$8 sps:$4 sm:$0xff]  }
  0x99   : > { %2120 = vmatprep.subr.bf16.mxu1 %v3913_v41  ;;  %v3971_v41 = vld [vmem:[%s5308_s3 + $0x2a0] ss:$8 sps:$4 sm:$0xff]  }
  0x9a   : > { %2078 = vmatpush1.bf16.msra.mxu0 %v3908_v40  ;;  %v2175_v40 = vor.u32 %v2174_v34, %v2170_v21  ;;  %v4027_v21 = vld [vmem:[%s5308_s3 + $0x714] ss:$8 sps:$4 sm:$0xff]   ;;  %v4031_v34 = vld [vmem:[%s5308_s3 + $0x700] ss:$8 sps:$4 sm:$0xff]  }
  0x9b   : > { %2079 = vmatprep.subr.bf16.mxu0 %v3916_v42  ;;  %v3974_v42 = vld [vmem:[%s5308_s3 + $0x190] ss:$8 sps:$4 sm:$0xff]  }
  0x9c   : > { %2121 = vmatpush1.bf16.msra.mxu1 %v3911_v44  ;;  %v3979_v44 = vld [vmem:[%s5308_s3 + $0x294] ss:$8 sps:$4 sm:$0xff]  }
  0x9d   : > { %2122 = vmatprep.subr.bf16.mxu1 %v3919_v48  ;;  %v3982_v48 = vld [vmem:[%s5308_s3 + $0x184] ss:$8 sps:$4 sm:$0xff]  }
  0x9e   : > { %2080 = vmatpush1.bf16.msra.mxu0 %v3914_v46  ;;  %v2179_v46 = vcombine.low %v2168_v38, %v2175_v40  ;;  %v4039_v38 = vld [vmem:[%s5308_s3 + $0x7f4] ss:$8 sps:$4 sm:$0xff]   ;;  %v4037_v40 = vld [vmem:[%s5308_s3 + $0x7f0] ss:$8 sps:$4 sm:$0xff]  }
  0x9f   : > { %2081 = vmatprep.subr.bf16.mxu0 %v3922_v50  ;;  %v3551_v50 = vcombine.low %v4400_v5, %v2186_v39  ;;  %v3988_v5 = vld [vmem:[%s5308_s3 + $0x674] ss:$8 sps:$4 sm:$0xff]   ;;  %v4042_v39 = vld [vmem:[%s5308_s3 + $0x6e4] ss:$8 sps:$4 sm:$0xff]  }
  0xa0   : > { %2123 = vmatpush1.bf16.msra.mxu1 %v3917_v51  ;;  %v2193_v51 = vrot.slane %v2179_v46, %v4352_v49  ;;  %v4043_v46 = vld [vmem:[%s5308_s3 + $0x7e0] ss:$8 sps:$4 sm:$0xff]  }
  0xa1   : > { %2124 = vmatprep.subr.bf16.mxu1 %v3925_v54  ;;  %v2177_v54 = vrot.slane %v3454_v10, 1  ;;  %v4016_v10 = vld [vmem:[%s5308_s3 + $0x620] ss:$8 sps:$4 sm:$0xff]  }
  0xa2   : > { %2082 = vmatpush1.bf16.msra.mxu0 %v3920_v53  ;;  %v2176_v53 = vrot.slane %v3453_v32, 1  ;;  %v4013_v32 = vld [vmem:[%s5308_s3 + $0x730] ss:$8 sps:$4 sm:$0xff]  }
  0xa3   : > { %2083 = vmatprep.subr.bf16.mxu0 %v3928_v55  ;;  %v3977_v55 = vld [vmem:[%s5308_s3 + $0x290] ss:$8 sps:$4 sm:$0xff]  }
  0xa4   : > { %2125 = vmatpush1.bf16.msra.mxu1 %v3923_v56  ;;  %v3980_v56 = vld [vmem:[%s5308_s3 + $0x180] ss:$8 sps:$4 sm:$0xff]  }
  0xa5   : > { %2126 = vmatprep.subr.bf16.mxu1 %v3931_v61  ;;  %v4963_v61 = vcombine.low %v2176_v53, %v2177_v54  ;;  %v4049_v53 = vld [vmem:[%s5308_s3 + $0x7d0] ss:$8 sps:$4 sm:$0xff]   ;;  %v4052_v54 = vld [vmem:[%s5308_s3 + $0x6c0] ss:$8 sps:$4 sm:$0xff]  }
  0xa6   : > { %2084 = vmatpush1.bf16.msra.mxu0 %v3926_v57  ;;  %v3985_v57 = vld [vmem:[%s5308_s3 + $0x284] ss:$8 sps:$4 sm:$0xff]  }
  0xa7   : > { %2085 = vmatprep.subr.bf16.mxu0 %v3934_v0  ;;  %v4969_v0 = vrot.slane %v3551_v50, %v4352_v49  ;;  %v4051_v50 = vld [vmem:[%s5308_s3 + $0x7d4] ss:$8 sps:$4 sm:$0xff]  }
  0xa8   : > { %2127 = vmatpush1.bf16.msra.mxu1 %v3929_v6  ;;  %v3552_v6 = vcombine.low %v4504_v26, %v2193_v51  ;;  %v3994_v26 = vld [vmem:[%s5308_s3 + $0x664] ss:$8 sps:$4 sm:$0xff]  }
  0xa9   : > { %2128 = vmatprep.subr.bf16.mxu1 %v3937_v8  ;;  %v1522_v8 = vcombine.low %v4747_v30, %v4744_v28  ;;  %v4054_v51 = vld [vmem:[%s5308_s3 + $0x6c4] ss:$8 sps:$4 sm:$0xff]  }
  0xaa   : > { %2086 = vmatpush1.bf16.msra.mxu0 %v3932_v7  ;;  %v3983_v7 = vld [vmem:[%s5308_s3 + $0x280] ss:$8 sps:$4 sm:$0xff]   ;;  %v4989_v30 = vrot.slane %v3552_v6, %v4352_v49  ;;  %v4063_v6 = vld [vmem:[%s5308_s3 + $0x7b4] ss:$8 sps:$4 sm:$0xff]  }
  0xab   : > { %2087 = vmatprep.subr.bf16.mxu0 %v3940_v11  ;;  %v3986_v11 = vld [vmem:[%s5308_s3 + $0x670] ss:$8 sps:$4 sm:$0xff]  }
  0xac   : > { %2129 = vmatpush1.bf16.msra.mxu1 %v3935_v12  ;;  %v3991_v12 = vld [vmem:[%s5308_s3 + $0x774] ss:$8 sps:$4 sm:$0xff]  }
  0xad   : > { %2130 = vmatprep.subr.bf16.mxu1 %v3943_v13  ;;  %v1540_v13 = vcombine.low %v4767_v45, %v4773_v47  ;;  %v4000_v45 = vld [vmem:[%s5308_s3 + $0x654] ss:$8 sps:$4 sm:$0xff]  }
  0xae   : > { %2088 = vmatpush2.bf16.msra.mxu0 %v3938_v58  ;;  %v2317_v58 = vcombine.high %v4621_v18, %v4969_v0 }
  0xaf   : > { %2089 = vmatprep.subr.bf16.mxu0 %v3946_v14  ;;  %v3989_v14 = vld [vmem:[%s5308_s3 + $0x770] ss:$8 sps:$4 sm:$0xff]  }
  0xb0   : > { %2131 = vmatpush2.bf16.msra.mxu1 %v3941_v15  ;;  %v3992_v15 = vld [vmem:[%s5308_s3 + $0x660] ss:$8 sps:$4 sm:$0xff]  }
  0xb1   : > { %2132 = vmatprep.subr.bf16.mxu1 %v3949_v59  ;;  %v2319_v59 = vcombine.high %v4744_v28, %v4989_v30 }
  0xb2   : > { %2090 = vmatpush2.bf16.msra.mxu0 %v3944_v16  ;;  %v3997_v16 = vld [vmem:[%s5308_s3 + $0x764] ss:$8 sps:$4 sm:$0xff]  }
  0xb3   : > { %2091 = vmatprep.subr.bf16.mxu0 %v3952_v2  ;;  %v3995_v2 = vld [vmem:[%s5308_s3 + $0x760] ss:$8 sps:$4 sm:$0xff]  }
  0xb4   : > { %2133 = vmatpush2.bf16.msra.mxu1 %v3947_v3  ;;  %v3998_v3 = vld [vmem:[%s5308_s3 + $0x650] ss:$8 sps:$4 sm:$0xff]  }
  0xb5   : > { %2134 = vmatprep.subr.bf16.mxu1 %v3955_v19  ;;  %v4006_v19 = vld [vmem:[%s5308_s3 + $0x644] ss:$8 sps:$4 sm:$0xff]  }
  0xb6   : > { %2092 = vmatpush2.bf16.msra.mxu0 %v3950_v62  ;;  %v4003_v62 = vld [vmem:[%s5308_s3 + $0x754] ss:$8 sps:$4 sm:$0xff]  }
  0xb7   : > { %2093 = vmatprep.subr.bf16.mxu0 %v3958_v63  ;;  %v4001_v63 = vld [vmem:[%s5308_s3 + $0x750] ss:$8 sps:$4 sm:$0xff]  }
  0xb8   : > { %2135 = vmatpush2.bf16.msra.mxu1 %v3953_v1  ;;  %v4004_v1 = vld [vmem:[%s5308_s3 + $0x640] ss:$8 sps:$4 sm:$0xff]  }
  0xb9   : > { %2136 = vmatprep.subr.bf16.mxu1 %v3961_v24  ;;  %v4012_v24 = vld [vmem:[%s5308_s3 + $0x634] ss:$8 sps:$4 sm:$0xff]  }
  0xba   : > { %2094 = vmatpush2.bf16.msra.mxu0 %v3956_v60  ;;  %v4009_v60 = vld [vmem:[%s5308_s3 + $0x744] ss:$8 sps:$4 sm:$0xff]  }
  0xbb   : > { %2095 = vmatprep.subr.bf16.mxu0 %v3964_v27  ;;  %v4007_v27 = vld [vmem:[%s5308_s3 + $0x740] ss:$8 sps:$4 sm:$0xff]  }
  0xbc   : > { %2137 = vmatpush2.bf16.msra.mxu1 %v3959_v9  ;;  %v4015_v9 = vld [vmem:[%s5308_s3 + $0x734] ss:$8 sps:$4 sm:$0xff]  }
  0xbd   : > { %2138 = vmatprep.subr.bf16.mxu1 %v3967_v17  ;;  %v4021_v17 = vld [vmem:[%s5308_s3 + $0x724] ss:$8 sps:$4 sm:$0xff]  }
  0xbe   : > { %2096 = vmatpush2.bf16.msra.mxu0 %v3962_v31  ;;  %v4018_v31 = vld [vmem:[%s5308_s3 + $0x624] ss:$8 sps:$4 sm:$0xff]  }
  0xbf   : > { %2097 = vmatprep.subr.bf16.mxu0 %v3970_v22  ;;  %v4024_v22 = vld [vmem:[%s5308_s3 + $0x614] ss:$8 sps:$4 sm:$0xff]  }
  0xc0   : > { %2139 = vmatpush2.bf16.msra.mxu1 %v3965_v29  ;;  %v4025_v29 = vld [vmem:[%s5308_s3 + $0x710] ss:$8 sps:$4 sm:$0xff]  }
  0xc1   : > { %2140 = vmatprep.subr.bf16.mxu1 %v3973_v23  ;;  %v4036_v23 = vld [vmem:[%s5308_s3 + $0x6f4] ss:$8 sps:$4 sm:$0xff]  }
  0xc2   : > { %2098 = vmatpush2.bf16.msra.mxu0 %v3968_v35  ;;  %v4033_v35 = vld [vmem:[%s5308_s3 + $0x704] ss:$8 sps:$4 sm:$0xff]  }
  0xc3   : > { %2099 = vmatprep.subr.bf16.mxu0 %v3976_v36  ;;  %v4034_v36 = vld [vmem:[%s5308_s3 + $0x6f0] ss:$8 sps:$4 sm:$0xff]  }
  0xc4   : > { %2141 = vmatpush2.bf16.msra.mxu1 %v3971_v41  ;;  %v4040_v41 = vld [vmem:[%s5308_s3 + $0x6e0] ss:$8 sps:$4 sm:$0xff]  }
  0xc5   : > { %2142 = vmatprep.subr.bf16.mxu1 %v3979_v44  ;;  %v4048_v44 = vld [vmem:[%s5308_s3 + $0x6d4] ss:$8 sps:$4 sm:$0xff]  }
  0xc6   : > { %2100 = vmatpush2.bf16.msra.mxu0 %v3974_v42  ;;  %v4045_v42 = vld [vmem:[%s5308_s3 + $0x7e4] ss:$8 sps:$4 sm:$0xff]  }
  0xc7   : > { %2101 = vmatprep.subr.bf16.mxu0 %v3982_v48  ;;  %v4046_v48 = vld [vmem:[%s5308_s3 + $0x6d0] ss:$8 sps:$4 sm:$0xff]  }
  0xc8   : > { %2143 = vmatpush2.bf16.msra.mxu1 %v3977_v55  ;;  %v4057_v55 = vld [vmem:[%s5308_s3 + $0x7c4] ss:$8 sps:$4 sm:$0xff]  }
  0xc9   : > { %2144 = vmatprep.subr.bf16.mxu1 %v3985_v57  ;;  %v4055_v57 = vld [vmem:[%s5308_s3 + $0x7c0] ss:$8 sps:$4 sm:$0xff]  }
  0xca   : > { %2102 = vmatpush2.bf16.msra.mxu0 %v3980_v56  ;;  %v4060_v56 = vld [vmem:[%s5308_s3 + $0x6b4] ss:$8 sps:$4 sm:$0xff]  }
  0xcb   : > { %2816 = vmatprep.subr.bf16.mxu0 %v3988_v5  ;;  %v4058_v5 = vld [vmem:[%s5308_s3 + $0x6b0] ss:$8 sps:$4 sm:$0xff]  }
  0xcc   : > { %2145 = vmatpush2.bf16.msra.mxu1 %v3983_v7  ;;  %v4066_v7 = vld [vmem:[%s5308_s3 + $0x6a4] ss:$8 sps:$4 sm:$0xff]  }
  0xcd   : > { %2104 = vmatmul.mubr.bf16.vlgmr.msra.gmra.mxu0 %v1522_v8  ;;  %2859 = vmatprep.subr.bf16.mxu1 %v3991_v12  ;;  %v4061_v8 = vld [vmem:[%s5308_s3 + $0x7b0] ss:$8 sps:$4 sm:$0xff]   ;;  %v4069_v12 = vld [vmem:[%s5308_s3 + $0x7a4] ss:$8 sps:$4 sm:$0xff]  }
  0xce   : > { %2817 = vmatpush1.bf16.msra.mxu0 %v3986_v11  ;;  %2848 = vmatprep.mubr.bf16.mxu0 %v2317_v58  ;;  %v4064_v11 = vld [vmem:[%s5308_s3 + $0x6a0] ss:$8 sps:$4 sm:$0xff]   ;;  %v2202_v58 = vrot.slane %v4963_v61, %v4352_v49  ;;  %v4078_v61 = vld [vmem:[%s5308_s3 + $0x684] ss:$8 sps:$4 sm:$0xff]  }
  0xcf   : > { %2818 = vmatprep.subr.bf16.mxu0 %v3994_v26  ;;  %2147 = vmatmul.mubr.bf16.vlgmr.msra.gmra.mxu1 %v1540_v13  ;;  %v4072_v26 = vld [vmem:[%s5308_s3 + $0x694] ss:$8 sps:$4 sm:$0xff]   ;;  %v4067_v13 = vld [vmem:[%s5308_s3 + $0x7a0] ss:$8 sps:$4 sm:$0xff]  }
  0xd0   : > { %2860 = vmatpush1.bf16.msra.mxu1 %v3989_v14  ;;  %2891 = vmatprep.mubr.bf16.mxu1 %v2319_v59  ;;  %v4070_v14 = vld [vmem:[%s5308_s3 + $0x690] ss:$8 sps:$4 sm:$0xff]   ;;  %v4076_v59 = vld [vmem:[%s5308_s3 + $0x680] ss:$8 sps:$4 sm:$0xff]  }
  0xd1   : > { %2861 = vmatprep.subr.bf16.mxu1 %v3997_v16  ;;  %v2320_v16 = vcombine.low %v4535_v37, %v2202_v58  ;;  %v4086_v37 = vld [vmem:[%s5308_s3 + $0x874] ss:$8 sps:$4 sm:$0xff]  }
  0xd2   : > { %2819 = vmatpush1.bf16.msra.mxu0 %v3992_v15  ;;  %v4075_v15 = vld [vmem:[%s5308_s3 + $0x794] ss:$8 sps:$4 sm:$0xff]  }
  0xd3   : > { %2820 = vmatprep.subr.bf16.mxu0 %v4000_v45  ;;  %v4073_v45 = vld [vmem:[%s5308_s3 + $0x790] ss:$8 sps:$4 sm:$0xff]  }
  0xd4   : > { %2862 = vmatpush1.bf16.msra.mxu1 %v3995_v2  ;;  %v4081_v2 = vld [vmem:[%s5308_s3 + $0x784] ss:$8 sps:$4 sm:$0xff]  }
  0xd5   : > { %2863 = vmatprep.subr.bf16.mxu1 %v4003_v62  ;;  %v2316_v62 = vcombine.low %v4621_v18, %v4969_v0  ;;  %v2318_v18 = vcombine.low %v4744_v28, %v4989_v30  ;;  %v4087_v0 = vld [vmem:[%s5308_s3 + $0x860] ss:$8 sps:$4 sm:$0xff]   ;;  %v4095_v28 = vld [vmem:[%s5308_s3 + $0x844] ss:$8 sps:$4 sm:$0xff]  }
  0xd6   : > { %2821 = vmatpush1.bf16.msra.mxu0 %v3998_v3  ;;  %v5179_v3 = vrot.slane %v2320_v16, %v4352_v49  ;;  %v4093_v30 = vld [vmem:[%s5308_s3 + $0x840] ss:$8 sps:$4 sm:$0xff]  }
  0xd7   : > { %2822 = vmatprep.subr.bf16.mxu0 %v4006_v19  ;;  %v4079_v19 = vld [vmem:[%s5308_s3 + $0x780] ss:$8 sps:$4 sm:$0xff]  }
  0xd8   : > { %2864 = vmatpush1.bf16.msra.mxu1 %v4001_v63  ;;  %v4084_v63 = vld [vmem:[%s5308_s3 + $0x870] ss:$8 sps:$4 sm:$0xff]  }
  0xd9   : > { %2865 = vmatprep.subr.bf16.mxu1 %v4009_v60  ;;  %v2329_v60 = vcombine.high %v4773_v47, %v5179_v3 }
  0xda   : > { %2823 = vmatpush1.bf16.msra.mxu0 %v4004_v1  ;;  %v4089_v1 = vld [vmem:[%s5308_s3 + $0x864] ss:$8 sps:$4 sm:$0xff]  }
  0xdb   : > { %2824 = vmatprep.subr.bf16.mxu0 %v4012_v24  ;;  %v4092_v24 = vld [vmem:[%s5308_s3 + $0x854] ss:$8 sps:$4 sm:$0xff]  }
  0xdc   : > { %2866 = vmatpush1.bf16.msra.mxu1 %v4007_v27  ;;  %v4090_v27 = vld [vmem:[%s5308_s3 + $0x850] ss:$8 sps:$4 sm:$0xff]  }
  0xdd   : > { %2867 = vmatprep.subr.bf16.mxu1 %v4015_v9  ;;  %v4096_v9 = vld [vmem:[%s5308_s3 + $0x830] ss:$8 sps:$4 sm:$0xff]  }
  0xde   : > { %2825 = vmatpush1.bf16.msra.mxu0 %v4010_v52  ;;  %v4098_v52 = vld [vmem:[%s5308_s3 + $0x834] ss:$8 sps:$4 sm:$0xff]  }
  0xdf   : > { %2826 = vmatprep.subr.bf16.mxu0 %v4018_v31  ;;  %v4101_v31 = vld [vmem:[%s5308_s3 + $0x824] ss:$8 sps:$4 sm:$0xff]  }
  0xe0   : > { %2868 = vmatpush1.bf16.msra.mxu1 %v4013_v32  ;;  %v4099_v32 = vld [vmem:[%s5308_s3 + $0x820] ss:$8 sps:$4 sm:$0xff]  }
  0xe1   : > { %2869 = vmatprep.subr.bf16.mxu1 %v4021_v17  ;;  %v4102_v17 = vld [vmem:[%s5308_s3 + $0x810] ss:$8 sps:$4 sm:$0xff]  }
  0xe2   : > { %2827 = vmatpush1.bf16.msra.mxu0 %v4016_v10  ;;  %v4104_v10 = vld [vmem:[%s5308_s3 + $0x814] ss:$8 sps:$4 sm:$0xff]  }
  0xe3   : > { %2828 = vmatprep.subr.bf16.mxu0 %v4024_v22  ;;  %v4107_v22 = vld [vmem:[%s5308_s3 + $0x804] ss:$8 sps:$4 sm:$0xff]  }
  0xe4   : > { %2870 = vmatpush1.bf16.msra.mxu1 %v4019_v4  ;;  %v4105_v4 = vld [vmem:[%s5308_s3 + $0x800] ss:$8 sps:$4 sm:$0xff]  }
  0xe5   : > { %2871 = vmatprep.subr.bf16.mxu1 %v4027_v21  ;;  %v4108_v21 = vld [vmem:[%s5308_s3 + $0x8f0] ss:$8 sps:$4 sm:$0xff]  }
  0xe6   : > { %2829 = vmatpush1.bf16.msra.mxu0 %v4022_v20  ;;  %v4110_v20 = vld [vmem:[%s5308_s3 + $0x8f4] ss:$8 sps:$4 sm:$0xff]  }
  0xe7   : > { %2830 = vmatprep.subr.bf16.mxu0 %v4030_v25  ;;  %v4113_v25 = vld [vmem:[%s5308_s3 + $0x8e4] ss:$8 sps:$4 sm:$0xff]  }
  0xe8   : > { %2872 = vmatpush1.bf16.msra.mxu1 %v4025_v29  ;;  %v4111_v29 = vld [vmem:[%s5308_s3 + $0x8e0] ss:$8 sps:$4 sm:$0xff]  }
  0xe9   : > { %2873 = vmatprep.subr.bf16.mxu1 %v4033_v35  ;;  %v4114_v35 = vld [vmem:[%s5308_s3 + $0x8d0] ss:$8 sps:$4 sm:$0xff]  }
  0xea   : > { %2831 = vmatpush1.bf16.msra.mxu0 %v4028_v33  ;;  %v4116_v33 = vld [vmem:[%s5308_s3 + $0x8d4] ss:$8 sps:$4 sm:$0xff]  }
  0xeb   : > { %2832 = vmatprep.subr.bf16.mxu0 %v4036_v23  ;;  %v4119_v23 = vld [vmem:[%s5308_s3 + $0x8c4] ss:$8 sps:$4 sm:$0xff]  }
  0xec   : > { %2874 = vmatpush1.bf16.msra.mxu1 %v4031_v34  ;;  %v4117_v34 = vld [vmem:[%s5308_s3 + $0x8c0] ss:$8 sps:$4 sm:$0xff]  }
  0xed   : > { %2875 = vmatprep.subr.bf16.mxu1 %v4039_v38  ;;  %v4120_v38 = vld [vmem:[%s5308_s3 + $0x8b0] ss:$8 sps:$4 sm:$0xff]  }
  0xee   : > { %2833 = vmatpush2.bf16.msra.mxu0 %v4034_v36  ;;  %v4122_v36 = vld [vmem:[%s5308_s3 + $0x8b4] ss:$8 sps:$4 sm:$0xff]  }
  0xef   : > { %2834 = vmatprep.subr.bf16.mxu0 %v4042_v39  ;;  %v4125_v39 = vld [vmem:[%s5308_s3 + $0x8a4] ss:$8 sps:$4 sm:$0xff]  }
  0xf0   : > { %2876 = vmatpush2.bf16.msra.mxu1 %v4037_v40  ;;  %v4123_v40 = vld [vmem:[%s5308_s3 + $0x8a0] ss:$8 sps:$4 sm:$0xff]  }
  0xf1   : > { %2877 = vmatprep.subr.bf16.mxu1 %v4045_v42  ;;  %v4126_v42 = vld [vmem:[%s5308_s3 + $0x890] ss:$8 sps:$4 sm:$0xff]  }
  0xf2   : > { %2835 = vmatpush2.bf16.msra.mxu0 %v4040_v41  ;;  %v4128_v41 = vld [vmem:[%s5308_s3 + $0x894] ss:$8 sps:$4 sm:$0xff]  }
  0xf3   : > { %2836 = vmatprep.subr.bf16.mxu0 %v4048_v44  ;;  %v4131_v44 = vld [vmem:[%s5308_s3 + $0x884] ss:$8 sps:$4 sm:$0xff]  }
  0xf4   : > { %2878 = vmatpush2.bf16.msra.mxu1 %v4043_v46  ;;  %v4129_v46 = vld [vmem:[%s5308_s3 + $0x880] ss:$8 sps:$4 sm:$0xff]  }
  0xf5   : > { %2879 = vmatprep.subr.bf16.mxu1 %v4051_v50 }
  0xf6   : > { %2837 = vmatpush2.bf16.msra.mxu0 %v4046_v48  ;;  %v2328_v48 = vcombine.low %v4773_v47, %v5179_v3 }
  0xf7   : > { %2838 = vmatprep.subr.bf16.mxu0 %v4054_v51 }
  0xf8   : > { %2880 = vmatpush2.bf16.msra.mxu1 %v4049_v53 }
  0xf9   : > { %2881 = vmatprep.subr.bf16.mxu1 %v4057_v55 }
  0xfa   : > { %2839 = vmatpush2.bf16.msra.mxu0 %v4052_v54 }
  0xfb   : > { %2840 = vmatprep.subr.bf16.mxu0 %v4060_v56 }
  0xfc   : > { %2882 = vmatpush2.bf16.msra.mxu1 %v4055_v57 }
  0xfd   : > { %2883 = vmatprep.subr.bf16.mxu1 %v4063_v6 }
  0xfe   : > { %2841 = vmatpush2.bf16.msra.mxu0 %v4058_v5 }
  0xff   : > { %2842 = vmatprep.subr.bf16.mxu0 %v4066_v7 }
 0x100   : > { %2884 = vmatpush2.bf16.msra.mxu1 %v4061_v8 }
 0x101   : > { %2885 = vmatprep.subr.bf16.mxu1 %v4069_v12 }
 0x102   : > { %2843 = vmatpush2.bf16.msra.mxu0 %v4064_v11 }
 0x103   : > { %2844 = vmatprep.subr.bf16.mxu0 %v4072_v26 }
 0x104   : > { %2886 = vmatpush2.bf16.msra.mxu1 %v4067_v13 }
 0x105   : > { %2887 = vmatprep.subr.bf16.mxu1 %v4075_v15 }
 0x106   : > { %2845 = vmatpush2.bf16.msra.mxu0 %v4070_v14 }
 0x107   : > { %2846 = vmatprep.subr.bf16.mxu0 %v4078_v61 }
 0x108   : > { %2888 = vmatpush2.bf16.msra.mxu1 %v4073_v45 }
 0x109   : > { %2889 = vmatprep.subr.bf16.mxu1 %v4081_v2 }
 0x10a   : > { %2847 = vmatpush2.bf16.msra.mxu0 %v4076_v59 }
 0x10b   : > { %2902 = vmatprep.subr.bf16.mxu0 %v4086_v37 }
 0x10c   : > { %2890 = vmatpush2.bf16.msra.mxu1 %v4079_v19 }
 0x10d   : > { %2849 = vmatmul.mubr.bf16.vlgmr.msra.gmra.mxu0 %v2316_v62  ;;  %v1393_v50 = vpop.f32.mrf.mxu0 }
 0x10e   : > { %2903 = vmatpush1.bf16.msra.mxu0 %v4084_v63  ;;  %2934 = vmatprep.mubr.bf16.mxu0 %v2329_v60  ;;  %v1436_v51 = vpop.f32.mrf.mxu1 }
 0x10f   : > { %2904 = vmatprep.subr.bf16.mxu0 %v4089_v1  ;;  %2892 = vmatmul.mubr.bf16.vlgmr.msra.gmra.mxu1 %v2318_v18  ;;  %v1395_v53 = vpop.f32.mrf.mxu0  ;;  %v1437_v3 = vadd.f32 %v1436_v51, %v1393_v50 }
 0x110   : > { %v1438_v54 = vpop.f32.mrf.mxu1 }
 0x111   : > { %v1397_v55 = vpop.f32.mrf.mxu0  ;;  %v1439_v62 = vadd.f32 %v1438_v54, %v1395_v53 }
 0x112   : > { %2905 = vmatpush1.bf16.msra.mxu0 %v4087_v0  ;;  %v1440_v56 = vpop.f32.mrf.mxu1 }
 0x113   : > { %2906 = vmatprep.subr.bf16.mxu0 %v4092_v24  ;;  %v1399_v57 = vpop.f32.mrf.mxu0  ;;  %v1441_v60 = vadd.f32 %v1440_v56, %v1397_v55 }
 0x114   : > { %v1442_v6 = vpop.f32.mrf.mxu1 }
 0x115   : > { %v1443_v0 = vadd.f32 %v1442_v6, %v1399_v57 }
 0x116   : > { %2907 = vmatpush1.bf16.msra.mxu0 %v4090_v27 }
 0x117   : > { %2908 = vmatprep.subr.bf16.mxu0 %v4095_v28 }
 0x11a   : > { %2909 = vmatpush1.bf16.msra.mxu0 %v4093_v30 }
 0x11b   : > { %2910 = vmatprep.subr.bf16.mxu0 %v4098_v52 }
 0x11e   : > { %2911 = vmatpush1.bf16.msra.mxu0 %v4096_v9 }
 0x11f   : > { %2912 = vmatprep.subr.bf16.mxu0 %v4101_v31 }
 0x122   : > { %2913 = vmatpush1.bf16.msra.mxu0 %v4099_v32  ;;  %v2953_v32 = vsub.s32 0, %v4327_v43 }
 0x123   : > { %2914 = vmatprep.subr.bf16.mxu0 %v4104_v10 }
 0x126   : > { %2915 = vmatpush1.bf16.msra.mxu0 %v4102_v17 }
 0x127   : > { %2916 = vmatprep.subr.bf16.mxu0 %v4107_v22 }
 0x12a   : > { %2917 = vmatpush1.bf16.msra.mxu0 %v4105_v4 }
 0x12b   : > { %2918 = vmatprep.subr.bf16.mxu0 %v4110_v20  ;;  %v2949_v20 = vld [vmem:[%s5309_s4] sm:$0x3] }
 0x12e   : > { %2919 = vmatpush2.bf16.msra.mxu0 %v4108_v21 }
 0x12f   : > { %2920 = vmatprep.subr.bf16.mxu0 %v4113_v25  ;;  %v2957_v25 = vsub.s32 1, %v4327_v43 }
 0x131   : > { %v2958_v50 = vrot.slane %v2949_v20, %v2957_v25 }
 0x132   : > { %2921 = vmatpush2.bf16.msra.mxu0 %v4111_v29 }
 0x133   : > { %2922 = vmatprep.subr.bf16.mxu0 %v4116_v33 }
 0x136   : > { %2923 = vmatpush2.bf16.msra.mxu0 %v4114_v35 }
 0x137   : > { %2924 = vmatprep.subr.bf16.mxu0 %v4119_v23 }
 0x13a   : > { %2925 = vmatpush2.bf16.msra.mxu0 %v4117_v34 }
 0x13b   : > { %2926 = vmatprep.subr.bf16.mxu0 %v4122_v36 }
 0x13e   : > { %2927 = vmatpush2.bf16.msra.mxu0 %v4120_v38  ;;  %v2954_v38 = vrot.slane %v2949_v20, %v2953_v32 }
 0x13f   : > { %2928 = vmatprep.subr.bf16.mxu0 %v4125_v39 }
 0x142   : > { %2929 = vmatpush2.bf16.msra.mxu0 %v4123_v40 }
 0x143   : > { %2930 = vmatprep.subr.bf16.mxu0 %v4128_v41 }
 0x146   : > { %2931 = vmatpush2.bf16.msra.mxu0 %v4126_v42 }
 0x147   : > { %2932 = vmatprep.subr.bf16.mxu0 %v4131_v44 }
 0x14a   : > { %2933 = vmatpush2.bf16.msra.mxu0 %v4129_v46 }
 0x14d   : > { %2935 = vmatmul.mubr.bf16.vlgmr.msra.gmra.mxu0 %v2328_v48  ;;  %v1479_v5 = vpop.f32.mrf.mxu0 }
 0x14e   : > { %v1480_v1 = vadd.f32 %v1479_v5, %v1437_v3 }
 0x14f   : > { %v1481_v7 = vpop.f32.mrf.mxu0  ;;  %v2062_v8 = vpop.f32.mrf.mxu1 }
 0x150   : > { %v1482_v18 = vadd.f32 %v1481_v7, %v1439_v62  ;;  %v2063_v30 = vadd.f32 %v2062_v8, %v1480_v1 }
 0x151   : > { %v1483_v11 = vpop.f32.mrf.mxu0  ;;  %v2064_v12 = vpop.f32.mrf.mxu1 }
 0x152   : > { %v1484_v24 = vadd.f32 %v1483_v11, %v1441_v60  ;;  %v2065_v52 = vadd.f32 %v2064_v12, %v1482_v18 }
 0x153   : > { %v1485_v26 = vpop.f32.mrf.mxu0  ;;  %v2066_v58 = vpop.f32.mrf.mxu1 }
 0x154   : > { %v1486_v9 = vadd.f32 %v1485_v26, %v1443_v0  ;;  %v2067_v10 = vadd.f32 %v2066_v58, %v1484_v24 }
 0x155   : > { %v2068_v14 = vpop.f32.mrf.mxu1 }
 0x156   : > { %v2069_v29 = vadd.f32 %v2068_v14, %v1486_v9 }
 0x18d   : > { %v2105_v13 = vpop.f32.mrf.mxu0 }
 0x18e   : > { %v2106_v31 = vadd.f32 %v2105_v13, %v2063_v30 }
 0x18f   : > { %v2107_v47 = vpop.f32.mrf.mxu0  ;;  %v2148_v15 = vpop.f32.mrf.mxu1 }
 0x190   : > { %v2108_v17 = vadd.f32 %v2107_v47, %v2065_v52  ;;  %v2149_v23 = vadd.f32 %v2148_v15, %v2106_v31 }
 0x191   : > { %v2109_v61 = vpop.f32.mrf.mxu0  ;;  %v2150_v16 = vpop.f32.mrf.mxu1 }
 0x192   : > { %v2110_v33 = vadd.f32 %v2109_v61, %v2067_v10  ;;  %v2151_v39 = vadd.f32 %v2150_v16, %v2108_v17 }
 0x193   : > { %v2111_v45 = vpop.f32.mrf.mxu0  ;;  %v2152_v59 = vpop.f32.mrf.mxu1 }
 0x194   : > { %v2112_v40 = vadd.f32 %v2111_v45, %v2069_v29  ;;  %v2153_v51 = vadd.f32 %v2152_v59, %v2110_v33 }
 0x195   : > { %v2154_v37 = vpop.f32.mrf.mxu1 }
 0x196   : > { %v2155_v5 = vadd.f32 %v2154_v37, %v2112_v40 }
 0x1cd   : > { %v2850_v2 = vpop.f32.mrf.mxu0 }
 0x1cf   : > { %v2893_v19 = vpop.f32.mrf.mxu1  ;;  %v2852_v63 = vpop.f32.mrf.mxu0 }
 0x1d0   : > { %v2894_v21 = vadd.f32 %v2893_v19, %v2850_v2 }
 0x1d1   : > { %v2895_v27 = vpop.f32.mrf.mxu1  ;;  %v2854_v28 = vpop.f32.mrf.mxu0 }
 0x1d2   : > { %v2896_v34 = vadd.f32 %v2895_v27, %v2852_v63 }
 0x1d3   : > { %v2897_v22 = vpop.f32.mrf.mxu1  ;;  %v2856_v4 = vpop.f32.mrf.mxu0 }
 0x1d4   : > { %v2898_v44 = vadd.f32 %v2897_v22, %v2854_v28 }
 0x1d5   : > { %v2899_v41 = vpop.f32.mrf.mxu1 }
 0x1d6   : > { %v2900_v54 = vadd.f32 %v2899_v41, %v2856_v4 }
 0x20d   : > { %v2936_v35 = vpop.f32.mrf.mxu0 }
 0x20e   : > { %v2937_v36 = vadd.f32 %v2936_v35, %v2894_v21 }
 0x20f   : > { %v2938_v42 = vpop.f32.mrf.mxu0 }
 0x210   : > { %v2945_v46 = vadd.f32 %v2937_v36, %v2149_v23  ;;  %v2939_v48 = vadd.f32 %v2938_v42, %v2896_v34 }
 0x211   : > { %v2940_v53 = vpop.f32.mrf.mxu0 }
 0x212   : > { %v2961_v43 = vadd.f32 %v2954_v38, %v2945_v46  ;;  %v2946_v55 = vadd.f32 %v2939_v48, %v2151_v39  ;;  %v2941_v56 = vadd.f32 %v2940_v53, %v2898_v44 }
 0x213   : > { %v2942_v57 = vpop.f32.mrf.mxu0 }
 0x214   : > { %v2962_v6 = vadd.f32 %v2958_v50, %v2946_v55  ;;  %v2947_v7 = vadd.f32 %v2941_v56, %v2153_v51  ;;  %v2943_v8 = vadd.f32 %v2942_v57, %v2900_v54  ;;  %v2965_v11 = vmax.f32 %v2961_v43, 0.0 }
 0x216   : > { %v2966_v12 = vmax.f32 %v2962_v6, 0.0  ;;  %v2963_v26 = vadd.f32 %v2954_v38, %v2947_v7  ;;  %v2948_v58 = vadd.f32 %v2943_v8, %v2155_v5 }
 0x218   : > { %v3649_v13 = vpack.c.bf16 %v2966_v12, %v2965_v11  ;;  %v2964_v14 = vadd.f32 %v2958_v50, %v2948_v58  ;;  %v2967_v15 = vmax.f32 %v2963_v26, 0.0 }
 0x21a   : > { %v2981_v47 = vrot.slane %v3649_v13, %v4352_v49  ;;  %3651 = vst.sshfl [vmem:[%s388_s24] sm:$0x33 pattern:$0x76325410] %v3649_v13  ;;  %v2968_v61 = vmax.f32 %v2964_v14, 0.0 }
 0x21c   : > { %v2989_v16 = vcombine.high %v2981_v47, %v2981_v47  ;;  %v3650_v45 = vpack.c.bf16 %v2968_v61, %v2967_v15 }
 0x21e   : > { %2996 = vst [vmem:[%s388_s24 + $0x4] sm:$0xf] %v2989_v16  ;;  %v2988_v59 = vrot.slane %v3650_v45, %v4352_v49  ;;  %3652 = vst.sshfl [vmem:[%s388_s24 + $0x8] sm:$0x33 pattern:$0x76325410] %v3650_v45 }
 0x220   : > { %v2990_v2 = vcombine.high %v2988_v59, %v2988_v59 }
 0x222   : > { %2998 = vst [vmem:[%s388_s24 + $0xc] sm:$0xf] %v2990_v2 }
 0x223 PF: > { %s15_s20 = sadd.s32 1, %s4154_s20   ;;  %s5311_s18 = smov %s4150_s19 }
 0x224   : > { %p12_p5 = scmp.ge.s32.totalorder %s15_s20, 6   ;;  %s5312_s19 = smov %s5314_s21 }
 0x226   :  { %14 = sbr.rel (!%p12_p5) target bundleno = 2 (0x2), region = 78 }

</bundles_post_ra>
